<compile_context>
chip_gen: v7x
topology: tpu7x:2x2x1
jax: 0.10.0
libtpu: 0.0.40
codegen_flags: <defaults>
</compile_context>

<pallas_src>
import functools
import math

import jax
import jax.numpy as jnp
from jax import lax
from jax.experimental import pallas as pl
from jax.experimental.pallas import tpu as pltpu

NEG_INF = -1e30
LN_EPS = 1e-5
HEADS = 8


# ----------------------------------------------------------------------------
# helpers
# ----------------------------------------------------------------------------
def _round_up(x, m):
    return (x + m - 1) // m * m


def _full_spec(arr):
    shape = arr.shape
    return pl.BlockSpec(shape, lambda *_: (0,) * len(shape))


def _layer_norm(x, g, b):
    """x: (L, D) f32, g/b: (1, D) f32."""
    mu = jnp.mean(x, axis=-1, keepdims=True)
    var = jnp.mean(jnp.square(x - mu), axis=-1, keepdims=True)
    return (x - mu) * lax.rsqrt(var + LN_EPS) * g + b


# ----------------------------------------------------------------------------
# Pallas kernels
# ----------------------------------------------------------------------------
def _embedding_kernel(x_ref, projw_ref, hwyw_ref, hwyb_ref, o_ref, *, num_hwy):
    """word-emb projection (wemb->D) + num_hwy highway layers; gate|transform share one matmul."""
    D = projw_ref.shape[1]
    x = jnp.dot(x_ref[...].astype(jnp.bfloat16), projw_ref[...],
                preferred_element_type=jnp.float32)                      # (rows, D)
    for i in range(num_hwy):
        gt = jnp.dot(x.astype(jnp.bfloat16), hwyw_ref[i],
                     preferred_element_type=jnp.float32) + hwyb_ref[i]   # (rows, 2D)
        g = jax.nn.sigmoid(gt[:, :D])
        t = jax.nn.relu(gt[:, D:])
        x = g * t + (1.0 - g) * x
    o_ref[...] = x


def _transformer_stack_kernel(x_ref, wqkv_ref, bqkv_ref, wo_ref, bo_ref,
                              ln1g_ref, ln1b_ref, w1_ref, b1_ref, w2_ref, b2_ref,
                              ln2g_ref, ln2b_ref, lnfg_ref, lnfb_ref, o_ref,
                              *, heads, num_layers, final_ln):
    """num_layers post-LN transformer encoder layers (PyTorch default) for one sequence row."""
    x0 = x_ref[0]                                   # (L, D) f32
    L, D = x0.shape
    dh = D // heads
    scale = 1.0 / math.sqrt(dh)

    def layer_body(l, x):
        # --- multi-head self attention (no mask: reference passes none to nn.TransformerEncoder)
        qkv = jnp.dot(x.astype(jnp.bfloat16), wqkv_ref[l],
                      preferred_element_type=jnp.float32) + bqkv_ref[l]          # (L, 3D)
        # heads stacked onto a leading batch axis (cheap lane slices + major-dim stack):
        q = jnp.stack([qkv[:, h * dh:(h + 1) * dh] for h in range(heads)], axis=0)
        k = jnp.stack([qkv[:, D + h * dh:D + (h + 1) * dh] for h in range(heads)], axis=0)
        v = jnp.stack([qkv[:, 2 * D + h * dh:2 * D + (h + 1) * dh] for h in range(heads)], axis=0)
        s = jnp.einsum('hld,hmd->hlm', q.astype(jnp.bfloat16), k.astype(jnp.bfloat16),
                       preferred_element_type=jnp.float32) * scale               # (H, L, L)
        s = s - jnp.max(s, axis=-1, keepdims=True)
        pr = jnp.exp(s)
        pr = pr * pl.reciprocal(jnp.sum(pr, axis=-1, keepdims=True), approx=True)
        o = jnp.einsum('hlm,hmd->hld', pr.astype(jnp.bfloat16), v.astype(jnp.bfloat16),
                       preferred_element_type=jnp.float32)                       # (H, L, dh)
        # out-projection as a batched matmul + head-sum (wo stored (nl, H, dh, D)):
        a = jnp.einsum('hld,hdk->hlk', o.astype(jnp.bfloat16), wo_ref[l],
                       preferred_element_type=jnp.float32).sum(axis=0) + bo_ref[l]
        x = _layer_norm(x + a, ln1g_ref[l], ln1b_ref[l])
        # --- feed forward (ReLU, PyTorch default activation) ---
        f = jnp.dot(x.astype(jnp.bfloat16), w1_ref[l],
                    preferred_element_type=jnp.float32) + b1_ref[l]
        f = jax.nn.relu(f)
        f = jnp.dot(f.astype(jnp.bfloat16), w2_ref[l],
                    preferred_element_type=jnp.float32) + b2_ref[l]
        return _layer_norm(x + f, ln2g_ref[l], ln2b_ref[l])

    x = lax.fori_loop(0, num_layers, layer_body, x0)
    if final_ln:                                   # nn.TransformerEncoder's final LayerNorm
        x = _layer_norm(x, lnfg_ref[0], lnfb_ref[0])
    o_ref[0] = x


def _cq_attention_kernel(bias_ref, c_ref, q_ref, qbias_ref, cbias_ref,
                         w4c_ref, w4q_ref, w4m_ref, ww_ref, wb_ref, wa_ref,
                         m_ref, attlog_ref):
    C = c_ref[0]              # (Lc, D) f32
    Q = q_ref[0]              # (Lq, D) f32
    qbias = qbias_ref[0]      # (1, Lq) additive mask (0 / NEG_INF)
    cbias = cbias_ref[0]      # (Lc, 1) additive mask
    # trilinear similarity; (D,1)/(1,D) terms stay off the MXU / get folded into one matmul:
    s0 = jnp.sum(C * w4c_ref[...], axis=-1, keepdims=True)                    # (Lc, 1)
    s21 = lax.dot_general((C * w4m_ref[...] + w4q_ref[...]).astype(jnp.bfloat16),
                          Q.astype(jnp.bfloat16), (((1,), (1,)), ((), ())),
                          preferred_element_type=jnp.float32)                 # (Lc, Lq)
    S = s21 + s0 + bias_ref[0, 0]
    # softmax over the question axis (lanes), additive mask
    S1 = S + qbias
    S1 = jnp.exp(S1 - jnp.max(S1, axis=1, keepdims=True))
    S1 = S1 * pl.reciprocal(jnp.sum(S1, axis=1, keepdims=True), approx=True)
    # softmax over the context axis (sublanes), additive mask
    S2 = S + cbias
    S2 = jnp.exp(S2 - jnp.max(S2, axis=0, keepdims=True))
    S2 = S2 * pl.reciprocal(jnp.sum(S2, axis=0, keepdims=True), approx=True)

    S1b = S1.astype(jnp.bfloat16)
    A = jnp.dot(S1b, Q.astype(jnp.bfloat16), preferred_element_type=jnp.float32)      # (Lc, D)
    # reassociated second product: Bm = S1 @ (S2^T @ C)  (no (Lc, Lc) intermediate)
    S2tC = lax.dot_general(S2.astype(jnp.bfloat16), C.astype(jnp.bfloat16),
                           (((0,), (0,)), ((), ())),
                           preferred_element_type=jnp.float32)                        # (Lq, D)
    Bm = jnp.dot(S1b, S2tC.astype(jnp.bfloat16), preferred_element_type=jnp.float32)  # (Lc, D)

    G = jnp.concatenate([C, A, C * A, C * Bm], axis=-1)     # (Lc, 4D) -- in-kernel only
    # fused W resizer: Linear(4D -> D)
    m_ref[0] = jnp.dot(G.astype(jnp.bfloat16), ww_ref[...],
                       preferred_element_type=jnp.float32) + wb_ref[...]
    # fused pointer att-head projections, emitted lane-major as (2, Lc):
    attlog_ref[0] = lax.dot_general(wa_ref[...], G, (((1,), (1,)), ((), ())),
                                    preferred_element_type=jnp.float32)


def _pointer_kernel(b_ref, attlog_ref, mod_ref, mod2_ref, mbias_ref,
                    wm1_ref, wm2_ref, out_ref):
    attlog = attlog_ref[0]    # (2, Lc) -- att-head partial logits from the CQ kernel
    mod = mod_ref[0]          # (Lc, D)
    mod2 = mod2_ref[0]        # (Lc, D)
    mbias = mbias_ref[0]      # (1, Lc) additive mask
    # (1,D)x(Lc,D)^T matmuls -> logits land lane-major (context axis on lanes), no transpose
    m1 = lax.dot_general(wm1_ref[...], mod, (((1,), (1,)), ((), ())),
                         preferred_element_type=jnp.float32) + b_ref[0]        # (1, Lc)
    m2 = lax.dot_general(wm2_ref[...], mod2, (((1,), (1,)), ((), ())),
                         preferred_element_type=jnp.float32) + b_ref[1]        # (1, Lc)
    logits = attlog + jnp.concatenate([m1, m2], axis=0) + mbias                # (2, Lc)
    logits = logits - jnp.max(logits, axis=-1, keepdims=True)
    out_ref[0] = logits - jnp.log(jnp.sum(jnp.exp(logits), axis=-1, keepdims=True))


# ----------------------------------------------------------------------------
# wrappers
# ----------------------------------------------------------------------------
def embedding(word_emb, p):
    """word_emb: (rows, wemb) f32 -> (rows, D) f32; >=2 grid steps so the v7x megacore splits."""
    rows, wemb = word_emb.shape
    D = p["proj_w"].shape[1]
    half = (rows + 1) // 2
    block_rows = min(512, _round_up(max(half, 8), 8))
    rows_p = _round_up(rows, block_rows)
    if rows_p != rows:
        word_emb = jnp.pad(word_emb, ((0, rows_p - rows), (0, 0)))
    out = pl.pallas_call(
        functools.partial(_embedding_kernel, num_hwy=p["hwy_w"].shape[0]),
        grid=(rows_p // block_rows,),
        in_specs=[pl.BlockSpec((block_rows, wemb), lambda i: (i, 0)),
                  _full_spec(p["proj_w"]), _full_spec(p["hwy_w"]), _full_spec(p["hwy_b"])],
        out_specs=pl.BlockSpec((block_rows, D), lambda i: (i, 0)),
        out_shape=jax.ShapeDtypeStruct((rows_p, D), jnp.float32),
        compiler_params=pltpu.CompilerParams(dimension_semantics=("parallel",)),
    )(word_emb, p["proj_w"], p["hwy_w"], p["hwy_b"])
    return out[:rows]


_STACK_KEYS = ("wqkv", "bqkv", "wo", "bo", "ln1g", "ln1b",
               "w1", "b1", "w2", "b2", "ln2g", "ln2b", "lnfg", "lnfb")


def transformer_stack(x, p, *, heads, final_ln=True):
    R, L, D = x.shape
    nl = p["wqkv"].shape[0]
    Dff = p["w1"].shape[-1]
    xspec = pl.BlockSpec((1, L, D), lambda b: (b, 0, 0))
    per_layer_flops = (2 * L * D * 3 * D) + (2 * 2 * L * L * D) + (2 * L * D * D) + (2 * 2 * L * D * Dff)
    weight_bytes = sum(int(p[k].size) * p[k].dtype.itemsize for k in _STACK_KEYS)
    ce = pl.CostEstimate(flops=int(R * nl * per_layer_flops),
                         transcendentals=int(R * nl * heads * L * L),
                         bytes_accessed=int(2 * x.size * 4 + weight_bytes))
    return pl.pallas_call(
        functools.partial(_transformer_stack_kernel, heads=heads,
                          num_layers=nl, final_ln=final_ln),
        grid=(R,),
        in_specs=[xspec] + [_full_spec(p[k]) for k in _STACK_KEYS],
        out_specs=xspec,
        out_shape=jax.ShapeDtypeStruct((R, L, D), jnp.float32),
        compiler_params=pltpu.CompilerParams(
            dimension_semantics=("parallel",),
            # cap scoped VMEM: safe on v5e/v6e (128 MiB phys) and within v7x's 64 MiB phys.
            vmem_limit_bytes=48 * 1024 * 1024),
        cost_estimate=ce,
    )(x, *[p[k] for k in _STACK_KEYS])


def cq_attention(C, Q, qbias, cbias, p):
    B, Lc, D = C.shape
    Lq = Q.shape[1]
    ce = pl.CostEstimate(
        flops=int(B * (3 * 2 * Lc * Lq * D + 2 * Lq * Lc * D + 2 * Lc * 4 * D * D + 2 * 2 * Lc * 4 * D)),
        transcendentals=int(B * 2 * Lc * Lq),
        bytes_accessed=int(4 * (C.size + Q.size + B * Lc * D + B * 2 * Lc)))
    return pl.pallas_call(
        _cq_attention_kernel,
        grid=(B,),
        in_specs=[pl.BlockSpec(memory_space=pltpu.MemorySpace.SMEM),          # scalar bias
                  pl.BlockSpec((1, Lc, D), lambda b: (b, 0, 0)),
                  pl.BlockSpec((1, Lq, D), lambda b: (b, 0, 0)),
                  pl.BlockSpec((1, 1, Lq), lambda b: (b, 0, 0)),
                  pl.BlockSpec((1, Lc, 1), lambda b: (b, 0, 0)),
                  _full_spec(p["w4c"]), _full_spec(p["w4q"]), _full_spec(p["w4mlu"]),
                  _full_spec(p["W_w"]), _full_spec(p["W_b"]), _full_spec(p["wa"])],
        out_specs=[pl.BlockSpec((1, Lc, D), lambda b: (b, 0, 0)),
                   pl.BlockSpec((1, 2, Lc), lambda b: (b, 0, 0))],
        out_shape=(jax.ShapeDtypeStruct((B, Lc, D), jnp.float32),
                   jax.ShapeDtypeStruct((B, 2, Lc), jnp.float32)),
        compiler_params=pltpu.CompilerParams(dimension_semantics=("parallel",)),
        cost_estimate=ce,
    )(p["bias"], C, Q, qbias, cbias,
      p["w4c"], p["w4q"], p["w4mlu"], p["W_w"], p["W_b"], p["wa"])


def pointer(attlog, mod, mod2, mbias, p):
    B, Lc, D = mod.shape
    out = pl.pallas_call(
        _pointer_kernel,
        grid=(B,),
        in_specs=[pl.BlockSpec(memory_space=pltpu.MemorySpace.SMEM),          # two scalar biases
                  pl.BlockSpec((1, 2, Lc), lambda b: (b, 0, 0)),
                  pl.BlockSpec((1, Lc, D), lambda b: (b, 0, 0)),
                  pl.BlockSpec((1, Lc, D), lambda b: (b, 0, 0)),
                  pl.BlockSpec((1, 1, Lc), lambda b: (b, 0, 0)),
                  _full_spec(p["wm1"]), _full_spec(p["wm2"])],
        out_specs=pl.BlockSpec((1, 2, Lc), lambda b: (b, 0, 0)),
        out_shape=jax.ShapeDtypeStruct((B, 2, Lc), jnp.float32),
        compiler_params=pltpu.CompilerParams(dimension_semantics=("parallel",)),
    )(p["b"], attlog, mod, mod2, mbias, p["wm1"], p["wm2"])
    return out[:, 0, :], out[:, 1, :]


# ----------------------------------------------------------------------------
# forward
# ----------------------------------------------------------------------------
def bidaf_transformer_forward(params, Cwid, Qwid, Ccid, Qcid, CQid):
    # The reference forward receives char / cq indices but layers.Embedding only uses word idxs.
    del Ccid, Qcid, CQid
    B, Lc = Cwid.shape
    Lq = Qwid.shape[1]
    maskC = (Cwid != 0).astype(jnp.float32)
    maskQ = (Qwid != 0).astype(jnp.float32)
    # additive NEG_INF mask biases (no in-kernel selects); question/context axes lane-major
    # where the layout allows it.
    qbias = (1.0 - maskQ)[:, None, :] * NEG_INF     # (B, 1, Lq)
    cbias = (1.0 - maskC)[:, :, None] * NEG_INF     # (B, Lc, 1)
    mbias = (1.0 - maskC)[:, None, :] * NEG_INF     # (B, 1, Lc)

    # word-embedding gather stays in plain JAX; projection + highway run fused in Pallas,
    # context and question rows batched into one launch.
    wv = params["word_vectors"]
    emb_rows = jnp.concatenate([wv[Cwid].reshape(B * Lc, -1),
                                wv[Qwid].reshape(B * Lq, -1)], axis=0)
    emb_out = embedding(emb_rows, params["emb"])
    D = emb_out.shape[-1]
    C = emb_out[:B * Lc].reshape(B, Lc, D)
    Q = emb_out[B * Lc:].reshape(B, Lq, D)

    # cnn1 + enc share weights between C and Q -> single merged launch, grid=(2B,)
    if Lc == Lq:
        enc = transformer_stack(jnp.concatenate([C, Q], axis=0),
                                params["cnn1_enc"], heads=HEADS, final_ln=True)
        Ce, Qe = enc[:B], enc[B:]
    else:  # unequal lengths: keep two launches to preserve unmasked-encoder semantics
        Ce = transformer_stack(C, params["cnn1_enc"], heads=HEADS, final_ln=True)
        Qe = transformer_stack(Q, params["cnn1_enc"], heads=HEADS, final_ln=True)

    # BiDAF attention with W: Linear(4D->D) and both pointer att-heads fused in
    M, attlog = cq_attention(Ce, Qe, qbias, cbias, params["att"])

    # cnn2 + mod stack, then the output head's own encoder stack
    mod = transformer_stack(M, params["cnn2_mod"], heads=HEADS, final_ln=True)
    mod2 = transformer_stack(mod, params["out_mod"], heads=HEADS, final_ln=True)

    return pointer(attlog, mod, mod2, mbias, params["out"])


# ----------------------------------------------------------------------------
# deterministic synthetic parameters (no checkpoint load)
# ----------------------------------------------------------------------------
def init_params(key, word_vocab, wemb, hidden, enc_layers=1, mod_layers=3):
    D = hidden
    Dff = 4 * D  # TODO(synk): PyTorch default dim_feedforward=2048; scaled down for toy config.
    dh = D // HEADS
    ks = list(jax.random.split(key, 16))

    def nrm(k, shape, s=0.05):
        return s * jax.random.normal(k, shape, jnp.float32)

    def stack(k, nl):
        k0, k1, k2, k3 = jax.random.split(k, 4)
        return dict(
            wqkv=nrm(k0, (nl, D, 3 * D)).astype(jnp.bfloat16),
            bqkv=jnp.zeros((nl, 1, 3 * D), jnp.float32),
            wo=nrm(k1, (nl, HEADS, dh, D)).astype(jnp.bfloat16),   # out-proj grouped per head
            bo=jnp.zeros((nl, 1, D), jnp.float32),
            ln1g=jnp.ones((nl, 1, D), jnp.float32),
            ln1b=jnp.zeros((nl, 1, D), jnp.float32),
            w1=nrm(k2, (nl, D, Dff)).astype(jnp.bfloat16),
            b1=jnp.zeros((nl, 1, Dff), jnp.float32),
            w2=nrm(k3, (nl, Dff, D)).astype(jnp.bfloat16),
            b2=jnp.zeros((nl, 1, D), jnp.float32),
            ln2g=jnp.ones((nl, 1, D), jnp.float32),
            ln2b=jnp.zeros((nl, 1, D), jnp.float32),
            lnfg=jnp.ones((1, 1, D), jnp.float32),
            lnfb=jnp.zeros((1, 1, D), jnp.float32),
        )

    return dict(
        word_vectors=jax.random.normal(ks[0], (word_vocab, wemb), jnp.float32),
        emb=dict(
            proj_w=nrm(ks[1], (wemb, D)).astype(jnp.bfloat16),
            hwy_w=nrm(ks[2], (2, D, 2 * D)).astype(jnp.bfloat16),   # [gate | transform] fused
            hwy_b=jnp.zeros((2, 1, 2 * D), jnp.float32),
        ),
        cnn1_enc=stack(ks[3], 1 + enc_layers),     # cnn1 layer + enc layers (+ final LN)
        att=dict(
            w4c=nrm(ks[4], (1, D), 0.1),
            w4q=nrm(ks[5], (1, D), 0.1),
            w4mlu=nrm(ks[6], (1, D), 0.1),
            bias=jnp.zeros((1, 1), jnp.float32),
            W_w=nrm(ks[7], (4 * D, D)).astype(jnp.bfloat16),
            W_b=jnp.zeros((1, D), jnp.float32),
            wa=nrm(ks[10], (2, 4 * D)),            # both pointer att-heads, fused here
        ),
        cnn2_mod=stack(ks[8], 1 + mod_layers),     # cnn2 layer + mod layers (+ final LN)
        out_mod=stack(ks[9], mod_layers),          # output head's own encoder stack
        out=dict(
            wm1=nrm(ks[11], (1, D)),
            wm2=nrm(ks[12], (1, D)),
            b=jnp.zeros((2,), jnp.float32),
        ),
    )


if __name__ == "__main__":
    key = jax.random.PRNGKey(0)
    B, Lc, Lq, Lch = 2, 16, 16, 8
    word_vocab, char_vocab, wemb, hidden = 50, 30, 32, 32

    kp, k1, k2, k3, k4, k5 = jax.random.split(key, 6)
    params = init_params(kp, word_vocab, wemb, hidden)

    Cwid = jax.random.randint(k1, (B, Lc), 1, word_vocab).at[1, 13:].set(0)
    Qwid = jax.random.randint(k2, (B, Lq), 1, word_vocab).at[0, 14:].set(0)
    Ccid = jax.random.randint(k3, (B, Lc, Lch), 1, char_vocab)
    Qcid = jax.random.randint(k4, (B, Lq, Lch), 1, char_vocab)
    CQid = jax.random.randint(k5, (B, Lc), 0, word_vocab)

    fwd = jax.jit(bidaf_transformer_forward)
    p1, p2 = fwd(params, Cwid, Qwid, Ccid, Qcid, CQid)
    jax.block_until_ready((p1, p2))

    assert p1.shape == (B, Lc) and p2.shape == (B, Lc)
    assert bool(jnp.all(jnp.isfinite(p1))) and bool(jnp.all(jnp.isfinite(p2)))
    print("KERNEL_OK")
</pallas_src>

<mosaic_0001>
module attributes {stable_mosaic.version = 11 : i64} {
  func.func @_embedding_kernel(%arg0: i32, %arg1: memref<32x32xf32, #tpu.memory_space<vmem>>, %arg2: memref<32x32xbf16, #tpu.memory_space<vmem>>, %arg3: memref<2x32x64xbf16, #tpu.memory_space<vmem>>, %arg4: memref<2x1x64xf32, #tpu.memory_space<vmem>>, %arg5: memref<32x32xf32, #tpu.memory_space<vmem>>) attributes {dimension_semantics = [#tpu.dimension_semantics<parallel>], iteration_bounds = array<i64: 2>, scalar_prefetch = 0 : i64, scratch_operands = 0 : i64, tpu.core_type = #tpu.core_type<tc>, window_params = [{transform_indices = @transform_0, window_bounds = array<i64: 32, 32>}, {pipeline_mode = #tpu.pipeline_mode<synchronous>, transform_indices = @transform_1, window_bounds = array<i64: 32, 32>}, {pipeline_mode = #tpu.pipeline_mode<synchronous>, transform_indices = @transform_2, window_bounds = array<i64: 2, 32, 64>}, {pipeline_mode = #tpu.pipeline_mode<synchronous>, transform_indices = @transform_3, window_bounds = array<i64: 2, 1, 64>}, {transform_indices = @transform_4, window_bounds = array<i64: 32, 32>}]} {
    %c0 = arith.constant 0 : index
    %c0_0 = arith.constant 0 : index
    %0 = vector.load %arg1[%c0, %c0_0] : memref<32x32xf32, #tpu.memory_space<vmem>>, vector<32x32xf32>
    %1 = arith.truncf %0 : vector<32x32xf32> to vector<32x32xbf16>
    %c0_1 = arith.constant 0 : index
    %c0_2 = arith.constant 0 : index
    %2 = vector.load %arg2[%c0_1, %c0_2] : memref<32x32xbf16, #tpu.memory_space<vmem>>, vector<32x32xbf16>
    %cst = arith.constant dense<0.000000e+00> : vector<32x32xf32>
    %3 = tpu.matmul %1, %2, %cst {dimension_numbers = #tpu.dot_dimension_numbers<[1], [0], [0], [1], [0, 0, 1, 1], [], []>} : vector<32x32xbf16>, vector<32x32xbf16>, vector<32x32xf32> -> vector<32x32xf32>
    %4 = arith.truncf %3 : vector<32x32xf32> to vector<32x32xbf16>
    %c0_3 = arith.constant 0 : index
    %c0_4 = arith.constant 0 : index
    %c0_5 = arith.constant 0 : index
    %5 = vector.load %arg3[%c0_3, %c0_4, %c0_5] : memref<2x32x64xbf16, #tpu.memory_space<vmem>>, vector<1x32x64xbf16>
    %6 = vector.shape_cast %5 : vector<1x32x64xbf16> to vector<32x64xbf16>
    %cst_6 = arith.constant dense<0.000000e+00> : vector<32x64xf32>
    %7 = tpu.matmul %4, %6, %cst_6 {dimension_numbers = #tpu.dot_dimension_numbers<[1], [0], [0], [1], [0, 0, 1, 1], [], []>} : vector<32x32xbf16>, vector<32x64xbf16>, vector<32x64xf32> -> vector<32x64xf32>
    %c0_7 = arith.constant 0 : index
    %c0_8 = arith.constant 0 : index
    %c0_9 = arith.constant 0 : index
    %8 = vector.load %arg4[%c0_7, %c0_8, %c0_9] : memref<2x1x64xf32, #tpu.memory_space<vmem>>, vector<1x1x64xf32>
    %9 = vector.shape_cast %8 : vector<1x1x64xf32> to vector<1x64xf32>
    %10 = vector.broadcast %9 : vector<1x64xf32> to vector<32x64xf32>
    %11 = arith.addf %7, %10 : vector<32x64xf32>
    %12 = vector.extract_strided_slice %11 {offsets = [0, 0], sizes = [32, 32], strides = [1, 1]} : vector<32x64xf32> to vector<32x32xf32>
    %13 = arith.negf %12 : vector<32x32xf32>
    %14 = math.exp %13 : vector<32x32xf32>
    %cst_10 = arith.constant 1.000000e+00 : f32
    %15 = vector.broadcast %cst_10 : f32 to vector<32x32xf32>
    %16 = arith.addf %15, %14 : vector<32x32xf32>
    %17 = arith.divf %15, %16 : vector<32x32xf32>
    %18 = vector.extract_strided_slice %11 {offsets = [0, 32], sizes = [32, 32], strides = [1, 1]} : vector<32x64xf32> to vector<32x32xf32>
    %cst_11 = arith.constant 0.000000e+00 : f32
    %19 = vector.broadcast %cst_11 : f32 to vector<32x32xf32>
    %20 = arith.maximumf %18, %19 : vector<32x32xf32>
    %21 = arith.mulf %17, %20 : vector<32x32xf32>
    %cst_12 = arith.constant 1.000000e+00 : f32
    %22 = vector.broadcast %cst_12 : f32 to vector<32x32xf32>
    %23 = arith.subf %22, %17 : vector<32x32xf32>
    %24 = arith.mulf %23, %3 : vector<32x32xf32>
    %25 = arith.addf %21, %24 : vector<32x32xf32>
    %26 = arith.truncf %25 : vector<32x32xf32> to vector<32x32xbf16>
    %c1 = arith.constant 1 : index
    %c0_13 = arith.constant 0 : index
    %c0_14 = arith.constant 0 : index
    %27 = vector.load %arg3[%c1, %c0_13, %c0_14] : memref<2x32x64xbf16, #tpu.memory_space<vmem>>, vector<1x32x64xbf16>
    %28 = vector.shape_cast %27 : vector<1x32x64xbf16> to vector<32x64xbf16>
    %cst_15 = arith.constant dense<0.000000e+00> : vector<32x64xf32>
    %29 = tpu.matmul %26, %28, %cst_15 {dimension_numbers = #tpu.dot_dimension_numbers<[1], [0], [0], [1], [0, 0, 1, 1], [], []>} : vector<32x32xbf16>, vector<32x64xbf16>, vector<32x64xf32> -> vector<32x64xf32>
    %c1_16 = arith.constant 1 : index
    %c0_17 = arith.constant 0 : index
    %c0_18 = arith.constant 0 : index
    %30 = vector.load %arg4[%c1_16, %c0_17, %c0_18] : memref<2x1x64xf32, #tpu.memory_space<vmem>>, vector<1x1x64xf32>
    %31 = vector.shape_cast %30 : vector<1x1x64xf32> to vector<1x64xf32>
    %32 = vector.broadcast %31 : vector<1x64xf32> to vector<32x64xf32>
    %33 = arith.addf %29, %32 : vector<32x64xf32>
    %34 = vector.extract_strided_slice %33 {offsets = [0, 0], sizes = [32, 32], strides = [1, 1]} : vector<32x64xf32> to vector<32x32xf32>
    %35 = arith.negf %34 : vector<32x32xf32>
    %36 = math.exp %35 : vector<32x32xf32>
    %cst_19 = arith.constant 1.000000e+00 : f32
    %37 = vector.broadcast %cst_19 : f32 to vector<32x32xf32>
    %38 = arith.addf %37, %36 : vector<32x32xf32>
    %39 = arith.divf %37, %38 : vector<32x32xf32>
    %40 = vector.extract_strided_slice %33 {offsets = [0, 32], sizes = [32, 32], strides = [1, 1]} : vector<32x64xf32> to vector<32x32xf32>
    %cst_20 = arith.constant 0.000000e+00 : f32
    %41 = vector.broadcast %cst_20 : f32 to vector<32x32xf32>
    %42 = arith.maximumf %40, %41 : vector<32x32xf32>
    %43 = arith.mulf %39, %42 : vector<32x32xf32>
    %cst_21 = arith.constant 1.000000e+00 : f32
    %44 = vector.broadcast %cst_21 : f32 to vector<32x32xf32>
    %45 = arith.subf %44, %39 : vector<32x32xf32>
    %46 = arith.mulf %45, %25 : vector<32x32xf32>
    %47 = arith.addf %43, %46 : vector<32x32xf32>
    %c0_22 = arith.constant 0 : index
    %c0_23 = arith.constant 0 : index
    %48 = vector.load %arg5[%c0_22, %c0_23] : memref<32x32xf32, #tpu.memory_space<vmem>>, vector<32x32xf32>
    tpu.vector_store %arg5[%c0_22, %c0_23], %47 {strides = array<i32>} : memref<32x32xf32, #tpu.memory_space<vmem>>, vector<32x32xf32>,
    return
  }
  func.func @transform_0(%arg0: i32) -> (i32, i32) {
    %c0_i32 = arith.constant 0 : i32
    %c0_i32_0 = arith.constant 0 : i32
    return %arg0, %c0_i32 : i32, i32
  }
  func.func @transform_1(%arg0: i32) -> (i32, i32) {
    %c0_i32 = arith.constant 0 : i32
    %c0_i32_0 = arith.constant 0 : i32
    %c0_i32_1 = arith.constant 0 : i32
    return %c0_i32, %c0_i32_0 : i32, i32
  }
  func.func @transform_2(%arg0: i32) -> (i32, i32, i32) {
    %c0_i32 = arith.constant 0 : i32
    %c0_i32_0 = arith.constant 0 : i32
    %c0_i32_1 = arith.constant 0 : i32
    %c0_i32_2 = arith.constant 0 : i32
    return %c0_i32, %c0_i32_0, %c0_i32_1 : i32, i32, i32
  }
  func.func @transform_3(%arg0: i32) -> (i32, i32, i32) {
    %c0_i32 = arith.constant 0 : i32
    %c0_i32_0 = arith.constant 0 : i32
    %c0_i32_1 = arith.constant 0 : i32
    %c0_i32_2 = arith.constant 0 : i32
    return %c0_i32, %c0_i32_0, %c0_i32_1 : i32, i32, i32
  }
  func.func @transform_4(%arg0: i32) -> (i32, i32) {
    %c0_i32 = arith.constant 0 : i32
    %c0_i32_0 = arith.constant 0 : i32
    return %arg0, %c0_i32 : i32, i32
  }
}

module attributes {stable_mosaic.version = 11 : i64} {
  func.func @_transformer_stack_kernel(%arg0: i32, %arg1: memref<1x16x32xf32, #tpu.memory_space<vmem>>, %arg2: memref<2x32x96xbf16, #tpu.memory_space<vmem>>, %arg3: memref<2x1x96xf32, #tpu.memory_space<vmem>>, %arg4: memref<2x8x4x32xbf16, #tpu.memory_space<vmem>>, %arg5: memref<2x1x32xf32, #tpu.memory_space<vmem>>, %arg6: memref<2x1x32xf32, #tpu.memory_space<vmem>>, %arg7: memref<2x1x32xf32, #tpu.memory_space<vmem>>, %arg8: memref<2x32x128xbf16, #tpu.memory_space<vmem>>, %arg9: memref<2x1x128xf32, #tpu.memory_space<vmem>>, %arg10: memref<2x128x32xbf16, #tpu.memory_space<vmem>>, %arg11: memref<2x1x32xf32, #tpu.memory_space<vmem>>, %arg12: memref<2x1x32xf32, #tpu.memory_space<vmem>>, %arg13: memref<2x1x32xf32, #tpu.memory_space<vmem>>, %arg14: memref<1x1x32xf32, #tpu.memory_space<vmem>>, %arg15: memref<1x1x32xf32, #tpu.memory_space<vmem>>, %arg16: memref<1x16x32xf32, #tpu.memory_space<vmem>>) attributes {dimension_semantics = [#tpu.dimension_semantics<parallel>], iteration_bounds = array<i64: 4>, scalar_prefetch = 0 : i64, scratch_operands = 0 : i64, tpu.core_type = #tpu.core_type<tc>, window_params = [{transform_indices = @transform_0, window_bounds = array<i64: 1, 16, 32>}, {pipeline_mode = #tpu.pipeline_mode<synchronous>, transform_indices = @transform_1, window_bounds = array<i64: 2, 32, 96>}, {pipeline_mode = #tpu.pipeline_mode<synchronous>, transform_indices = @transform_2, window_bounds = array<i64: 2, 1, 96>}, {pipeline_mode = #tpu.pipeline_mode<synchronous>, transform_indices = @transform_3, window_bounds = array<i64: 2, 8, 4, 32>}, {pipeline_mode = #tpu.pipeline_mode<synchronous>, transform_indices = @transform_4, window_bounds = array<i64: 2, 1, 32>}, {pipeline_mode = #tpu.pipeline_mode<synchronous>, transform_indices = @transform_5, window_bounds = array<i64: 2, 1, 32>}, {pipeline_mode = #tpu.pipeline_mode<synchronous>, transform_indices = @transform_6, window_bounds = array<i64: 2, 1, 32>}, {pipeline_mode = #tpu.pipeline_mode<synchronous>, transform_indices = @transform_7, window_bounds = array<i64: 2, 32, 128>}, {pipeline_mode = #tpu.pipeline_mode<synchronous>, transform_indices = @transform_8, window_bounds = array<i64: 2, 1, 128>}, {pipeline_mode = #tpu.pipeline_mode<synchronous>, transform_indices = @transform_9, window_bounds = array<i64: 2, 128, 32>}, {pipeline_mode = #tpu.pipeline_mode<synchronous>, transform_indices = @transform_10, window_bounds = array<i64: 2, 1, 32>}, {pipeline_mode = #tpu.pipeline_mode<synchronous>, transform_indices = @transform_11, window_bounds = array<i64: 2, 1, 32>}, {pipeline_mode = #tpu.pipeline_mode<synchronous>, transform_indices = @transform_12, window_bounds = array<i64: 2, 1, 32>}, {pipeline_mode = #tpu.pipeline_mode<synchronous>, transform_indices = @transform_13, window_bounds = array<i64: 1, 1, 32>}, {pipeline_mode = #tpu.pipeline_mode<synchronous>, transform_indices = @transform_14, window_bounds = array<i64: 1, 1, 32>}, {transform_indices = @transform_15, window_bounds = array<i64: 1, 16, 32>}]} {
    %c0 = arith.constant 0 : index
    %c0_0 = arith.constant 0 : index
    %c0_1 = arith.constant 0 : index
    %0 = vector.load %arg1[%c0, %c0_0, %c0_1] : memref<1x16x32xf32, #tpu.memory_space<vmem>>, vector<1x16x32xf32>
    %1 = vector.shape_cast %0 : vector<1x16x32xf32> to vector<16x32xf32>
    %c0_i32 = arith.constant 0 : i32
    %c2_i32 = arith.constant 2 : i32
    %2 = arith.addi %c0_i32, %c2_i32 : i32
    %c1_i32 = arith.constant 1 : i32
    %3 = scf.for %arg17 = %c0_i32 to %2 step %c1_i32 iter_args(%arg18 = %1) -> (vector<16x32xf32>)  : i32 {
      %33 = arith.truncf %arg18 : vector<16x32xf32> to vector<16x32xbf16>
      %34 = arith.index_cast %arg17 : i32 to index
      %c0_16 = arith.constant 0 : index
      %c0_17 = arith.constant 0 : index
      %35 = vector.load %arg2[%34, %c0_16, %c0_17] : memref<2x32x96xbf16, #tpu.memory_space<vmem>>, vector<1x32x96xbf16>
      %36 = vector.shape_cast %35 : vector<1x32x96xbf16> to vector<32x96xbf16>
      %cst_18 = arith.constant dense<0.000000e+00> : vector<16x96xf32>
      %37 = tpu.matmul %33, %36, %cst_18 {dimension_numbers = #tpu.dot_dimension_numbers<[1], [0], [0], [1], [0, 0, 1, 1], [], []>} : vector<16x32xbf16>, vector<32x96xbf16>, vector<16x96xf32> -> vector<16x96xf32>
      %38 = arith.index_cast %arg17 : i32 to index
      %c0_19 = arith.constant 0 : index
      %c0_20 = arith.constant 0 : index
      %39 = vector.load %arg3[%38, %c0_19, %c0_20] : memref<2x1x96xf32, #tpu.memory_space<vmem>>, vector<1x1x96xf32>
      %40 = vector.shape_cast %39 : vector<1x1x96xf32> to vector<1x96xf32>
      %41 = vector.broadcast %40 : vector<1x96xf32> to vector<16x96xf32>
      %42 = arith.addf %37, %41 : vector<16x96xf32>
      %43 = vector.extract_strided_slice %42 {offsets = [0, 0], sizes = [16, 4], strides = [1, 1]} : vector<16x96xf32> to vector<16x4xf32>
      %44 = vector.extract_strided_slice %42 {offsets = [0, 4], sizes = [16, 4], strides = [1, 1]} : vector<16x96xf32> to vector<16x4xf32>
      %45 = vector.extract_strided_slice %42 {offsets = [0, 8], sizes = [16, 4], strides = [1, 1]} : vector<16x96xf32> to vector<16x4xf32>
      %46 = vector.extract_strided_slice %42 {offsets = [0, 12], sizes = [16, 4], strides = [1, 1]} : vector<16x96xf32> to vector<16x4xf32>
      %47 = vector.extract_strided_slice %42 {offsets = [0, 16], sizes = [16, 4], strides = [1, 1]} : vector<16x96xf32> to vector<16x4xf32>
      %48 = vector.extract_strided_slice %42 {offsets = [0, 20], sizes = [16, 4], strides = [1, 1]} : vector<16x96xf32> to vector<16x4xf32>
      %49 = vector.extract_strided_slice %42 {offsets = [0, 24], sizes = [16, 4], strides = [1, 1]} : vector<16x96xf32> to vector<16x4xf32>
      %50 = vector.extract_strided_slice %42 {offsets = [0, 28], sizes = [16, 4], strides = [1, 1]} : vector<16x96xf32> to vector<16x4xf32>
      %51 = vector.shape_cast %43 : vector<16x4xf32> to vector<1x16x4xf32>
      %52 = vector.shape_cast %44 : vector<16x4xf32> to vector<1x16x4xf32>
      %53 = vector.shape_cast %45 : vector<16x4xf32> to vector<1x16x4xf32>
      %54 = vector.shape_cast %46 : vector<16x4xf32> to vector<1x16x4xf32>
      %55 = vector.shape_cast %47 : vector<16x4xf32> to vector<1x16x4xf32>
      %56 = vector.shape_cast %48 : vector<16x4xf32> to vector<1x16x4xf32>
      %57 = vector.shape_cast %49 : vector<16x4xf32> to vector<1x16x4xf32>
      %58 = vector.shape_cast %50 : vector<16x4xf32> to vector<1x16x4xf32>
      %59 = tpu.concatenate %51, %52, %53, %54, %55, %56, %57, %58 in 0 : vector<1x16x4xf32>, vector<1x16x4xf32>, vector<1x16x4xf32>, vector<1x16x4xf32>, vector<1x16x4xf32>, vector<1x16x4xf32>, vector<1x16x4xf32>, vector<1x16x4xf32> -> vector<8x16x4xf32>
      %60 = vector.extract_strided_slice %42 {offsets = [0, 32], sizes = [16, 4], strides = [1, 1]} : vector<16x96xf32> to vector<16x4xf32>
      %61 = vector.extract_strided_slice %42 {offsets = [0, 36], sizes = [16, 4], strides = [1, 1]} : vector<16x96xf32> to vector<16x4xf32>
      %62 = vector.extract_strided_slice %42 {offsets = [0, 40], sizes = [16, 4], strides = [1, 1]} : vector<16x96xf32> to vector<16x4xf32>
      %63 = vector.extract_strided_slice %42 {offsets = [0, 44], sizes = [16, 4], strides = [1, 1]} : vector<16x96xf32> to vector<16x4xf32>
      %64 = vector.extract_strided_slice %42 {offsets = [0, 48], sizes = [16, 4], strides = [1, 1]} : vector<16x96xf32> to vector<16x4xf32>
      %65 = vector.extract_strided_slice %42 {offsets = [0, 52], sizes = [16, 4], strides = [1, 1]} : vector<16x96xf32> to vector<16x4xf32>
      %66 = vector.extract_strided_slice %42 {offsets = [0, 56], sizes = [16, 4], strides = [1, 1]} : vector<16x96xf32> to vector<16x4xf32>
      %67 = vector.extract_strided_slice %42 {offsets = [0, 60], sizes = [16, 4], strides = [1, 1]} : vector<16x96xf32> to vector<16x4xf32>
      %68 = vector.shape_cast %60 : vector<16x4xf32> to vector<1x16x4xf32>
      %69 = vector.shape_cast %61 : vector<16x4xf32> to vector<1x16x4xf32>
      %70 = vector.shape_cast %62 : vector<16x4xf32> to vector<1x16x4xf32>
      %71 = vector.shape_cast %63 : vector<16x4xf32> to vector<1x16x4xf32>
      %72 = vector.shape_cast %64 : vector<16x4xf32> to vector<1x16x4xf32>
      %73 = vector.shape_cast %65 : vector<16x4xf32> to vector<1x16x4xf32>
      %74 = vector.shape_cast %66 : vector<16x4xf32> to vector<1x16x4xf32>
      %75 = vector.shape_cast %67 : vector<16x4xf32> to vector<1x16x4xf32>
      %76 = tpu.concatenate %68, %69, %70, %71, %72, %73, %74, %75 in 0 : vector<1x16x4xf32>, vector<1x16x4xf32>, vector<1x16x4xf32>, vector<1x16x4xf32>, vector<1x16x4xf32>, vector<1x16x4xf32>, vector<1x16x4xf32>, vector<1x16x4xf32> -> vector<8x16x4xf32>
      %77 = vector.extract_strided_slice %42 {offsets = [0, 64], sizes = [16, 4], strides = [1, 1]} : vector<16x96xf32> to vector<16x4xf32>
      %78 = vector.extract_strided_slice %42 {offsets = [0, 68], sizes = [16, 4], strides = [1, 1]} : vector<16x96xf32> to vector<16x4xf32>
      %79 = vector.extract_strided_slice %42 {offsets = [0, 72], sizes = [16, 4], strides = [1, 1]} : vector<16x96xf32> to vector<16x4xf32>
      %80 = vector.extract_strided_slice %42 {offsets = [0, 76], sizes = [16, 4], strides = [1, 1]} : vector<16x96xf32> to vector<16x4xf32>
      %81 = vector.extract_strided_slice %42 {offsets = [0, 80], sizes = [16, 4], strides = [1, 1]} : vector<16x96xf32> to vector<16x4xf32>
      %82 = vector.extract_strided_slice %42 {offsets = [0, 84], sizes = [16, 4], strides = [1, 1]} : vector<16x96xf32> to vector<16x4xf32>
      %83 = vector.extract_strided_slice %42 {offsets = [0, 88], sizes = [16, 4], strides = [1, 1]} : vector<16x96xf32> to vector<16x4xf32>
      %84 = vector.extract_strided_slice %42 {offsets = [0, 92], sizes = [16, 4], strides = [1, 1]} : vector<16x96xf32> to vector<16x4xf32>
      %85 = vector.shape_cast %77 : vector<16x4xf32> to vector<1x16x4xf32>
      %86 = vector.shape_cast %78 : vector<16x4xf32> to vector<1x16x4xf32>
      %87 = vector.shape_cast %79 : vector<16x4xf32> to vector<1x16x4xf32>
      %88 = vector.shape_cast %80 : vector<16x4xf32> to vector<1x16x4xf32>
      %89 = vector.shape_cast %81 : vector<16x4xf32> to vector<1x16x4xf32>
      %90 = vector.shape_cast %82 : vector<16x4xf32> to vector<1x16x4xf32>
      %91 = vector.shape_cast %83 : vector<16x4xf32> to vector<1x16x4xf32>
      %92 = vector.shape_cast %84 : vector<16x4xf32> to vector<1x16x4xf32>
      %93 = tpu.concatenate %85, %86, %87, %88, %89, %90, %91, %92 in 0 : vector<1x16x4xf32>, vector<1x16x4xf32>, vector<1x16x4xf32>, vector<1x16x4xf32>, vector<1x16x4xf32>, vector<1x16x4xf32>, vector<1x16x4xf32>, vector<1x16x4xf32> -> vector<8x16x4xf32>
      %94 = arith.truncf %59 : vector<8x16x4xf32> to vector<8x16x4xbf16>
      %95 = arith.truncf %76 : vector<8x16x4xf32> to vector<8x16x4xbf16>
      "tpu.trace_start"() <{level = 10 : i32, message = "hld,hmd->hlm"}> : () -> ()
      %cst_21 = arith.constant dense<0.000000e+00> : vector<8x16x16xf32>
      %96 = tpu.matmul %94, %95, %cst_21 {dimension_numbers = #tpu.dot_dimension_numbers<[2], [2], [1], [1], [0, 0, 0, 1, 1, 1], [0], [0]>} : vector<8x16x4xbf16>, vector<8x16x4xbf16>, vector<8x16x16xf32> -> vector<8x16x16xf32>
      "tpu.trace_stop"() : () -> ()
      %cst_22 = arith.constant 5.000000e-01 : f32
      %97 = vector.broadcast %cst_22 : f32 to vector<8x16x16xf32>
      %98 = arith.mulf %96, %97 : vector<8x16x16xf32>
      %cst_23 = arith.constant dense<0xFF800000> : vector<8x16xf32>
      %99 = vector.multi_reduction <maximumf>, %98, %cst_23 [2] : vector<8x16x16xf32> to vector<8x16xf32>
      %100 = vector.shape_cast %99 : vector<8x16xf32> to vector<8x16x1xf32>
      %101 = vector.broadcast %100 : vector<8x16x1xf32> to vector<8x16x16xf32>
      %102 = arith.subf %98, %101 : vector<8x16x16xf32>
      %103 = math.exp %102 : vector<8x16x16xf32>
      %cst_24 = arith.constant dense<0.000000e+00> : vector<8x16xf32>
      %104 = vector.multi_reduction <add>, %103, %cst_24 [2] : vector<8x16x16xf32> to vector<8x16xf32>
      %105 = vector.shape_cast %104 : vector<8x16xf32> to vector<8x16x1xf32>
      %106 = tpu.reciprocal %105 {approx = true} : vector<8x16x1xf32> -> vector<8x16x1xf32>
      %107 = vector.broadcast %106 : vector<8x16x1xf32> to vector<8x16x16xf32>
      %108 = arith.mulf %103, %107 : vector<8x16x16xf32>
      %109 = arith.truncf %108 : vector<8x16x16xf32> to vector<8x16x16xbf16>
      %110 = arith.truncf %93 : vector<8x16x4xf32> to vector<8x16x4xbf16>
      "tpu.trace_start"() <{level = 10 : i32, message = "hlm,hmd->hld"}> : () -> ()
      %cst_25 = arith.constant dense<0.000000e+00> : vector<8x16x4xf32>
      %111 = tpu.matmul %109, %110, %cst_25 {dimension_numbers = #tpu.dot_dimension_numbers<[2], [1], [1], [2], [0, 0, 0, 1, 1, 2], [0], [0]>} : vector<8x16x16xbf16>, vector<8x16x4xbf16>, vector<8x16x4xf32> -> vector<8x16x4xf32>
      "tpu.trace_stop"() : () -> ()
      %112 = arith.truncf %111 : vector<8x16x4xf32> to vector<8x16x4xbf16>
      %113 = arith.index_cast %arg17 : i32 to index
      %c0_26 = arith.constant 0 : index
      %c0_27 = arith.constant 0 : index
      %c0_28 = arith.constant 0 : index
      %114 = vector.load %arg4[%113, %c0_26, %c0_27, %c0_28] : memref<2x8x4x32xbf16, #tpu.memory_space<vmem>>, vector<1x8x4x32xbf16>
      %115 = vector.shape_cast %114 : vector<1x8x4x32xbf16> to vector<8x4x32xbf16>
      "tpu.trace_start"() <{level = 10 : i32, message = "hld,hdk->hlk"}> : () -> ()
      %cst_29 = arith.constant dense<0.000000e+00> : vector<8x16x32xf32>
      %116 = tpu.matmul %112, %115, %cst_29 {dimension_numbers = #tpu.dot_dimension_numbers<[2], [1], [1], [2], [0, 0, 0, 1, 1, 2], [0], [0]>} : vector<8x16x4xbf16>, vector<8x4x32xbf16>, vector<8x16x32xf32> -> vector<8x16x32xf32>
      "tpu.trace_stop"() : () -> ()
      %cst_30 = arith.constant dense<0.000000e+00> : vector<16x32xf32>
      %117 = vector.multi_reduction <add>, %116, %cst_30 [0] : vector<8x16x32xf32> to vector<16x32xf32>
      %118 = arith.index_cast %arg17 : i32 to index
      %c0_31 = arith.constant 0 : index
      %c0_32 = arith.constant 0 : index
      %119 = vector.load %arg5[%118, %c0_31, %c0_32] : memref<2x1x32xf32, #tpu.memory_space<vmem>>, vector<1x1x32xf32>
      %120 = vector.shape_cast %119 : vector<1x1x32xf32> to vector<1x32xf32>
      %121 = vector.broadcast %120 : vector<1x32xf32> to vector<16x32xf32>
      %122 = arith.addf %117, %121 : vector<16x32xf32>
      %123 = arith.addf %arg18, %122 : vector<16x32xf32>
      %124 = arith.index_cast %arg17 : i32 to index
      %c0_33 = arith.constant 0 : index
      %c0_34 = arith.constant 0 : index
      %125 = vector.load %arg6[%124, %c0_33, %c0_34] : memref<2x1x32xf32, #tpu.memory_space<vmem>>, vector<1x1x32xf32>
      %126 = vector.shape_cast %125 : vector<1x1x32xf32> to vector<1x32xf32>
      %127 = arith.index_cast %arg17 : i32 to index
      %c0_35 = arith.constant 0 : index
      %c0_36 = arith.constant 0 : index
      %128 = vector.load %arg7[%127, %c0_35, %c0_36] : memref<2x1x32xf32, #tpu.memory_space<vmem>>, vector<1x1x32xf32>
      %129 = vector.shape_cast %128 : vector<1x1x32xf32> to vector<1x32xf32>
      %cst_37 = arith.constant dense<0.000000e+00> : vector<16xf32>
      %130 = vector.multi_reduction <add>, %123, %cst_37 [1] : vector<16x32xf32> to vector<16xf32>
      %131 = vector.shape_cast %130 : vector<16xf32> to vector<16x1xf32>
      %cst_38 = arith.constant 3.200000e+01 : f32
      %132 = vector.broadcast %cst_38 : f32 to vector<16x1xf32>
      %133 = arith.divf %131, %132 : vector<16x1xf32>
      %134 = vector.broadcast %133 : vector<16x1xf32> to vector<16x32xf32>
      %135 = arith.subf %123, %134 : vector<16x32xf32>
      %136 = arith.mulf %135, %135 : vector<16x32xf32>
      %cst_39 = arith.constant dense<0.000000e+00> : vector<16xf32>
      %137 = vector.multi_reduction <add>, %136, %cst_39 [1] : vector<16x32xf32> to vector<16xf32>
      %138 = vector.shape_cast %137 : vector<16xf32> to vector<16x1xf32>
      %cst_40 = arith.constant 3.200000e+01 : f32
      %139 = vector.broadcast %cst_40 : f32 to vector<16x1xf32>
      %140 = arith.divf %138, %139 : vector<16x1xf32>
      %141 = vector.broadcast %133 : vector<16x1xf32> to vector<16x32xf32>
      %142 = arith.subf %123, %141 : vector<16x32xf32>
      %cst_41 = arith.constant 9.99999974E-6 : f32
      %143 = vector.broadcast %cst_41 : f32 to vector<16x1xf32>
      %144 = arith.addf %140, %143 : vector<16x1xf32>
      %145 = math.rsqrt %144 : vector<16x1xf32>
      %146 = vector.broadcast %145 : vector<16x1xf32> to vector<16x32xf32>
      %147 = arith.mulf %142, %146 : vector<16x32xf32>
      %148 = vector.broadcast %126 : vector<1x32xf32> to vector<16x32xf32>
      %149 = arith.mulf %147, %148 : vector<16x32xf32>
      %150 = vector.broadcast %129 : vector<1x32xf32> to vector<16x32xf32>
      %151 = arith.addf %149, %150 : vector<16x32xf32>
      %152 = arith.truncf %151 : vector<16x32xf32> to vector<16x32xbf16>
      %153 = arith.index_cast %arg17 : i32 to index
      %c0_42 = arith.constant 0 : index
      %c0_43 = arith.constant 0 : index
      %154 = vector.load %arg8[%153, %c0_42, %c0_43] : memref<2x32x128xbf16, #tpu.memory_space<vmem>>, vector<1x32x128xbf16>
      %155 = vector.shape_cast %154 : vector<1x32x128xbf16> to vector<32x128xbf16>
      %cst_44 = arith.constant dense<0.000000e+00> : vector<16x128xf32>
      %156 = tpu.matmul %152, %155, %cst_44 {dimension_numbers = #tpu.dot_dimension_numbers<[1], [0], [0], [1], [0, 0, 1, 1], [], []>} : vector<16x32xbf16>, vector<32x128xbf16>, vector<16x128xf32> -> vector<16x128xf32>
      %157 = arith.index_cast %arg17 : i32 to index
      %c0_45 = arith.constant 0 : index
      %c0_46 = arith.constant 0 : index
      %158 = vector.load %arg9[%157, %c0_45, %c0_46] : memref<2x1x128xf32, #tpu.memory_space<vmem>>, vector<1x1x128xf32>
      %159 = vector.shape_cast %158 : vector<1x1x128xf32> to vector<1x128xf32>
      %160 = vector.broadcast %159 : vector<1x128xf32> to vector<16x128xf32>
      %161 = arith.addf %156, %160 : vector<16x128xf32>
      %cst_47 = arith.constant 0.000000e+00 : f32
      %162 = vector.broadcast %cst_47 : f32 to vector<16x128xf32>
      %163 = arith.maximumf %161, %162 : vector<16x128xf32>
      %164 = arith.truncf %163 : vector<16x128xf32> to vector<16x128xbf16>
      %165 = arith.index_cast %arg17 : i32 to index
      %c0_48 = arith.constant 0 : index
      %c0_49 = arith.constant 0 : index
      %166 = vector.load %arg10[%165, %c0_48, %c0_49] : memref<2x128x32xbf16, #tpu.memory_space<vmem>>, vector<1x128x32xbf16>
      %167 = vector.shape_cast %166 : vector<1x128x32xbf16> to vector<128x32xbf16>
      %cst_50 = arith.constant dense<0.000000e+00> : vector<16x32xf32>
      %168 = tpu.matmul %164, %167, %cst_50 {dimension_numbers = #tpu.dot_dimension_numbers<[1], [0], [0], [1], [0, 0, 1, 1], [], []>} : vector<16x128xbf16>, vector<128x32xbf16>, vector<16x32xf32> -> vector<16x32xf32>
      %169 = arith.index_cast %arg17 : i32 to index
      %c0_51 = arith.constant 0 : index
      %c0_52 = arith.constant 0 : index
      %170 = vector.load %arg11[%169, %c0_51, %c0_52] : memref<2x1x32xf32, #tpu.memory_space<vmem>>, vector<1x1x32xf32>
      %171 = vector.shape_cast %170 : vector<1x1x32xf32> to vector<1x32xf32>
      %172 = vector.broadcast %171 : vector<1x32xf32> to vector<16x32xf32>
      %173 = arith.addf %168, %172 : vector<16x32xf32>
      %174 = arith.addf %151, %173 : vector<16x32xf32>
      %175 = arith.index_cast %arg17 : i32 to index
      %c0_53 = arith.constant 0 : index
      %c0_54 = arith.constant 0 : index
      %176 = vector.load %arg12[%175, %c0_53, %c0_54] : memref<2x1x32xf32, #tpu.memory_space<vmem>>, vector<1x1x32xf32>
      %177 = vector.shape_cast %176 : vector<1x1x32xf32> to vector<1x32xf32>
      %178 = arith.index_cast %arg17 : i32 to index
      %c0_55 = arith.constant 0 : index
      %c0_56 = arith.constant 0 : index
      %179 = vector.load %arg13[%178, %c0_55, %c0_56] : memref<2x1x32xf32, #tpu.memory_space<vmem>>, vector<1x1x32xf32>
      %180 = vector.shape_cast %179 : vector<1x1x32xf32> to vector<1x32xf32>
      %cst_57 = arith.constant dense<0.000000e+00> : vector<16xf32>
      %181 = vector.multi_reduction <add>, %174, %cst_57 [1] : vector<16x32xf32> to vector<16xf32>
      %182 = vector.shape_cast %181 : vector<16xf32> to vector<16x1xf32>
      %cst_58 = arith.constant 3.200000e+01 : f32
      %183 = vector.broadcast %cst_58 : f32 to vector<16x1xf32>
      %184 = arith.divf %182, %183 : vector<16x1xf32>
      %185 = vector.broadcast %184 : vector<16x1xf32> to vector<16x32xf32>
      %186 = arith.subf %174, %185 : vector<16x32xf32>
      %187 = arith.mulf %186, %186 : vector<16x32xf32>
      %cst_59 = arith.constant dense<0.000000e+00> : vector<16xf32>
      %188 = vector.multi_reduction <add>, %187, %cst_59 [1] : vector<16x32xf32> to vector<16xf32>
      %189 = vector.shape_cast %188 : vector<16xf32> to vector<16x1xf32>
      %cst_60 = arith.constant 3.200000e+01 : f32
      %190 = vector.broadcast %cst_60 : f32 to vector<16x1xf32>
      %191 = arith.divf %189, %190 : vector<16x1xf32>
      %192 = vector.broadcast %184 : vector<16x1xf32> to vector<16x32xf32>
      %193 = arith.subf %174, %192 : vector<16x32xf32>
      %cst_61 = arith.constant 9.99999974E-6 : f32
      %194 = vector.broadcast %cst_61 : f32 to vector<16x1xf32>
      %195 = arith.addf %191, %194 : vector<16x1xf32>
      %196 = math.rsqrt %195 : vector<16x1xf32>
      %197 = vector.broadcast %196 : vector<16x1xf32> to vector<16x32xf32>
      %198 = arith.mulf %193, %197 : vector<16x32xf32>
      %199 = vector.broadcast %177 : vector<1x32xf32> to vector<16x32xf32>
      %200 = arith.mulf %198, %199 : vector<16x32xf32>
      %201 = vector.broadcast %180 : vector<1x32xf32> to vector<16x32xf32>
      %202 = arith.addf %200, %201 : vector<16x32xf32>
      scf.yield %202 : vector<16x32xf32>
    }
    %c2_i32_2 = arith.constant 2 : i32
    %c0_3 = arith.constant 0 : index
    %c0_4 = arith.constant 0 : index
    %c0_5 = arith.constant 0 : index
    %4 = vector.load %arg14[%c0_3, %c0_4, %c0_5] : memref<1x1x32xf32, #tpu.memory_space<vmem>>, vector<1x1x32xf32>
    %5 = vector.shape_cast %4 : vector<1x1x32xf32> to vector<1x32xf32>
    %c0_6 = arith.constant 0 : index
    %c0_7 = arith.constant 0 : index
    %c0_8 = arith.constant 0 : index
    %6 = vector.load %arg15[%c0_6, %c0_7, %c0_8] : memref<1x1x32xf32, #tpu.memory_space<vmem>>, vector<1x1x32xf32>
    %7 = vector.shape_cast %6 : vector<1x1x32xf32> to vector<1x32xf32>
    %cst = arith.constant dense<0.000000e+00> : vector<16xf32>
    %8 = vector.multi_reduction <add>, %3, %cst [1] : vector<16x32xf32> to vector<16xf32>
    %9 = vector.shape_cast %8 : vector<16xf32> to vector<16x1xf32>
    %cst_9 = arith.constant 3.200000e+01 : f32
    %10 = vector.broadcast %cst_9 : f32 to vector<16x1xf32>
    %11 = arith.divf %9, %10 : vector<16x1xf32>
    %12 = vector.broadcast %11 : vector<16x1xf32> to vector<16x32xf32>
    %13 = arith.subf %3, %12 : vector<16x32xf32>
    %14 = arith.mulf %13, %13 : vector<16x32xf32>
    %cst_10 = arith.constant dense<0.000000e+00> : vector<16xf32>
    %15 = vector.multi_reduction <add>, %14, %cst_10 [1] : vector<16x32xf32> to vector<16xf32>
    %16 = vector.shape_cast %15 : vector<16xf32> to vector<16x1xf32>
    %cst_11 = arith.constant 3.200000e+01 : f32
    %17 = vector.broadcast %cst_11 : f32 to vector<16x1xf32>
    %18 = arith.divf %16, %17 : vector<16x1xf32>
    %19 = vector.broadcast %11 : vector<16x1xf32> to vector<16x32xf32>
    %20 = arith.subf %3, %19 : vector<16x32xf32>
    %cst_12 = arith.constant 9.99999974E-6 : f32
    %21 = vector.broadcast %cst_12 : f32 to vector<16x1xf32>
    %22 = arith.addf %18, %21 : vector<16x1xf32>
    %23 = math.rsqrt %22 : vector<16x1xf32>
    %24 = vector.broadcast %23 : vector<16x1xf32> to vector<16x32xf32>
    %25 = arith.mulf %20, %24 : vector<16x32xf32>
    %26 = vector.broadcast %5 : vector<1x32xf32> to vector<16x32xf32>
    %27 = arith.mulf %25, %26 : vector<16x32xf32>
    %28 = vector.broadcast %7 : vector<1x32xf32> to vector<16x32xf32>
    %29 = arith.addf %27, %28 : vector<16x32xf32>
    %c0_13 = arith.constant 0 : index
    %c0_14 = arith.constant 0 : index
    %c0_15 = arith.constant 0 : index
    %30 = vector.load %arg16[%c0_13, %c0_14, %c0_15] : memref<1x16x32xf32, #tpu.memory_space<vmem>>, vector<1x16x32xf32>
    %31 = vector.shape_cast %30 : vector<1x16x32xf32> to vector<16x32xf32>
    %32 = vector.shape_cast %29 : vector<16x32xf32> to vector<1x16x32xf32>
    tpu.vector_store %arg16[%c0_13, %c0_14, %c0_15], %32 {strides = array<i32>} : memref<1x16x32xf32, #tpu.memory_space<vmem>>, vector<1x16x32xf32>,
    return
  }
  func.func @transform_0(%arg0: i32) -> (i32, i32, i32) {
    %c0_i32 = arith.constant 0 : i32
    %c0_i32_0 = arith.constant 0 : i32
    %c0_i32_1 = arith.constant 0 : i32
    return %arg0, %c0_i32, %c0_i32_0 : i32, i32, i32
  }
  func.func @transform_1(%arg0: i32) -> (i32, i32, i32) {
    %c0_i32 = arith.constant 0 : i32
    %c0_i32_0 = arith.constant 0 : i32
    %c0_i32_1 = arith.constant 0 : i32
    %c0_i32_2 = arith.constant 0 : i32
    return %c0_i32, %c0_i32_0, %c0_i32_1 : i32, i32, i32
  }
  func.func @transform_2(%arg0: i32) -> (i32, i32, i32) {
    %c0_i32 = arith.constant 0 : i32
    %c0_i32_0 = arith.constant 0 : i32
    %c0_i32_1 = arith.constant 0 : i32
    %c0_i32_2 = arith.constant 0 : i32
    return %c0_i32, %c0_i32_0, %c0_i32_1 : i32, i32, i32
  }
  func.func @transform_3(%arg0: i32) -> (i32, i32, i32, i32) {
    %c0_i32 = arith.constant 0 : i32
    %c0_i32_0 = arith.constant 0 : i32
    %c0_i32_1 = arith.constant 0 : i32
    %c0_i32_2 = arith.constant 0 : i32
    %c0_i32_3 = arith.constant 0 : i32
    return %c0_i32, %c0_i32_0, %c0_i32_1, %c0_i32_2 : i32, i32, i32, i32
  }
  func.func @transform_4(%arg0: i32) -> (i32, i32, i32) {
    %c0_i32 = arith.constant 0 : i32
    %c0_i32_0 = arith.constant 0 : i32
    %c0_i32_1 = arith.constant 0 : i32
    %c0_i32_2 = arith.constant 0 : i32
    return %c0_i32, %c0_i32_0, %c0_i32_1 : i32, i32, i32
  }
  func.func @transform_5(%arg0: i32) -> (i32, i32, i32) {
    %c0_i32 = arith.constant 0 : i32
    %c0_i32_0 = arith.constant 0 : i32
    %c0_i32_1 = arith.constant 0 : i32
    %c0_i32_2 = arith.constant 0 : i32
    return %c0_i32, %c0_i32_0, %c0_i32_1 : i32, i32, i32
  }
  func.func @transform_6(%arg0: i32) -> (i32, i32, i32) {
    %c0_i32 = arith.constant 0 : i32
    %c0_i32_0 = arith.constant 0 : i32
    %c0_i32_1 = arith.constant 0 : i32
    %c0_i32_2 = arith.constant 0 : i32
    return %c0_i32, %c0_i32_0, %c0_i32_1 : i32, i32, i32
  }
  func.func @transform_7(%arg0: i32) -> (i32, i32, i32) {
    %c0_i32 = arith.constant 0 : i32
    %c0_i32_0 = arith.constant 0 : i32
    %c0_i32_1 = arith.constant 0 : i32
    %c0_i32_2 = arith.constant 0 : i32
    return %c0_i32, %c0_i32_0, %c0_i32_1 : i32, i32, i32
  }
  func.func @transform_8(%arg0: i32) -> (i32, i32, i32) {
    %c0_i32 = arith.constant 0 : i32
    %c0_i32_0 = arith.constant 0 : i32
    %c0_i32_1 = arith.constant 0 : i32
    %c0_i32_2 = arith.constant 0 : i32
    return %c0_i32, %c0_i32_0, %c0_i32_1 : i32, i32, i32
  }
  func.func @transform_9(%arg0: i32) -> (i32, i32, i32) {
    %c0_i32 = arith.constant 0 : i32
    %c0_i32_0 = arith.constant 0 : i32
    %c0_i32_1 = arith.constant 0 : i32
    %c0_i32_2 = arith.constant 0 : i32
    return %c0_i32, %c0_i32_0, %c0_i32_1 : i32, i32, i32
  }
  func.func @transform_10(%arg0: i32) -> (i32, i32, i32) {
    %c0_i32 = arith.constant 0 : i32
    %c0_i32_0 = arith.constant 0 : i32
    %c0_i32_1 = arith.constant 0 : i32
    %c0_i32_2 = arith.constant 0 : i32
    return %c0_i32, %c0_i32_0, %c0_i32_1 : i32, i32, i32
  }
  func.func @transform_11(%arg0: i32) -> (i32, i32, i32) {
    %c0_i32 = arith.constant 0 : i32
    %c0_i32_0 = arith.constant 0 : i32
    %c0_i32_1 = arith.constant 0 : i32
    %c0_i32_2 = arith.constant 0 : i32
    return %c0_i32, %c0_i32_0, %c0_i32_1 : i32, i32, i32
  }
  func.func @transform_12(%arg0: i32) -> (i32, i32, i32) {
    %c0_i32 = arith.constant 0 : i32
    %c0_i32_0 = arith.constant 0 : i32
    %c0_i32_1 = arith.constant 0 : i32
    %c0_i32_2 = arith.constant 0 : i32
    return %c0_i32, %c0_i32_0, %c0_i32_1 : i32, i32, i32
  }
  func.func @transform_13(%arg0: i32) -> (i32, i32, i32) {
    %c0_i32 = arith.constant 0 : i32
    %c0_i32_0 = arith.constant 0 : i32
    %c0_i32_1 = arith.constant 0 : i32
    %c0_i32_2 = arith.constant 0 : i32
    return %c0_i32, %c0_i32_0, %c0_i32_1 : i32, i32, i32
  }
  func.func @transform_14(%arg0: i32) -> (i32, i32, i32) {
    %c0_i32 = arith.constant 0 : i32
    %c0_i32_0 = arith.constant 0 : i32
    %c0_i32_1 = arith.constant 0 : i32
    %c0_i32_2 = arith.constant 0 : i32
    return %c0_i32, %c0_i32_0, %c0_i32_1 : i32, i32, i32
  }
  func.func @transform_15(%arg0: i32) -> (i32, i32, i32) {
    %c0_i32 = arith.constant 0 : i32
    %c0_i32_0 = arith.constant 0 : i32
    %c0_i32_1 = arith.constant 0 : i32
    return %arg0, %c0_i32, %c0_i32_0 : i32, i32, i32
  }
}

module attributes {stable_mosaic.version = 11 : i64} {
  func.func @_cq_attention_kernel(%arg0: i32, %arg1: memref<1x1xf32, #tpu.memory_space<smem>>, %arg2: memref<1x16x32xf32, #tpu.memory_space<vmem>>, %arg3: memref<1x16x32xf32, #tpu.memory_space<vmem>>, %arg4: memref<1x1x16xf32, #tpu.memory_space<vmem>>, %arg5: memref<1x16x1xf32, #tpu.memory_space<vmem>>, %arg6: memref<1x32xf32, #tpu.memory_space<vmem>>, %arg7: memref<1x32xf32, #tpu.memory_space<vmem>>, %arg8: memref<1x32xf32, #tpu.memory_space<vmem>>, %arg9: memref<128x32xbf16, #tpu.memory_space<vmem>>, %arg10: memref<1x32xf32, #tpu.memory_space<vmem>>, %arg11: memref<2x128xf32, #tpu.memory_space<vmem>>, %arg12: memref<1x16x32xf32, #tpu.memory_space<vmem>>, %arg13: memref<1x2x16xf32, #tpu.memory_space<vmem>>) attributes {dimension_semantics = [#tpu.dimension_semantics<parallel>], iteration_bounds = array<i64: 2>, scalar_prefetch = 0 : i64, scratch_operands = 0 : i64, tpu.core_type = #tpu.core_type<tc>, window_params = [{transform_indices = @transform_0, window_bounds = array<i64: 1, 1>}, {transform_indices = @transform_1, window_bounds = array<i64: 1, 16, 32>}, {transform_indices = @transform_2, window_bounds = array<i64: 1, 16, 32>}, {transform_indices = @transform_3, window_bounds = array<i64: 1, 1, 16>}, {transform_indices = @transform_4, window_bounds = array<i64: 1, 16, 1>}, {pipeline_mode = #tpu.pipeline_mode<synchronous>, transform_indices = @transform_5, window_bounds = array<i64: 1, 32>}, {pipeline_mode = #tpu.pipeline_mode<synchronous>, transform_indices = @transform_6, window_bounds = array<i64: 1, 32>}, {pipeline_mode = #tpu.pipeline_mode<synchronous>, transform_indices = @transform_7, window_bounds = array<i64: 1, 32>}, {pipeline_mode = #tpu.pipeline_mode<synchronous>, transform_indices = @transform_8, window_bounds = array<i64: 128, 32>}, {pipeline_mode = #tpu.pipeline_mode<synchronous>, transform_indices = @transform_9, window_bounds = array<i64: 1, 32>}, {pipeline_mode = #tpu.pipeline_mode<synchronous>, transform_indices = @transform_10, window_bounds = array<i64: 2, 128>}, {transform_indices = @transform_11, window_bounds = array<i64: 1, 16, 32>}, {transform_indices = @transform_12, window_bounds = array<i64: 1, 2, 16>}]} {
    %c0 = arith.constant 0 : index
    %c0_0 = arith.constant 0 : index
    %c0_1 = arith.constant 0 : index
    %0 = vector.load %arg2[%c0, %c0_0, %c0_1] : memref<1x16x32xf32, #tpu.memory_space<vmem>>, vector<1x16x32xf32>
    %1 = vector.shape_cast %0 : vector<1x16x32xf32> to vector<16x32xf32>
    %c0_2 = arith.constant 0 : index
    %c0_3 = arith.constant 0 : index
    %c0_4 = arith.constant 0 : index
    %2 = vector.load %arg3[%c0_2, %c0_3, %c0_4] : memref<1x16x32xf32, #tpu.memory_space<vmem>>, vector<1x16x32xf32>
    %3 = vector.shape_cast %2 : vector<1x16x32xf32> to vector<16x32xf32>
    %c0_5 = arith.constant 0 : index
    %c0_6 = arith.constant 0 : index
    %c0_7 = arith.constant 0 : index
    %4 = vector.load %arg4[%c0_5, %c0_6, %c0_7] : memref<1x1x16xf32, #tpu.memory_space<vmem>>, vector<1x1x16xf32>
    %5 = vector.shape_cast %4 : vector<1x1x16xf32> to vector<1x16xf32>
    %c0_8 = arith.constant 0 : index
    %c0_9 = arith.constant 0 : index
    %c0_10 = arith.constant 0 : index
    %6 = vector.load %arg5[%c0_8, %c0_9, %c0_10] : memref<1x16x1xf32, #tpu.memory_space<vmem>>, vector<1x16x1xf32>
    %7 = vector.shape_cast %6 : vector<1x16x1xf32> to vector<16x1xf32>
    %c0_11 = arith.constant 0 : index
    %c0_12 = arith.constant 0 : index
    %8 = vector.load %arg6[%c0_11, %c0_12] : memref<1x32xf32, #tpu.memory_space<vmem>>, vector<1x32xf32>
    %9 = vector.broadcast %8 : vector<1x32xf32> to vector<16x32xf32>
    %10 = arith.mulf %1, %9 : vector<16x32xf32>
    %cst = arith.constant dense<0.000000e+00> : vector<16xf32>
    %11 = vector.multi_reduction <add>, %10, %cst [1] : vector<16x32xf32> to vector<16xf32>
    %12 = vector.shape_cast %11 : vector<16xf32> to vector<16x1xf32>
    %c0_13 = arith.constant 0 : index
    %c0_14 = arith.constant 0 : index
    %13 = vector.load %arg8[%c0_13, %c0_14] : memref<1x32xf32, #tpu.memory_space<vmem>>, vector<1x32xf32>
    %14 = vector.broadcast %13 : vector<1x32xf32> to vector<16x32xf32>
    %15 = arith.mulf %1, %14 : vector<16x32xf32>
    %c0_15 = arith.constant 0 : index
    %c0_16 = arith.constant 0 : index
    %16 = vector.load %arg7[%c0_15, %c0_16] : memref<1x32xf32, #tpu.memory_space<vmem>>, vector<1x32xf32>
    %17 = vector.broadcast %16 : vector<1x32xf32> to vector<16x32xf32>
    %18 = arith.addf %15, %17 : vector<16x32xf32>
    %19 = arith.truncf %18 : vector<16x32xf32> to vector<16x32xbf16>
    %20 = arith.truncf %3 : vector<16x32xf32> to vector<16x32xbf16>
    %cst_17 = arith.constant dense<0.000000e+00> : vector<16x16xf32>
    %21 = tpu.matmul %19, %20, %cst_17 {dimension_numbers = #tpu.dot_dimension_numbers<[1], [1], [0], [0], [0, 0, 1, 0], [], []>} : vector<16x32xbf16>, vector<16x32xbf16>, vector<16x16xf32> -> vector<16x16xf32>
    %22 = vector.broadcast %12 : vector<16x1xf32> to vector<16x16xf32>
    %23 = arith.addf %21, %22 : vector<16x16xf32>
    %c0_18 = arith.constant 0 : index
    %c0_19 = arith.constant 0 : index
    %24 = memref.load %arg1[%c0_18, %c0_19] : memref<1x1xf32, #tpu.memory_space<smem>>
    %25 = vector.broadcast %24 : f32 to vector<16x16xf32>
    %26 = arith.addf %23, %25 : vector<16x16xf32>
    %27 = vector.broadcast %5 : vector<1x16xf32> to vector<16x16xf32>
    %28 = arith.addf %26, %27 : vector<16x16xf32>
    %cst_20 = arith.constant dense<0xFF800000> : vector<16xf32>
    %29 = vector.multi_reduction <maximumf>, %28, %cst_20 [1] : vector<16x16xf32> to vector<16xf32>
    %30 = vector.shape_cast %29 : vector<16xf32> to vector<16x1xf32>
    %31 = vector.broadcast %30 : vector<16x1xf32> to vector<16x16xf32>
    %32 = arith.subf %28, %31 : vector<16x16xf32>
    %33 = math.exp %32 : vector<16x16xf32>
    %cst_21 = arith.constant dense<0.000000e+00> : vector<16xf32>
    %34 = vector.multi_reduction <add>, %33, %cst_21 [1] : vector<16x16xf32> to vector<16xf32>
    %35 = vector.shape_cast %34 : vector<16xf32> to vector<16x1xf32>
    %36 = tpu.reciprocal %35 {approx = true} : vector<16x1xf32> -> vector<16x1xf32>
    %37 = vector.broadcast %36 : vector<16x1xf32> to vector<16x16xf32>
    %38 = arith.mulf %33, %37 : vector<16x16xf32>
    %39 = vector.broadcast %7 : vector<16x1xf32> to vector<16x16xf32>
    %40 = arith.addf %26, %39 : vector<16x16xf32>
    %cst_22 = arith.constant dense<0xFF800000> : vector<16xf32>
    %41 = vector.multi_reduction <maximumf>, %40, %cst_22 [0] : vector<16x16xf32> to vector<16xf32>
    %42 = vector.shape_cast %41 : vector<16xf32> to vector<1x16xf32>
    %43 = vector.broadcast %42 : vector<1x16xf32> to vector<16x16xf32>
    %44 = arith.subf %40, %43 : vector<16x16xf32>
    %45 = math.exp %44 : vector<16x16xf32>
    %cst_23 = arith.constant dense<0.000000e+00> : vector<16xf32>
    %46 = vector.multi_reduction <add>, %45, %cst_23 [0] : vector<16x16xf32> to vector<16xf32>
    %47 = vector.shape_cast %46 : vector<16xf32> to vector<1x16xf32>
    %48 = tpu.reciprocal %47 {approx = true} : vector<1x16xf32> -> vector<1x16xf32>
    %49 = vector.broadcast %48 : vector<1x16xf32> to vector<16x16xf32>
    %50 = arith.mulf %45, %49 : vector<16x16xf32>
    %51 = arith.truncf %38 : vector<16x16xf32> to vector<16x16xbf16>
    %52 = arith.truncf %3 : vector<16x32xf32> to vector<16x32xbf16>
    %cst_24 = arith.constant dense<0.000000e+00> : vector<16x32xf32>
    %53 = tpu.matmul %51, %52, %cst_24 {dimension_numbers = #tpu.dot_dimension_numbers<[1], [0], [0], [1], [0, 0, 1, 1], [], []>} : vector<16x16xbf16>, vector<16x32xbf16>, vector<16x32xf32> -> vector<16x32xf32>
    %54 = arith.truncf %50 : vector<16x16xf32> to vector<16x16xbf16>
    %55 = arith.truncf %1 : vector<16x32xf32> to vector<16x32xbf16>
    %cst_25 = arith.constant dense<0.000000e+00> : vector<16x32xf32>
    %56 = tpu.matmul %54, %55, %cst_25 {dimension_numbers = #tpu.dot_dimension_numbers<[0], [0], [1], [1], [0, 1, 1, 1], [], []>} : vector<16x16xbf16>, vector<16x32xbf16>, vector<16x32xf32> -> vector<16x32xf32>
    %57 = arith.truncf %56 : vector<16x32xf32> to vector<16x32xbf16>
    %cst_26 = arith.constant dense<0.000000e+00> : vector<16x32xf32>
    %58 = tpu.matmul %51, %57, %cst_26 {dimension_numbers = #tpu.dot_dimension_numbers<[1], [0], [0], [1], [0, 0, 1, 1], [], []>} : vector<16x16xbf16>, vector<16x32xbf16>, vector<16x32xf32> -> vector<16x32xf32>
    %59 = arith.mulf %1, %53 : vector<16x32xf32>
    %60 = arith.mulf %1, %58 : vector<16x32xf32>
    %61 = tpu.concatenate %1, %53, %59, %60 in 1 : vector<16x32xf32>, vector<16x32xf32>, vector<16x32xf32>, vector<16x32xf32> -> vector<16x128xf32>
    %62 = arith.truncf %61 : vector<16x128xf32> to vector<16x128xbf16>
    %c0_27 = arith.constant 0 : index
    %c0_28 = arith.constant 0 : index
    %63 = vector.load %arg9[%c0_27, %c0_28] : memref<128x32xbf16, #tpu.memory_space<vmem>>, vector<128x32xbf16>
    %cst_29 = arith.constant dense<0.000000e+00> : vector<16x32xf32>
    %64 = tpu.matmul %62, %63, %cst_29 {dimension_numbers = #tpu.dot_dimension_numbers<[1], [0], [0], [1], [0, 0, 1, 1], [], []>} : vector<16x128xbf16>, vector<128x32xbf16>, vector<16x32xf32> -> vector<16x32xf32>
    %c0_30 = arith.constant 0 : index
    %c0_31 = arith.constant 0 : index
    %65 = vector.load %arg10[%c0_30, %c0_31] : memref<1x32xf32, #tpu.memory_space<vmem>>, vector<1x32xf32>
    %66 = vector.broadcast %65 : vector<1x32xf32> to vector<16x32xf32>
    %67 = arith.addf %64, %66 : vector<16x32xf32>
    %c0_32 = arith.constant 0 : index
    %c0_33 = arith.constant 0 : index
    %c0_34 = arith.constant 0 : index
    %68 = vector.load %arg12[%c0_32, %c0_33, %c0_34] : memref<1x16x32xf32, #tpu.memory_space<vmem>>, vector<1x16x32xf32>
    %69 = vector.shape_cast %68 : vector<1x16x32xf32> to vector<16x32xf32>
    %70 = vector.shape_cast %67 : vector<16x32xf32> to vector<1x16x32xf32>
    tpu.vector_store %arg12[%c0_32, %c0_33, %c0_34], %70 {strides = array<i32>} : memref<1x16x32xf32, #tpu.memory_space<vmem>>, vector<1x16x32xf32>,
    %c0_35 = arith.constant 0 : index
    %c0_36 = arith.constant 0 : index
    %71 = vector.load %arg11[%c0_35, %c0_36] : memref<2x128xf32, #tpu.memory_space<vmem>>, vector<2x128xf32>
    %cst_37 = arith.constant dense<0.000000e+00> : vector<2x16xf32>
    %72 = tpu.matmul %71, %61, %cst_37 {dimension_numbers = #tpu.dot_dimension_numbers<[1], [1], [0], [0], [0, 0, 1, 0], [], []>} : vector<2x128xf32>, vector<16x128xf32>, vector<2x16xf32> -> vector<2x16xf32>
    %c0_38 = arith.constant 0 : index
    %c0_39 = arith.constant 0 : index
    %c0_40 = arith.constant 0 : index
    %73 = vector.load %arg13[%c0_38, %c0_39, %c0_40] : memref<1x2x16xf32, #tpu.memory_space<vmem>>, vector<1x2x16xf32>
    %74 = vector.shape_cast %73 : vector<1x2x16xf32> to vector<2x16xf32>
    %75 = vector.shape_cast %72 : vector<2x16xf32> to vector<1x2x16xf32>
    tpu.vector_store %arg13[%c0_38, %c0_39, %c0_40], %75 {strides = array<i32>} : memref<1x2x16xf32, #tpu.memory_space<vmem>>, vector<1x2x16xf32>,
    return
  }
  func.func @transform_0(%arg0: i32) -> (i32, i32) {
    %c0_i32 = arith.constant 0 : i32
    %c0_i32_0 = arith.constant 0 : i32
    %c0_i32_1 = arith.constant 0 : i32
    return %c0_i32, %c0_i32_0 : i32, i32
  }
  func.func @transform_1(%arg0: i32) -> (i32, i32, i32) {
    %c0_i32 = arith.constant 0 : i32
    %c0_i32_0 = arith.constant 0 : i32
    %c0_i32_1 = arith.constant 0 : i32
    return %arg0, %c0_i32, %c0_i32_0 : i32, i32, i32
  }
  func.func @transform_2(%arg0: i32) -> (i32, i32, i32) {
    %c0_i32 = arith.constant 0 : i32
    %c0_i32_0 = arith.constant 0 : i32
    %c0_i32_1 = arith.constant 0 : i32
    return %arg0, %c0_i32, %c0_i32_0 : i32, i32, i32
  }
  func.func @transform_3(%arg0: i32) -> (i32, i32, i32) {
    %c0_i32 = arith.constant 0 : i32
    %c0_i32_0 = arith.constant 0 : i32
    %c0_i32_1 = arith.constant 0 : i32
    return %arg0, %c0_i32, %c0_i32_0 : i32, i32, i32
  }
  func.func @transform_4(%arg0: i32) -> (i32, i32, i32) {
    %c0_i32 = arith.constant 0 : i32
    %c0_i32_0 = arith.constant 0 : i32
    %c0_i32_1 = arith.constant 0 : i32
    return %arg0, %c0_i32, %c0_i32_0 : i32, i32, i32
  }
  func.func @transform_5(%arg0: i32) -> (i32, i32) {
    %c0_i32 = arith.constant 0 : i32
    %c0_i32_0 = arith.constant 0 : i32
    %c0_i32_1 = arith.constant 0 : i32
    return %c0_i32, %c0_i32_0 : i32, i32
  }
  func.func @transform_6(%arg0: i32) -> (i32, i32) {
    %c0_i32 = arith.constant 0 : i32
    %c0_i32_0 = arith.constant 0 : i32
    %c0_i32_1 = arith.constant 0 : i32
    return %c0_i32, %c0_i32_0 : i32, i32
  }
  func.func @transform_7(%arg0: i32) -> (i32, i32) {
    %c0_i32 = arith.constant 0 : i32
    %c0_i32_0 = arith.constant 0 : i32
    %c0_i32_1 = arith.constant 0 : i32
    return %c0_i32, %c0_i32_0 : i32, i32
  }
  func.func @transform_8(%arg0: i32) -> (i32, i32) {
    %c0_i32 = arith.constant 0 : i32
    %c0_i32_0 = arith.constant 0 : i32
    %c0_i32_1 = arith.constant 0 : i32
    return %c0_i32, %c0_i32_0 : i32, i32
  }
  func.func @transform_9(%arg0: i32) -> (i32, i32) {
    %c0_i32 = arith.constant 0 : i32
    %c0_i32_0 = arith.constant 0 : i32
    %c0_i32_1 = arith.constant 0 : i32
    return %c0_i32, %c0_i32_0 : i32, i32
  }
  func.func @transform_10(%arg0: i32) -> (i32, i32) {
    %c0_i32 = arith.constant 0 : i32
    %c0_i32_0 = arith.constant 0 : i32
    %c0_i32_1 = arith.constant 0 : i32
    return %c0_i32, %c0_i32_0 : i32, i32
  }
  func.func @transform_11(%arg0: i32) -> (i32, i32, i32) {
    %c0_i32 = arith.constant 0 : i32
    %c0_i32_0 = arith.constant 0 : i32
    %c0_i32_1 = arith.constant 0 : i32
    return %arg0, %c0_i32, %c0_i32_0 : i32, i32, i32
  }
  func.func @transform_12(%arg0: i32) -> (i32, i32, i32) {
    %c0_i32 = arith.constant 0 : i32
    %c0_i32_0 = arith.constant 0 : i32
    %c0_i32_1 = arith.constant 0 : i32
    return %arg0, %c0_i32, %c0_i32_0 : i32, i32, i32
  }
}

module attributes {stable_mosaic.version = 11 : i64} {
  func.func @_transformer_stack_kernel(%arg0: i32, %arg1: memref<1x16x32xf32, #tpu.memory_space<vmem>>, %arg2: memref<4x32x96xbf16, #tpu.memory_space<vmem>>, %arg3: memref<4x1x96xf32, #tpu.memory_space<vmem>>, %arg4: memref<4x8x4x32xbf16, #tpu.memory_space<vmem>>, %arg5: memref<4x1x32xf32, #tpu.memory_space<vmem>>, %arg6: memref<4x1x32xf32, #tpu.memory_space<vmem>>, %arg7: memref<4x1x32xf32, #tpu.memory_space<vmem>>, %arg8: memref<4x32x128xbf16, #tpu.memory_space<vmem>>, %arg9: memref<4x1x128xf32, #tpu.memory_space<vmem>>, %arg10: memref<4x128x32xbf16, #tpu.memory_space<vmem>>, %arg11: memref<4x1x32xf32, #tpu.memory_space<vmem>>, %arg12: memref<4x1x32xf32, #tpu.memory_space<vmem>>, %arg13: memref<4x1x32xf32, #tpu.memory_space<vmem>>, %arg14: memref<1x1x32xf32, #tpu.memory_space<vmem>>, %arg15: memref<1x1x32xf32, #tpu.memory_space<vmem>>, %arg16: memref<1x16x32xf32, #tpu.memory_space<vmem>>) attributes {dimension_semantics = [#tpu.dimension_semantics<parallel>], iteration_bounds = array<i64: 2>, scalar_prefetch = 0 : i64, scratch_operands = 0 : i64, tpu.core_type = #tpu.core_type<tc>, window_params = [{transform_indices = @transform_0, window_bounds = array<i64: 1, 16, 32>}, {pipeline_mode = #tpu.pipeline_mode<synchronous>, transform_indices = @transform_1, window_bounds = array<i64: 4, 32, 96>}, {pipeline_mode = #tpu.pipeline_mode<synchronous>, transform_indices = @transform_2, window_bounds = array<i64: 4, 1, 96>}, {pipeline_mode = #tpu.pipeline_mode<synchronous>, transform_indices = @transform_3, window_bounds = array<i64: 4, 8, 4, 32>}, {pipeline_mode = #tpu.pipeline_mode<synchronous>, transform_indices = @transform_4, window_bounds = array<i64: 4, 1, 32>}, {pipeline_mode = #tpu.pipeline_mode<synchronous>, transform_indices = @transform_5, window_bounds = array<i64: 4, 1, 32>}, {pipeline_mode = #tpu.pipeline_mode<synchronous>, transform_indices = @transform_6, window_bounds = array<i64: 4, 1, 32>}, {pipeline_mode = #tpu.pipeline_mode<synchronous>, transform_indices = @transform_7, window_bounds = array<i64: 4, 32, 128>}, {pipeline_mode = #tpu.pipeline_mode<synchronous>, transform_indices = @transform_8, window_bounds = array<i64: 4, 1, 128>}, {pipeline_mode = #tpu.pipeline_mode<synchronous>, transform_indices = @transform_9, window_bounds = array<i64: 4, 128, 32>}, {pipeline_mode = #tpu.pipeline_mode<synchronous>, transform_indices = @transform_10, window_bounds = array<i64: 4, 1, 32>}, {pipeline_mode = #tpu.pipeline_mode<synchronous>, transform_indices = @transform_11, window_bounds = array<i64: 4, 1, 32>}, {pipeline_mode = #tpu.pipeline_mode<synchronous>, transform_indices = @transform_12, window_bounds = array<i64: 4, 1, 32>}, {pipeline_mode = #tpu.pipeline_mode<synchronous>, transform_indices = @transform_13, window_bounds = array<i64: 1, 1, 32>}, {pipeline_mode = #tpu.pipeline_mode<synchronous>, transform_indices = @transform_14, window_bounds = array<i64: 1, 1, 32>}, {transform_indices = @transform_15, window_bounds = array<i64: 1, 16, 32>}]} {
    %c0 = arith.constant 0 : index
    %c0_0 = arith.constant 0 : index
    %c0_1 = arith.constant 0 : index
    %0 = vector.load %arg1[%c0, %c0_0, %c0_1] : memref<1x16x32xf32, #tpu.memory_space<vmem>>, vector<1x16x32xf32>
    %1 = vector.shape_cast %0 : vector<1x16x32xf32> to vector<16x32xf32>
    %c0_i32 = arith.constant 0 : i32
    %c4_i32 = arith.constant 4 : i32
    %2 = arith.addi %c0_i32, %c4_i32 : i32
    %c1_i32 = arith.constant 1 : i32
    %3 = scf.for %arg17 = %c0_i32 to %2 step %c1_i32 iter_args(%arg18 = %1) -> (vector<16x32xf32>)  : i32 {
      %33 = arith.truncf %arg18 : vector<16x32xf32> to vector<16x32xbf16>
      %34 = arith.index_cast %arg17 : i32 to index
      %c0_16 = arith.constant 0 : index
      %c0_17 = arith.constant 0 : index
      %35 = vector.load %arg2[%34, %c0_16, %c0_17] : memref<4x32x96xbf16, #tpu.memory_space<vmem>>, vector<1x32x96xbf16>
      %36 = vector.shape_cast %35 : vector<1x32x96xbf16> to vector<32x96xbf16>
      %cst_18 = arith.constant dense<0.000000e+00> : vector<16x96xf32>
      %37 = tpu.matmul %33, %36, %cst_18 {dimension_numbers = #tpu.dot_dimension_numbers<[1], [0], [0], [1], [0, 0, 1, 1], [], []>} : vector<16x32xbf16>, vector<32x96xbf16>, vector<16x96xf32> -> vector<16x96xf32>
      %38 = arith.index_cast %arg17 : i32 to index
      %c0_19 = arith.constant 0 : index
      %c0_20 = arith.constant 0 : index
      %39 = vector.load %arg3[%38, %c0_19, %c0_20] : memref<4x1x96xf32, #tpu.memory_space<vmem>>, vector<1x1x96xf32>
      %40 = vector.shape_cast %39 : vector<1x1x96xf32> to vector<1x96xf32>
      %41 = vector.broadcast %40 : vector<1x96xf32> to vector<16x96xf32>
      %42 = arith.addf %37, %41 : vector<16x96xf32>
      %43 = vector.extract_strided_slice %42 {offsets = [0, 0], sizes = [16, 4], strides = [1, 1]} : vector<16x96xf32> to vector<16x4xf32>
      %44 = vector.extract_strided_slice %42 {offsets = [0, 4], sizes = [16, 4], strides = [1, 1]} : vector<16x96xf32> to vector<16x4xf32>
      %45 = vector.extract_strided_slice %42 {offsets = [0, 8], sizes = [16, 4], strides = [1, 1]} : vector<16x96xf32> to vector<16x4xf32>
      %46 = vector.extract_strided_slice %42 {offsets = [0, 12], sizes = [16, 4], strides = [1, 1]} : vector<16x96xf32> to vector<16x4xf32>
      %47 = vector.extract_strided_slice %42 {offsets = [0, 16], sizes = [16, 4], strides = [1, 1]} : vector<16x96xf32> to vector<16x4xf32>
      %48 = vector.extract_strided_slice %42 {offsets = [0, 20], sizes = [16, 4], strides = [1, 1]} : vector<16x96xf32> to vector<16x4xf32>
      %49 = vector.extract_strided_slice %42 {offsets = [0, 24], sizes = [16, 4], strides = [1, 1]} : vector<16x96xf32> to vector<16x4xf32>
      %50 = vector.extract_strided_slice %42 {offsets = [0, 28], sizes = [16, 4], strides = [1, 1]} : vector<16x96xf32> to vector<16x4xf32>
      %51 = vector.shape_cast %43 : vector<16x4xf32> to vector<1x16x4xf32>
      %52 = vector.shape_cast %44 : vector<16x4xf32> to vector<1x16x4xf32>
      %53 = vector.shape_cast %45 : vector<16x4xf32> to vector<1x16x4xf32>
      %54 = vector.shape_cast %46 : vector<16x4xf32> to vector<1x16x4xf32>
      %55 = vector.shape_cast %47 : vector<16x4xf32> to vector<1x16x4xf32>
      %56 = vector.shape_cast %48 : vector<16x4xf32> to vector<1x16x4xf32>
      %57 = vector.shape_cast %49 : vector<16x4xf32> to vector<1x16x4xf32>
      %58 = vector.shape_cast %50 : vector<16x4xf32> to vector<1x16x4xf32>
      %59 = tpu.concatenate %51, %52, %53, %54, %55, %56, %57, %58 in 0 : vector<1x16x4xf32>, vector<1x16x4xf32>, vector<1x16x4xf32>, vector<1x16x4xf32>, vector<1x16x4xf32>, vector<1x16x4xf32>, vector<1x16x4xf32>, vector<1x16x4xf32> -> vector<8x16x4xf32>
      %60 = vector.extract_strided_slice %42 {offsets = [0, 32], sizes = [16, 4], strides = [1, 1]} : vector<16x96xf32> to vector<16x4xf32>
      %61 = vector.extract_strided_slice %42 {offsets = [0, 36], sizes = [16, 4], strides = [1, 1]} : vector<16x96xf32> to vector<16x4xf32>
      %62 = vector.extract_strided_slice %42 {offsets = [0, 40], sizes = [16, 4], strides = [1, 1]} : vector<16x96xf32> to vector<16x4xf32>
      %63 = vector.extract_strided_slice %42 {offsets = [0, 44], sizes = [16, 4], strides = [1, 1]} : vector<16x96xf32> to vector<16x4xf32>
      %64 = vector.extract_strided_slice %42 {offsets = [0, 48], sizes = [16, 4], strides = [1, 1]} : vector<16x96xf32> to vector<16x4xf32>
      %65 = vector.extract_strided_slice %42 {offsets = [0, 52], sizes = [16, 4], strides = [1, 1]} : vector<16x96xf32> to vector<16x4xf32>
      %66 = vector.extract_strided_slice %42 {offsets = [0, 56], sizes = [16, 4], strides = [1, 1]} : vector<16x96xf32> to vector<16x4xf32>
      %67 = vector.extract_strided_slice %42 {offsets = [0, 60], sizes = [16, 4], strides = [1, 1]} : vector<16x96xf32> to vector<16x4xf32>
      %68 = vector.shape_cast %60 : vector<16x4xf32> to vector<1x16x4xf32>
      %69 = vector.shape_cast %61 : vector<16x4xf32> to vector<1x16x4xf32>
      %70 = vector.shape_cast %62 : vector<16x4xf32> to vector<1x16x4xf32>
      %71 = vector.shape_cast %63 : vector<16x4xf32> to vector<1x16x4xf32>
      %72 = vector.shape_cast %64 : vector<16x4xf32> to vector<1x16x4xf32>
      %73 = vector.shape_cast %65 : vector<16x4xf32> to vector<1x16x4xf32>
      %74 = vector.shape_cast %66 : vector<16x4xf32> to vector<1x16x4xf32>
      %75 = vector.shape_cast %67 : vector<16x4xf32> to vector<1x16x4xf32>
      %76 = tpu.concatenate %68, %69, %70, %71, %72, %73, %74, %75 in 0 : vector<1x16x4xf32>, vector<1x16x4xf32>, vector<1x16x4xf32>, vector<1x16x4xf32>, vector<1x16x4xf32>, vector<1x16x4xf32>, vector<1x16x4xf32>, vector<1x16x4xf32> -> vector<8x16x4xf32>
      %77 = vector.extract_strided_slice %42 {offsets = [0, 64], sizes = [16, 4], strides = [1, 1]} : vector<16x96xf32> to vector<16x4xf32>
      %78 = vector.extract_strided_slice %42 {offsets = [0, 68], sizes = [16, 4], strides = [1, 1]} : vector<16x96xf32> to vector<16x4xf32>
      %79 = vector.extract_strided_slice %42 {offsets = [0, 72], sizes = [16, 4], strides = [1, 1]} : vector<16x96xf32> to vector<16x4xf32>
      %80 = vector.extract_strided_slice %42 {offsets = [0, 76], sizes = [16, 4], strides = [1, 1]} : vector<16x96xf32> to vector<16x4xf32>
      %81 = vector.extract_strided_slice %42 {offsets = [0, 80], sizes = [16, 4], strides = [1, 1]} : vector<16x96xf32> to vector<16x4xf32>
      %82 = vector.extract_strided_slice %42 {offsets = [0, 84], sizes = [16, 4], strides = [1, 1]} : vector<16x96xf32> to vector<16x4xf32>
      %83 = vector.extract_strided_slice %42 {offsets = [0, 88], sizes = [16, 4], strides = [1, 1]} : vector<16x96xf32> to vector<16x4xf32>
      %84 = vector.extract_strided_slice %42 {offsets = [0, 92], sizes = [16, 4], strides = [1, 1]} : vector<16x96xf32> to vector<16x4xf32>
      %85 = vector.shape_cast %77 : vector<16x4xf32> to vector<1x16x4xf32>
      %86 = vector.shape_cast %78 : vector<16x4xf32> to vector<1x16x4xf32>
      %87 = vector.shape_cast %79 : vector<16x4xf32> to vector<1x16x4xf32>
      %88 = vector.shape_cast %80 : vector<16x4xf32> to vector<1x16x4xf32>
      %89 = vector.shape_cast %81 : vector<16x4xf32> to vector<1x16x4xf32>
      %90 = vector.shape_cast %82 : vector<16x4xf32> to vector<1x16x4xf32>
      %91 = vector.shape_cast %83 : vector<16x4xf32> to vector<1x16x4xf32>
      %92 = vector.shape_cast %84 : vector<16x4xf32> to vector<1x16x4xf32>
      %93 = tpu.concatenate %85, %86, %87, %88, %89, %90, %91, %92 in 0 : vector<1x16x4xf32>, vector<1x16x4xf32>, vector<1x16x4xf32>, vector<1x16x4xf32>, vector<1x16x4xf32>, vector<1x16x4xf32>, vector<1x16x4xf32>, vector<1x16x4xf32> -> vector<8x16x4xf32>
      %94 = arith.truncf %59 : vector<8x16x4xf32> to vector<8x16x4xbf16>
      %95 = arith.truncf %76 : vector<8x16x4xf32> to vector<8x16x4xbf16>
      "tpu.trace_start"() <{level = 10 : i32, message = "hld,hmd->hlm"}> : () -> ()
      %cst_21 = arith.constant dense<0.000000e+00> : vector<8x16x16xf32>
      %96 = tpu.matmul %94, %95, %cst_21 {dimension_numbers = #tpu.dot_dimension_numbers<[2], [2], [1], [1], [0, 0, 0, 1, 1, 1], [0], [0]>} : vector<8x16x4xbf16>, vector<8x16x4xbf16>, vector<8x16x16xf32> -> vector<8x16x16xf32>
      "tpu.trace_stop"() : () -> ()
      %cst_22 = arith.constant 5.000000e-01 : f32
      %97 = vector.broadcast %cst_22 : f32 to vector<8x16x16xf32>
      %98 = arith.mulf %96, %97 : vector<8x16x16xf32>
      %cst_23 = arith.constant dense<0xFF800000> : vector<8x16xf32>
      %99 = vector.multi_reduction <maximumf>, %98, %cst_23 [2] : vector<8x16x16xf32> to vector<8x16xf32>
      %100 = vector.shape_cast %99 : vector<8x16xf32> to vector<8x16x1xf32>
      %101 = vector.broadcast %100 : vector<8x16x1xf32> to vector<8x16x16xf32>
      %102 = arith.subf %98, %101 : vector<8x16x16xf32>
      %103 = math.exp %102 : vector<8x16x16xf32>
      %cst_24 = arith.constant dense<0.000000e+00> : vector<8x16xf32>
      %104 = vector.multi_reduction <add>, %103, %cst_24 [2] : vector<8x16x16xf32> to vector<8x16xf32>
      %105 = vector.shape_cast %104 : vector<8x16xf32> to vector<8x16x1xf32>
      %106 = tpu.reciprocal %105 {approx = true} : vector<8x16x1xf32> -> vector<8x16x1xf32>
      %107 = vector.broadcast %106 : vector<8x16x1xf32> to vector<8x16x16xf32>
      %108 = arith.mulf %103, %107 : vector<8x16x16xf32>
      %109 = arith.truncf %108 : vector<8x16x16xf32> to vector<8x16x16xbf16>
      %110 = arith.truncf %93 : vector<8x16x4xf32> to vector<8x16x4xbf16>
      "tpu.trace_start"() <{level = 10 : i32, message = "hlm,hmd->hld"}> : () -> ()
      %cst_25 = arith.constant dense<0.000000e+00> : vector<8x16x4xf32>
      %111 = tpu.matmul %109, %110, %cst_25 {dimension_numbers = #tpu.dot_dimension_numbers<[2], [1], [1], [2], [0, 0, 0, 1, 1, 2], [0], [0]>} : vector<8x16x16xbf16>, vector<8x16x4xbf16>, vector<8x16x4xf32> -> vector<8x16x4xf32>
      "tpu.trace_stop"() : () -> ()
      %112 = arith.truncf %111 : vector<8x16x4xf32> to vector<8x16x4xbf16>
      %113 = arith.index_cast %arg17 : i32 to index
      %c0_26 = arith.constant 0 : index
      %c0_27 = arith.constant 0 : index
      %c0_28 = arith.constant 0 : index
      %114 = vector.load %arg4[%113, %c0_26, %c0_27, %c0_28] : memref<4x8x4x32xbf16, #tpu.memory_space<vmem>>, vector<1x8x4x32xbf16>
      %115 = vector.shape_cast %114 : vector<1x8x4x32xbf16> to vector<8x4x32xbf16>
      "tpu.trace_start"() <{level = 10 : i32, message = "hld,hdk->hlk"}> : () -> ()
      %cst_29 = arith.constant dense<0.000000e+00> : vector<8x16x32xf32>
      %116 = tpu.matmul %112, %115, %cst_29 {dimension_numbers = #tpu.dot_dimension_numbers<[2], [1], [1], [2], [0, 0, 0, 1, 1, 2], [0], [0]>} : vector<8x16x4xbf16>, vector<8x4x32xbf16>, vector<8x16x32xf32> -> vector<8x16x32xf32>
      "tpu.trace_stop"() : () -> ()
      %cst_30 = arith.constant dense<0.000000e+00> : vector<16x32xf32>
      %117 = vector.multi_reduction <add>, %116, %cst_30 [0] : vector<8x16x32xf32> to vector<16x32xf32>
      %118 = arith.index_cast %arg17 : i32 to index
      %c0_31 = arith.constant 0 : index
      %c0_32 = arith.constant 0 : index
      %119 = vector.load %arg5[%118, %c0_31, %c0_32] : memref<4x1x32xf32, #tpu.memory_space<vmem>>, vector<1x1x32xf32>
      %120 = vector.shape_cast %119 : vector<1x1x32xf32> to vector<1x32xf32>
      %121 = vector.broadcast %120 : vector<1x32xf32> to vector<16x32xf32>
      %122 = arith.addf %117, %121 : vector<16x32xf32>
      %123 = arith.addf %arg18, %122 : vector<16x32xf32>
      %124 = arith.index_cast %arg17 : i32 to index
      %c0_33 = arith.constant 0 : index
      %c0_34 = arith.constant 0 : index
      %125 = vector.load %arg6[%124, %c0_33, %c0_34] : memref<4x1x32xf32, #tpu.memory_space<vmem>>, vector<1x1x32xf32>
      %126 = vector.shape_cast %125 : vector<1x1x32xf32> to vector<1x32xf32>
      %127 = arith.index_cast %arg17 : i32 to index
      %c0_35 = arith.constant 0 : index
      %c0_36 = arith.constant 0 : index
      %128 = vector.load %arg7[%127, %c0_35, %c0_36] : memref<4x1x32xf32, #tpu.memory_space<vmem>>, vector<1x1x32xf32>
      %129 = vector.shape_cast %128 : vector<1x1x32xf32> to vector<1x32xf32>
      %cst_37 = arith.constant dense<0.000000e+00> : vector<16xf32>
      %130 = vector.multi_reduction <add>, %123, %cst_37 [1] : vector<16x32xf32> to vector<16xf32>
      %131 = vector.shape_cast %130 : vector<16xf32> to vector<16x1xf32>
      %cst_38 = arith.constant 3.200000e+01 : f32
      %132 = vector.broadcast %cst_38 : f32 to vector<16x1xf32>
      %133 = arith.divf %131, %132 : vector<16x1xf32>
      %134 = vector.broadcast %133 : vector<16x1xf32> to vector<16x32xf32>
      %135 = arith.subf %123, %134 : vector<16x32xf32>
      %136 = arith.mulf %135, %135 : vector<16x32xf32>
      %cst_39 = arith.constant dense<0.000000e+00> : vector<16xf32>
      %137 = vector.multi_reduction <add>, %136, %cst_39 [1] : vector<16x32xf32> to vector<16xf32>
      %138 = vector.shape_cast %137 : vector<16xf32> to vector<16x1xf32>
      %cst_40 = arith.constant 3.200000e+01 : f32
      %139 = vector.broadcast %cst_40 : f32 to vector<16x1xf32>
      %140 = arith.divf %138, %139 : vector<16x1xf32>
      %141 = vector.broadcast %133 : vector<16x1xf32> to vector<16x32xf32>
      %142 = arith.subf %123, %141 : vector<16x32xf32>
      %cst_41 = arith.constant 9.99999974E-6 : f32
      %143 = vector.broadcast %cst_41 : f32 to vector<16x1xf32>
      %144 = arith.addf %140, %143 : vector<16x1xf32>
      %145 = math.rsqrt %144 : vector<16x1xf32>
      %146 = vector.broadcast %145 : vector<16x1xf32> to vector<16x32xf32>
      %147 = arith.mulf %142, %146 : vector<16x32xf32>
      %148 = vector.broadcast %126 : vector<1x32xf32> to vector<16x32xf32>
      %149 = arith.mulf %147, %148 : vector<16x32xf32>
      %150 = vector.broadcast %129 : vector<1x32xf32> to vector<16x32xf32>
      %151 = arith.addf %149, %150 : vector<16x32xf32>
      %152 = arith.truncf %151 : vector<16x32xf32> to vector<16x32xbf16>
      %153 = arith.index_cast %arg17 : i32 to index
      %c0_42 = arith.constant 0 : index
      %c0_43 = arith.constant 0 : index
      %154 = vector.load %arg8[%153, %c0_42, %c0_43] : memref<4x32x128xbf16, #tpu.memory_space<vmem>>, vector<1x32x128xbf16>
      %155 = vector.shape_cast %154 : vector<1x32x128xbf16> to vector<32x128xbf16>
      %cst_44 = arith.constant dense<0.000000e+00> : vector<16x128xf32>
      %156 = tpu.matmul %152, %155, %cst_44 {dimension_numbers = #tpu.dot_dimension_numbers<[1], [0], [0], [1], [0, 0, 1, 1], [], []>} : vector<16x32xbf16>, vector<32x128xbf16>, vector<16x128xf32> -> vector<16x128xf32>
      %157 = arith.index_cast %arg17 : i32 to index
      %c0_45 = arith.constant 0 : index
      %c0_46 = arith.constant 0 : index
      %158 = vector.load %arg9[%157, %c0_45, %c0_46] : memref<4x1x128xf32, #tpu.memory_space<vmem>>, vector<1x1x128xf32>
      %159 = vector.shape_cast %158 : vector<1x1x128xf32> to vector<1x128xf32>
      %160 = vector.broadcast %159 : vector<1x128xf32> to vector<16x128xf32>
      %161 = arith.addf %156, %160 : vector<16x128xf32>
      %cst_47 = arith.constant 0.000000e+00 : f32
      %162 = vector.broadcast %cst_47 : f32 to vector<16x128xf32>
      %163 = arith.maximumf %161, %162 : vector<16x128xf32>
      %164 = arith.truncf %163 : vector<16x128xf32> to vector<16x128xbf16>
      %165 = arith.index_cast %arg17 : i32 to index
      %c0_48 = arith.constant 0 : index
      %c0_49 = arith.constant 0 : index
      %166 = vector.load %arg10[%165, %c0_48, %c0_49] : memref<4x128x32xbf16, #tpu.memory_space<vmem>>, vector<1x128x32xbf16>
      %167 = vector.shape_cast %166 : vector<1x128x32xbf16> to vector<128x32xbf16>
      %cst_50 = arith.constant dense<0.000000e+00> : vector<16x32xf32>
      %168 = tpu.matmul %164, %167, %cst_50 {dimension_numbers = #tpu.dot_dimension_numbers<[1], [0], [0], [1], [0, 0, 1, 1], [], []>} : vector<16x128xbf16>, vector<128x32xbf16>, vector<16x32xf32> -> vector<16x32xf32>
      %169 = arith.index_cast %arg17 : i32 to index
      %c0_51 = arith.constant 0 : index
      %c0_52 = arith.constant 0 : index
      %170 = vector.load %arg11[%169, %c0_51, %c0_52] : memref<4x1x32xf32, #tpu.memory_space<vmem>>, vector<1x1x32xf32>
      %171 = vector.shape_cast %170 : vector<1x1x32xf32> to vector<1x32xf32>
      %172 = vector.broadcast %171 : vector<1x32xf32> to vector<16x32xf32>
      %173 = arith.addf %168, %172 : vector<16x32xf32>
      %174 = arith.addf %151, %173 : vector<16x32xf32>
      %175 = arith.index_cast %arg17 : i32 to index
      %c0_53 = arith.constant 0 : index
      %c0_54 = arith.constant 0 : index
      %176 = vector.load %arg12[%175, %c0_53, %c0_54] : memref<4x1x32xf32, #tpu.memory_space<vmem>>, vector<1x1x32xf32>
      %177 = vector.shape_cast %176 : vector<1x1x32xf32> to vector<1x32xf32>
      %178 = arith.index_cast %arg17 : i32 to index
      %c0_55 = arith.constant 0 : index
      %c0_56 = arith.constant 0 : index
      %179 = vector.load %arg13[%178, %c0_55, %c0_56] : memref<4x1x32xf32, #tpu.memory_space<vmem>>, vector<1x1x32xf32>
      %180 = vector.shape_cast %179 : vector<1x1x32xf32> to vector<1x32xf32>
      %cst_57 = arith.constant dense<0.000000e+00> : vector<16xf32>
      %181 = vector.multi_reduction <add>, %174, %cst_57 [1] : vector<16x32xf32> to vector<16xf32>
      %182 = vector.shape_cast %181 : vector<16xf32> to vector<16x1xf32>
      %cst_58 = arith.constant 3.200000e+01 : f32
      %183 = vector.broadcast %cst_58 : f32 to vector<16x1xf32>
      %184 = arith.divf %182, %183 : vector<16x1xf32>
      %185 = vector.broadcast %184 : vector<16x1xf32> to vector<16x32xf32>
      %186 = arith.subf %174, %185 : vector<16x32xf32>
      %187 = arith.mulf %186, %186 : vector<16x32xf32>
      %cst_59 = arith.constant dense<0.000000e+00> : vector<16xf32>
      %188 = vector.multi_reduction <add>, %187, %cst_59 [1] : vector<16x32xf32> to vector<16xf32>
      %189 = vector.shape_cast %188 : vector<16xf32> to vector<16x1xf32>
      %cst_60 = arith.constant 3.200000e+01 : f32
      %190 = vector.broadcast %cst_60 : f32 to vector<16x1xf32>
      %191 = arith.divf %189, %190 : vector<16x1xf32>
      %192 = vector.broadcast %184 : vector<16x1xf32> to vector<16x32xf32>
      %193 = arith.subf %174, %192 : vector<16x32xf32>
      %cst_61 = arith.constant 9.99999974E-6 : f32
      %194 = vector.broadcast %cst_61 : f32 to vector<16x1xf32>
      %195 = arith.addf %191, %194 : vector<16x1xf32>
      %196 = math.rsqrt %195 : vector<16x1xf32>
      %197 = vector.broadcast %196 : vector<16x1xf32> to vector<16x32xf32>
      %198 = arith.mulf %193, %197 : vector<16x32xf32>
      %199 = vector.broadcast %177 : vector<1x32xf32> to vector<16x32xf32>
      %200 = arith.mulf %198, %199 : vector<16x32xf32>
      %201 = vector.broadcast %180 : vector<1x32xf32> to vector<16x32xf32>
      %202 = arith.addf %200, %201 : vector<16x32xf32>
      scf.yield %202 : vector<16x32xf32>
    }
    %c4_i32_2 = arith.constant 4 : i32
    %c0_3 = arith.constant 0 : index
    %c0_4 = arith.constant 0 : index
    %c0_5 = arith.constant 0 : index
    %4 = vector.load %arg14[%c0_3, %c0_4, %c0_5] : memref<1x1x32xf32, #tpu.memory_space<vmem>>, vector<1x1x32xf32>
    %5 = vector.shape_cast %4 : vector<1x1x32xf32> to vector<1x32xf32>
    %c0_6 = arith.constant 0 : index
    %c0_7 = arith.constant 0 : index
    %c0_8 = arith.constant 0 : index
    %6 = vector.load %arg15[%c0_6, %c0_7, %c0_8] : memref<1x1x32xf32, #tpu.memory_space<vmem>>, vector<1x1x32xf32>
    %7 = vector.shape_cast %6 : vector<1x1x32xf32> to vector<1x32xf32>
    %cst = arith.constant dense<0.000000e+00> : vector<16xf32>
    %8 = vector.multi_reduction <add>, %3, %cst [1] : vector<16x32xf32> to vector<16xf32>
    %9 = vector.shape_cast %8 : vector<16xf32> to vector<16x1xf32>
    %cst_9 = arith.constant 3.200000e+01 : f32
    %10 = vector.broadcast %cst_9 : f32 to vector<16x1xf32>
    %11 = arith.divf %9, %10 : vector<16x1xf32>
    %12 = vector.broadcast %11 : vector<16x1xf32> to vector<16x32xf32>
    %13 = arith.subf %3, %12 : vector<16x32xf32>
    %14 = arith.mulf %13, %13 : vector<16x32xf32>
    %cst_10 = arith.constant dense<0.000000e+00> : vector<16xf32>
    %15 = vector.multi_reduction <add>, %14, %cst_10 [1] : vector<16x32xf32> to vector<16xf32>
    %16 = vector.shape_cast %15 : vector<16xf32> to vector<16x1xf32>
    %cst_11 = arith.constant 3.200000e+01 : f32
    %17 = vector.broadcast %cst_11 : f32 to vector<16x1xf32>
    %18 = arith.divf %16, %17 : vector<16x1xf32>
    %19 = vector.broadcast %11 : vector<16x1xf32> to vector<16x32xf32>
    %20 = arith.subf %3, %19 : vector<16x32xf32>
    %cst_12 = arith.constant 9.99999974E-6 : f32
    %21 = vector.broadcast %cst_12 : f32 to vector<16x1xf32>
    %22 = arith.addf %18, %21 : vector<16x1xf32>
    %23 = math.rsqrt %22 : vector<16x1xf32>
    %24 = vector.broadcast %23 : vector<16x1xf32> to vector<16x32xf32>
    %25 = arith.mulf %20, %24 : vector<16x32xf32>
    %26 = vector.broadcast %5 : vector<1x32xf32> to vector<16x32xf32>
    %27 = arith.mulf %25, %26 : vector<16x32xf32>
    %28 = vector.broadcast %7 : vector<1x32xf32> to vector<16x32xf32>
    %29 = arith.addf %27, %28 : vector<16x32xf32>
    %c0_13 = arith.constant 0 : index
    %c0_14 = arith.constant 0 : index
    %c0_15 = arith.constant 0 : index
    %30 = vector.load %arg16[%c0_13, %c0_14, %c0_15] : memref<1x16x32xf32, #tpu.memory_space<vmem>>, vector<1x16x32xf32>
    %31 = vector.shape_cast %30 : vector<1x16x32xf32> to vector<16x32xf32>
    %32 = vector.shape_cast %29 : vector<16x32xf32> to vector<1x16x32xf32>
    tpu.vector_store %arg16[%c0_13, %c0_14, %c0_15], %32 {strides = array<i32>} : memref<1x16x32xf32, #tpu.memory_space<vmem>>, vector<1x16x32xf32>,
    return
  }
  func.func @transform_0(%arg0: i32) -> (i32, i32, i32) {
    %c0_i32 = arith.constant 0 : i32
    %c0_i32_0 = arith.constant 0 : i32
    %c0_i32_1 = arith.constant 0 : i32
    return %arg0, %c0_i32, %c0_i32_0 : i32, i32, i32
  }
  func.func @transform_1(%arg0: i32) -> (i32, i32, i32) {
    %c0_i32 = arith.constant 0 : i32
    %c0_i32_0 = arith.constant 0 : i32
    %c0_i32_1 = arith.constant 0 : i32
    %c0_i32_2 = arith.constant 0 : i32
    return %c0_i32, %c0_i32_0, %c0_i32_1 : i32, i32, i32
  }
  func.func @transform_2(%arg0: i32) -> (i32, i32, i32) {
    %c0_i32 = arith.constant 0 : i32
    %c0_i32_0 = arith.constant 0 : i32
    %c0_i32_1 = arith.constant 0 : i32
    %c0_i32_2 = arith.constant 0 : i32
    return %c0_i32, %c0_i32_0, %c0_i32_1 : i32, i32, i32
  }
  func.func @transform_3(%arg0: i32) -> (i32, i32, i32, i32) {
    %c0_i32 = arith.constant 0 : i32
    %c0_i32_0 = arith.constant 0 : i32
    %c0_i32_1 = arith.constant 0 : i32
    %c0_i32_2 = arith.constant 0 : i32
    %c0_i32_3 = arith.constant 0 : i32
    return %c0_i32, %c0_i32_0, %c0_i32_1, %c0_i32_2 : i32, i32, i32, i32
  }
  func.func @transform_4(%arg0: i32) -> (i32, i32, i32) {
    %c0_i32 = arith.constant 0 : i32
    %c0_i32_0 = arith.constant 0 : i32
    %c0_i32_1 = arith.constant 0 : i32
    %c0_i32_2 = arith.constant 0 : i32
    return %c0_i32, %c0_i32_0, %c0_i32_1 : i32, i32, i32
  }
  func.func @transform_5(%arg0: i32) -> (i32, i32, i32) {
    %c0_i32 = arith.constant 0 : i32
    %c0_i32_0 = arith.constant 0 : i32
    %c0_i32_1 = arith.constant 0 : i32
    %c0_i32_2 = arith.constant 0 : i32
    return %c0_i32, %c0_i32_0, %c0_i32_1 : i32, i32, i32
  }
  func.func @transform_6(%arg0: i32) -> (i32, i32, i32) {
    %c0_i32 = arith.constant 0 : i32
    %c0_i32_0 = arith.constant 0 : i32
    %c0_i32_1 = arith.constant 0 : i32
    %c0_i32_2 = arith.constant 0 : i32
    return %c0_i32, %c0_i32_0, %c0_i32_1 : i32, i32, i32
  }
  func.func @transform_7(%arg0: i32) -> (i32, i32, i32) {
    %c0_i32 = arith.constant 0 : i32
    %c0_i32_0 = arith.constant 0 : i32
    %c0_i32_1 = arith.constant 0 : i32
    %c0_i32_2 = arith.constant 0 : i32
    return %c0_i32, %c0_i32_0, %c0_i32_1 : i32, i32, i32
  }
  func.func @transform_8(%arg0: i32) -> (i32, i32, i32) {
    %c0_i32 = arith.constant 0 : i32
    %c0_i32_0 = arith.constant 0 : i32
    %c0_i32_1 = arith.constant 0 : i32
    %c0_i32_2 = arith.constant 0 : i32
    return %c0_i32, %c0_i32_0, %c0_i32_1 : i32, i32, i32
  }
  func.func @transform_9(%arg0: i32) -> (i32, i32, i32) {
    %c0_i32 = arith.constant 0 : i32
    %c0_i32_0 = arith.constant 0 : i32
    %c0_i32_1 = arith.constant 0 : i32
    %c0_i32_2 = arith.constant 0 : i32
    return %c0_i32, %c0_i32_0, %c0_i32_1 : i32, i32, i32
  }
  func.func @transform_10(%arg0: i32) -> (i32, i32, i32) {
    %c0_i32 = arith.constant 0 : i32
    %c0_i32_0 = arith.constant 0 : i32
    %c0_i32_1 = arith.constant 0 : i32
    %c0_i32_2 = arith.constant 0 : i32
    return %c0_i32, %c0_i32_0, %c0_i32_1 : i32, i32, i32
  }
  func.func @transform_11(%arg0: i32) -> (i32, i32, i32) {
    %c0_i32 = arith.constant 0 : i32
    %c0_i32_0 = arith.constant 0 : i32
    %c0_i32_1 = arith.constant 0 : i32
    %c0_i32_2 = arith.constant 0 : i32
    return %c0_i32, %c0_i32_0, %c0_i32_1 : i32, i32, i32
  }
  func.func @transform_12(%arg0: i32) -> (i32, i32, i32) {
    %c0_i32 = arith.constant 0 : i32
    %c0_i32_0 = arith.constant 0 : i32
    %c0_i32_1 = arith.constant 0 : i32
    %c0_i32_2 = arith.constant 0 : i32
    return %c0_i32, %c0_i32_0, %c0_i32_1 : i32, i32, i32
  }
  func.func @transform_13(%arg0: i32) -> (i32, i32, i32) {
    %c0_i32 = arith.constant 0 : i32
    %c0_i32_0 = arith.constant 0 : i32
    %c0_i32_1 = arith.constant 0 : i32
    %c0_i32_2 = arith.constant 0 : i32
    return %c0_i32, %c0_i32_0, %c0_i32_1 : i32, i32, i32
  }
  func.func @transform_14(%arg0: i32) -> (i32, i32, i32) {
    %c0_i32 = arith.constant 0 : i32
    %c0_i32_0 = arith.constant 0 : i32
    %c0_i32_1 = arith.constant 0 : i32
    %c0_i32_2 = arith.constant 0 : i32
    return %c0_i32, %c0_i32_0, %c0_i32_1 : i32, i32, i32
  }
  func.func @transform_15(%arg0: i32) -> (i32, i32, i32) {
    %c0_i32 = arith.constant 0 : i32
    %c0_i32_0 = arith.constant 0 : i32
    %c0_i32_1 = arith.constant 0 : i32
    return %arg0, %c0_i32, %c0_i32_0 : i32, i32, i32
  }
}

module attributes {stable_mosaic.version = 11 : i64} {
  func.func @_transformer_stack_kernel(%arg0: i32, %arg1: memref<1x16x32xf32, #tpu.memory_space<vmem>>, %arg2: memref<3x32x96xbf16, #tpu.memory_space<vmem>>, %arg3: memref<3x1x96xf32, #tpu.memory_space<vmem>>, %arg4: memref<3x8x4x32xbf16, #tpu.memory_space<vmem>>, %arg5: memref<3x1x32xf32, #tpu.memory_space<vmem>>, %arg6: memref<3x1x32xf32, #tpu.memory_space<vmem>>, %arg7: memref<3x1x32xf32, #tpu.memory_space<vmem>>, %arg8: memref<3x32x128xbf16, #tpu.memory_space<vmem>>, %arg9: memref<3x1x128xf32, #tpu.memory_space<vmem>>, %arg10: memref<3x128x32xbf16, #tpu.memory_space<vmem>>, %arg11: memref<3x1x32xf32, #tpu.memory_space<vmem>>, %arg12: memref<3x1x32xf32, #tpu.memory_space<vmem>>, %arg13: memref<3x1x32xf32, #tpu.memory_space<vmem>>, %arg14: memref<1x1x32xf32, #tpu.memory_space<vmem>>, %arg15: memref<1x1x32xf32, #tpu.memory_space<vmem>>, %arg16: memref<1x16x32xf32, #tpu.memory_space<vmem>>) attributes {dimension_semantics = [#tpu.dimension_semantics<parallel>], iteration_bounds = array<i64: 2>, scalar_prefetch = 0 : i64, scratch_operands = 0 : i64, tpu.core_type = #tpu.core_type<tc>, window_params = [{transform_indices = @transform_0, window_bounds = array<i64: 1, 16, 32>}, {pipeline_mode = #tpu.pipeline_mode<synchronous>, transform_indices = @transform_1, window_bounds = array<i64: 3, 32, 96>}, {pipeline_mode = #tpu.pipeline_mode<synchronous>, transform_indices = @transform_2, window_bounds = array<i64: 3, 1, 96>}, {pipeline_mode = #tpu.pipeline_mode<synchronous>, transform_indices = @transform_3, window_bounds = array<i64: 3, 8, 4, 32>}, {pipeline_mode = #tpu.pipeline_mode<synchronous>, transform_indices = @transform_4, window_bounds = array<i64: 3, 1, 32>}, {pipeline_mode = #tpu.pipeline_mode<synchronous>, transform_indices = @transform_5, window_bounds = array<i64: 3, 1, 32>}, {pipeline_mode = #tpu.pipeline_mode<synchronous>, transform_indices = @transform_6, window_bounds = array<i64: 3, 1, 32>}, {pipeline_mode = #tpu.pipeline_mode<synchronous>, transform_indices = @transform_7, window_bounds = array<i64: 3, 32, 128>}, {pipeline_mode = #tpu.pipeline_mode<synchronous>, transform_indices = @transform_8, window_bounds = array<i64: 3, 1, 128>}, {pipeline_mode = #tpu.pipeline_mode<synchronous>, transform_indices = @transform_9, window_bounds = array<i64: 3, 128, 32>}, {pipeline_mode = #tpu.pipeline_mode<synchronous>, transform_indices = @transform_10, window_bounds = array<i64: 3, 1, 32>}, {pipeline_mode = #tpu.pipeline_mode<synchronous>, transform_indices = @transform_11, window_bounds = array<i64: 3, 1, 32>}, {pipeline_mode = #tpu.pipeline_mode<synchronous>, transform_indices = @transform_12, window_bounds = array<i64: 3, 1, 32>}, {pipeline_mode = #tpu.pipeline_mode<synchronous>, transform_indices = @transform_13, window_bounds = array<i64: 1, 1, 32>}, {pipeline_mode = #tpu.pipeline_mode<synchronous>, transform_indices = @transform_14, window_bounds = array<i64: 1, 1, 32>}, {transform_indices = @transform_15, window_bounds = array<i64: 1, 16, 32>}]} {
    %c0 = arith.constant 0 : index
    %c0_0 = arith.constant 0 : index
    %c0_1 = arith.constant 0 : index
    %0 = vector.load %arg1[%c0, %c0_0, %c0_1] : memref<1x16x32xf32, #tpu.memory_space<vmem>>, vector<1x16x32xf32>
    %1 = vector.shape_cast %0 : vector<1x16x32xf32> to vector<16x32xf32>
    %c0_i32 = arith.constant 0 : i32
    %c3_i32 = arith.constant 3 : i32
    %2 = arith.addi %c0_i32, %c3_i32 : i32
    %c1_i32 = arith.constant 1 : i32
    %3 = scf.for %arg17 = %c0_i32 to %2 step %c1_i32 iter_args(%arg18 = %1) -> (vector<16x32xf32>)  : i32 {
      %33 = arith.truncf %arg18 : vector<16x32xf32> to vector<16x32xbf16>
      %34 = arith.index_cast %arg17 : i32 to index
      %c0_16 = arith.constant 0 : index
      %c0_17 = arith.constant 0 : index
      %35 = vector.load %arg2[%34, %c0_16, %c0_17] : memref<3x32x96xbf16, #tpu.memory_space<vmem>>, vector<1x32x96xbf16>
      %36 = vector.shape_cast %35 : vector<1x32x96xbf16> to vector<32x96xbf16>
      %cst_18 = arith.constant dense<0.000000e+00> : vector<16x96xf32>
      %37 = tpu.matmul %33, %36, %cst_18 {dimension_numbers = #tpu.dot_dimension_numbers<[1], [0], [0], [1], [0, 0, 1, 1], [], []>} : vector<16x32xbf16>, vector<32x96xbf16>, vector<16x96xf32> -> vector<16x96xf32>
      %38 = arith.index_cast %arg17 : i32 to index
      %c0_19 = arith.constant 0 : index
      %c0_20 = arith.constant 0 : index
      %39 = vector.load %arg3[%38, %c0_19, %c0_20] : memref<3x1x96xf32, #tpu.memory_space<vmem>>, vector<1x1x96xf32>
      %40 = vector.shape_cast %39 : vector<1x1x96xf32> to vector<1x96xf32>
      %41 = vector.broadcast %40 : vector<1x96xf32> to vector<16x96xf32>
      %42 = arith.addf %37, %41 : vector<16x96xf32>
      %43 = vector.extract_strided_slice %42 {offsets = [0, 0], sizes = [16, 4], strides = [1, 1]} : vector<16x96xf32> to vector<16x4xf32>
      %44 = vector.extract_strided_slice %42 {offsets = [0, 4], sizes = [16, 4], strides = [1, 1]} : vector<16x96xf32> to vector<16x4xf32>
      %45 = vector.extract_strided_slice %42 {offsets = [0, 8], sizes = [16, 4], strides = [1, 1]} : vector<16x96xf32> to vector<16x4xf32>
      %46 = vector.extract_strided_slice %42 {offsets = [0, 12], sizes = [16, 4], strides = [1, 1]} : vector<16x96xf32> to vector<16x4xf32>
      %47 = vector.extract_strided_slice %42 {offsets = [0, 16], sizes = [16, 4], strides = [1, 1]} : vector<16x96xf32> to vector<16x4xf32>
      %48 = vector.extract_strided_slice %42 {offsets = [0, 20], sizes = [16, 4], strides = [1, 1]} : vector<16x96xf32> to vector<16x4xf32>
      %49 = vector.extract_strided_slice %42 {offsets = [0, 24], sizes = [16, 4], strides = [1, 1]} : vector<16x96xf32> to vector<16x4xf32>
      %50 = vector.extract_strided_slice %42 {offsets = [0, 28], sizes = [16, 4], strides = [1, 1]} : vector<16x96xf32> to vector<16x4xf32>
      %51 = vector.shape_cast %43 : vector<16x4xf32> to vector<1x16x4xf32>
      %52 = vector.shape_cast %44 : vector<16x4xf32> to vector<1x16x4xf32>
      %53 = vector.shape_cast %45 : vector<16x4xf32> to vector<1x16x4xf32>
      %54 = vector.shape_cast %46 : vector<16x4xf32> to vector<1x16x4xf32>
      %55 = vector.shape_cast %47 : vector<16x4xf32> to vector<1x16x4xf32>
      %56 = vector.shape_cast %48 : vector<16x4xf32> to vector<1x16x4xf32>
      %57 = vector.shape_cast %49 : vector<16x4xf32> to vector<1x16x4xf32>
      %58 = vector.shape_cast %50 : vector<16x4xf32> to vector<1x16x4xf32>
      %59 = tpu.concatenate %51, %52, %53, %54, %55, %56, %57, %58 in 0 : vector<1x16x4xf32>, vector<1x16x4xf32>, vector<1x16x4xf32>, vector<1x16x4xf32>, vector<1x16x4xf32>, vector<1x16x4xf32>, vector<1x16x4xf32>, vector<1x16x4xf32> -> vector<8x16x4xf32>
      %60 = vector.extract_strided_slice %42 {offsets = [0, 32], sizes = [16, 4], strides = [1, 1]} : vector<16x96xf32> to vector<16x4xf32>
      %61 = vector.extract_strided_slice %42 {offsets = [0, 36], sizes = [16, 4], strides = [1, 1]} : vector<16x96xf32> to vector<16x4xf32>
      %62 = vector.extract_strided_slice %42 {offsets = [0, 40], sizes = [16, 4], strides = [1, 1]} : vector<16x96xf32> to vector<16x4xf32>
      %63 = vector.extract_strided_slice %42 {offsets = [0, 44], sizes = [16, 4], strides = [1, 1]} : vector<16x96xf32> to vector<16x4xf32>
      %64 = vector.extract_strided_slice %42 {offsets = [0, 48], sizes = [16, 4], strides = [1, 1]} : vector<16x96xf32> to vector<16x4xf32>
      %65 = vector.extract_strided_slice %42 {offsets = [0, 52], sizes = [16, 4], strides = [1, 1]} : vector<16x96xf32> to vector<16x4xf32>
      %66 = vector.extract_strided_slice %42 {offsets = [0, 56], sizes = [16, 4], strides = [1, 1]} : vector<16x96xf32> to vector<16x4xf32>
      %67 = vector.extract_strided_slice %42 {offsets = [0, 60], sizes = [16, 4], strides = [1, 1]} : vector<16x96xf32> to vector<16x4xf32>
      %68 = vector.shape_cast %60 : vector<16x4xf32> to vector<1x16x4xf32>
      %69 = vector.shape_cast %61 : vector<16x4xf32> to vector<1x16x4xf32>
      %70 = vector.shape_cast %62 : vector<16x4xf32> to vector<1x16x4xf32>
      %71 = vector.shape_cast %63 : vector<16x4xf32> to vector<1x16x4xf32>
      %72 = vector.shape_cast %64 : vector<16x4xf32> to vector<1x16x4xf32>
      %73 = vector.shape_cast %65 : vector<16x4xf32> to vector<1x16x4xf32>
      %74 = vector.shape_cast %66 : vector<16x4xf32> to vector<1x16x4xf32>
      %75 = vector.shape_cast %67 : vector<16x4xf32> to vector<1x16x4xf32>
      %76 = tpu.concatenate %68, %69, %70, %71, %72, %73, %74, %75 in 0 : vector<1x16x4xf32>, vector<1x16x4xf32>, vector<1x16x4xf32>, vector<1x16x4xf32>, vector<1x16x4xf32>, vector<1x16x4xf32>, vector<1x16x4xf32>, vector<1x16x4xf32> -> vector<8x16x4xf32>
      %77 = vector.extract_strided_slice %42 {offsets = [0, 64], sizes = [16, 4], strides = [1, 1]} : vector<16x96xf32> to vector<16x4xf32>
      %78 = vector.extract_strided_slice %42 {offsets = [0, 68], sizes = [16, 4], strides = [1, 1]} : vector<16x96xf32> to vector<16x4xf32>
      %79 = vector.extract_strided_slice %42 {offsets = [0, 72], sizes = [16, 4], strides = [1, 1]} : vector<16x96xf32> to vector<16x4xf32>
      %80 = vector.extract_strided_slice %42 {offsets = [0, 76], sizes = [16, 4], strides = [1, 1]} : vector<16x96xf32> to vector<16x4xf32>
      %81 = vector.extract_strided_slice %42 {offsets = [0, 80], sizes = [16, 4], strides = [1, 1]} : vector<16x96xf32> to vector<16x4xf32>
      %82 = vector.extract_strided_slice %42 {offsets = [0, 84], sizes = [16, 4], strides = [1, 1]} : vector<16x96xf32> to vector<16x4xf32>
      %83 = vector.extract_strided_slice %42 {offsets = [0, 88], sizes = [16, 4], strides = [1, 1]} : vector<16x96xf32> to vector<16x4xf32>
      %84 = vector.extract_strided_slice %42 {offsets = [0, 92], sizes = [16, 4], strides = [1, 1]} : vector<16x96xf32> to vector<16x4xf32>
      %85 = vector.shape_cast %77 : vector<16x4xf32> to vector<1x16x4xf32>
      %86 = vector.shape_cast %78 : vector<16x4xf32> to vector<1x16x4xf32>
      %87 = vector.shape_cast %79 : vector<16x4xf32> to vector<1x16x4xf32>
      %88 = vector.shape_cast %80 : vector<16x4xf32> to vector<1x16x4xf32>
      %89 = vector.shape_cast %81 : vector<16x4xf32> to vector<1x16x4xf32>
      %90 = vector.shape_cast %82 : vector<16x4xf32> to vector<1x16x4xf32>
      %91 = vector.shape_cast %83 : vector<16x4xf32> to vector<1x16x4xf32>
      %92 = vector.shape_cast %84 : vector<16x4xf32> to vector<1x16x4xf32>
      %93 = tpu.concatenate %85, %86, %87, %88, %89, %90, %91, %92 in 0 : vector<1x16x4xf32>, vector<1x16x4xf32>, vector<1x16x4xf32>, vector<1x16x4xf32>, vector<1x16x4xf32>, vector<1x16x4xf32>, vector<1x16x4xf32>, vector<1x16x4xf32> -> vector<8x16x4xf32>
      %94 = arith.truncf %59 : vector<8x16x4xf32> to vector<8x16x4xbf16>
      %95 = arith.truncf %76 : vector<8x16x4xf32> to vector<8x16x4xbf16>
      "tpu.trace_start"() <{level = 10 : i32, message = "hld,hmd->hlm"}> : () -> ()
      %cst_21 = arith.constant dense<0.000000e+00> : vector<8x16x16xf32>
      %96 = tpu.matmul %94, %95, %cst_21 {dimension_numbers = #tpu.dot_dimension_numbers<[2], [2], [1], [1], [0, 0, 0, 1, 1, 1], [0], [0]>} : vector<8x16x4xbf16>, vector<8x16x4xbf16>, vector<8x16x16xf32> -> vector<8x16x16xf32>
      "tpu.trace_stop"() : () -> ()
      %cst_22 = arith.constant 5.000000e-01 : f32
      %97 = vector.broadcast %cst_22 : f32 to vector<8x16x16xf32>
      %98 = arith.mulf %96, %97 : vector<8x16x16xf32>
      %cst_23 = arith.constant dense<0xFF800000> : vector<8x16xf32>
      %99 = vector.multi_reduction <maximumf>, %98, %cst_23 [2] : vector<8x16x16xf32> to vector<8x16xf32>
      %100 = vector.shape_cast %99 : vector<8x16xf32> to vector<8x16x1xf32>
      %101 = vector.broadcast %100 : vector<8x16x1xf32> to vector<8x16x16xf32>
      %102 = arith.subf %98, %101 : vector<8x16x16xf32>
      %103 = math.exp %102 : vector<8x16x16xf32>
      %cst_24 = arith.constant dense<0.000000e+00> : vector<8x16xf32>
      %104 = vector.multi_reduction <add>, %103, %cst_24 [2] : vector<8x16x16xf32> to vector<8x16xf32>
      %105 = vector.shape_cast %104 : vector<8x16xf32> to vector<8x16x1xf32>
      %106 = tpu.reciprocal %105 {approx = true} : vector<8x16x1xf32> -> vector<8x16x1xf32>
      %107 = vector.broadcast %106 : vector<8x16x1xf32> to vector<8x16x16xf32>
      %108 = arith.mulf %103, %107 : vector<8x16x16xf32>
      %109 = arith.truncf %108 : vector<8x16x16xf32> to vector<8x16x16xbf16>
      %110 = arith.truncf %93 : vector<8x16x4xf32> to vector<8x16x4xbf16>
      "tpu.trace_start"() <{level = 10 : i32, message = "hlm,hmd->hld"}> : () -> ()
      %cst_25 = arith.constant dense<0.000000e+00> : vector<8x16x4xf32>
      %111 = tpu.matmul %109, %110, %cst_25 {dimension_numbers = #tpu.dot_dimension_numbers<[2], [1], [1], [2], [0, 0, 0, 1, 1, 2], [0], [0]>} : vector<8x16x16xbf16>, vector<8x16x4xbf16>, vector<8x16x4xf32> -> vector<8x16x4xf32>
      "tpu.trace_stop"() : () -> ()
      %112 = arith.truncf %111 : vector<8x16x4xf32> to vector<8x16x4xbf16>
      %113 = arith.index_cast %arg17 : i32 to index
      %c0_26 = arith.constant 0 : index
      %c0_27 = arith.constant 0 : index
      %c0_28 = arith.constant 0 : index
      %114 = vector.load %arg4[%113, %c0_26, %c0_27, %c0_28] : memref<3x8x4x32xbf16, #tpu.memory_space<vmem>>, vector<1x8x4x32xbf16>
      %115 = vector.shape_cast %114 : vector<1x8x4x32xbf16> to vector<8x4x32xbf16>
      "tpu.trace_start"() <{level = 10 : i32, message = "hld,hdk->hlk"}> : () -> ()
      %cst_29 = arith.constant dense<0.000000e+00> : vector<8x16x32xf32>
      %116 = tpu.matmul %112, %115, %cst_29 {dimension_numbers = #tpu.dot_dimension_numbers<[2], [1], [1], [2], [0, 0, 0, 1, 1, 2], [0], [0]>} : vector<8x16x4xbf16>, vector<8x4x32xbf16>, vector<8x16x32xf32> -> vector<8x16x32xf32>
      "tpu.trace_stop"() : () -> ()
      %cst_30 = arith.constant dense<0.000000e+00> : vector<16x32xf32>
      %117 = vector.multi_reduction <add>, %116, %cst_30 [0] : vector<8x16x32xf32> to vector<16x32xf32>
      %118 = arith.index_cast %arg17 : i32 to index
      %c0_31 = arith.constant 0 : index
      %c0_32 = arith.constant 0 : index
      %119 = vector.load %arg5[%118, %c0_31, %c0_32] : memref<3x1x32xf32, #tpu.memory_space<vmem>>, vector<1x1x32xf32>
      %120 = vector.shape_cast %119 : vector<1x1x32xf32> to vector<1x32xf32>
      %121 = vector.broadcast %120 : vector<1x32xf32> to vector<16x32xf32>
      %122 = arith.addf %117, %121 : vector<16x32xf32>
      %123 = arith.addf %arg18, %122 : vector<16x32xf32>
      %124 = arith.index_cast %arg17 : i32 to index
      %c0_33 = arith.constant 0 : index
      %c0_34 = arith.constant 0 : index
      %125 = vector.load %arg6[%124, %c0_33, %c0_34] : memref<3x1x32xf32, #tpu.memory_space<vmem>>, vector<1x1x32xf32>
      %126 = vector.shape_cast %125 : vector<1x1x32xf32> to vector<1x32xf32>
      %127 = arith.index_cast %arg17 : i32 to index
      %c0_35 = arith.constant 0 : index
      %c0_36 = arith.constant 0 : index
      %128 = vector.load %arg7[%127, %c0_35, %c0_36] : memref<3x1x32xf32, #tpu.memory_space<vmem>>, vector<1x1x32xf32>
      %129 = vector.shape_cast %128 : vector<1x1x32xf32> to vector<1x32xf32>
      %cst_37 = arith.constant dense<0.000000e+00> : vector<16xf32>
      %130 = vector.multi_reduction <add>, %123, %cst_37 [1] : vector<16x32xf32> to vector<16xf32>
      %131 = vector.shape_cast %130 : vector<16xf32> to vector<16x1xf32>
      %cst_38 = arith.constant 3.200000e+01 : f32
      %132 = vector.broadcast %cst_38 : f32 to vector<16x1xf32>
      %133 = arith.divf %131, %132 : vector<16x1xf32>
      %134 = vector.broadcast %133 : vector<16x1xf32> to vector<16x32xf32>
      %135 = arith.subf %123, %134 : vector<16x32xf32>
      %136 = arith.mulf %135, %135 : vector<16x32xf32>
      %cst_39 = arith.constant dense<0.000000e+00> : vector<16xf32>
      %137 = vector.multi_reduction <add>, %136, %cst_39 [1] : vector<16x32xf32> to vector<16xf32>
      %138 = vector.shape_cast %137 : vector<16xf32> to vector<16x1xf32>
      %cst_40 = arith.constant 3.200000e+01 : f32
      %139 = vector.broadcast %cst_40 : f32 to vector<16x1xf32>
      %140 = arith.divf %138, %139 : vector<16x1xf32>
      %141 = vector.broadcast %133 : vector<16x1xf32> to vector<16x32xf32>
      %142 = arith.subf %123, %141 : vector<16x32xf32>
      %cst_41 = arith.constant 9.99999974E-6 : f32
      %143 = vector.broadcast %cst_41 : f32 to vector<16x1xf32>
      %144 = arith.addf %140, %143 : vector<16x1xf32>
      %145 = math.rsqrt %144 : vector<16x1xf32>
      %146 = vector.broadcast %145 : vector<16x1xf32> to vector<16x32xf32>
      %147 = arith.mulf %142, %146 : vector<16x32xf32>
      %148 = vector.broadcast %126 : vector<1x32xf32> to vector<16x32xf32>
      %149 = arith.mulf %147, %148 : vector<16x32xf32>
      %150 = vector.broadcast %129 : vector<1x32xf32> to vector<16x32xf32>
      %151 = arith.addf %149, %150 : vector<16x32xf32>
      %152 = arith.truncf %151 : vector<16x32xf32> to vector<16x32xbf16>
      %153 = arith.index_cast %arg17 : i32 to index
      %c0_42 = arith.constant 0 : index
      %c0_43 = arith.constant 0 : index
      %154 = vector.load %arg8[%153, %c0_42, %c0_43] : memref<3x32x128xbf16, #tpu.memory_space<vmem>>, vector<1x32x128xbf16>
      %155 = vector.shape_cast %154 : vector<1x32x128xbf16> to vector<32x128xbf16>
      %cst_44 = arith.constant dense<0.000000e+00> : vector<16x128xf32>
      %156 = tpu.matmul %152, %155, %cst_44 {dimension_numbers = #tpu.dot_dimension_numbers<[1], [0], [0], [1], [0, 0, 1, 1], [], []>} : vector<16x32xbf16>, vector<32x128xbf16>, vector<16x128xf32> -> vector<16x128xf32>
      %157 = arith.index_cast %arg17 : i32 to index
      %c0_45 = arith.constant 0 : index
      %c0_46 = arith.constant 0 : index
      %158 = vector.load %arg9[%157, %c0_45, %c0_46] : memref<3x1x128xf32, #tpu.memory_space<vmem>>, vector<1x1x128xf32>
      %159 = vector.shape_cast %158 : vector<1x1x128xf32> to vector<1x128xf32>
      %160 = vector.broadcast %159 : vector<1x128xf32> to vector<16x128xf32>
      %161 = arith.addf %156, %160 : vector<16x128xf32>
      %cst_47 = arith.constant 0.000000e+00 : f32
      %162 = vector.broadcast %cst_47 : f32 to vector<16x128xf32>
      %163 = arith.maximumf %161, %162 : vector<16x128xf32>
      %164 = arith.truncf %163 : vector<16x128xf32> to vector<16x128xbf16>
      %165 = arith.index_cast %arg17 : i32 to index
      %c0_48 = arith.constant 0 : index
      %c0_49 = arith.constant 0 : index
      %166 = vector.load %arg10[%165, %c0_48, %c0_49] : memref<3x128x32xbf16, #tpu.memory_space<vmem>>, vector<1x128x32xbf16>
      %167 = vector.shape_cast %166 : vector<1x128x32xbf16> to vector<128x32xbf16>
      %cst_50 = arith.constant dense<0.000000e+00> : vector<16x32xf32>
      %168 = tpu.matmul %164, %167, %cst_50 {dimension_numbers = #tpu.dot_dimension_numbers<[1], [0], [0], [1], [0, 0, 1, 1], [], []>} : vector<16x128xbf16>, vector<128x32xbf16>, vector<16x32xf32> -> vector<16x32xf32>
      %169 = arith.index_cast %arg17 : i32 to index
      %c0_51 = arith.constant 0 : index
      %c0_52 = arith.constant 0 : index
      %170 = vector.load %arg11[%169, %c0_51, %c0_52] : memref<3x1x32xf32, #tpu.memory_space<vmem>>, vector<1x1x32xf32>
      %171 = vector.shape_cast %170 : vector<1x1x32xf32> to vector<1x32xf32>
      %172 = vector.broadcast %171 : vector<1x32xf32> to vector<16x32xf32>
      %173 = arith.addf %168, %172 : vector<16x32xf32>
      %174 = arith.addf %151, %173 : vector<16x32xf32>
      %175 = arith.index_cast %arg17 : i32 to index
      %c0_53 = arith.constant 0 : index
      %c0_54 = arith.constant 0 : index
      %176 = vector.load %arg12[%175, %c0_53, %c0_54] : memref<3x1x32xf32, #tpu.memory_space<vmem>>, vector<1x1x32xf32>
      %177 = vector.shape_cast %176 : vector<1x1x32xf32> to vector<1x32xf32>
      %178 = arith.index_cast %arg17 : i32 to index
      %c0_55 = arith.constant 0 : index
      %c0_56 = arith.constant 0 : index
      %179 = vector.load %arg13[%178, %c0_55, %c0_56] : memref<3x1x32xf32, #tpu.memory_space<vmem>>, vector<1x1x32xf32>
      %180 = vector.shape_cast %179 : vector<1x1x32xf32> to vector<1x32xf32>
      %cst_57 = arith.constant dense<0.000000e+00> : vector<16xf32>
      %181 = vector.multi_reduction <add>, %174, %cst_57 [1] : vector<16x32xf32> to vector<16xf32>
      %182 = vector.shape_cast %181 : vector<16xf32> to vector<16x1xf32>
      %cst_58 = arith.constant 3.200000e+01 : f32
      %183 = vector.broadcast %cst_58 : f32 to vector<16x1xf32>
      %184 = arith.divf %182, %183 : vector<16x1xf32>
      %185 = vector.broadcast %184 : vector<16x1xf32> to vector<16x32xf32>
      %186 = arith.subf %174, %185 : vector<16x32xf32>
      %187 = arith.mulf %186, %186 : vector<16x32xf32>
      %cst_59 = arith.constant dense<0.000000e+00> : vector<16xf32>
      %188 = vector.multi_reduction <add>, %187, %cst_59 [1] : vector<16x32xf32> to vector<16xf32>
      %189 = vector.shape_cast %188 : vector<16xf32> to vector<16x1xf32>
      %cst_60 = arith.constant 3.200000e+01 : f32
      %190 = vector.broadcast %cst_60 : f32 to vector<16x1xf32>
      %191 = arith.divf %189, %190 : vector<16x1xf32>
      %192 = vector.broadcast %184 : vector<16x1xf32> to vector<16x32xf32>
      %193 = arith.subf %174, %192 : vector<16x32xf32>
      %cst_61 = arith.constant 9.99999974E-6 : f32
      %194 = vector.broadcast %cst_61 : f32 to vector<16x1xf32>
      %195 = arith.addf %191, %194 : vector<16x1xf32>
      %196 = math.rsqrt %195 : vector<16x1xf32>
      %197 = vector.broadcast %196 : vector<16x1xf32> to vector<16x32xf32>
      %198 = arith.mulf %193, %197 : vector<16x32xf32>
      %199 = vector.broadcast %177 : vector<1x32xf32> to vector<16x32xf32>
      %200 = arith.mulf %198, %199 : vector<16x32xf32>
      %201 = vector.broadcast %180 : vector<1x32xf32> to vector<16x32xf32>
      %202 = arith.addf %200, %201 : vector<16x32xf32>
      scf.yield %202 : vector<16x32xf32>
    }
    %c3_i32_2 = arith.constant 3 : i32
    %c0_3 = arith.constant 0 : index
    %c0_4 = arith.constant 0 : index
    %c0_5 = arith.constant 0 : index
    %4 = vector.load %arg14[%c0_3, %c0_4, %c0_5] : memref<1x1x32xf32, #tpu.memory_space<vmem>>, vector<1x1x32xf32>
    %5 = vector.shape_cast %4 : vector<1x1x32xf32> to vector<1x32xf32>
    %c0_6 = arith.constant 0 : index
    %c0_7 = arith.constant 0 : index
    %c0_8 = arith.constant 0 : index
    %6 = vector.load %arg15[%c0_6, %c0_7, %c0_8] : memref<1x1x32xf32, #tpu.memory_space<vmem>>, vector<1x1x32xf32>
    %7 = vector.shape_cast %6 : vector<1x1x32xf32> to vector<1x32xf32>
    %cst = arith.constant dense<0.000000e+00> : vector<16xf32>
    %8 = vector.multi_reduction <add>, %3, %cst [1] : vector<16x32xf32> to vector<16xf32>
    %9 = vector.shape_cast %8 : vector<16xf32> to vector<16x1xf32>
    %cst_9 = arith.constant 3.200000e+01 : f32
    %10 = vector.broadcast %cst_9 : f32 to vector<16x1xf32>
    %11 = arith.divf %9, %10 : vector<16x1xf32>
    %12 = vector.broadcast %11 : vector<16x1xf32> to vector<16x32xf32>
    %13 = arith.subf %3, %12 : vector<16x32xf32>
    %14 = arith.mulf %13, %13 : vector<16x32xf32>
    %cst_10 = arith.constant dense<0.000000e+00> : vector<16xf32>
    %15 = vector.multi_reduction <add>, %14, %cst_10 [1] : vector<16x32xf32> to vector<16xf32>
    %16 = vector.shape_cast %15 : vector<16xf32> to vector<16x1xf32>
    %cst_11 = arith.constant 3.200000e+01 : f32
    %17 = vector.broadcast %cst_11 : f32 to vector<16x1xf32>
    %18 = arith.divf %16, %17 : vector<16x1xf32>
    %19 = vector.broadcast %11 : vector<16x1xf32> to vector<16x32xf32>
    %20 = arith.subf %3, %19 : vector<16x32xf32>
    %cst_12 = arith.constant 9.99999974E-6 : f32
    %21 = vector.broadcast %cst_12 : f32 to vector<16x1xf32>
    %22 = arith.addf %18, %21 : vector<16x1xf32>
    %23 = math.rsqrt %22 : vector<16x1xf32>
    %24 = vector.broadcast %23 : vector<16x1xf32> to vector<16x32xf32>
    %25 = arith.mulf %20, %24 : vector<16x32xf32>
    %26 = vector.broadcast %5 : vector<1x32xf32> to vector<16x32xf32>
    %27 = arith.mulf %25, %26 : vector<16x32xf32>
    %28 = vector.broadcast %7 : vector<1x32xf32> to vector<16x32xf32>
    %29 = arith.addf %27, %28 : vector<16x32xf32>
    %c0_13 = arith.constant 0 : index
    %c0_14 = arith.constant 0 : index
    %c0_15 = arith.constant 0 : index
    %30 = vector.load %arg16[%c0_13, %c0_14, %c0_15] : memref<1x16x32xf32, #tpu.memory_space<vmem>>, vector<1x16x32xf32>
    %31 = vector.shape_cast %30 : vector<1x16x32xf32> to vector<16x32xf32>
    %32 = vector.shape_cast %29 : vector<16x32xf32> to vector<1x16x32xf32>
    tpu.vector_store %arg16[%c0_13, %c0_14, %c0_15], %32 {strides = array<i32>} : memref<1x16x32xf32, #tpu.memory_space<vmem>>, vector<1x16x32xf32>,
    return
  }
  func.func @transform_0(%arg0: i32) -> (i32, i32, i32) {
    %c0_i32 = arith.constant 0 : i32
    %c0_i32_0 = arith.constant 0 : i32
    %c0_i32_1 = arith.constant 0 : i32
    return %arg0, %c0_i32, %c0_i32_0 : i32, i32, i32
  }
  func.func @transform_1(%arg0: i32) -> (i32, i32, i32) {
    %c0_i32 = arith.constant 0 : i32
    %c0_i32_0 = arith.constant 0 : i32
    %c0_i32_1 = arith.constant 0 : i32
    %c0_i32_2 = arith.constant 0 : i32
    return %c0_i32, %c0_i32_0, %c0_i32_1 : i32, i32, i32
  }
  func.func @transform_2(%arg0: i32) -> (i32, i32, i32) {
    %c0_i32 = arith.constant 0 : i32
    %c0_i32_0 = arith.constant 0 : i32
    %c0_i32_1 = arith.constant 0 : i32
    %c0_i32_2 = arith.constant 0 : i32
    return %c0_i32, %c0_i32_0, %c0_i32_1 : i32, i32, i32
  }
  func.func @transform_3(%arg0: i32) -> (i32, i32, i32, i32) {
    %c0_i32 = arith.constant 0 : i32
    %c0_i32_0 = arith.constant 0 : i32
    %c0_i32_1 = arith.constant 0 : i32
    %c0_i32_2 = arith.constant 0 : i32
    %c0_i32_3 = arith.constant 0 : i32
    return %c0_i32, %c0_i32_0, %c0_i32_1, %c0_i32_2 : i32, i32, i32, i32
  }
  func.func @transform_4(%arg0: i32) -> (i32, i32, i32) {
    %c0_i32 = arith.constant 0 : i32
    %c0_i32_0 = arith.constant 0 : i32
    %c0_i32_1 = arith.constant 0 : i32
    %c0_i32_2 = arith.constant 0 : i32
    return %c0_i32, %c0_i32_0, %c0_i32_1 : i32, i32, i32
  }
  func.func @transform_5(%arg0: i32) -> (i32, i32, i32) {
    %c0_i32 = arith.constant 0 : i32
    %c0_i32_0 = arith.constant 0 : i32
    %c0_i32_1 = arith.constant 0 : i32
    %c0_i32_2 = arith.constant 0 : i32
    return %c0_i32, %c0_i32_0, %c0_i32_1 : i32, i32, i32
  }
  func.func @transform_6(%arg0: i32) -> (i32, i32, i32) {
    %c0_i32 = arith.constant 0 : i32
    %c0_i32_0 = arith.constant 0 : i32
    %c0_i32_1 = arith.constant 0 : i32
    %c0_i32_2 = arith.constant 0 : i32
    return %c0_i32, %c0_i32_0, %c0_i32_1 : i32, i32, i32
  }
  func.func @transform_7(%arg0: i32) -> (i32, i32, i32) {
    %c0_i32 = arith.constant 0 : i32
    %c0_i32_0 = arith.constant 0 : i32
    %c0_i32_1 = arith.constant 0 : i32
    %c0_i32_2 = arith.constant 0 : i32
    return %c0_i32, %c0_i32_0, %c0_i32_1 : i32, i32, i32
  }
  func.func @transform_8(%arg0: i32) -> (i32, i32, i32) {
    %c0_i32 = arith.constant 0 : i32
    %c0_i32_0 = arith.constant 0 : i32
    %c0_i32_1 = arith.constant 0 : i32
    %c0_i32_2 = arith.constant 0 : i32
    return %c0_i32, %c0_i32_0, %c0_i32_1 : i32, i32, i32
  }
  func.func @transform_9(%arg0: i32) -> (i32, i32, i32) {
    %c0_i32 = arith.constant 0 : i32
    %c0_i32_0 = arith.constant 0 : i32
    %c0_i32_1 = arith.constant 0 : i32
    %c0_i32_2 = arith.constant 0 : i32
    return %c0_i32, %c0_i32_0, %c0_i32_1 : i32, i32, i32
  }
  func.func @transform_10(%arg0: i32) -> (i32, i32, i32) {
    %c0_i32 = arith.constant 0 : i32
    %c0_i32_0 = arith.constant 0 : i32
    %c0_i32_1 = arith.constant 0 : i32
    %c0_i32_2 = arith.constant 0 : i32
    return %c0_i32, %c0_i32_0, %c0_i32_1 : i32, i32, i32
  }
  func.func @transform_11(%arg0: i32) -> (i32, i32, i32) {
    %c0_i32 = arith.constant 0 : i32
    %c0_i32_0 = arith.constant 0 : i32
    %c0_i32_1 = arith.constant 0 : i32
    %c0_i32_2 = arith.constant 0 : i32
    return %c0_i32, %c0_i32_0, %c0_i32_1 : i32, i32, i32
  }
  func.func @transform_12(%arg0: i32) -> (i32, i32, i32) {
    %c0_i32 = arith.constant 0 : i32
    %c0_i32_0 = arith.constant 0 : i32
    %c0_i32_1 = arith.constant 0 : i32
    %c0_i32_2 = arith.constant 0 : i32
    return %c0_i32, %c0_i32_0, %c0_i32_1 : i32, i32, i32
  }
  func.func @transform_13(%arg0: i32) -> (i32, i32, i32) {
    %c0_i32 = arith.constant 0 : i32
    %c0_i32_0 = arith.constant 0 : i32
    %c0_i32_1 = arith.constant 0 : i32
    %c0_i32_2 = arith.constant 0 : i32
    return %c0_i32, %c0_i32_0, %c0_i32_1 : i32, i32, i32
  }
  func.func @transform_14(%arg0: i32) -> (i32, i32, i32) {
    %c0_i32 = arith.constant 0 : i32
    %c0_i32_0 = arith.constant 0 : i32
    %c0_i32_1 = arith.constant 0 : i32
    %c0_i32_2 = arith.constant 0 : i32
    return %c0_i32, %c0_i32_0, %c0_i32_1 : i32, i32, i32
  }
  func.func @transform_15(%arg0: i32) -> (i32, i32, i32) {
    %c0_i32 = arith.constant 0 : i32
    %c0_i32_0 = arith.constant 0 : i32
    %c0_i32_1 = arith.constant 0 : i32
    return %arg0, %c0_i32, %c0_i32_0 : i32, i32, i32
  }
}

module attributes {stable_mosaic.version = 11 : i64} {
  func.func @_pointer_kernel(%arg0: i32, %arg1: memref<2xf32, #tpu.memory_space<smem>>, %arg2: memref<1x2x16xf32, #tpu.memory_space<vmem>>, %arg3: memref<1x16x32xf32, #tpu.memory_space<vmem>>, %arg4: memref<1x16x32xf32, #tpu.memory_space<vmem>>, %arg5: memref<1x1x16xf32, #tpu.memory_space<vmem>>, %arg6: memref<1x32xf32, #tpu.memory_space<vmem>>, %arg7: memref<1x32xf32, #tpu.memory_space<vmem>>, %arg8: memref<1x2x16xf32, #tpu.memory_space<vmem>>) attributes {dimension_semantics = [#tpu.dimension_semantics<parallel>], iteration_bounds = array<i64: 2>, scalar_prefetch = 0 : i64, scratch_operands = 0 : i64, tpu.core_type = #tpu.core_type<tc>, window_params = [{transform_indices = @transform_0, window_bounds = array<i64: 2>}, {transform_indices = @transform_1, window_bounds = array<i64: 1, 2, 16>}, {transform_indices = @transform_2, window_bounds = array<i64: 1, 16, 32>}, {transform_indices = @transform_3, window_bounds = array<i64: 1, 16, 32>}, {transform_indices = @transform_4, window_bounds = array<i64: 1, 1, 16>}, {pipeline_mode = #tpu.pipeline_mode<synchronous>, transform_indices = @transform_5, window_bounds = array<i64: 1, 32>}, {pipeline_mode = #tpu.pipeline_mode<synchronous>, transform_indices = @transform_6, window_bounds = array<i64: 1, 32>}, {transform_indices = @transform_7, window_bounds = array<i64: 1, 2, 16>}]} {
    %c0 = arith.constant 0 : index
    %c0_0 = arith.constant 0 : index
    %c0_1 = arith.constant 0 : index
    %0 = vector.load %arg2[%c0, %c0_0, %c0_1] : memref<1x2x16xf32, #tpu.memory_space<vmem>>, vector<1x2x16xf32>
    %1 = vector.shape_cast %0 : vector<1x2x16xf32> to vector<2x16xf32>
    %c0_2 = arith.constant 0 : index
    %c0_3 = arith.constant 0 : index
    %c0_4 = arith.constant 0 : index
    %2 = vector.load %arg3[%c0_2, %c0_3, %c0_4] : memref<1x16x32xf32, #tpu.memory_space<vmem>>, vector<1x16x32xf32>
    %3 = vector.shape_cast %2 : vector<1x16x32xf32> to vector<16x32xf32>
    %c0_5 = arith.constant 0 : index
    %c0_6 = arith.constant 0 : index
    %c0_7 = arith.constant 0 : index
    %4 = vector.load %arg4[%c0_5, %c0_6, %c0_7] : memref<1x16x32xf32, #tpu.memory_space<vmem>>, vector<1x16x32xf32>
    %5 = vector.shape_cast %4 : vector<1x16x32xf32> to vector<16x32xf32>
    %c0_8 = arith.constant 0 : index
    %c0_9 = arith.constant 0 : index
    %c0_10 = arith.constant 0 : index
    %6 = vector.load %arg5[%c0_8, %c0_9, %c0_10] : memref<1x1x16xf32, #tpu.memory_space<vmem>>, vector<1x1x16xf32>
    %7 = vector.shape_cast %6 : vector<1x1x16xf32> to vector<1x16xf32>
    %c0_11 = arith.constant 0 : index
    %c0_12 = arith.constant 0 : index
    %8 = vector.load %arg6[%c0_11, %c0_12] : memref<1x32xf32, #tpu.memory_space<vmem>>, vector<1x32xf32>
    %cst = arith.constant dense<0.000000e+00> : vector<1x16xf32>
    %9 = tpu.matmul %8, %3, %cst {dimension_numbers = #tpu.dot_dimension_numbers<[1], [1], [0], [0], [0, 0, 1, 0], [], []>} : vector<1x32xf32>, vector<16x32xf32>, vector<1x16xf32> -> vector<1x16xf32>
    %c0_13 = arith.constant 0 : index
    %10 = memref.load %arg1[%c0_13] : memref<2xf32, #tpu.memory_space<smem>>
    %11 = vector.broadcast %10 : f32 to vector<1x16xf32>
    %12 = arith.addf %9, %11 : vector<1x16xf32>
    %c0_14 = arith.constant 0 : index
    %c0_15 = arith.constant 0 : index
    %13 = vector.load %arg7[%c0_14, %c0_15] : memref<1x32xf32, #tpu.memory_space<vmem>>, vector<1x32xf32>
    %cst_16 = arith.constant dense<0.000000e+00> : vector<1x16xf32>
    %14 = tpu.matmul %13, %5, %cst_16 {dimension_numbers = #tpu.dot_dimension_numbers<[1], [1], [0], [0], [0, 0, 1, 0], [], []>} : vector<1x32xf32>, vector<16x32xf32>, vector<1x16xf32> -> vector<1x16xf32>
    %c1 = arith.constant 1 : index
    %15 = memref.load %arg1[%c1] : memref<2xf32, #tpu.memory_space<smem>>
    %16 = vector.broadcast %15 : f32 to vector<1x16xf32>
    %17 = arith.addf %14, %16 : vector<1x16xf32>
    %18 = tpu.concatenate %12, %17 in 0 : vector<1x16xf32>, vector<1x16xf32> -> vector<2x16xf32>
    %19 = arith.addf %1, %18 : vector<2x16xf32>
    %20 = vector.broadcast %7 : vector<1x16xf32> to vector<2x16xf32>
    %21 = arith.addf %19, %20 : vector<2x16xf32>
    %cst_17 = arith.constant dense<0xFF800000> : vector<2xf32>
    %22 = vector.multi_reduction <maximumf>, %21, %cst_17 [1] : vector<2x16xf32> to vector<2xf32>
    %23 = vector.shape_cast %22 : vector<2xf32> to vector<2x1xf32>
    %24 = vector.broadcast %23 : vector<2x1xf32> to vector<2x16xf32>
    %25 = arith.subf %21, %24 : vector<2x16xf32>
    %26 = math.exp %25 : vector<2x16xf32>
    %cst_18 = arith.constant dense<0.000000e+00> : vector<2xf32>
    %27 = vector.multi_reduction <add>, %26, %cst_18 [1] : vector<2x16xf32> to vector<2xf32>
    %28 = vector.shape_cast %27 : vector<2xf32> to vector<2x1xf32>
    %29 = math.log %28 : vector<2x1xf32>
    %30 = vector.broadcast %29 : vector<2x1xf32> to vector<2x16xf32>
    %31 = arith.subf %25, %30 : vector<2x16xf32>
    %c0_19 = arith.constant 0 : index
    %c0_20 = arith.constant 0 : index
    %c0_21 = arith.constant 0 : index
    %32 = vector.load %arg8[%c0_19, %c0_20, %c0_21] : memref<1x2x16xf32, #tpu.memory_space<vmem>>, vector<1x2x16xf32>
    %33 = vector.shape_cast %32 : vector<1x2x16xf32> to vector<2x16xf32>
    %34 = vector.shape_cast %31 : vector<2x16xf32> to vector<1x2x16xf32>
    tpu.vector_store %arg8[%c0_19, %c0_20, %c0_21], %34 {strides = array<i32>} : memref<1x2x16xf32, #tpu.memory_space<vmem>>, vector<1x2x16xf32>,
    return
  }
  func.func @transform_0(%arg0: i32) -> i32 {
    %c0_i32 = arith.constant 0 : i32
    %c0_i32_0 = arith.constant 0 : i32
    return %c0_i32 : i32
  }
  func.func @transform_1(%arg0: i32) -> (i32, i32, i32) {
    %c0_i32 = arith.constant 0 : i32
    %c0_i32_0 = arith.constant 0 : i32
    %c0_i32_1 = arith.constant 0 : i32
    return %arg0, %c0_i32, %c0_i32_0 : i32, i32, i32
  }
  func.func @transform_2(%arg0: i32) -> (i32, i32, i32) {
    %c0_i32 = arith.constant 0 : i32
    %c0_i32_0 = arith.constant 0 : i32
    %c0_i32_1 = arith.constant 0 : i32
    return %arg0, %c0_i32, %c0_i32_0 : i32, i32, i32
  }
  func.func @transform_3(%arg0: i32) -> (i32, i32, i32) {
    %c0_i32 = arith.constant 0 : i32
    %c0_i32_0 = arith.constant 0 : i32
    %c0_i32_1 = arith.constant 0 : i32
    return %arg0, %c0_i32, %c0_i32_0 : i32, i32, i32
  }
  func.func @transform_4(%arg0: i32) -> (i32, i32, i32) {
    %c0_i32 = arith.constant 0 : i32
    %c0_i32_0 = arith.constant 0 : i32
    %c0_i32_1 = arith.constant 0 : i32
    return %arg0, %c0_i32, %c0_i32_0 : i32, i32, i32
  }
  func.func @transform_5(%arg0: i32) -> (i32, i32) {
    %c0_i32 = arith.constant 0 : i32
    %c0_i32_0 = arith.constant 0 : i32
    %c0_i32_1 = arith.constant 0 : i32
    return %c0_i32, %c0_i32_0 : i32, i32
  }
  func.func @transform_6(%arg0: i32) -> (i32, i32) {
    %c0_i32 = arith.constant 0 : i32
    %c0_i32_0 = arith.constant 0 : i32
    %c0_i32_1 = arith.constant 0 : i32
    return %c0_i32, %c0_i32_0 : i32, i32
  }
  func.func @transform_7(%arg0: i32) -> (i32, i32, i32) {
    %c0_i32 = arith.constant 0 : i32
    %c0_i32_0 = arith.constant 0 : i32
    %c0_i32_1 = arith.constant 0 : i32
    return %arg0, %c0_i32, %c0_i32_0 : i32, i32, i32
  }
}

</mosaic_0001>

<bundles_post_ra>
// kernel: bidaf_transformer_forward.8
= control target key start
LH: loop header
LB: loop body
LE: loop exit
PB: predicated region body
PF: predicated region fallthrough
CT: control target
= control target key end

     0   :  { %s1385_s23 = smov 0   ;;  %s1525_s0 = inlined_call_operand.<no memory space> [shape: f32[1,1], index: 0, kind: input, shape index: {}]   ;;  %s1526_s1 = inlined_call_operand.vmem [shape: f32[2,16,32], index: 1, kind: input, shape index: {}]   ;;  %s1527_s2 = inlined_call_operand.vmem [shape: f32[2,16,32], index: 2, kind: input, shape index: {}]   ;;  %s1528_s3 = inlined_call_operand.vmem [shape: f32[2,1,16], index: 3, kind: input, shape index: {}]   ;;  %s1529_s4 = inlined_call_operand.vmem [shape: f32[2,16,1], index: 4, kind: input, shape index: {}]   ;;  %s1530_s5 = inlined_call_operand.vmem [shape: f32[1,32], index: 5, kind: input, shape index: {}]   ;;  %s1531_s6 = inlined_call_operand.vmem [shape: f32[1,32], index: 6, kind: input, shape index: {}]   ;;  %s1532_s7 = inlined_call_operand.vmem [shape: f32[1,32], index: 7, kind: input, shape index: {}]   ;;  %s1533_s8 = inlined_call_operand.vmem [shape: bf16[128,32], index: 8, kind: input, shape index: {}]   ;;  %s1534_s9 = inlined_call_operand.vmem [shape: f32[1,32], index: 9, kind: input, shape index: {}]   ;;  %s1535_s10 = inlined_call_operand.vmem [shape: f32[2,128], index: 10, kind: input, shape index: {}]   ;;  %s1536_s11 = inlined_call_operand.vmem [shape: f32[2,16,32], index: 11, kind: output, shape index: {0}]   ;;  %s1537_s12 = inlined_call_operand.vmem [shape: f32[2,2,16], index: 12, kind: output, shape index: {1}]  }
   0x1   :  { %18 = sst [smem:[#allocation2]] %s1525_s0 }
   0x2 LB: > { %s1137_s24 = sadd.s32 4294967295, %s1308_s23   ;;  %p1141_p0 = scmp.ge.s32.totalorder %s1308_s23, 1  ;;  %s1308_s23 = sphi %s1385_s23, %s24_s23  }
   0x3   : > { %p394_p1 = scmp.lt.s32.totalorder %s1308_s23, 3 }
   0x5   : > { %p395_p2 = pnand %p1141_p0, %p394_p1 }
   0x6   : > { %p453_p3 = scmp.lt.s32.totalorder (!%p395_p2), %s1137_s24, 1  ;;  %v1310_v0 = vmov (!%p395_p2), 0.0   ;;  %vm1311_vm0 = vmmov (!%p395_p2), 0   ;;  %v1152_v1 = vld [vmem:[%s1532_s7] ss:$0 sm:$0xff] (!%p395_p2)  ;;  %v1312_v3 = vmov (!%p395_p2), 0  }
   0x7   : > { %398 = sbr.rel (%p395_p2) target bundleno = 1190 (0x4a6), region = 64  ;;  %1194 = vmatprep.subr.bf16.mxu0 (!%p395_p2), %v1310_v0  ;;  %1196 = vmatprep.mubr.msk.bf16.mxu0 (!%p395_p2), %vm1311_vm0, %v1310_v0  ;;  %v1151_v2 = vld [vmem:[%s1530_s5] ss:$0 sm:$0xff] (!%p395_p2)  ;;  %vm497_vm1 = vcmask (!%p395_p2), 261120   ;;  %s571_s22 = sld [smem:[#allocation2]] (!%p395_p2)  ;;  %vm583_vm2 = vcmask (!%p395_p2), 130048  }
   0x8   : > { %1263 = vset.pattern.permute.xlu1 (!%p395_p2), %v1312_v3  ;;  %1206 = vmatprep.subr.bf16.mxu1 (!%p395_p2), %v1310_v0  ;;  %v1153_v10 = vld [vmem:[%s1531_s6] ss:$0 sm:$0xff] (!%p395_p2)  ;;  %s1316_s30 = smov (!%p395_p2), 96   ;;  %vm824_vm3 = vcmask (!%p395_p2), 523264   ;;  %vm827_vm4 = vcmask (!%p395_p2), 785408   ;;  %vm1016_vm5 = vcmask (!%p395_p2), 123904  }
   0x9   : > { %1208 = vmatprep.mubr.msk.bf16.mxu1 (!%p395_p2), %vm1311_vm0, %v1310_v0 }
   0xd   : > { %v572_v25 = vstv (!%p395_p2), %s571_s22 }
   0xe   : > { %s1539_s24 = smov (!%p453_p3, %s1137_s24), 1 }
   0xf   : > { %s1409_s28 = sshll.u32 %s1539_s24, 4  ;;  %s465_s26 = scalar_lea.vmem %s1528_s3, %s1539_s24 }
  0x10   : > { %s457_s13 = scalar_lea.vmem %s1526_s1, %s1409_s28  ;;  %s462_s16 = scalar_lea.vmem %s1527_s2, %s1409_s28  ;;  %v1155_v30 = vld [vmem:[%s465_s26] ss:$0 sm:$0xff] }
  0x11   : > { %v1419_v4 = vld [vmem:[%s457_s13] sm:$0xff]  ;;  %v1421_v5 = vld [vmem:[%s457_s13 + $0x8] sm:$0xff]  ;;  %s470_s19 = scalar_lea.vmem %s1529_s4, %s1409_s28  ;;  %s1150_s20 = sshll.u32 %s1539_s24, 1 }
  0x12   : > { %v483_v6 = vld [vmem:[%s462_s16] sm:$0xff]  ;;  %v484_v7 = vld [vmem:[%s462_s16 + $0x8] sm:$0xff]  ;;  %v511_v8 = vmul.f32 %v1152_v1, %v1419_v4  ;;  %v512_v9 = vmul.f32 %v1152_v1, %v1421_v5  ;;  %v495_v11 = vmul.f32 %v1151_v2, %v1419_v4  ;;  %v496_v12 = vmul.f32 %v1151_v2, %v1421_v5  ;;  %s1313_s16 = smov 32   ;;  %s479_s0 = scalar_lea.vmem %s1537_s12, %s1150_s20 }
  0x13   : > { %v486_v13 = vld [vmem:[%s470_s19] sm:$0xff]  ;;  %v523_v14 = vpack.c.bf16 %v484_v7, %v483_v6  ;;  %v487_v16 = vld [vmem:[%s470_s19 + $0x8] sm:$0xff]  ;;  %v691_v56 = vpack.c.bf16 %v1421_v5, %v1419_v4  ;;  %s1314_s19 = smov 64  }
  0x14   : > { %608 = vperm.xlu1 %1263, %v486_v13   ;;  %v498_v15 = vsel %vm497_vm1, %v495_v11, 0.0  ;;  %v520_v18 = vadd.f32 %v1153_v10, %v511_v8  ;;  %v521_v19 = vadd.f32 %v1153_v10, %v512_v9  ;;  %v501_v20 = vsel %vm497_vm1, %v496_v12, 0.0 }
  0x15   : > { %v528_v17 = vsel %vm497_vm1, %v523_v14, 0  ;;  %499 = vadd.xlane.f32.xlu0 %v498_v15  ;;  %1207 = vmatpush3.bf16.msra.mxu1 %v691_v56 }
  0x16   : > { %1195 = vmatpush3.bf16.xpose.msra.mxu0 %v528_v17  ;;  %v522_v21 = vpack.c.bf16 %v521_v19, %v520_v18  ;;  %1218 = vmatprep.subr.bf16.mxu1 %v1310_v0 }
  0x17   : > { %1200 = vmatprep.subr.bf16.mxu0 %v1310_v0 }
  0x18   : > { %613 = vperm.xlu1 %1263, %v487_v16  }
  0x19   : > { %502 = vadd.xlane.f32.xlu0 %v501_v20 }
  0x1d   : > { %1197 = vmatmul.mubr.msk.bf16.vlgmr.msra.gmra.mrb[0].mxu0 %vm497_vm1, %v522_v21 }
  0x1e   : > { %1201 = vmatpush3.bf16.msra.mxu0 %v523_v14  ;;  %1202 = vmatprep.mubr.msk.bf16.mxu0 %vm1311_vm0, %v1310_v0 }
  0x1f   : > { %1212 = vmatprep.subr.bf16.mxu0 %v1310_v0 }
  0x93   : > { %v609_v23 = vpop.permute.xlu1 %608 }
  0x97   : > { %v614_v37 = vpop.permute.xlu1 %613 }
  0xa2   : > { %v500_v22 = vpop.xlane.xlu0 %499 }
  0xa6   : > { %v503_v26 = vpop.xlane.xlu0 %502 }
  0xf0   : > { %v564_v24 = vpop.f32.mrb[0].mxu0 }
  0xf1   : > { %v565_v27 = vadd.f32 %v564_v24, %v500_v22  ;;  %v1198_v28 = vpop.f32.mrb[1].mxu0 }
  0xf2   : > { %v567_v29 = vpop.f32.mrb[2].mxu0 }
  0xf3   : > { %v573_v31 = vadd.f32 %v572_v25, %v565_v27  ;;  %v568_v32 = vadd.f32 %v567_v29, %v503_v26  ;;  %v1199_v33 = vpop.f32.mrb[3].mxu0 }
  0xf4   : > { %v1280_v33 = vld [vmem:[%s1533_s8] sm:$0xff]  }
  0xf5   : > { %v616_v34 = vadd.f32 %v609_v23, %v573_v31  ;;  %v574_v35 = vadd.f32 %v572_v25, %v568_v32  ;;  %v581_v36 = vadd.f32 %v1155_v30, %v573_v31 }
  0xf7   : > { %v617_v38 = vadd.f32 %v614_v37, %v574_v35  ;;  %v584_v39 = vsel %vm583_vm2, %v581_v36, -inf  ;;  %v582_v40 = vadd.f32 %v1155_v30, %v574_v35  ;;  %v618_v41 = vsel %vm583_vm2, %v616_v34, -inf }
  0xf8   : > { %585 = vmax.xlane.f32.xlu1 %v584_v39 }
  0xf9   : > { %v619_v42 = vsel %vm583_vm2, %v617_v38, -inf  ;;  %v587_v44 = vsel %vm583_vm2, %v582_v40, -inf }
  0xfa   : > { %v620_v43 = vmax.f32 %v618_v41, %v619_v42 }
  0xfc   : > { %v621_v45 = vrot.slane %v620_v43, 4  ;;  %588 = vmax.xlane.f32.xlu1 %v587_v44  ;;  %v1283_v44 = vld [vmem:[%s1533_s8 + $0x18] sm:$0xff]  }
  0xfe   : > { %v622_v46 = vmax.f32 %v620_v43, %v621_v45  ;;  %v1284_v45 = vld [vmem:[%s1533_s8 + $0x20] sm:$0xff]  }
 0x100   : > { %v623_v47 = vrot.slane %v622_v46, 2 }
 0x102   : > { %v624_v48 = vmax.f32 %v622_v46, %v623_v47  ;;  %v1285_v46 = vld [vmem:[%s1533_s8 + $0x28] sm:$0xff]   ;;  %v1286_v47 = vld [vmem:[%s1533_s8 + $0x30] sm:$0xff]  }
 0x104   : > { %v625_v49 = vrot.slane %v624_v48, 1 }
 0x106   : > { %v626_v50 = vmax.f32 %v624_v48, %v625_v49  ;;  %v1287_v48 = vld [vmem:[%s1533_s8 + $0x38] sm:$0xff]   ;;  %v1315_v49 = vmov 0.0|0.0  }
 0x108   : > { %v627_v51 = vsub.f32 %v616_v34, %v626_v50  ;;  %v628_v52 = vsub.f32 %v617_v38, %v626_v50  ;;  %v1281_v34 = vld [vmem:[%s1533_s8 + $0x8] sm:$0xff]   ;;  %v1282_v38 = vld [vmem:[%s1533_s8 + $0x10] sm:$0xff]  }
 0x10a   : > { %v629_v53 = vmul.f32 1.442695, %v627_v51  ;;  %v631_v54 = vmul.f32 1.442695, %v628_v52 }
 0x10c   : > { %1288 = vpow2.f32 %v629_v53 }
 0x10d   : > { %1290 = vpow2.f32 %v631_v54 }
 0x116   : > { %v1289_v55 = vpop.eup %1288 }
 0x117   : > { %v1291_v57 = vpop.eup %1290  ;;  %v633_v58 = vsel %vm583_vm2, %v1289_v55, 0.0 }
 0x118   : > { %v634_v59 = vsel %vm583_vm2, %v1291_v57, 0.0 }
 0x119   : > { %v635_v60 = vadd.f32 %v634_v59, %v633_v58 }
 0x11b   : > { %v636_v61 = vrot.slane %v635_v60, 4 }
 0x11d   : > { %v637_v62 = vadd.f32 %v636_v61, %v635_v60 }
 0x11f   : > { %v638_v63 = vrot.slane %v637_v62, 2 }
 0x121   : > { %v639_v1 = vadd.f32 %v638_v63, %v637_v62 }
 0x123   : > { %v640_v2 = vrot.slane %v639_v1, 1 }
 0x125   : > { %v641_v6 = vadd.f32 %v640_v2, %v639_v1 }
 0x127   : > { %1292 = vrcp.f32 %v641_v6 }
 0x131   : > { %v1293_v7 = vpop.eup %1292 }
 0x132   : > { %v643_v8 = vmul.f32 %v1293_v7, %v1289_v55  ;;  %v644_v9 = vmul.f32 %v1293_v7, %v1291_v57 }
 0x134   : > { %v690_v10 = vpack.c.bf16 %v644_v9, %v643_v8 }
 0x136   : > { %692 = vxpose.xlu0.c.b16.start.end [1/1] (short) (narrow) %v690_v10, 16 }
 0x13f   : > { %1279 = vset.pattern.permute.xlu0 %v1312_v3 }
 0x185   : > { %v586_v11 = vpop.xlane.xlu1 %585 }
 0x186   : > { %v590_v12 = vsub.f32 %v581_v36, %v586_v11 }
 0x188   : > { %v592_v13 = vmul.f32 1.442695, %v590_v12 }
 0x189   : > { %v589_v14 = vpop.xlane.xlu1 %588 }
 0x18a   : > { %1294 = vpow2.f32 %v592_v13  ;;  %v591_v15 = vsub.f32 %v582_v40, %v589_v14 }
 0x18c   : > { %v594_v16 = vmul.f32 1.442695, %v591_v15 }
 0x18e   : > { %1296 = vpow2.f32 %v594_v16 }
 0x194   : > { %v1295_v17 = vpop.eup %1294 }
 0x195   : > { %v596_v18 = vsel %vm583_vm2, %v1295_v17, 0.0 }
 0x196   : > { %597 = vadd.xlane.f32.xlu1 %v596_v18 }
 0x198   : > { %v1297_v19 = vpop.eup %1296 }
 0x199   : > { %v599_v20 = vsel %vm583_vm2, %v1297_v19, 0.0 }
 0x19a   : > { %600 = vadd.xlane.f32.xlu1 %v599_v20 }
 0x19c   : > { %v700_v21 = vpop.trf.xlu0 }
 0x19d   : > { %1209 = vmatmul.mubr.msk.bf16.vlgmr.msra.gmra.mrb[0].mxu1 %vm583_vm2, %v700_v21 }
 0x19e   : > { %1234 = vmatprep.mubr.msk.bf16.mxu1 %vm1311_vm0, %v1310_v0  ;;  %1219 = vmatpush3.bf16.msra.mxu1 %v1280_v33 }
 0x19f   : > { %1220 = vmatprep.subr.bf16.mxu1 %v1310_v0 }
 0x1a2   : > { %1221 = vmatpush3.bf16.msra.mxu1 %v1281_v34 }
 0x1a3   : > { %1222 = vmatprep.subr.bf16.mxu1 %v1310_v0 }
 0x1a6   : > { %1223 = vmatpush3.bf16.msra.mxu1 %v1282_v38 }
 0x1a7   : > { %1224 = vmatprep.subr.bf16.mxu1 %v1310_v0 }
 0x1aa   : > { %1225 = vmatpush3.bf16.msra.mxu1 %v1283_v44 }
 0x1ab   : > { %1226 = vmatprep.subr.bf16.mxu1 %v1310_v0 }
 0x1ae   : > { %1227 = vmatpush3.bf16.msra.mxu1 %v1284_v45 }
 0x1af   : > { %1228 = vmatprep.subr.bf16.mxu1 %v1310_v0 }
 0x1b2   : > { %1229 = vmatpush3.bf16.msra.mxu1 %v1285_v46 }
 0x1b3   : > { %1230 = vmatprep.subr.bf16.mxu1 %v1310_v0 }
 0x1b6   : > { %1231 = vmatpush3.bf16.msra.mxu1 %v1286_v47 }
 0x1b7   : > { %1232 = vmatprep.subr.bf16.mxu1 %v1310_v0 }
 0x1ba   : > { %1233 = vmatpush3.bf16.msra.mxu1 %v1287_v48 }
 0x223   : > { %v598_v3 = vpop.xlane.xlu1 %597 }
 0x224   : > { %1298 = vrcp.f32 %v598_v3 }
 0x227   : > { %v601_v22 = vpop.xlane.xlu1 %600 }
 0x228   : > { %1300 = vrcp.f32 %v601_v22 }
 0x22e   : > { %v1299_v23 = vpop.eup %1298 }
 0x22f   : > { %v604_v25 = vmul.f32 %v1299_v23, %v1295_v17 }
 0x232   : > { %v1301_v24 = vpop.eup %1300 }
 0x233   : > { %v605_v26 = vmul.f32 %v1301_v24, %v1297_v19 }
 0x235   : > { %v645_v27 = vpack.c.bf16 %v605_v26, %v604_v25 }
 0x237   : > { %1203 = vmatmul.mubr.msk.bf16.vlgmr.msra.gmra.mrb[4].mxu0 %vm583_vm2, %v645_v27 }
 0x238   : > { %1214 = vmatprep.mubr.msk.bf16.mxu0 %vm1311_vm0, %v1310_v0 }
 0x270   : > { %v745_v28 = vpop.f32.mrb[0].mxu1 }
 0x271   : > { %v1210_v29 = vpop.f32.mrb[1].mxu1 }
 0x272   : > { %v748_v30 = vpop.f32.mrb[2].mxu1 }
 0x273   : > { %v752_v31 = vpack.c.bf16 %v748_v30, %v745_v28  ;;  %v1211_v32 = vpop.f32.mrb[3].mxu1 }
 0x275   : > { %1213 = vmatpush3.bf16.msra.mxu0 %v752_v31 }
 0x276   : > { %1245 = vmatprep.subr.bf16.mxu0 %v1315_v49 }
 0x278   : > { %1215 = vmatmul.mubr.msk.bf16.vlgmr.msra.gmra.mrb[8].mxu0 %vm583_vm2, %v645_v27 }
 0x279   : > { %1242 = vmatprep.mubr.msk.f32.mxu0 %vm1311_vm0, %v1310_v0 }
 0x30a   : > { %v683_v35 = vpop.f32.mrb[4].mxu0 }
 0x30b   : > { %v1204_v36 = vpop.f32.mrb[5].mxu0  ;;  %v794_v39 = vmul.f32 %v683_v35, %v1419_v4 }
 0x30c   : > { %v686_v37 = vpop.f32.mrb[6].mxu0 }
 0x30d   : > { %v1264_v40 = vpack.i.bf16 %v686_v37, %v683_v35  ;;  %v795_v41 = vmul.f32 %v686_v37, %v1421_v5  ;;  %v1205_v42 = vpop.f32.mrb[7].mxu0 }
 0x30f   : > { %v1269_v43 = vpack.i.bf16 %v795_v41, %v794_v39  ;;  %1265 = vrot.lane.b32.xlu0 %v1264_v40, %s1313_s16 }
 0x311   : > { %1270 = vrot.lane.b32.xlu1 %v1269_v43, %s1314_s19  ;;  %s475_s19 = scalar_lea.vmem %s1536_s11, %s1409_s28 }
 0x34b   : > { %v787_v50 = vpop.f32.mrb[8].mxu0 }
 0x34c   : > { %v1216_v51 = vpop.f32.mrb[9].mxu0  ;;  %v796_v53 = vmul.f32 %v787_v50, %v1419_v4 }
 0x34d   : > { %v790_v52 = vpop.f32.mrb[10].mxu0 }
 0x34e   : > { %v797_v54 = vmul.f32 %v790_v52, %v1421_v5  ;;  %v1217_v55 = vpop.f32.mrb[11].mxu0 }
 0x350   : > { %v1274_v56 = vpack.i.bf16 %v797_v54, %v796_v53 }
 0x352   : > { %1275 = vrot.lane.b32.xlu0 %v1274_v56, %s1316_s30 }
 0x381   : > { %v1266_v57 = vpop.permute.xlu0 %1265 }
 0x382   : > { %v1268_v0 = vunpack.i.h.bf16 %v1266_v57  ;;  %v1267_v58 = vunpack.i.l.bf16 %v1266_v57 }
 0x383   : > { %v1271_v59 = vpop.permute.xlu1 %1270 }
 0x384   : > { %v1273_v60 = vunpack.i.h.bf16 %v1271_v59  ;;  %v1272_v61 = vunpack.i.l.bf16 %v1271_v59  ;;  %v823_v62 = vsel %vm497_vm1, %v1421_v5, %v1268_v0  ;;  %v822_v63 = vsel %vm497_vm1, %v1419_v4, %v1267_v58  ;;  %v945_v5 = vld [vmem:[%s1535_s10] sm:$0x3] }
 0x385   : > { %v1159_v4 = vld [vmem:[%s1534_s9] ss:$0 sm:$0xff] }
 0x386   : > { %v826_v7 = vsel %vm824_vm3, %v823_v62, %v1273_v60  ;;  %v825_v8 = vsel %vm824_vm3, %v822_v63, %v1272_v61 }
 0x3c4   : > { %v1276_v1 = vpop.permute.xlu0 %1275 }
 0x3c5   : > { %v1278_v2 = vunpack.i.h.bf16 %v1276_v1  ;;  %v1277_v6 = vunpack.i.l.bf16 %v1276_v1 }
 0x3c7   : > { %v829_v9 = vsel %vm827_vm4, %v826_v7, %v1278_v2  ;;  %v828_v10 = vsel %vm827_vm4, %v825_v8, %v1277_v6 }
 0x3c8   : > { %v830_v11 = vpack.c.bf16 %v829_v9, %v828_v10 }
 0x3ca   : > { %1235 = vmatmul.mubr.bf16.vlgmr.msra.gmra.mrb[4].mxu1 %v830_v11  ;;  %1247 = vmatpush3.bf16.xpose.msra.mxu0 %v830_v11 }
 0x3d1   : > { %1243 = vmatmul.mubr.f32.vlgmr.msra.gmra.mrb[12].mxu0 %v945_v5 }
 0x49d   : > { %v936_v12 = vpop.f32.mrb[4].mxu1 }
 0x49e   : > { %v937_v13 = vadd.f32 %v1159_v4, %v936_v12  ;;  %v1236_v14 = vpop.f32.mrb[5].mxu1 }
 0x49f   : > { %v939_v15 = vpop.f32.mrb[6].mxu1 }
 0x4a0   : > { %943 = vst.msk [vmem:[%s475_s19] sm:$0xff] %vm497_vm1, %v937_v13  ;;  %v940_v16 = vadd.f32 %v1159_v4, %v939_v15  ;;  %v1237_v17 = vpop.f32.mrb[7].mxu1 }
 0x4a2   : > { %944 = vst.msk [vmem:[%s475_s19 + $0x8] sm:$0xff] %vm497_vm1, %v940_v16 }
 0x4a4   : > { %v1012_v18 = vpop.f32.mrb[12].mxu0 }
 0x4a5   : > { %1017 = vst.msk [vmem:[%s479_s0] sm:$0x3] %vm1016_vm5, %v1012_v18  ;;  %v1244_v19 = vpop.f32.mrb[13].mxu0 }
 0x4a6 PF: > { %s24_s23 = sadd.s32 1, %s1308_s23  }
 0x4a7   : > { %p21_p4 = scmp.ge.s32.totalorder %s24_s23, 4  }
 0x4a9   :  { %23 = sbr.rel (!%p21_p4) target bundleno = 2 (0x2), region = 115 }

// kernel: bidaf_transformer_forward.6
= control target key start
LH: loop header
LB: loop body
LE: loop exit
PB: predicated region body
PF: predicated region fallthrough
CT: control target
= control target key end

     0   :  { %s777_s15 = smov 0   ;;  %s851_s0 = inlined_call_operand.vmem [shape: f32[64,32], index: 0, kind: input, shape index: {}]   ;;  %s852_s1 = inlined_call_operand.vmem [shape: bf16[32,32], index: 1, kind: input, shape index: {}]   ;;  %s853_s2 = inlined_call_operand.vmem [shape: bf16[2,32,64], index: 2, kind: input, shape index: {}]   ;;  %s854_s3 = inlined_call_operand.vmem [shape: f32[2,1,64], index: 3, kind: input, shape index: {}]   ;;  %s855_s4 = inlined_call_operand.vmem [shape: f32[64,32], index: 4, kind: output, shape index: {}]  }
   0x1 LB: > { %s622_s16 = sadd.s32 4294967295, %s749_s15   ;;  %p626_p0 = scmp.ge.s32.totalorder %s749_s15, 1  ;;  %s749_s15 = sphi %s777_s15, %s14_s15  }
   0x2   : > { %p163_p1 = scmp.lt.s32.totalorder %s749_s15, 3 }
   0x4   : > { %p164_p2 = pnand %p626_p0, %p163_p1 }
   0x5   : > { %v705_v0 = vld [vmem:[%s852_s1] sm:$0xff] (!%p164_p2)   ;;  %s627_s19 = sshll.u32 (!%p164_p2), %s622_s16, 2  ;;  %v706_v1 = vld [vmem:[%s852_s1 + $0x8] sm:$0xff] (!%p164_p2)   ;;  %vm224_vm0 = vcmask (!%p164_p2), 261120   ;;  %v709_v16 = vld [vmem:[%s853_s2 + $0x10] sm:$0xff] (!%p164_p2)   ;;  %s751_s10 = smov (!%p164_p2), 96  }
   0x6   : > { %167 = sbr.rel (%p164_p2) target bundleno = 924 (0x39c), region = 36  ;;  %p190_p3 = scmp.lt.s32.totalorder (!%p164_p2), %s627_s19, 7  ;;  %672 = vmatprep.subr.bf16.mxu0 (!%p164_p2), %v705_v0  ;;  %v707_v2 = vld [vmem:[%s853_s2] sm:$0xff] (!%p164_p2)   ;;  %v708_v9 = vld [vmem:[%s853_s2 + $0x8] sm:$0xff] (!%p164_p2)   ;;  %v710_v18 = vld [vmem:[%s853_s2 + $0x18] sm:$0xff] (!%p164_p2)  }
   0x7   : > { %673 = vmatpush3.bf16.msra.mxu0 (!%p164_p2), %v705_v0  ;;  %680 = vmatprep.subr.bf16.mxu1 (!%p164_p2), %v707_v2  ;;  %v635_v17 = vld [vmem:[%s854_s3] ss:$0 sm:$0xff] (!%p164_p2) }
   0x8   : > { %674 = vmatprep.subr.bf16.mxu0 (!%p164_p2), %v706_v1  ;;  %681 = vmatpush3.bf16.msra.mxu1 (!%p164_p2), %v707_v2 }
   0x9   : > { %682 = vmatprep.subr.bf16.mxu1 (!%p164_p2), %v708_v9 }
   0xb   : > { %675 = vmatpush3.bf16.msra.mxu0 (!%p164_p2), %v706_v1 }
   0xc   : > { %683 = vmatpush3.bf16.msra.mxu1 (!%p164_p2), %v708_v9  ;;  %688 = vmatprep.subr.bf16.mxu0 (!%p164_p2), %v709_v16 }
   0xd   : > { %s857_s19 = smov (!%p190_p3, %s627_s19), 7 }
   0xe   : > { %s628_s24 = sshll.u32 %s857_s19, 3 }
   0xf   : > { %s193_s27 = scalar_lea.vmem %s851_s0, %s628_s24  ;;  %s199_s16 = scalar_lea.vmem %s855_s4, %s628_s24 }
  0x10   : > { %v202_v3 = vld [vmem:[%s193_s27] sm:$0xff]  ;;  %v203_v4 = vld [vmem:[%s193_s27 + $0x8] sm:$0xff]  ;;  %v204_v5 = vld [vmem:[%s193_s27 + $0x10] sm:$0xff] }
  0x11   : > { %v206_v6 = vpack.c.bf16 %v203_v4, %v202_v3  ;;  %v205_v7 = vld [vmem:[%s193_s27 + $0x18] sm:$0xff] }
  0x12   : > { %v207_v8 = vpack.c.bf16 %v205_v7, %v204_v5  ;;  %v649_v5 = vld [vmem:[%s854_s3 + $0x1] ss:$0 sm:$0xff] }
  0x13   : > { %676 = vmatprep.mubr.msk.bf16.mxu0 %vm224_vm0, %v206_v6 }
  0x14   : > { %677 = vmatmul.mubr.msk.bf16.vlgmr.msra.gmra.mrb[0].mxu0 %vm224_vm0, %v207_v8 }
  0x15   : > { %689 = vmatpush3.bf16.msra.mxu0 %v709_v16 }
  0x16   : > { %690 = vmatprep.subr.bf16.mxu0 %v710_v18 }
  0x19   : > { %691 = vmatpush3.bf16.msra.mxu0 %v710_v18 }
  0xe7   : > { %v678_v10 = vpop.f32.mrb[0].mxu0 }
  0xe8   : > { %v265_v11 = vpop.f32.mrb[1].mxu0 }
  0xe9   : > { %v679_v12 = vpop.f32.mrb[2].mxu0 }
  0xea   : > { %v281_v13 = vpack.c.bf16 %v679_v12, %v678_v10  ;;  %v268_v14 = vpop.f32.mrb[3].mxu0 }
  0xeb   : > { %v280_v15 = vpack.c.bf16 %v268_v14, %v265_v11 }
  0xed   : > { %684 = vmatprep.mubr.msk.bf16.mxu1 %vm224_vm0, %v280_v15 }
  0xee   : > { %685 = vmatmul.mubr.msk.bf16.vlgmr.msra.gmra.mrb[0].mxu1 %vm224_vm0, %v281_v13 }
 0x1c1   : > { %v686_v19 = vpop.f32.mrb[0].mxu1 }
 0x1c2   : > { %v354_v20 = vadd.f32 %v686_v19, %v635_v17  ;;  %v345_v21 = vpop.f32.mrb[1].mxu1 }
 0x1c3   : > { %v346_v22 = vadd.f32 %v635_v17, %v345_v21  ;;  %v687_v23 = vpop.f32.mrb[2].mxu1 }
 0x1c4   : > { %v642_v24 = vmul.f32 -1.442695, %v354_v20  ;;  %v357_v25 = vadd.f32 %v687_v23, %v635_v17  ;;  %v348_v26 = vpop.f32.mrb[3].mxu1  ;;  %v386_v27 = vmax.f32 %v354_v20, 0.0 }
 0x1c5   : > { %v640_v28 = vmul.f32 -1.442695, %v346_v22  ;;  %v349_v29 = vadd.f32 %v635_v17, %v348_v26  ;;  %v384_v30 = vmax.f32 %v346_v22, 0.0 }
 0x1c6   : > { %711 = vpow2.f32 %v642_v24  ;;  %v643_v31 = vmul.f32 -1.442695, %v357_v25  ;;  %396 = vrot.lane.b32.xlu1 %v386_v27, %s751_s10  ;;  %v387_v33 = vmax.f32 %v357_v25, 0.0 }
 0x1c7   : > { %713 = vpow2.f32 %v640_v28  ;;  %v641_v32 = vmul.f32 -1.442695, %v349_v29  ;;  %392 = vrot.lane.b32.xlu0 %v384_v30, %s751_s10  ;;  %v385_v34 = vmax.f32 %v349_v29, 0.0 }
 0x1c8   : > { %715 = vpow2.f32 %v643_v31 }
 0x1c9   : > { %717 = vpow2.f32 %v641_v32 }
 0x1ca   : > { %398 = vrot.lane.b32.xlu1 %v387_v33, %s751_s10 }
 0x1cb   : > { %394 = vrot.lane.b32.xlu0 %v385_v34, %s751_s10 }
 0x1d0   : > { %v712_v35 = vpop.eup %711 }
 0x1d1   : > { %v714_v36 = vpop.eup %713  ;;  %v374_v37 = vadd.f32 1.0, %v712_v35 }
 0x1d2   : > { %v716_v38 = vpop.eup %715  ;;  %v372_v39 = vadd.f32 1.0, %v714_v36 }
 0x1d3   : > { %v718_v40 = vpop.eup %717  ;;  %719 = vrcp.f32 %v374_v37  ;;  %v375_v41 = vadd.f32 1.0, %v716_v38 }
 0x1d4   : > { %721 = vrcp.f32 %v372_v39  ;;  %v373_v42 = vadd.f32 1.0, %v718_v40 }
 0x1d5   : > { %723 = vrcp.f32 %v375_v41 }
 0x1d6   : > { %725 = vrcp.f32 %v373_v42 }
 0x1dd   : > { %v720_v43 = vpop.eup %719 }
 0x1de   : > { %v722_v44 = vpop.eup %721  ;;  %v410_v45 = vsub.f32 1.0, %v720_v43 }
 0x1df   : > { %v724_v46 = vpop.eup %723  ;;  %v408_v47 = vsub.f32 1.0, %v722_v44 }
 0x1e0   : > { %v726_v48 = vpop.eup %725  ;;  %v414_v49 = vmul.f32 %v678_v10, %v410_v45  ;;  %v411_v50 = vsub.f32 1.0, %v724_v46 }
 0x1e1   : > { %v412_v51 = vmul.f32 %v408_v47, %v265_v11  ;;  %v409_v52 = vsub.f32 1.0, %v726_v48 }
 0x1e2   : > { %v415_v53 = vmul.f32 %v679_v12, %v411_v50 }
 0x1e3   : > { %v413_v54 = vmul.f32 %v409_v52, %v268_v14 }
 0x238   : > { %v397_v55 = vpop.permute.xlu1 %396 }
 0x239   : > { %v406_v56 = vmul.f32 %v720_v43, %v397_v55  ;;  %v393_v57 = vpop.permute.xlu0 %392 }
 0x23a   : > { %v404_v58 = vmul.f32 %v722_v44, %v393_v57 }
 0x23b   : > { %v822_v59 = vadd.f32 %v414_v49, %v406_v56 }
 0x23c   : > { %v416_v60 = vadd.f32 %v412_v51, %v404_v58  ;;  %v399_v61 = vpop.permute.xlu1 %398 }
 0x23d   : > { %v407_v62 = vmul.f32 %v724_v46, %v399_v61  ;;  %v395_v63 = vpop.permute.xlu0 %394 }
 0x23e   : > { %v405_v0 = vmul.f32 %v726_v48, %v395_v63 }
 0x23f   : > { %v824_v1 = vadd.f32 %v415_v53, %v407_v62 }
 0x240   : > { %v417_v2 = vadd.f32 %v413_v54, %v405_v0 }
 0x241   : > { %v421_v4 = vpack.c.bf16 %v824_v1, %v822_v59 }
 0x242   : > { %v420_v3 = vpack.c.bf16 %v417_v2, %v416_v60 }
 0x244   : > { %692 = vmatprep.mubr.msk.bf16.mxu0 %vm224_vm0, %v420_v3 }
 0x245   : > { %693 = vmatmul.mubr.msk.bf16.vlgmr.msra.gmra.mrb[4].mxu0 %vm224_vm0, %v421_v4 }
 0x318   : > { %v694_v6 = vpop.f32.mrb[4].mxu0 }
 0x319   : > { %v487_v7 = vpop.f32.mrb[5].mxu0  ;;  %v496_v11 = vadd.f32 %v694_v6, %v649_v5 }
 0x31a   : > { %v488_v8 = vadd.f32 %v649_v5, %v487_v7  ;;  %v695_v9 = vpop.f32.mrb[6].mxu0 }
 0x31b   : > { %v490_v10 = vpop.f32.mrb[7].mxu0  ;;  %v499_v14 = vadd.f32 %v695_v9, %v649_v5  ;;  %v528_v16 = vmax.f32 %v496_v11, 0.0  ;;  %v656_v20 = vmul.f32 -1.442695, %v496_v11 }
 0x31c   : > { %v526_v12 = vmax.f32 %v488_v8, 0.0  ;;  %v491_v13 = vadd.f32 %v649_v5, %v490_v10  ;;  %v654_v18 = vmul.f32 -1.442695, %v488_v8 }
 0x31d   : > { %v529_v17 = vmax.f32 %v499_v14, 0.0  ;;  %v657_v21 = vmul.f32 -1.442695, %v499_v14 }
 0x31e   : > { %v527_v15 = vmax.f32 %v491_v13, 0.0  ;;  %534 = vrot.lane.b32.xlu0 %v526_v12, %s751_s10  ;;  %v655_v19 = vmul.f32 -1.442695, %v491_v13  ;;  %727 = vpow2.f32 %v654_v18 }
 0x320   : > { %536 = vrot.lane.b32.xlu1 %v527_v15, %s751_s10  ;;  %729 = vpow2.f32 %v655_v19 }
 0x321   : > { %731 = vpow2.f32 %v656_v20 }
 0x322   : > { %538 = vrot.lane.b32.xlu0 %v528_v16, %s751_s10  ;;  %733 = vpow2.f32 %v657_v21 }
 0x324   : > { %540 = vrot.lane.b32.xlu1 %v529_v17, %s751_s10 }
 0x328   : > { %v728_v22 = vpop.eup %727 }
 0x329   : > { %v514_v24 = vadd.f32 1.0, %v728_v22 }
 0x32a   : > { %v730_v23 = vpop.eup %729 }
 0x32b   : > { %v732_v25 = vpop.eup %731  ;;  %v515_v26 = vadd.f32 1.0, %v730_v23  ;;  %735 = vrcp.f32 %v514_v24 }
 0x32c   : > { %v734_v27 = vpop.eup %733  ;;  %v516_v28 = vadd.f32 1.0, %v732_v25 }
 0x32d   : > { %v517_v29 = vadd.f32 1.0, %v734_v27  ;;  %737 = vrcp.f32 %v515_v26 }
 0x32e   : > { %739 = vrcp.f32 %v516_v28 }
 0x32f   : > { %741 = vrcp.f32 %v517_v29 }
 0x335   : > { %v736_v30 = vpop.eup %735 }
 0x336   : > { %v550_v32 = vsub.f32 1.0, %v736_v30 }
 0x337   : > { %v738_v31 = vpop.eup %737 }
 0x338   : > { %v740_v33 = vpop.eup %739  ;;  %v551_v34 = vsub.f32 1.0, %v738_v31  ;;  %v554_v38 = vmul.f32 %v550_v32, %v416_v60 }
 0x339   : > { %v742_v35 = vpop.eup %741  ;;  %v552_v39 = vsub.f32 1.0, %v740_v33 }
 0x33a   : > { %v555_v43 = vmul.f32 %v551_v34, %v417_v2  ;;  %v553_v44 = vsub.f32 1.0, %v742_v35 }
 0x33b   : > { %v556_v47 = vmul.f32 %v552_v39, %v822_v59 }
 0x33c   : > { %v557_v51 = vmul.f32 %v553_v44, %v824_v1 }
 0x390   : > { %v535_v36 = vpop.permute.xlu0 %534 }
 0x391   : > { %v546_v37 = vmul.f32 %v736_v30, %v535_v36 }
 0x392   : > { %v537_v40 = vpop.permute.xlu1 %536 }
 0x393   : > { %v558_v41 = vadd.f32 %v554_v38, %v546_v37  ;;  %v547_v42 = vmul.f32 %v738_v31, %v537_v40 }
 0x394   : > { %v539_v45 = vpop.permute.xlu0 %538 }
 0x395   : > { %562 = vst.msk [vmem:[%s199_s16] sm:$0xff] %vm224_vm0, %v558_v41  ;;  %v559_v46 = vadd.f32 %v555_v43, %v547_v42  ;;  %v548_v48 = vmul.f32 %v740_v33, %v539_v45 }
 0x396   : > { %v541_v49 = vpop.permute.xlu1 %540 }
 0x397   : > { %563 = vst.msk [vmem:[%s199_s16 + $0x8] sm:$0xff] %vm224_vm0, %v559_v46  ;;  %v560_v50 = vadd.f32 %v556_v47, %v548_v48  ;;  %v549_v52 = vmul.f32 %v742_v35, %v541_v49 }
 0x399   : > { %564 = vst.msk [vmem:[%s199_s16 + $0x10] sm:$0xff] %vm224_vm0, %v560_v50  ;;  %v561_v53 = vadd.f32 %v557_v51, %v549_v52 }
 0x39b   : > { %565 = vst.msk [vmem:[%s199_s16 + $0x18] sm:$0xff] %vm224_vm0, %v561_v53 }
 0x39c PF: > { %s14_s15 = sadd.s32 1, %s749_s15  }
 0x39d   : > { %p11_p4 = scmp.ge.s32.totalorder %s14_s15, 4  }
 0x39f   :  { %13 = sbr.rel (!%p11_p4) target bundleno = 1 (0x1), region = 68 }

// kernel: bidaf_transformer_forward.7
= control target key start
LH: loop header
LB: loop body
LE: loop exit
PB: predicated region body
PF: predicated region fallthrough
CT: control target
= control target key end

     0   :  { %s3066_s18 = smov 0   ;;  %s3566_s0 = inlined_call_operand.vmem [shape: f32[4,16,32], index: 0, kind: input, shape index: {}]   ;;  %s3567_s1 = inlined_call_operand.vmem [shape: bf16[2,32,96], index: 1, kind: input, shape index: {}]   ;;  %s3568_s2 = inlined_call_operand.vmem [shape: f32[2,1,96], index: 2, kind: input, shape index: {}]   ;;  %s3569_s3 = inlined_call_operand.vmem [shape: bf16[2,8,4,32], index: 3, kind: input, shape index: {}]   ;;  %s3570_s4 = inlined_call_operand.vmem [shape: f32[2,1,32], index: 4, kind: input, shape index: {}]   ;;  %s3571_s5 = inlined_call_operand.vmem [shape: f32[2,1,32], index: 5, kind: input, shape index: {}]   ;;  %s3572_s6 = inlined_call_operand.vmem [shape: f32[2,1,32], index: 6, kind: input, shape index: {}]   ;;  %s3573_s7 = inlined_call_operand.vmem [shape: bf16[2,32,128], index: 7, kind: input, shape index: {}]   ;;  %s3574_s8 = inlined_call_operand.vmem [shape: f32[2,1,128], index: 8, kind: input, shape index: {}]   ;;  %s3575_s9 = inlined_call_operand.vmem [shape: bf16[2,128,32], index: 9, kind: input, shape index: {}]   ;;  %s3576_s10 = inlined_call_operand.vmem [shape: f32[2,1,32], index: 10, kind: input, shape index: {}]   ;;  %s3577_s11 = inlined_call_operand.vmem [shape: f32[2,1,32], index: 11, kind: input, shape index: {}]   ;;  %s3578_s12 = inlined_call_operand.vmem [shape: f32[2,1,32], index: 12, kind: input, shape index: {}]   ;;  %s3579_s13 = inlined_call_operand.vmem [shape: f32[1,1,32], index: 13, kind: input, shape index: {}]   ;;  %s3580_s14 = inlined_call_operand.vmem [shape: f32[1,1,32], index: 14, kind: input, shape index: {}]   ;;  %s3581_s15 = inlined_call_operand.vmem [shape: f32[4,16,32], index: 15, kind: output, shape index: {}]  }
   0x1 LB: > { %s2462_s19 = sadd.s32 4294967295, %s2961_s18   ;;  %p2466_p0 = scmp.ge.s32.totalorder %s2961_s18, 1  ;;  %s2961_s18 = sphi %s3066_s18, %s25_s18  }
   0x2   : > { %p437_p1 = scmp.lt.s32.totalorder %s2961_s18, 5 }
   0x4   : > { %p438_p2 = pnand %p2466_p0, %p437_p1 }
   0x5   : > { %p485_p3 = scmp.lt.s32.totalorder (!%p438_p2), %s2462_s19, 3  ;;  %s3086_s27 = smov (!%p438_p2), 0  }
   0x6   : > { %441 = sbr.rel (%p438_p2) target bundleno = 2864 (0xb30), region = 80 }
   0xd   : > { %s3585_s19 = smov (!%p485_p3, %s2462_s19), 3 }
   0xe   : > { %s2528_s20 = sshll.u32 %s3585_s19, 4 }
   0xf   : > { %s489_s23 = scalar_lea.vmem %s3566_s0, %s2528_s20  ;;  %s3080_s26 = scalar_lea.vmem %s3581_s15, %s2528_s20 }
  0x10   : > { %v496_v0 = vld [vmem:[%s489_s23] sm:$0xff]   ;;  %v497_v1 = vld [vmem:[%s489_s23 + $0x8] sm:$0xff]  }
  0x11 LB: >> { %v2975_v2 = vmov 0.0   ;;  %vm2976_vm0 = vmmov 0   ;;  %s3101_s28 = sshll.u32 %s2973_s27, 4  ;;  %s2533_s17 = sshll.u32 %s2973_s27, 6  ;;  %vm534_vm1 = vcmask 261120   ;;  %v506_v5 = vpack.c.bf16 %v2965_v1, %v2969_v0  ;;  %s2973_s27 = sphi %s3086_s27, %s503_s27   ;;  %v2969_v0 = vphi %v496_v0, %v3583_v0   ;;  %v2965_v1 = vphi %v497_v1, %v3582_v1  }
  0x12   : >> { %2597 = vmatprep.subr.bf16.mxu1 %v2975_v2  ;;  %2601 = vmatprep.mubr.msk.bf16.mxu1 %vm2976_vm0, %v2975_v2  ;;  %s509_s16 = scalar_lea.vmem %s3567_s1, %s3101_s28  ;;  %s3115_s21 = scalar_lea.vmem %s3573_s7, %s3101_s28  ;;  %vm634_vm2 = vcmask 31744   ;;  %vm1048_vm3 = vcmask 130048   ;;  %vm1631_vm4 = vcmask 1041408  }
  0x13   : >> { %2623 = vmatprep.subr.bf16.mxu0 %v2975_v2  ;;  %2625 = vmatprep.mubr.msk.bf16.mxu0 %vm2976_vm0, %v2975_v2  ;;  %v2855_v3 = vld [vmem:[%s509_s16] sm:$0xff]   ;;  %s3120_s24 = scalar_lea.vmem %s3575_s9, %s2533_s17  ;;  %v2856_v4 = vld [vmem:[%s509_s16 + $0x8] sm:$0xff]   ;;  %s514_s30 = scalar_lea.vmem %s3568_s2, %s2973_s27 }
  0x14   : >> { %2598 = vmatpush3.bf16.msra.mxu1 %v2855_v3  ;;  %v2473_v6 = vld [vmem:[%s514_s30] ss:$0 sm:$0xff]  ;;  %s2977_s16 = smov 116   ;;  %s2978_s17 = smov 124  }
  0x15   : >> { %2599 = vmatprep.subr.bf16.mxu1 %v2975_v2  ;;  %s2979_s19 = smov 112   ;;  %s2980_s20 = smov 120  }
  0x16   : >> { %s2981_s22 = smov 104   ;;  %s2982_s23 = smov 108  }
  0x17   : >> { %s2983_s25 = smov 100   ;;  %s2984_s29 = smov 96  }
  0x18   : >> { %2600 = vmatpush3.bf16.msra.mxu1 %v2856_v4  ;;  %s2985_s30 = smov 64  }
  0x19   : >> { %2605 = vmatprep.subr.bf16.mxu1 %v2975_v2 }
  0x1b   : >> { %2602 = vmatmul.mubr.msk.bf16.vlgmr.msra.gmra.mrb[0].mxu1 %vm534_vm1, %v506_v5 }
  0x1c   : >> { %2607 = vmatprep.mubr.msk.bf16.mxu1 %vm2976_vm0, %v2975_v2 }
  0xee   : >> { %v572_v7 = vpop.f32.mrb[0].mxu1 }
  0xef   : >> { %v2603_v8 = vpop.f32.mrb[1].mxu1  ;;  %v573_v10 = vadd.f32 %v2473_v6, %v572_v7 }
  0xf0   : >> { %v575_v9 = vpop.f32.mrb[2].mxu1 }
  0xf1   : >> { %v576_v11 = vadd.f32 %v2473_v6, %v575_v9  ;;  %v2604_v12 = vpop.f32.mrb[3].mxu1 }
  0xf3   : >> { %v2830_v13 = vpack.i.bf16 %v576_v11, %v573_v10  ;;  %v623_v14 = vpack.c.bf16 %v576_v11, %v573_v10 }
  0xf5   : >> { %2831 = vrot.lane.b32.xlu1 %v2830_v13, %s2977_s16  ;;  %2821 = vrot.lane.b32.xlu0 %v2830_v13, %s2978_s17  ;;  %s2049_s16 = scalar_lea.vmem %s3572_s6, %s2973_s27 }
  0xf9   : >> { %2836 = vrot.lane.b32.xlu1 %v2830_v13, %s2979_s19  ;;  %2826 = vrot.lane.b32.xlu0 %v2830_v13, %s2980_s20  ;;  %s3401_s19 = scalar_lea.vmem %s3569_s3, %s3101_s28  ;;  %s2101_s28 = scalar_lea.vmem %s3574_s8, %s2973_s27 }
  0xfd   : >> { %2846 = vrot.lane.b32.xlu1 %v2830_v13, %s2981_s22  ;;  %2841 = vrot.lane.b32.xlu0 %v2830_v13, %s2982_s23  ;;  %s2035_s22 = scalar_lea.vmem %s3570_s4, %s2973_s27 }
 0x101   : >> { %2851 = vrot.lane.b32.xlu0 %v2830_v13, %s2983_s25  ;;  %632 = vrot.lane.b32.xlu1 %v623_v14, %s2984_s29  ;;  %s2047_s25 = scalar_lea.vmem %s3571_s5, %s2973_s27 }
 0x167   : >> { %v2832_v15 = vpop.permute.xlu1 %2831  ;;  %v2822_v16 = vpop.permute.xlu0 %2821 }
 0x168   : >> { %v2824_v17 = vunpack.i.h.bf16 %v2822_v16  ;;  %v2823_v18 = vunpack.i.l.bf16 %v2822_v16  ;;  %v2834_v19 = vunpack.i.h.bf16 %v2832_v15  ;;  %v2833_v20 = vunpack.i.l.bf16 %v2832_v15 }
 0x16a   : >> { %v624_v21 = vpack.c.bf16 %v2824_v17, %v2823_v18  ;;  %v3135_v26 = vpack.c.bf16 %v2834_v19, %v2833_v20 }
 0x16b   : >> { %v2837_v22 = vpop.permute.xlu1 %2836  ;;  %v2827_v23 = vpop.permute.xlu0 %2826 }
 0x16c   : >> { %v2829_v24 = vunpack.i.h.bf16 %v2827_v23  ;;  %v2828_v25 = vunpack.i.l.bf16 %v2827_v23  ;;  %683 = vrot.lane.b32.xlu0 %v624_v21, %s2984_s29  ;;  %v2839_v27 = vunpack.i.h.bf16 %v2837_v22  ;;  %v2838_v28 = vunpack.i.l.bf16 %v2837_v22 }
 0x16e   : >> { %v625_v29 = vpack.c.bf16 %v2829_v24, %v2828_v25  ;;  %v3140_v34 = vpack.c.bf16 %v2839_v27, %v2838_v28 }
 0x16f   : >> { %v2847_v30 = vpop.permute.xlu1 %2846  ;;  %v2842_v31 = vpop.permute.xlu0 %2841 }
 0x170   : >> { %v2844_v32 = vunpack.i.h.bf16 %v2842_v31  ;;  %v2843_v33 = vunpack.i.l.bf16 %v2842_v31  ;;  %783 = vrot.lane.b32.xlu0 %v3135_v26, %s2984_s29  ;;  %733 = vrot.lane.b32.xlu1 %v625_v29, %s2984_s29  ;;  %v2849_v35 = vunpack.i.h.bf16 %v2847_v30  ;;  %v2848_v36 = vunpack.i.l.bf16 %v2847_v30 }
 0x172   : >> { %v3142_v37 = vpack.c.bf16 %v2844_v32, %v2843_v33  ;;  %v3149_v43 = vpack.c.bf16 %v2849_v35, %v2848_v36 }
 0x173   : >> { %v2852_v38 = vpop.permute.xlu0 %2851  ;;  %v633_v39 = vpop.permute.xlu1 %632 }
 0x174   : >> { %v2854_v40 = vunpack.i.h.bf16 %v2852_v38  ;;  %v2853_v41 = vunpack.i.l.bf16 %v2852_v38  ;;  %v639_v42 = vsel %vm634_vm2, %v633_v39, 0  ;;  %883 = vrot.lane.b32.xlu0 %v3142_v37, %s2984_s29  ;;  %833 = vrot.lane.b32.xlu1 %v3140_v34, %s2984_s29 }
 0x175   : >> { %2606 = vmatpush3.bf16.xpose.msra.mxu1 %v639_v42 }
 0x176   : >> { %v3151_v44 = vpack.c.bf16 %v2854_v40, %v2853_v41  ;;  %2611 = vmatprep.subr.bf16.mxu1 %v2975_v2 }
 0x178   : >> { %983 = vrot.lane.b32.xlu0 %v3151_v44, %s2984_s29  ;;  %933 = vrot.lane.b32.xlu1 %v3149_v43, %s2984_s29 }
 0x17c   : >> { %1233 = vrot.lane.b32.xlu0 %v623_v14, %s2985_s30  ;;  %1280 = vrot.lane.b32.xlu1 %v624_v21, %s2985_s30 }
 0x17d   : >> { %2608 = vmatmul.mubr.msk.bf16.vlgmr.msra.gmra.mrb[4].mxu1 %vm634_vm2, %v623_v14 }
 0x17e   : >> { %2613 = vmatprep.mubr.msk.bf16.mxu1 %vm2976_vm0, %v2975_v2 }
 0x180   : >> { %1327 = vrot.lane.b32.xlu1 %v625_v29, %s2985_s30 }
 0x1de   : >> { %v684_v45 = vpop.permute.xlu0 %683 }
 0x1df   : >> { %v689_v46 = vsel %vm634_vm2, %v684_v45, 0 }
 0x1e0   : >> { %2612 = vmatpush3.bf16.xpose.msra.mxu1 %v689_v46 }
 0x1e1   : >> { %2617 = vmatprep.subr.bf16.mxu1 %v2975_v2 }
 0x1e2   : >> { %v784_v47 = vpop.permute.xlu0 %783  ;;  %v734_v49 = vpop.permute.xlu1 %733 }
 0x1e3   : >> { %v789_v48 = vsel %vm634_vm2, %v784_v47, 0  ;;  %v739_v50 = vsel %vm634_vm2, %v734_v49, 0 }
 0x1e4   : >> { %2624 = vmatpush3.bf16.xpose.msra.mxu0 %v789_v48 }
 0x1e5   : >> { %2635 = vmatprep.subr.bf16.mxu0 %v2975_v2 }
 0x1e6   : >> { %v884_v51 = vpop.permute.xlu0 %883  ;;  %v834_v53 = vpop.permute.xlu1 %833 }
 0x1e7   : >> { %2614 = vmatmul.mubr.msk.bf16.vlgmr.msra.gmra.mrb[8].mxu1 %vm634_vm2, %v624_v21  ;;  %v889_v52 = vsel %vm634_vm2, %v884_v51, 0  ;;  %v839_v54 = vsel %vm634_vm2, %v834_v53, 0 }
 0x1e8   : >> { %2618 = vmatpush3.bf16.xpose.msra.mxu1 %v739_v50  ;;  %2619 = vmatprep.mubr.msk.bf16.mxu1 %vm2976_vm0, %v2975_v2 }
 0x1e9   : >> { %2629 = vmatprep.subr.bf16.mxu1 %v2975_v2 }
 0x1ea   : >> { %v984_v55 = vpop.permute.xlu0 %983  ;;  %v934_v57 = vpop.permute.xlu1 %933 }
 0x1eb   : >> { %2626 = vmatmul.mubr.msk.bf16.vlgmr.msra.gmra.mrb[0].mxu0 %vm634_vm2, %v3135_v26  ;;  %v989_v56 = vsel %vm634_vm2, %v984_v55, 0  ;;  %v939_v58 = vsel %vm634_vm2, %v934_v57, 0 }
 0x1ec   : >> { %2636 = vmatpush3.bf16.xpose.msra.mxu0 %v889_v52  ;;  %2637 = vmatprep.mubr.msk.bf16.mxu0 %vm2976_vm0, %v2975_v2 }
 0x1ed   : >> { %2647 = vmatprep.subr.bf16.mxu0 %v2975_v2 }
 0x1ee   : >> { %v1281_v59 = vpop.permute.xlu1 %1280  ;;  %v1234_v60 = vpop.permute.xlu0 %1233 }
 0x1ef   : >> { %2620 = vmatmul.mubr.msk.bf16.vlgmr.msra.gmra.mrb[12].mxu1 %vm634_vm2, %v625_v29 }
 0x1f0   : >> { %2630 = vmatpush3.bf16.xpose.msra.mxu1 %v839_v54  ;;  %2631 = vmatprep.mubr.msk.bf16.mxu1 %vm2976_vm0, %v2975_v2 }
 0x1f1   : >> { %2641 = vmatprep.subr.bf16.mxu1 %v2975_v2 }
 0x1f3   : >> { %2638 = vmatmul.mubr.msk.bf16.vlgmr.msra.gmra.mrb[4].mxu0 %vm634_vm2, %v3142_v37 }
 0x1f4   : >> { %2648 = vmatpush3.bf16.xpose.msra.mxu0 %v989_v56  ;;  %2649 = vmatprep.mubr.msk.bf16.mxu0 %vm2976_vm0, %v2975_v2 }
 0x1f5   : >> { %2659 = vmatprep.subr.bf16.mxu0 %v2975_v2 }
 0x1f7   : >> { %2632 = vmatmul.mubr.msk.bf16.vlgmr.msra.gmra.mrb[16].mxu1 %vm634_vm2, %v3140_v34 }
 0x1f8   : >> { %2642 = vmatpush3.bf16.xpose.msra.mxu1 %v939_v58  ;;  %2643 = vmatprep.mubr.msk.bf16.mxu1 %vm2976_vm0, %v2975_v2 }
 0x1f9   : >> { %2653 = vmatprep.subr.bf16.mxu1 %v2975_v2 }
 0x1fb   : >> { %2650 = vmatmul.mubr.msk.bf16.vlgmr.msra.gmra.mrb[8].mxu0 %vm634_vm2, %v3151_v44 }
 0x1fc   : >> { %2660 = vmatpush3.bf16.msra.mxu0 %v1281_v59  ;;  %2661 = vmatprep.mubr.msk.bf16.mxu0 %vm2976_vm0, %v2975_v2 }
 0x1fd   : >> { %2671 = vmatprep.subr.bf16.mxu0 %v2975_v2 }
 0x1ff   : >> { %2644 = vmatmul.mubr.msk.bf16.vlgmr.msra.gmra.mrb[20].mxu1 %vm634_vm2, %v3149_v43 }
 0x200   : >> { %2654 = vmatpush3.bf16.msra.mxu1 %v1234_v60  ;;  %2655 = vmatprep.mubr.msk.bf16.mxu1 %vm2976_vm0, %v2975_v2 }
 0x201   : >> { %2665 = vmatprep.subr.bf16.mxu1 %v2975_v2 }
 0x250   : >> { %v675_v61 = vpop.f32.mrb[4].mxu1 }
 0x251   : >> { %v3206_v62 = vmul.f32 0.5, %v675_v61  ;;  %v2609_v63 = vpop.f32.mrb[5].mxu1 }
 0x252   : >> { %v678_v3 = vpop.f32.mrb[6].mxu1 }
 0x253   : >> { %v3208_v4 = vmul.f32 0.5, %v678_v3  ;;  %v2610_v5 = vpop.f32.mrb[7].mxu1  ;;  %v1049_v6 = vsel %vm1048_vm3, %v3206_v62, -inf }
 0x254   : >> { %1050 = vmax.xlane.f32.xlu1 %v1049_v6 }
 0x255   : >> { %v1052_v7 = vsel %vm1048_vm3, %v3208_v4, -inf }
 0x256   : >> { %1053 = vmax.xlane.f32.xlu0 %v1052_v7 }
 0x2ba   : >> { %v725_v8 = vpop.f32.mrb[8].mxu1 }
 0x2bb   : >> { %v3214_v9 = vmul.f32 0.5, %v725_v8  ;;  %v2615_v10 = vpop.f32.mrb[9].mxu1 }
 0x2bc   : >> { %v728_v11 = vpop.f32.mrb[10].mxu1 }
 0x2bd   : >> { %v3216_v12 = vmul.f32 0.5, %v728_v11  ;;  %v2616_v13 = vpop.f32.mrb[11].mxu1  ;;  %v1055_v14 = vsel %vm1048_vm3, %v3214_v9, -inf  ;;  %v3276_v11 = vpop.permute.xlu1 %1327 }
 0x2be   : >> { %v825_v15 = vpop.f32.mrb[0].mxu0  ;;  %1056 = vmax.xlane.f32.xlu0 %v1055_v14 }
 0x2bf   : >> { %v3220_v16 = vmul.f32 0.5, %v825_v15  ;;  %v2627_v17 = vpop.f32.mrb[1].mxu0  ;;  %v1058_v18 = vsel %vm1048_vm3, %v3216_v12, -inf }
 0x2c0   : >> { %v828_v19 = vpop.f32.mrb[2].mxu0  ;;  %1059 = vmax.xlane.f32.xlu1 %v1058_v18 }
 0x2c1   : >> { %v3224_v20 = vmul.f32 0.5, %v828_v19  ;;  %v2628_v21 = vpop.f32.mrb[3].mxu0  ;;  %v1067_v22 = vsel %vm1048_vm3, %v3220_v16, -inf }
 0x2c2   : >> { %1068 = vmax.xlane.f32.xlu0 %v1067_v22  ;;  %v775_v23 = vpop.f32.mrb[12].mxu1 }
 0x2c3   : >> { %v3228_v24 = vmul.f32 0.5, %v775_v23  ;;  %v2621_v25 = vpop.f32.mrb[13].mxu1  ;;  %v1070_v27 = vsel %vm1048_vm3, %v3224_v20, -inf }
 0x2c4   : >> { %1071 = vmax.xlane.f32.xlu1 %v1070_v27  ;;  %v778_v28 = vpop.f32.mrb[14].mxu1 }
 0x2c5   : >> { %v3232_v29 = vmul.f32 0.5, %v778_v28  ;;  %v2622_v30 = vpop.f32.mrb[15].mxu1  ;;  %v1061_v31 = vsel %vm1048_vm3, %v3228_v24, -inf }
 0x2c6   : >> { %v925_v32 = vpop.f32.mrb[4].mxu0  ;;  %1062 = vmax.xlane.f32.xlu0 %v1061_v31 }
 0x2c7   : >> { %v3236_v33 = vmul.f32 0.5, %v925_v32  ;;  %v2639_v35 = vpop.f32.mrb[5].mxu0  ;;  %v1064_v36 = vsel %vm1048_vm3, %v3232_v29, -inf }
 0x2c8   : >> { %v928_v38 = vpop.f32.mrb[6].mxu0  ;;  %1065 = vmax.xlane.f32.xlu1 %v1064_v36 }
 0x2c9   : >> { %v3240_v39 = vmul.f32 0.5, %v928_v38  ;;  %v2640_v40 = vpop.f32.mrb[7].mxu0  ;;  %v1079_v41 = vsel %vm1048_vm3, %v3236_v33, -inf }
 0x2ca   : >> { %1080 = vmax.xlane.f32.xlu0 %v1079_v41  ;;  %v875_v42 = vpop.f32.mrb[16].mxu1 }
 0x2cb   : >> { %v3244_v45 = vmul.f32 0.5, %v875_v42  ;;  %v2633_v46 = vpop.f32.mrb[17].mxu1  ;;  %v1082_v47 = vsel %vm1048_vm3, %v3240_v39, -inf }
 0x2cc   : >> { %1083 = vmax.xlane.f32.xlu1 %v1082_v47  ;;  %v878_v48 = vpop.f32.mrb[18].mxu1 }
 0x2cd   : >> { %v3248_v49 = vmul.f32 0.5, %v878_v48  ;;  %v2634_v50 = vpop.f32.mrb[19].mxu1  ;;  %v1073_v51 = vsel %vm1048_vm3, %v3244_v45, -inf }
 0x2ce   : >> { %v1025_v52 = vpop.f32.mrb[8].mxu0  ;;  %1074 = vmax.xlane.f32.xlu0 %v1073_v51 }
 0x2cf   : >> { %v3252_v53 = vmul.f32 0.5, %v1025_v52  ;;  %v2651_v54 = vpop.f32.mrb[9].mxu0  ;;  %v1076_v55 = vsel %vm1048_vm3, %v3248_v49, -inf }
 0x2d0   : >> { %v1028_v56 = vpop.f32.mrb[10].mxu0  ;;  %1077 = vmax.xlane.f32.xlu1 %v1076_v55 }
 0x2d1   : >> { %v3256_v57 = vmul.f32 0.5, %v1028_v56  ;;  %v2652_v58 = vpop.f32.mrb[11].mxu0  ;;  %v1091_v59 = vsel %vm1048_vm3, %v3252_v53, -inf }
 0x2d2   : >> { %1092 = vmax.xlane.f32.xlu0 %v1091_v59  ;;  %v975_v60 = vpop.f32.mrb[20].mxu1 }
 0x2d3   : >> { %v3260_v61 = vmul.f32 0.5, %v975_v60  ;;  %v2645_v63 = vpop.f32.mrb[21].mxu1  ;;  %v1094_v3 = vsel %vm1048_vm3, %v3256_v57, -inf }
 0x2d4   : >> { %1095 = vmax.xlane.f32.xlu1 %v1094_v3  ;;  %v978_v5 = vpop.f32.mrb[22].mxu1 }
 0x2d5   : >> { %v3264_v6 = vmul.f32 0.5, %v978_v5  ;;  %v2646_v7 = vpop.f32.mrb[23].mxu1  ;;  %v1085_v8 = vsel %vm1048_vm3, %v3260_v61, -inf }
 0x2d6   : >> { %1086 = vmax.xlane.f32.xlu0 %v1085_v8 }
 0x2d7   : >> { %v1088_v10 = vsel %vm1048_vm3, %v3264_v6, -inf }
 0x2d8   : >> { %1089 = vmax.xlane.f32.xlu1 %v1088_v10 }
 0x2e1   : >> { %v1051_v14 = vpop.xlane.xlu1 %1050 }
 0x2e2   : >> { %v1097_v17 = vsub.f32 %v3206_v62, %v1051_v14 }
 0x2e3   : >> { %v1054_v13 = vpop.xlane.xlu0 %1053 }
 0x2e4   : >> { %v1098_v15 = vsub.f32 %v3208_v4, %v1054_v13  ;;  %v1113_v19 = vmul.f32 1.442695, %v1097_v17 }
 0x2e6   : >> { %v1115_v18 = vmul.f32 1.442695, %v1098_v15 }
 0x2e8   : >> { %2867 = vpow2.f32 %v1115_v18 }
 0x2e9   : >> { %1421 = vrot.lane.b32.xlu1 %v3140_v34, %s2985_s30  ;;  %2869 = vpow2.f32 %v1113_v19 }
 0x2ec   : >> { %1374 = vrot.lane.b32.xlu0 %v3135_v26, %s2985_s30 }
 0x2f0   : >> { %1468 = vrot.lane.b32.xlu0 %v3142_v37, %s2985_s30 }
 0x2f2   : >> { %v3280_v21 = vpop.eup %2867 }
 0x2f3   : >> { %v3282_v34 = vpop.eup %2869  ;;  %v1148_v26 = vsel %vm1048_vm3, %v3280_v21, 0.0 }
 0x2f4   : >> { %v1145_v37 = vsel %vm1048_vm3, %v3282_v34, 0.0 }
 0x30d   : >> { %1149 = vadd.xlane.f32.xlu1 %v1148_v26 }
 0x30f   : >> { %1146 = vadd.xlane.f32.xlu0 %v1145_v37 }
 0x34b   : >> { %v1057_v22 = vpop.xlane.xlu0 %1056 }
 0x34c   : >> { %v1099_v4 = vsub.f32 %v3214_v9, %v1057_v22 }
 0x34d   : >> { %v1060_v62 = vpop.xlane.xlu1 %1059 }
 0x34e   : >> { %v1117_v23 = vmul.f32 1.442695, %v1099_v4  ;;  %v1100_v25 = vsub.f32 %v3216_v12, %v1060_v62 }
 0x34f   : >> { %v1069_v27 = vpop.xlane.xlu0 %1068 }
 0x350   : >> { %2871 = vpow2.f32 %v1117_v23  ;;  %v1119_v28 = vmul.f32 1.442695, %v1100_v25  ;;  %v1103_v30 = vsub.f32 %v3220_v16, %v1069_v27 }
 0x351   : >> { %v1072_v31 = vpop.xlane.xlu1 %1071 }
 0x352   : >> { %2873 = vpow2.f32 %v1119_v28  ;;  %v1125_v32 = vmul.f32 1.442695, %v1103_v30  ;;  %v1104_v35 = vsub.f32 %v3224_v20, %v1072_v31 }
 0x353   : >> { %v1063_v36 = vpop.xlane.xlu0 %1062 }
 0x354   : >> { %2875 = vpow2.f32 %v1125_v32  ;;  %v1127_v38 = vmul.f32 1.442695, %v1104_v35  ;;  %v1101_v40 = vsub.f32 %v3228_v24, %v1063_v36 }
 0x355   : >> { %v1066_v9 = vpop.xlane.xlu1 %1065 }
 0x356   : >> { %2877 = vpow2.f32 %v1127_v38  ;;  %v1121_v41 = vmul.f32 1.442695, %v1101_v40  ;;  %v1102_v12 = vsub.f32 %v3232_v29, %v1066_v9 }
 0x357   : >> { %v1081_v42 = vpop.xlane.xlu0 %1080 }
 0x358   : >> { %2879 = vpow2.f32 %v1121_v41  ;;  %v1123_v46 = vmul.f32 1.442695, %v1102_v12  ;;  %v1107_v16 = vsub.f32 %v3236_v33, %v1081_v42 }
 0x359   : >> { %v1084_v47 = vpop.xlane.xlu1 %1083 }
 0x35a   : >> { %v3295_v48 = vpop.eup %2871  ;;  %2881 = vpow2.f32 %v1123_v46  ;;  %v1133_v20 = vmul.f32 1.442695, %v1107_v16  ;;  %v1108_v50 = vsub.f32 %v3240_v39, %v1084_v47 }
 0x35b   : >> { %v1075_v51 = vpop.xlane.xlu0 %1074  ;;  %v1151_v24 = vsel %vm1048_vm3, %v3295_v48, 0.0 }
 0x35c   : >> { %v3300_v52 = vpop.eup %2873  ;;  %2883 = vpow2.f32 %v1133_v20  ;;  %v1135_v29 = vmul.f32 1.442695, %v1108_v50  ;;  %v1105_v54 = vsub.f32 %v3244_v45, %v1075_v51  ;;  %1152 = vadd.xlane.f32.xlu0 %v1151_v24 }
 0x35d   : >> { %v1078_v55 = vpop.xlane.xlu1 %1077  ;;  %v1154_v33 = vsel %vm1048_vm3, %v3300_v52, 0.0 }
 0x35e   : >> { %v3305_v56 = vpop.eup %2875  ;;  %2885 = vpow2.f32 %v1135_v29  ;;  %v1129_v58 = vmul.f32 1.442695, %v1105_v54  ;;  %v1106_v39 = vsub.f32 %v3248_v49, %v1078_v55  ;;  %1155 = vadd.xlane.f32.xlu1 %v1154_v33 }
 0x35f   : >> { %v1093_v59 = vpop.xlane.xlu0 %1092  ;;  %v1163_v60 = vsel %vm1048_vm3, %v3305_v56, 0.0 }
 0x360   : >> { %v3310_v63 = vpop.eup %2877  ;;  %2887 = vpow2.f32 %v1129_v58  ;;  %v1131_v45 = vmul.f32 1.442695, %v1106_v39  ;;  %v1111_v3 = vsub.f32 %v3252_v53, %v1093_v59  ;;  %1164 = vadd.xlane.f32.xlu0 %v1163_v60 }
 0x361   : >> { %v1096_v5 = vpop.xlane.xlu1 %1095  ;;  %v1166_v7 = vsel %vm1048_vm3, %v3310_v63, 0.0 }
 0x362   : >> { %v3315_v8 = vpop.eup %2879  ;;  %2889 = vpow2.f32 %v1131_v45  ;;  %v1141_v49 = vmul.f32 1.442695, %v1111_v3  ;;  %v1112_v10 = vsub.f32 %v3256_v57, %v1096_v5  ;;  %1167 = vadd.xlane.f32.xlu1 %v1166_v7 }
 0x363   : >> { %v1087_v13 = vpop.xlane.xlu0 %1086  ;;  %v1157_v14 = vsel %vm1048_vm3, %v3315_v8, 0.0 }
 0x364   : >> { %v3320_v15 = vpop.eup %2881  ;;  %2891 = vpow2.f32 %v1141_v49  ;;  %v1143_v53 = vmul.f32 1.442695, %v1112_v10  ;;  %v1109_v17 = vsub.f32 %v3260_v61, %v1087_v13  ;;  %1158 = vadd.xlane.f32.xlu0 %v1157_v14 }
 0x365   : >> { %v1090_v18 = vpop.xlane.xlu1 %1089  ;;  %v1160_v19 = vsel %vm1048_vm3, %v3320_v15, 0.0 }
 0x366   : >> { %v3325_v26 = vpop.eup %2883  ;;  %2893 = vpow2.f32 %v1143_v53  ;;  %v1137_v57 = vmul.f32 1.442695, %v1109_v17  ;;  %v1110_v37 = vsub.f32 %v3264_v6, %v1090_v18  ;;  %1161 = vadd.xlane.f32.xlu1 %v1160_v19 }
 0x367   : >> { %v1175_v22 = vsel %vm1048_vm3, %v3325_v26, 0.0  ;;  %v1375_v9 = vpop.permute.xlu0 %1374 }
 0x368   : >> { %v3330_v4 = vpop.eup %2885  ;;  %2895 = vpow2.f32 %v1137_v57  ;;  %v1139_v62 = vmul.f32 1.442695, %v1110_v37  ;;  %1176 = vadd.xlane.f32.xlu0 %v1175_v22 }
 0x369   : >> { %v1178_v61 = vsel %vm1048_vm3, %v3330_v4, 0.0  ;;  %v3362_v41 = vpop.permute.xlu1 %1421 }
 0x36a   : >> { %v3334_v23 = vpop.eup %2887  ;;  %2897 = vpow2.f32 %v1139_v62  ;;  %1179 = vadd.xlane.f32.xlu1 %v1178_v61 }
 0x36b   : >> { %v1169_v25 = vsel %vm1048_vm3, %v3334_v23, 0.0  ;;  %v3364_v12 = vpop.permute.xlu0 %1468 }
 0x36c   : >> { %v3338_v6 = vpop.eup %2889  ;;  %1170 = vadd.xlane.f32.xlu0 %v1169_v25 }
 0x36d   : >> { %v1172_v27 = vsel %vm1048_vm3, %v3338_v6, 0.0 }
 0x36e   : >> { %v3342_v28 = vpop.eup %2891  ;;  %1173 = vadd.xlane.f32.xlu1 %v1172_v27 }
 0x36f   : >> { %v1187_v30 = vsel %vm1048_vm3, %v3342_v28, 0.0 }
 0x370   : >> { %v3346_v31 = vpop.eup %2893  ;;  %1188 = vadd.xlane.f32.xlu0 %v1187_v30 }
 0x371   : >> { %v1190_v32 = vsel %vm1048_vm3, %v3346_v31, 0.0 }
 0x372   : >> { %v3350_v35 = vpop.eup %2895  ;;  %1191 = vadd.xlane.f32.xlu1 %v1190_v32 }
 0x373   : >> { %v1181_v36 = vsel %vm1048_vm3, %v3350_v35, 0.0 }
 0x374   : >> { %v3354_v38 = vpop.eup %2897  ;;  %1182 = vadd.xlane.f32.xlu0 %v1181_v36 }
 0x375   : >> { %v1184_v40 = vsel %vm1048_vm3, %v3354_v38, 0.0 }
 0x376   : >> { %1185 = vadd.xlane.f32.xlu1 %v1184_v40  ;;  %v1620_v40 = vld [vmem:[%s3401_s19] sm:$0x3] }
 0x387   : >> { %1515 = vrot.lane.b32.xlu1 %v3149_v43, %s2985_s30 }
 0x38a   : >> { %1562 = vrot.lane.b32.xlu0 %v3151_v44, %s2985_s30 }
 0x39a   : >> { %v1150_v42 = vpop.xlane.xlu1 %1149 }
 0x39b   : >> { %2899 = vrcp.f32 %v1150_v42 }
 0x39c   : >> { %v1147_v46 = vpop.xlane.xlu0 %1146 }
 0x39d   : >> { %2901 = vrcp.f32 %v1147_v46  ;;  %v1633_v46 = vsel %vm1631_vm4, %v1620_v40, 0 }
 0x3a5   : >> { %v2900_v16 = vpop.eup %2899 }
 0x3a6   : >> { %v1210_v20 = vmul.f32 %v2900_v16, %v3280_v21  ;;  %v1622_v16 = vld [vmem:[%s3401_s19 + $0x4] sm:$0x3] }
 0x3a7   : >> { %v2902_v47 = vpop.eup %2901 }
 0x3a8   : >> { %v1209_v50 = vmul.f32 %v2902_v47, %v3282_v34 }
 0x3aa   : >> { %v1225_v51 = vpack.c.bf16 %v1210_v20, %v1209_v50 }
 0x3ac   : >> { %2656 = vmatmul.mubr.msk.bf16.vlgmr.msra.gmra.mrb[24].mxu1 %vm1048_vm3, %v1225_v51 }
 0x3ad   : >> { %2666 = vmatpush3.bf16.msra.mxu1 %v3276_v11  ;;  %2667 = vmatprep.mubr.msk.bf16.mxu1 %vm2976_vm0, %v2975_v2 }
 0x3ae   : >> { %2677 = vmatprep.subr.bf16.mxu1 %v2975_v2 }
 0x3e9   : >> { %v1153_v43 = vpop.xlane.xlu0 %1152 }
 0x3ea   : >> { %2903 = vrcp.f32 %v1153_v43  ;;  %v1727_v43 = vsel %vm1631_vm4, %v1622_v16, 0 }
 0x3eb   : >> { %v1156_v44 = vpop.xlane.xlu1 %1155 }
 0x3ec   : >> { %2905 = vrcp.f32 %v1156_v44 }
 0x3ed   : >> { %v1165_v24 = vpop.xlane.xlu0 %1164 }
 0x3ef   : >> { %v1168_v29 = vpop.xlane.xlu1 %1167 }
 0x3f0   : >> { %2907 = vrcp.f32 %v1168_v29 }
 0x3f1   : >> { %2909 = vrcp.f32 %v1165_v24  ;;  %v1159_v21 = vpop.xlane.xlu0 %1158  ;;  %v1623_v24 = vld [vmem:[%s3401_s19 + $0x6] sm:$0x3] }
 0x3f2   : >> { %2911 = vrcp.f32 %v1159_v21 }
 0x3f3   : >> { %v1162_v34 = vpop.xlane.xlu1 %1161 }
 0x3f4   : >> { %v2904_v54 = vpop.eup %2903  ;;  %2913 = vrcp.f32 %v1162_v34 }
 0x3f5   : >> { %v1177_v55 = vpop.xlane.xlu0 %1176  ;;  %v1211_v33 = vmul.f32 %v2904_v54, %v3295_v48 }
 0x3f6   : >> { %v2906_v11 = vpop.eup %2905 }
 0x3f7   : >> { %v1212_v58 = vmul.f32 %v2906_v11, %v3300_v52  ;;  %v1180_v39 = vpop.xlane.xlu1 %1179 }
 0x3f8   : >> { %2915 = vrcp.f32 %v1180_v39  ;;  %v1625_v39 = vld [vmem:[%s3401_s19 + $0xa] sm:$0x3] }
 0x3f9   : >> { %2917 = vrcp.f32 %v1177_v55  ;;  %v1171_v59 = vpop.xlane.xlu0 %1170  ;;  %v1226_v60 = vpack.c.bf16 %v1212_v58, %v1211_v33  ;;  %v1774_v55 = vsel %vm1631_vm4, %v1623_v24, 0  ;;  %v1624_v58 = vld [vmem:[%s3401_s19 + $0x8] sm:$0x3] }
 0x3fa   : >> { %v2908_v45 = vpop.eup %2907  ;;  %2919 = vrcp.f32 %v1171_v59 }
 0x3fb   : >> { %v2910_v3 = vpop.eup %2909  ;;  %2662 = vmatmul.mubr.msk.bf16.vlgmr.msra.gmra.mrb[12].mxu0 %vm1048_vm3, %v1226_v60  ;;  %v1174_v5 = vpop.xlane.xlu1 %1173  ;;  %v1216_v48 = vmul.f32 %v2908_v45, %v3310_v63 }
 0x3fc   : >> { %v2912_v7 = vpop.eup %2911  ;;  %2672 = vmatpush3.bf16.msra.mxu0 %v1375_v9  ;;  %2921 = vrcp.f32 %v1174_v5  ;;  %2673 = vmatprep.mubr.msk.bf16.mxu0 %vm2976_vm0, %v2975_v2  ;;  %v1215_v10 = vmul.f32 %v2910_v3, %v3305_v56 }
 0x3fd   : >> { %v1189_v52 = vpop.xlane.xlu0 %1188  ;;  %2683 = vmatprep.subr.bf16.mxu0 %v2975_v2  ;;  %v1213_v13 = vmul.f32 %v2912_v7, %v3315_v8 }
 0x3fe   : >> { %v2914_v49 = vpop.eup %2913  ;;  %v1228_v19 = vpack.c.bf16 %v1216_v48, %v1215_v10  ;;  %v1868_v10 = vsel %vm1631_vm4, %v1625_v39, 0 }
 0x3ff   : >> { %v1214_v14 = vmul.f32 %v2914_v49, %v3320_v15  ;;  %v1192_v53 = vpop.xlane.xlu1 %1191  ;;  %v1821_v49 = vsel %vm1631_vm4, %v1624_v58, 0 }
 0x400   : >> { %2923 = vrcp.f32 %v1192_v53  ;;  %v1626_v53 = vld [vmem:[%s3401_s19 + $0xc] sm:$0x3] }
 0x401   : >> { %2925 = vrcp.f32 %v1189_v52  ;;  %v1183_v17 = vpop.xlane.xlu0 %1182  ;;  %v1227_v18 = vpack.c.bf16 %v1214_v14, %v1213_v13 }
 0x402   : >> { %v2916_v57 = vpop.eup %2915  ;;  %2927 = vrcp.f32 %v1183_v17  ;;  %v1627_v17 = vld [vmem:[%s3401_s19 + $0xe] sm:$0x3] }
 0x403   : >> { %v2918_v37 = vpop.eup %2917  ;;  %2668 = vmatmul.mubr.msk.bf16.vlgmr.msra.gmra.mrb[28].mxu1 %vm1048_vm3, %v1227_v18  ;;  %2674 = vmatmul.mubr.msk.bf16.vlgmr.msra.gmra.mrb[16].mxu0 %vm1048_vm3, %v1228_v19  ;;  %v1186_v63 = vpop.xlane.xlu1 %1185  ;;  %v1220_v56 = vmul.f32 %v2916_v57, %v3330_v4 }
 0x404   : >> { %v2920_v22 = vpop.eup %2919  ;;  %2678 = vmatpush3.bf16.msra.mxu1 %v3362_v41  ;;  %2684 = vmatpush3.bf16.msra.mxu0 %v3364_v12  ;;  %2929 = vrcp.f32 %v1186_v63  ;;  %v1219_v15 = vmul.f32 %v2918_v37, %v3325_v26 }
 0x405   : >> { %2679 = vmatprep.mubr.msk.bf16.mxu1 %vm2976_vm0, %v2975_v2  ;;  %2685 = vmatprep.mubr.msk.bf16.mxu0 %vm2976_vm0, %v2975_v2  ;;  %v1217_v62 = vmul.f32 %v2920_v22, %v3334_v23  ;;  %v1563_v32 = vpop.permute.xlu0 %1562 }
 0x406   : >> { %v2922_v8 = vpop.eup %2921  ;;  %2689 = vmatprep.subr.bf16.mxu1 %v2975_v2  ;;  %2695 = vmatprep.subr.bf16.mxu0 %v2975_v2  ;;  %v1230_v27 = vpack.c.bf16 %v1220_v56, %v1219_v15  ;;  %v1915_v15 = vsel %vm1631_vm4, %v1626_v53, 0 }
 0x407   : >> { %v1218_v61 = vmul.f32 %v2922_v8, %v3338_v6  ;;  %v1516_v36 = vpop.permute.xlu1 %1515 }
 0x409   : >> { %v1229_v25 = vpack.c.bf16 %v1218_v61, %v1217_v62  ;;  %v1962_v62 = vsel %vm1631_vm4, %v1627_v17, 0 }
 0x40a   : >> { %v2924_v4 = vpop.eup %2923 }
 0x40b   : >> { %v2926_v30 = vpop.eup %2925  ;;  %2680 = vmatmul.mubr.msk.bf16.vlgmr.msra.gmra.mrb[32].mxu1 %vm1048_vm3, %v1229_v25  ;;  %2686 = vmatmul.mubr.msk.bf16.vlgmr.msra.gmra.mrb[20].mxu0 %vm1048_vm3, %v1230_v27  ;;  %v1224_v23 = vmul.f32 %v2924_v4, %v3346_v31 }
 0x40c   : >> { %v2928_v26 = vpop.eup %2927  ;;  %2690 = vmatpush3.bf16.msra.mxu1 %v1516_v36  ;;  %2696 = vmatpush3.bf16.msra.mxu0 %v1563_v32  ;;  %v1223_v9 = vmul.f32 %v2926_v30, %v3342_v28  ;;  %v1621_v28 = vld [vmem:[%s3401_s19 + $0x2] sm:$0x3] }
 0x40d   : >> { %2691 = vmatprep.mubr.msk.bf16.mxu1 %vm2976_vm0, %v2975_v2  ;;  %2697 = vmatprep.mubr.msk.bf16.mxu0 %vm2976_vm0, %v2975_v2  ;;  %v1221_v41 = vmul.f32 %v2928_v26, %v3350_v35  ;;  %v1680_v35 = vsel %vm1631_vm4, %v1621_v28, 0 }
 0x40e   : >> { %v2930_v6 = vpop.eup %2929  ;;  %2701 = vmatprep.subr.bf16.mxu1 %v2975_v2  ;;  %2707 = vmatprep.subr.bf16.mxu0 %v2975_v2  ;;  %v1232_v42 = vpack.c.bf16 %v1224_v23, %v1223_v9 }
 0x40f   : >> { %v1222_v31 = vmul.f32 %v2930_v6, %v3354_v38 }
 0x411   : >> { %v1231_v12 = vpack.c.bf16 %v1222_v31, %v1221_v41 }
 0x413   : >> { %2692 = vmatmul.mubr.msk.bf16.vlgmr.msra.gmra.mrb[36].mxu1 %vm1048_vm3, %v1231_v12  ;;  %2698 = vmatmul.mubr.msk.bf16.vlgmr.msra.gmra.mrb[24].mxu0 %vm1048_vm3, %v1232_v42 }
 0x414   : >> { %2702 = vmatpush3.bf16.msra.mxu1 %v1633_v46  ;;  %2703 = vmatprep.mubr.msk.bf16.mxu1 %vm2976_vm0, %v2975_v2 }
 0x415   : >> { %2709 = vmatprep.mubr.msk.bf16.mxu0 %vm2976_vm0, %v2975_v2  ;;  %2713 = vmatprep.subr.bf16.mxu1 %v2975_v2 }
 0x416   : >> { %2708 = vmatpush3.bf16.msra.mxu0 %v1680_v35 }
 0x417   : >> { %2719 = vmatprep.subr.bf16.mxu0 %v2975_v2 }
 0x47f   : >> { %v1273_v38 = vpop.f32.mrb[24].mxu1 }
 0x480   : >> { %v2657_v47 = vpop.f32.mrb[25].mxu1 }
 0x481   : >> { %v1276_v20 = vpop.f32.mrb[26].mxu1 }
 0x482   : >> { %v1609_v50 = vpack.c.bf16 %v1276_v20, %v1273_v38  ;;  %v2658_v51 = vpop.f32.mrb[27].mxu1 }
 0x484   : >> { %2704 = vmatmul.mubr.msk.bf16.vlgmr.msra.gmra.mrb[40].mxu1 %vm634_vm2, %v1609_v50 }
 0x485   : >> { %2714 = vmatpush3.bf16.msra.mxu1 %v1727_v43  ;;  %2715 = vmatprep.mubr.msk.bf16.mxu1 %vm2976_vm0, %v2975_v2 }
 0x486   : >> { %2725 = vmatprep.subr.bf16.mxu1 %v2975_v2 }
 0x4ce   : >> { %v1320_v44 = vpop.f32.mrb[12].mxu0 }
 0x4cf   : >> { %v2663_v29 = vpop.f32.mrb[13].mxu0 }
 0x4d0   : >> { %v1323_v21 = vpop.f32.mrb[14].mxu0 }
 0x4d1   : >> { %v1610_v34 = vpack.c.bf16 %v1323_v21, %v1320_v44  ;;  %v2664_v54 = vpop.f32.mrb[15].mxu0 }
 0x4d3   : >> { %2710 = vmatmul.mubr.msk.bf16.vlgmr.msra.gmra.mrb[28].mxu0 %vm634_vm2, %v1610_v34 }
 0x4d4   : >> { %2720 = vmatpush3.bf16.msra.mxu0 %v1774_v55  ;;  %2721 = vmatprep.mubr.msk.bf16.mxu0 %vm2976_vm0, %v2975_v2 }
 0x4d5   : >> { %2731 = vmatprep.subr.bf16.mxu0 %v2975_v2 }
 0x4d6   : >> { %v1367_v11 = vpop.f32.mrb[28].mxu1  ;;  %v1414_v33 = vpop.f32.mrb[16].mxu0 }
 0x4d7   : >> { %v2669_v59 = vpop.f32.mrb[29].mxu1  ;;  %v2675_v60 = vpop.f32.mrb[17].mxu0 }
 0x4d8   : >> { %v1370_v45 = vpop.f32.mrb[30].mxu1  ;;  %v1417_v3 = vpop.f32.mrb[18].mxu0 }
 0x4d9   : >> { %v1611_v5 = vpack.c.bf16 %v1370_v45, %v1367_v11  ;;  %v1612_v7 = vpack.c.bf16 %v1417_v3, %v1414_v33  ;;  %v2670_v48 = vpop.f32.mrb[31].mxu1  ;;  %v2676_v52 = vpop.f32.mrb[19].mxu0 }
 0x4db   : >> { %2716 = vmatmul.mubr.msk.bf16.vlgmr.msra.gmra.mrb[44].mxu1 %vm634_vm2, %v1611_v5  ;;  %2722 = vmatmul.mubr.msk.bf16.vlgmr.msra.gmra.mrb[32].mxu0 %vm634_vm2, %v1612_v7 }
 0x4dc   : >> { %2726 = vmatpush3.bf16.msra.mxu1 %v1821_v49  ;;  %2732 = vmatpush3.bf16.msra.mxu0 %v1868_v10 }
 0x4dd   : >> { %2727 = vmatprep.mubr.msk.bf16.mxu1 %vm2976_vm0, %v2975_v2  ;;  %2733 = vmatprep.mubr.msk.bf16.mxu0 %vm2976_vm0, %v2975_v2 }
 0x4de   : >> { %v1461_v13 = vpop.f32.mrb[32].mxu1  ;;  %v1508_v14 = vpop.f32.mrb[20].mxu0  ;;  %2737 = vmatprep.subr.bf16.mxu1 %v2975_v2  ;;  %2743 = vmatprep.subr.bf16.mxu0 %v2975_v2 }
 0x4df   : >> { %v2681_v18 = vpop.f32.mrb[33].mxu1  ;;  %v2687_v19 = vpop.f32.mrb[21].mxu0 }
 0x4e0   : >> { %v1464_v57 = vpop.f32.mrb[34].mxu1  ;;  %v1511_v37 = vpop.f32.mrb[22].mxu0 }
 0x4e1   : >> { %v1613_v63 = vpack.c.bf16 %v1464_v57, %v1461_v13  ;;  %v1614_v22 = vpack.c.bf16 %v1511_v37, %v1508_v14  ;;  %v2682_v56 = vpop.f32.mrb[35].mxu1  ;;  %v2688_v8 = vpop.f32.mrb[23].mxu0 }
 0x4e3   : >> { %2728 = vmatmul.mubr.msk.bf16.vlgmr.msra.gmra.mrb[48].mxu1 %vm634_vm2, %v1613_v63  ;;  %2734 = vmatmul.mubr.msk.bf16.vlgmr.msra.gmra.mrb[36].mxu0 %vm634_vm2, %v1614_v22 }
 0x4e4   : >> { %2738 = vmatpush3.bf16.msra.mxu1 %v1915_v15  ;;  %2744 = vmatpush3.bf16.msra.mxu0 %v1962_v62 }
 0x4e5   : >> { %2739 = vmatprep.mubr.msk.bf16.mxu1 %vm2976_vm0, %v2975_v2  ;;  %2745 = vmatprep.mubr.msk.bf16.mxu0 %vm2976_vm0, %v2975_v2 }
 0x4e6   : >> { %v1555_v61 = vpop.f32.mrb[36].mxu1  ;;  %v1602_v25 = vpop.f32.mrb[24].mxu0  ;;  %2749 = vmatprep.subr.bf16.mxu1 %v2975_v2  ;;  %2757 = vmatprep.subr.bf16.mxu0 %v2975_v2 }
 0x4e7   : >> { %v2693_v27 = vpop.f32.mrb[37].mxu1  ;;  %v2699_v4 = vpop.f32.mrb[25].mxu0 }
 0x4e8   : >> { %v1558_v30 = vpop.f32.mrb[38].mxu1  ;;  %v1605_v32 = vpop.f32.mrb[26].mxu0 }
 0x4e9   : >> { %v1615_v36 = vpack.c.bf16 %v1558_v30, %v1555_v61  ;;  %v1616_v26 = vpack.c.bf16 %v1605_v32, %v1602_v25  ;;  %v2694_v23 = vpop.f32.mrb[39].mxu1  ;;  %v2700_v6 = vpop.f32.mrb[27].mxu0  ;;  %v2503_v30 = vld [vmem:[%s2035_s22] ss:$0 sm:$0xff] }
 0x4eb   : >> { %2740 = vmatmul.mubr.msk.bf16.vlgmr.msra.gmra.mrb[52].mxu1 %vm634_vm2, %v1615_v36  ;;  %2746 = vmatmul.mubr.msk.bf16.vlgmr.msra.gmra.mrb[40].mxu0 %vm634_vm2, %v1616_v26 }
 0x4ec   : >> { %2753 = vmatprep.mubr.msk.bf16.mxu1 %vm2976_vm0, %v2975_v2  ;;  %2773 = vmatprep.mubr.msk.bf16.mxu0 %vm2976_vm0, %v2975_v2 }
 0x557   : >> { %v1669_v40 = vpop.f32.mrb[40].mxu1 }
 0x558   : >> { %v2705_v9 = vpop.f32.mrb[41].mxu1  ;;  %v2005_v42 = vsel %vm534_vm1, %v1669_v40, 0.0 }
 0x559   : >> { %v1672_v41 = vpop.f32.mrb[42].mxu1 }
 0x55a   : >> { %v2706_v31 = vpop.f32.mrb[43].mxu1  ;;  %v2020_v16 = vsel %vm534_vm1, %v1672_v41, 0.0 }
 0x5a6   : >> { %v1716_v12 = vpop.f32.mrb[28].mxu0 }
 0x5a7   : >> { %v2006_v46 = vsel %vm534_vm1, %v1716_v12, 0.0  ;;  %v2711_v28 = vpop.f32.mrb[29].mxu0 }
 0x5a8   : >> { %v2007_v35 = vadd.f32 %v2006_v46, %v2005_v42  ;;  %v1719_v38 = vpop.f32.mrb[30].mxu0 }
 0x5a9   : >> { %v2021_v47 = vsel %vm534_vm1, %v1719_v38, 0.0  ;;  %v2712_v20 = vpop.f32.mrb[31].mxu0 }
 0x5aa   : >> { %v2022_v50 = vadd.f32 %v2021_v47, %v2020_v16 }
 0x5ae   : >> { %v1763_v51 = vpop.f32.mrb[44].mxu1  ;;  %v1810_v43 = vpop.f32.mrb[32].mxu0 }
 0x5af   : >> { %v2008_v44 = vsel %vm534_vm1, %v1763_v51, 0.0  ;;  %v2717_v24 = vpop.f32.mrb[45].mxu1  ;;  %v2723_v29 = vpop.f32.mrb[33].mxu0  ;;  %v2010_v55 = vsel %vm534_vm1, %v1810_v43, 0.0 }
 0x5b0   : >> { %v2009_v21 = vadd.f32 %v2008_v44, %v2007_v35  ;;  %v1766_v34 = vpop.f32.mrb[46].mxu1  ;;  %v1813_v54 = vpop.f32.mrb[34].mxu0  ;;  %v2857_v44 = vld [vmem:[%s3115_s21] sm:$0xff]   ;;  %v2858_v24 = vld [vmem:[%s3115_s21 + $0x8] sm:$0xff]  }
 0x5b1   : >> { %v2023_v11 = vsel %vm534_vm1, %v1766_v34, 0.0  ;;  %v2718_v33 = vpop.f32.mrb[47].mxu1  ;;  %v2724_v58 = vpop.f32.mrb[35].mxu0  ;;  %v2025_v60 = vsel %vm534_vm1, %v1813_v54, 0.0  ;;  %2750 = vmatpush3.bf16.msra.mxu1 %v2857_v44  ;;  %v2859_v29 = vld [vmem:[%s3120_s24] sm:$0xff]   ;;  %v2861_v34 = vld [vmem:[%s3120_s24 + $0x10] sm:$0xff]  }
 0x5b2   : >> { %v2011_v39 = vadd.f32 %v2010_v55, %v2009_v21  ;;  %v2024_v59 = vadd.f32 %v2023_v11, %v2022_v50  ;;  %2751 = vmatprep.subr.bf16.mxu1 %v2975_v2  ;;  %2758 = vmatpush3.bf16.msra.mxu0 %v2859_v29  ;;  %v2860_v21 = vld [vmem:[%s3120_s24 + $0x8] sm:$0xff]   ;;  %v2862_v54 = vld [vmem:[%s3120_s24 + $0x18] sm:$0xff]   ;;  %v2863_v55 = vld [vmem:[%s3120_s24 + $0x20] sm:$0xff]  }
 0x5b3   : >> { %2759 = vmatprep.subr.bf16.mxu0 %v2975_v2  ;;  %v2864_v11 = vld [vmem:[%s3120_s24 + $0x28] sm:$0xff]  }
 0x5b4   : >> { %v2026_v45 = vadd.f32 %v2025_v60, %v2024_v59 }
 0x5b5   : >> { %2752 = vmatpush3.bf16.msra.mxu1 %v2858_v24 }
 0x5b6   : >> { %v1857_v3 = vpop.f32.mrb[48].mxu1  ;;  %v1904_v5 = vpop.f32.mrb[36].mxu0  ;;  %2760 = vmatpush3.bf16.msra.mxu0 %v2860_v21 }
 0x5b7   : >> { %v2012_v7 = vsel %vm534_vm1, %v1857_v3, 0.0  ;;  %v2729_v48 = vpop.f32.mrb[49].mxu1  ;;  %v2735_v52 = vpop.f32.mrb[37].mxu0  ;;  %v2014_v14 = vsel %vm534_vm1, %v1904_v5, 0.0  ;;  %2761 = vmatprep.subr.bf16.mxu0 %v2975_v2  ;;  %v2504_v5 = vld [vmem:[%s2047_s25] ss:$0 sm:$0xff]  ;;  %s2286_s25 = scalar_lea.vmem %s3577_s11, %s2973_s27 }
 0x5b8   : >> { %v2013_v49 = vadd.f32 %v2012_v7, %v2011_v39  ;;  %v1860_v10 = vpop.f32.mrb[50].mxu1  ;;  %v1907_v13 = vpop.f32.mrb[38].mxu0  ;;  %v2522_v24 = vld [vmem:[%s2286_s25] ss:$0 sm:$0xff] }
 0x5b9   : >> { %v2027_v53 = vsel %vm534_vm1, %v1860_v10, 0.0  ;;  %v2730_v17 = vpop.f32.mrb[51].mxu1  ;;  %v2736_v18 = vpop.f32.mrb[39].mxu0  ;;  %v2029_v37 = vsel %vm534_vm1, %v1907_v13, 0.0  ;;  %v2505_v10 = vld [vmem:[%s2049_s16] ss:$0 sm:$0xff]  ;;  %s2288_s16 = scalar_lea.vmem %s3578_s12, %s2973_s27 }
 0x5ba   : >> { %v2015_v19 = vadd.f32 %v2014_v14, %v2013_v49  ;;  %v2028_v57 = vadd.f32 %v2027_v53, %v2026_v45  ;;  %2762 = vmatpush3.bf16.msra.mxu0 %v2861_v34  ;;  %v2865_v18 = vld [vmem:[%s3120_s24 + $0x30] sm:$0xff]   ;;  %v2523_v34 = vld [vmem:[%s2288_s16] ss:$0 sm:$0xff] }
 0x5bb   : >> { %2763 = vmatprep.subr.bf16.mxu0 %v2975_v2 }
 0x5bc   : >> { %v2030_v63 = vadd.f32 %v2029_v37, %v2028_v57  ;;  %v2507_v57 = vld [vmem:[%s2101_s28] ss:$0 sm:$0xff] }
 0x5be   : >> { %v1951_v22 = vpop.f32.mrb[52].mxu1  ;;  %v1998_v56 = vpop.f32.mrb[40].mxu0  ;;  %2764 = vmatpush3.bf16.msra.mxu0 %v2862_v54 }
 0x5bf   : >> { %v2016_v8 = vsel %vm534_vm1, %v1951_v22, 0.0  ;;  %v2741_v15 = vpop.f32.mrb[53].mxu1  ;;  %v2747_v62 = vpop.f32.mrb[41].mxu0  ;;  %v2018_v4 = vsel %vm534_vm1, %v1998_v56, 0.0  ;;  %2765 = vmatprep.subr.bf16.mxu0 %v2975_v2 }
 0x5c0   : >> { %v2017_v61 = vadd.f32 %v2016_v8, %v2015_v19  ;;  %v1954_v25 = vpop.f32.mrb[54].mxu1  ;;  %v2001_v27 = vpop.f32.mrb[42].mxu0  ;;  %v2866_v19 = vld [vmem:[%s3120_s24 + $0x38] sm:$0xff]   ;;  %s2187_s24 = scalar_lea.vmem %s3576_s10, %s2973_s27  ;;  %s503_s27 = sadd.s32 1, %s2973_s27  }
 0x5c1   : >> { %v2031_v32 = vsel %vm534_vm1, %v1954_v25, 0.0  ;;  %v2742_v36 = vpop.f32.mrb[55].mxu1  ;;  %v2748_v26 = vpop.f32.mrb[43].mxu0  ;;  %v2033_v40 = vsel %vm534_vm1, %v2001_v27, 0.0  ;;  %p500_p4 = scmp.ge.s32.totalorder %s503_s27, 2  }
 0x5c2   : >> { %v2019_v23 = vadd.f32 %v2018_v4, %v2017_v61  ;;  %v2032_v6 = vadd.f32 %v2031_v32, %v2030_v63  ;;  %2766 = vmatpush3.bf16.msra.mxu0 %v2863_v55 }
 0x5c3   : >> { %2767 = vmatprep.subr.bf16.mxu0 %v2975_v2 }
 0x5c4   : >> { %v2043_v9 = vadd.f32 %v2503_v30, %v2019_v23  ;;  %v2034_v41 = vadd.f32 %v2033_v40, %v2032_v6 }
 0x5c6   : >> { %v2044_v31 = vadd.f32 %v2503_v30, %v2034_v41  ;;  %v2045_v12 = vadd.f32 %v2969_v0, %v2043_v9  ;;  %2768 = vmatpush3.bf16.msra.mxu0 %v2864_v11 }
 0x5c7   : >> { %2769 = vmatprep.subr.bf16.mxu0 %v2975_v2 }
 0x5c8   : >> { %v2051_v42 = vsel %vm534_vm1, %v2045_v12, 0.0  ;;  %v2046_v46 = vadd.f32 %v2965_v1, %v2044_v31 }
 0x5c9   : >> { %2052 = vadd.xlane.f32.xlu1 %v2051_v42 }
 0x5ca   : >> { %v2054_v28 = vsel %vm534_vm1, %v2046_v46, 0.0  ;;  %2770 = vmatpush3.bf16.msra.mxu0 %v2865_v18 }
 0x5cb   : >> { %2055 = vadd.xlane.f32.xlu0 %v2054_v28  ;;  %2771 = vmatprep.subr.bf16.mxu0 %v2975_v2  ;;  %v2513_v2 = vld [vmem:[%s2187_s24] ss:$0 sm:$0xff] }
 0x5ce   : >> { %2772 = vmatpush3.bf16.msra.mxu0 %v2866_v19 }
 0x656   : >> { %v2053_v35 = vpop.xlane.xlu1 %2052 }
 0x657   : >> { %v2058_v38 = vmul.f32 0.03125, %v2053_v35 }
 0x658   : >> { %v2056_v16 = vpop.xlane.xlu0 %2055 }
 0x659   : >> { %v2060_v47 = vsub.f32 %v2045_v12, %v2058_v38  ;;  %v2059_v20 = vmul.f32 0.03125, %v2056_v16 }
 0x65b   : >> { %v2061_v50 = vsub.f32 %v2046_v46, %v2059_v20  ;;  %v2062_v51 = vmul.f32 %v2060_v47, %v2060_v47 }
 0x65d   : >> { %v2064_v0 = vsel %vm534_vm1, %v2062_v51, 0.0  ;;  %v2063_v43 = vmul.f32 %v2061_v50, %v2061_v50 }
 0x65e   : >> { %2065 = vadd.xlane.f32.xlu0 %v2064_v0 }
 0x65f   : >> { %v2067_v1 = vsel %vm534_vm1, %v2063_v43, 0.0 }
 0x660   : >> { %2068 = vadd.xlane.f32.xlu1 %v2067_v1 }
 0x6eb   : >> { %v2066_v33 = vpop.xlane.xlu0 %2065 }
 0x6ec   : >> { %v2070_v58 = vmul.f32 0.03125, %v2066_v33 }
 0x6ed   : >> { %v2069_v39 = vpop.xlane.xlu1 %2068 }
 0x6ee   : >> { %v2072_v59 = vadd.f32 1e-05, %v2070_v58  ;;  %v2071_v60 = vmul.f32 0.03125, %v2069_v39 }
 0x6f0   : >> { %2931 = vrsqrt.f32 %v2072_v59  ;;  %v2073_v45 = vadd.f32 1e-05, %v2071_v60 }
 0x6f2   : >> { %2933 = vrsqrt.f32 %v2073_v45 }
 0x6fa   : >> { %v2932_v3 = vpop.eup %2931 }
 0x6fb   : >> { %v2076_v7 = vmul.f32 %v2932_v3, %v2060_v47 }
 0x6fc   : >> { %v2934_v48 = vpop.eup %2933 }
 0x6fd   : >> { %v2084_v52 = vmul.f32 %v2504_v5, %v2076_v7  ;;  %v2077_v49 = vmul.f32 %v2934_v48, %v2061_v50 }
 0x6ff   : >> { %v2085_v13 = vmul.f32 %v2504_v5, %v2077_v49  ;;  %v2092_v14 = vadd.f32 %v2505_v10, %v2084_v52 }
 0x701   : >> { %v2093_v53 = vadd.f32 %v2505_v10, %v2085_v13 }
 0x703   : >> { %v2094_v17 = vpack.c.bf16 %v2093_v53, %v2092_v14 }
 0x705   : >> { %2754 = vmatmul.mubr.msk.bf16.vlgmr.msra.gmra.mrb[56].mxu1 %vm534_vm1, %v2094_v17 }
 0x7d8   : >> { %v2158_v37 = vpop.f32.mrb[56].mxu1 }
 0x7d9   : >> { %v2159_v63 = vadd.f32 %v2507_v57, %v2158_v37  ;;  %v2755_v22 = vpop.f32.mrb[57].mxu1 }
 0x7da   : >> { %v2161_v56 = vpop.f32.mrb[58].mxu1 }
 0x7db   : >> { %v2162_v8 = vadd.f32 %v2507_v57, %v2161_v56  ;;  %v2756_v15 = vpop.f32.mrb[59].mxu1  ;;  %v2165_v62 = vmax.f32 %v2159_v63, 0.0  ;;  %v2524_v63 = vld [vmem:[%s3579_s13] ss:$0 sm:$0xff] (%p500_p4) }
 0x7dc   : > { %v2525_v56 = vld [vmem:[%s3580_s14] ss:$0 sm:$0xff] (%p500_p4) }
 0x7dd   : >> { %v2166_v61 = vmax.f32 %v2162_v8, 0.0 }
 0x7df   : >> { %v2167_v25 = vpack.c.bf16 %v2166_v61, %v2165_v62 }
 0x7e1   : >> { %2774 = vmatmul.mubr.bf16.vlgmr.msra.gmra.mrb[44].mxu0 %v2167_v25 }
 0x8b4   : >> { %v2277_v27 = vpop.f32.mrb[44].mxu0 }
 0x8b5   : >> { %v2278_v4 = vadd.f32 %v2513_v2, %v2277_v27  ;;  %v2775_v30 = vpop.f32.mrb[45].mxu0 }
 0x8b6   : >> { %v2280_v32 = vpop.f32.mrb[46].mxu0 }
 0x8b7   : >> { %v2281_v36 = vadd.f32 %v2513_v2, %v2280_v32  ;;  %v2776_v26 = vpop.f32.mrb[47].mxu0  ;;  %v2284_v23 = vadd.f32 %v2278_v4, %v2092_v14 }
 0x8b9   : >> { %v2290_v6 = vsel %vm534_vm1, %v2284_v23, 0.0  ;;  %v2285_v40 = vadd.f32 %v2281_v36, %v2093_v53 }
 0x8ba   : >> { %2291 = vadd.xlane.f32.xlu0 %v2290_v6 }
 0x8bb   : >> { %v2293_v9 = vsel %vm534_vm1, %v2285_v40, 0.0 }
 0x8bc   : >> { %2294 = vadd.xlane.f32.xlu1 %v2293_v9 }
 0x947   : >> { %v2292_v41 = vpop.xlane.xlu0 %2291 }
 0x948   : >> { %v2296_v31 = vmul.f32 0.03125, %v2292_v41 }
 0x949   : >> { %v2295_v12 = vpop.xlane.xlu1 %2294 }
 0x94a   : >> { %v2298_v42 = vsub.f32 %v2284_v23, %v2296_v31  ;;  %v2297_v46 = vmul.f32 0.03125, %v2295_v12 }
 0x94c   : >> { %v2299_v28 = vsub.f32 %v2285_v40, %v2297_v46  ;;  %v2300_v35 = vmul.f32 %v2298_v42, %v2298_v42 }
 0x94e   : >> { %v2302_v38 = vsel %vm534_vm1, %v2300_v35, 0.0  ;;  %v2301_v16 = vmul.f32 %v2299_v28, %v2299_v28 }
 0x94f   : >> { %2303 = vadd.xlane.f32.xlu0 %v2302_v38 }
 0x950   : >> { %v2305_v47 = vsel %vm534_vm1, %v2301_v16, 0.0 }
 0x951   : >> { %2306 = vadd.xlane.f32.xlu1 %v2305_v47 }
 0x9dc   : >> { %v2304_v20 = vpop.xlane.xlu0 %2303 }
 0x9dd   : >> { %v2308_v50 = vmul.f32 0.03125, %v2304_v20 }
 0x9de   : >> { %v2307_v51 = vpop.xlane.xlu1 %2306 }
 0x9df   : >> { %v2310_v0 = vadd.f32 1e-05, %v2308_v50  ;;  %v2309_v43 = vmul.f32 0.03125, %v2307_v51 }
 0x9e1   : >> { %2935 = vrsqrt.f32 %v2310_v0  ;;  %v2311_v1 = vadd.f32 1e-05, %v2309_v43 }
 0x9e3   : >> { %2937 = vrsqrt.f32 %v2311_v1 }
 0x9eb   : >> { %v2936_v44 = vpop.eup %2935 }
 0x9ec   : >> { %v2314_v29 = vmul.f32 %v2936_v44, %v2298_v42 }
 0x9ed   : >> { %v2938_v21 = vpop.eup %2937 }
 0x9ee   : >> { %v2322_v54 = vmul.f32 %v2522_v24, %v2314_v29  ;;  %v2315_v55 = vmul.f32 %v2938_v21, %v2299_v28  ;;  %502 = sbr.rel (!%p500_p4) target bundleno = 17 (0x11), region = 129 }
 0x9f0   : >> { %v2330_v11 = vadd.f32 %v2523_v34, %v2322_v54   ;;  %v2323_v33 = vmul.f32 %v2522_v24, %v2315_v55 }
 0x9f2   : >> { %v2331_v58 = vadd.f32 %v2523_v34, %v2323_v33   ;;  %v3583_v0 = vmov %v2330_v11  ;;  %v2335_v39 = vsel (%p500_p4), %vm534_vm1, %v2330_v11, 0.0 }
 0x9f3   : > { %2336 = vadd.xlane.f32.xlu0 (%p500_p4), %v2335_v39 }
 0x9f4   : >> { %v3582_v1 = vmov %v2331_v58  ;;  %v2338_v59 = vsel (%p500_p4), %vm534_vm1, %v2331_v58, 0.0 }
 0x9f7   : > { %2339 = vadd.xlane.f32.xlu0 %v2338_v59 }
 0xa80   : > { %v2337_v60 = vpop.xlane.xlu0 %2336 }
 0xa81   : > { %v2342_v45 = vmul.f32 0.03125, %v2337_v60 }
 0xa83   : > { %v2344_v3 = vsub.f32 %v2330_v11, %v2342_v45 }
 0xa84   : > { %v2340_v5 = vpop.xlane.xlu0 %2339 }
 0xa85   : > { %v2343_v7 = vmul.f32 0.03125, %v2340_v5  ;;  %v2346_v48 = vmul.f32 %v2344_v3, %v2344_v3 }
 0xa87   : > { %v2345_v52 = vsub.f32 %v2331_v58, %v2343_v7  ;;  %v2348_v49 = vsel %vm534_vm1, %v2346_v48, 0.0 }
 0xa88   : > { %2349 = vadd.xlane.f32.xlu1 %v2348_v49 }
 0xa89   : > { %v2347_v10 = vmul.f32 %v2345_v52, %v2345_v52 }
 0xa8b   : > { %v2351_v13 = vsel %vm534_vm1, %v2347_v10, 0.0 }
 0xa8c   : > { %2352 = vadd.xlane.f32.xlu1 %v2351_v13 }
 0xb15   : > { %v2350_v14 = vpop.xlane.xlu1 %2349 }
 0xb16   : > { %v2354_v53 = vmul.f32 0.03125, %v2350_v14 }
 0xb18   : > { %v2356_v17 = vadd.f32 1e-05, %v2354_v53 }
 0xb19   : > { %v2353_v18 = vpop.xlane.xlu1 %2352 }
 0xb1a   : > { %2939 = vrsqrt.f32 %v2356_v17  ;;  %v2355_v19 = vmul.f32 0.03125, %v2353_v18 }
 0xb1c   : > { %v2357_v57 = vadd.f32 1e-05, %v2355_v19 }
 0xb1e   : > { %2941 = vrsqrt.f32 %v2357_v57 }
 0xb24   : > { %v2940_v37 = vpop.eup %2939 }
 0xb25   : > { %v2360_v22 = vmul.f32 %v2940_v37, %v2344_v3 }
 0xb27   : > { %v2368_v8 = vmul.f32 %v2524_v63, %v2360_v22 }
 0xb28   : > { %v2942_v15 = vpop.eup %2941 }
 0xb29   : > { %v2376_v62 = vadd.f32 %v2525_v56, %v2368_v8  ;;  %v2361_v61 = vmul.f32 %v2942_v15, %v2345_v52 }
 0xb2b   : > { %2378 = vst.msk [vmem:[%s3080_s26] sm:$0xff] %vm534_vm1, %v2376_v62  ;;  %v2369_v25 = vmul.f32 %v2524_v63, %v2361_v61 }
 0xb2d   : > { %v2377_v2 = vadd.f32 %v2525_v56, %v2369_v25 }
 0xb2f   : > { %2379 = vst.msk [vmem:[%s3080_s26 + $0x8] sm:$0xff] %vm534_vm1, %v2377_v2 }
 0xb30 PF: > { %s25_s18 = sadd.s32 1, %s2961_s18  }
 0xb31   : > { %p22_p5 = scmp.ge.s32.totalorder %s25_s18, 6  }
 0xb33   :  { %24 = sbr.rel (!%p22_p5) target bundleno = 1 (0x1), region = 140 }

// kernel: bidaf_transformer_forward.9
= control target key start
LH: loop header
LB: loop body
LE: loop exit
PB: predicated region body
PF: predicated region fallthrough
CT: control target
= control target key end

     0   :  { %s3066_s18 = smov 0   ;;  %s3566_s0 = inlined_call_operand.vmem [shape: f32[2,16,32], index: 0, kind: input, shape index: {}]   ;;  %s3567_s1 = inlined_call_operand.vmem [shape: bf16[4,32,96], index: 1, kind: input, shape index: {}]   ;;  %s3568_s2 = inlined_call_operand.vmem [shape: f32[4,1,96], index: 2, kind: input, shape index: {}]   ;;  %s3569_s3 = inlined_call_operand.vmem [shape: bf16[4,8,4,32], index: 3, kind: input, shape index: {}]   ;;  %s3570_s4 = inlined_call_operand.vmem [shape: f32[4,1,32], index: 4, kind: input, shape index: {}]   ;;  %s3571_s5 = inlined_call_operand.vmem [shape: f32[4,1,32], index: 5, kind: input, shape index: {}]   ;;  %s3572_s6 = inlined_call_operand.vmem [shape: f32[4,1,32], index: 6, kind: input, shape index: {}]   ;;  %s3573_s7 = inlined_call_operand.vmem [shape: bf16[4,32,128], index: 7, kind: input, shape index: {}]   ;;  %s3574_s8 = inlined_call_operand.vmem [shape: f32[4,1,128], index: 8, kind: input, shape index: {}]   ;;  %s3575_s9 = inlined_call_operand.vmem [shape: bf16[4,128,32], index: 9, kind: input, shape index: {}]   ;;  %s3576_s10 = inlined_call_operand.vmem [shape: f32[4,1,32], index: 10, kind: input, shape index: {}]   ;;  %s3577_s11 = inlined_call_operand.vmem [shape: f32[4,1,32], index: 11, kind: input, shape index: {}]   ;;  %s3578_s12 = inlined_call_operand.vmem [shape: f32[4,1,32], index: 12, kind: input, shape index: {}]   ;;  %s3579_s13 = inlined_call_operand.vmem [shape: f32[1,1,32], index: 13, kind: input, shape index: {}]   ;;  %s3580_s14 = inlined_call_operand.vmem [shape: f32[1,1,32], index: 14, kind: input, shape index: {}]   ;;  %s3581_s15 = inlined_call_operand.vmem [shape: f32[2,16,32], index: 15, kind: output, shape index: {}]  }
   0x1 LB: > { %s2462_s19 = sadd.s32 4294967295, %s2961_s18   ;;  %p2466_p0 = scmp.ge.s32.totalorder %s2961_s18, 1  ;;  %s2961_s18 = sphi %s3066_s18, %s25_s18  }
   0x2   : > { %p437_p1 = scmp.lt.s32.totalorder %s2961_s18, 3 }
   0x4   : > { %p438_p2 = pnand %p2466_p0, %p437_p1 }
   0x5   : > { %p485_p3 = scmp.lt.s32.totalorder (!%p438_p2), %s2462_s19, 1  ;;  %s3086_s27 = smov (!%p438_p2), 0  }
   0x6   : > { %441 = sbr.rel (%p438_p2) target bundleno = 2864 (0xb30), region = 80 }
   0xd   : > { %s3585_s19 = smov (!%p485_p3, %s2462_s19), 1 }
   0xe   : > { %s2528_s20 = sshll.u32 %s3585_s19, 4 }
   0xf   : > { %s489_s23 = scalar_lea.vmem %s3566_s0, %s2528_s20  ;;  %s3080_s26 = scalar_lea.vmem %s3581_s15, %s2528_s20 }
  0x10   : > { %v496_v0 = vld [vmem:[%s489_s23] sm:$0xff]   ;;  %v497_v1 = vld [vmem:[%s489_s23 + $0x8] sm:$0xff]  }
  0x11 LB: >> { %v2975_v2 = vmov 0.0   ;;  %vm2976_vm0 = vmmov 0   ;;  %s3101_s28 = sshll.u32 %s2973_s27, 4  ;;  %s2533_s17 = sshll.u32 %s2973_s27, 6  ;;  %vm534_vm1 = vcmask 261120   ;;  %v506_v5 = vpack.c.bf16 %v2965_v1, %v2969_v0  ;;  %s2973_s27 = sphi %s3086_s27, %s503_s27   ;;  %v2969_v0 = vphi %v496_v0, %v3583_v0   ;;  %v2965_v1 = vphi %v497_v1, %v3582_v1  }
  0x12   : >> { %2597 = vmatprep.subr.bf16.mxu1 %v2975_v2  ;;  %2601 = vmatprep.mubr.msk.bf16.mxu1 %vm2976_vm0, %v2975_v2  ;;  %s509_s16 = scalar_lea.vmem %s3567_s1, %s3101_s28  ;;  %s3115_s21 = scalar_lea.vmem %s3573_s7, %s3101_s28  ;;  %vm634_vm2 = vcmask 31744   ;;  %vm1048_vm3 = vcmask 130048   ;;  %vm1631_vm4 = vcmask 1041408  }
  0x13   : >> { %2623 = vmatprep.subr.bf16.mxu0 %v2975_v2  ;;  %2625 = vmatprep.mubr.msk.bf16.mxu0 %vm2976_vm0, %v2975_v2  ;;  %v2855_v3 = vld [vmem:[%s509_s16] sm:$0xff]   ;;  %s3120_s24 = scalar_lea.vmem %s3575_s9, %s2533_s17  ;;  %v2856_v4 = vld [vmem:[%s509_s16 + $0x8] sm:$0xff]   ;;  %s514_s30 = scalar_lea.vmem %s3568_s2, %s2973_s27 }
  0x14   : >> { %2598 = vmatpush3.bf16.msra.mxu1 %v2855_v3  ;;  %v2473_v6 = vld [vmem:[%s514_s30] ss:$0 sm:$0xff]  ;;  %s2977_s16 = smov 116   ;;  %s2978_s17 = smov 124  }
  0x15   : >> { %2599 = vmatprep.subr.bf16.mxu1 %v2975_v2  ;;  %s2979_s19 = smov 112   ;;  %s2980_s20 = smov 120  }
  0x16   : >> { %s2981_s22 = smov 104   ;;  %s2982_s23 = smov 108  }
  0x17   : >> { %s2983_s25 = smov 100   ;;  %s2984_s29 = smov 96  }
  0x18   : >> { %2600 = vmatpush3.bf16.msra.mxu1 %v2856_v4  ;;  %s2985_s30 = smov 64  }
  0x19   : >> { %2605 = vmatprep.subr.bf16.mxu1 %v2975_v2 }
  0x1b   : >> { %2602 = vmatmul.mubr.msk.bf16.vlgmr.msra.gmra.mrb[0].mxu1 %vm534_vm1, %v506_v5 }
  0x1c   : >> { %2607 = vmatprep.mubr.msk.bf16.mxu1 %vm2976_vm0, %v2975_v2 }
  0xee   : >> { %v572_v7 = vpop.f32.mrb[0].mxu1 }
  0xef   : >> { %v2603_v8 = vpop.f32.mrb[1].mxu1  ;;  %v573_v10 = vadd.f32 %v2473_v6, %v572_v7 }
  0xf0   : >> { %v575_v9 = vpop.f32.mrb[2].mxu1 }
  0xf1   : >> { %v576_v11 = vadd.f32 %v2473_v6, %v575_v9  ;;  %v2604_v12 = vpop.f32.mrb[3].mxu1 }
  0xf3   : >> { %v2830_v13 = vpack.i.bf16 %v576_v11, %v573_v10  ;;  %v623_v14 = vpack.c.bf16 %v576_v11, %v573_v10 }
  0xf5   : >> { %2831 = vrot.lane.b32.xlu1 %v2830_v13, %s2977_s16  ;;  %2821 = vrot.lane.b32.xlu0 %v2830_v13, %s2978_s17  ;;  %s2049_s16 = scalar_lea.vmem %s3572_s6, %s2973_s27 }
  0xf9   : >> { %2836 = vrot.lane.b32.xlu1 %v2830_v13, %s2979_s19  ;;  %2826 = vrot.lane.b32.xlu0 %v2830_v13, %s2980_s20  ;;  %s3401_s19 = scalar_lea.vmem %s3569_s3, %s3101_s28  ;;  %s2101_s28 = scalar_lea.vmem %s3574_s8, %s2973_s27 }
  0xfd   : >> { %2846 = vrot.lane.b32.xlu1 %v2830_v13, %s2981_s22  ;;  %2841 = vrot.lane.b32.xlu0 %v2830_v13, %s2982_s23  ;;  %s2035_s22 = scalar_lea.vmem %s3570_s4, %s2973_s27 }
 0x101   : >> { %2851 = vrot.lane.b32.xlu0 %v2830_v13, %s2983_s25  ;;  %632 = vrot.lane.b32.xlu1 %v623_v14, %s2984_s29  ;;  %s2047_s25 = scalar_lea.vmem %s3571_s5, %s2973_s27 }
 0x167   : >> { %v2832_v15 = vpop.permute.xlu1 %2831  ;;  %v2822_v16 = vpop.permute.xlu0 %2821 }
 0x168   : >> { %v2824_v17 = vunpack.i.h.bf16 %v2822_v16  ;;  %v2823_v18 = vunpack.i.l.bf16 %v2822_v16  ;;  %v2834_v19 = vunpack.i.h.bf16 %v2832_v15  ;;  %v2833_v20 = vunpack.i.l.bf16 %v2832_v15 }
 0x16a   : >> { %v624_v21 = vpack.c.bf16 %v2824_v17, %v2823_v18  ;;  %v3135_v26 = vpack.c.bf16 %v2834_v19, %v2833_v20 }
 0x16b   : >> { %v2837_v22 = vpop.permute.xlu1 %2836  ;;  %v2827_v23 = vpop.permute.xlu0 %2826 }
 0x16c   : >> { %v2829_v24 = vunpack.i.h.bf16 %v2827_v23  ;;  %v2828_v25 = vunpack.i.l.bf16 %v2827_v23  ;;  %683 = vrot.lane.b32.xlu0 %v624_v21, %s2984_s29  ;;  %v2839_v27 = vunpack.i.h.bf16 %v2837_v22  ;;  %v2838_v28 = vunpack.i.l.bf16 %v2837_v22 }
 0x16e   : >> { %v625_v29 = vpack.c.bf16 %v2829_v24, %v2828_v25  ;;  %v3140_v34 = vpack.c.bf16 %v2839_v27, %v2838_v28 }
 0x16f   : >> { %v2847_v30 = vpop.permute.xlu1 %2846  ;;  %v2842_v31 = vpop.permute.xlu0 %2841 }
 0x170   : >> { %v2844_v32 = vunpack.i.h.bf16 %v2842_v31  ;;  %v2843_v33 = vunpack.i.l.bf16 %v2842_v31  ;;  %783 = vrot.lane.b32.xlu0 %v3135_v26, %s2984_s29  ;;  %733 = vrot.lane.b32.xlu1 %v625_v29, %s2984_s29  ;;  %v2849_v35 = vunpack.i.h.bf16 %v2847_v30  ;;  %v2848_v36 = vunpack.i.l.bf16 %v2847_v30 }
 0x172   : >> { %v3142_v37 = vpack.c.bf16 %v2844_v32, %v2843_v33  ;;  %v3149_v43 = vpack.c.bf16 %v2849_v35, %v2848_v36 }
 0x173   : >> { %v2852_v38 = vpop.permute.xlu0 %2851  ;;  %v633_v39 = vpop.permute.xlu1 %632 }
 0x174   : >> { %v2854_v40 = vunpack.i.h.bf16 %v2852_v38  ;;  %v2853_v41 = vunpack.i.l.bf16 %v2852_v38  ;;  %v639_v42 = vsel %vm634_vm2, %v633_v39, 0  ;;  %883 = vrot.lane.b32.xlu0 %v3142_v37, %s2984_s29  ;;  %833 = vrot.lane.b32.xlu1 %v3140_v34, %s2984_s29 }
 0x175   : >> { %2606 = vmatpush3.bf16.xpose.msra.mxu1 %v639_v42 }
 0x176   : >> { %v3151_v44 = vpack.c.bf16 %v2854_v40, %v2853_v41  ;;  %2611 = vmatprep.subr.bf16.mxu1 %v2975_v2 }
 0x178   : >> { %983 = vrot.lane.b32.xlu0 %v3151_v44, %s2984_s29  ;;  %933 = vrot.lane.b32.xlu1 %v3149_v43, %s2984_s29 }
 0x17c   : >> { %1233 = vrot.lane.b32.xlu0 %v623_v14, %s2985_s30  ;;  %1280 = vrot.lane.b32.xlu1 %v624_v21, %s2985_s30 }
 0x17d   : >> { %2608 = vmatmul.mubr.msk.bf16.vlgmr.msra.gmra.mrb[4].mxu1 %vm634_vm2, %v623_v14 }
 0x17e   : >> { %2613 = vmatprep.mubr.msk.bf16.mxu1 %vm2976_vm0, %v2975_v2 }
 0x180   : >> { %1327 = vrot.lane.b32.xlu1 %v625_v29, %s2985_s30 }
 0x1de   : >> { %v684_v45 = vpop.permute.xlu0 %683 }
 0x1df   : >> { %v689_v46 = vsel %vm634_vm2, %v684_v45, 0 }
 0x1e0   : >> { %2612 = vmatpush3.bf16.xpose.msra.mxu1 %v689_v46 }
 0x1e1   : >> { %2617 = vmatprep.subr.bf16.mxu1 %v2975_v2 }
 0x1e2   : >> { %v784_v47 = vpop.permute.xlu0 %783  ;;  %v734_v49 = vpop.permute.xlu1 %733 }
 0x1e3   : >> { %v789_v48 = vsel %vm634_vm2, %v784_v47, 0  ;;  %v739_v50 = vsel %vm634_vm2, %v734_v49, 0 }
 0x1e4   : >> { %2624 = vmatpush3.bf16.xpose.msra.mxu0 %v789_v48 }
 0x1e5   : >> { %2635 = vmatprep.subr.bf16.mxu0 %v2975_v2 }
 0x1e6   : >> { %v884_v51 = vpop.permute.xlu0 %883  ;;  %v834_v53 = vpop.permute.xlu1 %833 }
 0x1e7   : >> { %2614 = vmatmul.mubr.msk.bf16.vlgmr.msra.gmra.mrb[8].mxu1 %vm634_vm2, %v624_v21  ;;  %v889_v52 = vsel %vm634_vm2, %v884_v51, 0  ;;  %v839_v54 = vsel %vm634_vm2, %v834_v53, 0 }
 0x1e8   : >> { %2618 = vmatpush3.bf16.xpose.msra.mxu1 %v739_v50  ;;  %2619 = vmatprep.mubr.msk.bf16.mxu1 %vm2976_vm0, %v2975_v2 }
 0x1e9   : >> { %2629 = vmatprep.subr.bf16.mxu1 %v2975_v2 }
 0x1ea   : >> { %v984_v55 = vpop.permute.xlu0 %983  ;;  %v934_v57 = vpop.permute.xlu1 %933 }
 0x1eb   : >> { %2626 = vmatmul.mubr.msk.bf16.vlgmr.msra.gmra.mrb[0].mxu0 %vm634_vm2, %v3135_v26  ;;  %v989_v56 = vsel %vm634_vm2, %v984_v55, 0  ;;  %v939_v58 = vsel %vm634_vm2, %v934_v57, 0 }
 0x1ec   : >> { %2636 = vmatpush3.bf16.xpose.msra.mxu0 %v889_v52  ;;  %2637 = vmatprep.mubr.msk.bf16.mxu0 %vm2976_vm0, %v2975_v2 }
 0x1ed   : >> { %2647 = vmatprep.subr.bf16.mxu0 %v2975_v2 }
 0x1ee   : >> { %v1281_v59 = vpop.permute.xlu1 %1280  ;;  %v1234_v60 = vpop.permute.xlu0 %1233 }
 0x1ef   : >> { %2620 = vmatmul.mubr.msk.bf16.vlgmr.msra.gmra.mrb[12].mxu1 %vm634_vm2, %v625_v29 }
 0x1f0   : >> { %2630 = vmatpush3.bf16.xpose.msra.mxu1 %v839_v54  ;;  %2631 = vmatprep.mubr.msk.bf16.mxu1 %vm2976_vm0, %v2975_v2 }
 0x1f1   : >> { %2641 = vmatprep.subr.bf16.mxu1 %v2975_v2 }
 0x1f3   : >> { %2638 = vmatmul.mubr.msk.bf16.vlgmr.msra.gmra.mrb[4].mxu0 %vm634_vm2, %v3142_v37 }
 0x1f4   : >> { %2648 = vmatpush3.bf16.xpose.msra.mxu0 %v989_v56  ;;  %2649 = vmatprep.mubr.msk.bf16.mxu0 %vm2976_vm0, %v2975_v2 }
 0x1f5   : >> { %2659 = vmatprep.subr.bf16.mxu0 %v2975_v2 }
 0x1f7   : >> { %2632 = vmatmul.mubr.msk.bf16.vlgmr.msra.gmra.mrb[16].mxu1 %vm634_vm2, %v3140_v34 }
 0x1f8   : >> { %2642 = vmatpush3.bf16.xpose.msra.mxu1 %v939_v58  ;;  %2643 = vmatprep.mubr.msk.bf16.mxu1 %vm2976_vm0, %v2975_v2 }
 0x1f9   : >> { %2653 = vmatprep.subr.bf16.mxu1 %v2975_v2 }
 0x1fb   : >> { %2650 = vmatmul.mubr.msk.bf16.vlgmr.msra.gmra.mrb[8].mxu0 %vm634_vm2, %v3151_v44 }
 0x1fc   : >> { %2660 = vmatpush3.bf16.msra.mxu0 %v1281_v59  ;;  %2661 = vmatprep.mubr.msk.bf16.mxu0 %vm2976_vm0, %v2975_v2 }
 0x1fd   : >> { %2671 = vmatprep.subr.bf16.mxu0 %v2975_v2 }
 0x1ff   : >> { %2644 = vmatmul.mubr.msk.bf16.vlgmr.msra.gmra.mrb[20].mxu1 %vm634_vm2, %v3149_v43 }
 0x200   : >> { %2654 = vmatpush3.bf16.msra.mxu1 %v1234_v60  ;;  %2655 = vmatprep.mubr.msk.bf16.mxu1 %vm2976_vm0, %v2975_v2 }
 0x201   : >> { %2665 = vmatprep.subr.bf16.mxu1 %v2975_v2 }
 0x250   : >> { %v675_v61 = vpop.f32.mrb[4].mxu1 }
 0x251   : >> { %v3206_v62 = vmul.f32 0.5, %v675_v61  ;;  %v2609_v63 = vpop.f32.mrb[5].mxu1 }
 0x252   : >> { %v678_v3 = vpop.f32.mrb[6].mxu1 }
 0x253   : >> { %v3208_v4 = vmul.f32 0.5, %v678_v3  ;;  %v2610_v5 = vpop.f32.mrb[7].mxu1  ;;  %v1049_v6 = vsel %vm1048_vm3, %v3206_v62, -inf }
 0x254   : >> { %1050 = vmax.xlane.f32.xlu1 %v1049_v6 }
 0x255   : >> { %v1052_v7 = vsel %vm1048_vm3, %v3208_v4, -inf }
 0x256   : >> { %1053 = vmax.xlane.f32.xlu0 %v1052_v7 }
 0x2ba   : >> { %v725_v8 = vpop.f32.mrb[8].mxu1 }
 0x2bb   : >> { %v3214_v9 = vmul.f32 0.5, %v725_v8  ;;  %v2615_v10 = vpop.f32.mrb[9].mxu1 }
 0x2bc   : >> { %v728_v11 = vpop.f32.mrb[10].mxu1 }
 0x2bd   : >> { %v3216_v12 = vmul.f32 0.5, %v728_v11  ;;  %v2616_v13 = vpop.f32.mrb[11].mxu1  ;;  %v1055_v14 = vsel %vm1048_vm3, %v3214_v9, -inf  ;;  %v3276_v11 = vpop.permute.xlu1 %1327 }
 0x2be   : >> { %v825_v15 = vpop.f32.mrb[0].mxu0  ;;  %1056 = vmax.xlane.f32.xlu0 %v1055_v14 }
 0x2bf   : >> { %v3220_v16 = vmul.f32 0.5, %v825_v15  ;;  %v2627_v17 = vpop.f32.mrb[1].mxu0  ;;  %v1058_v18 = vsel %vm1048_vm3, %v3216_v12, -inf }
 0x2c0   : >> { %v828_v19 = vpop.f32.mrb[2].mxu0  ;;  %1059 = vmax.xlane.f32.xlu1 %v1058_v18 }
 0x2c1   : >> { %v3224_v20 = vmul.f32 0.5, %v828_v19  ;;  %v2628_v21 = vpop.f32.mrb[3].mxu0  ;;  %v1067_v22 = vsel %vm1048_vm3, %v3220_v16, -inf }
 0x2c2   : >> { %1068 = vmax.xlane.f32.xlu0 %v1067_v22  ;;  %v775_v23 = vpop.f32.mrb[12].mxu1 }
 0x2c3   : >> { %v3228_v24 = vmul.f32 0.5, %v775_v23  ;;  %v2621_v25 = vpop.f32.mrb[13].mxu1  ;;  %v1070_v27 = vsel %vm1048_vm3, %v3224_v20, -inf }
 0x2c4   : >> { %1071 = vmax.xlane.f32.xlu1 %v1070_v27  ;;  %v778_v28 = vpop.f32.mrb[14].mxu1 }
 0x2c5   : >> { %v3232_v29 = vmul.f32 0.5, %v778_v28  ;;  %v2622_v30 = vpop.f32.mrb[15].mxu1  ;;  %v1061_v31 = vsel %vm1048_vm3, %v3228_v24, -inf }
 0x2c6   : >> { %v925_v32 = vpop.f32.mrb[4].mxu0  ;;  %1062 = vmax.xlane.f32.xlu0 %v1061_v31 }
 0x2c7   : >> { %v3236_v33 = vmul.f32 0.5, %v925_v32  ;;  %v2639_v35 = vpop.f32.mrb[5].mxu0  ;;  %v1064_v36 = vsel %vm1048_vm3, %v3232_v29, -inf }
 0x2c8   : >> { %v928_v38 = vpop.f32.mrb[6].mxu0  ;;  %1065 = vmax.xlane.f32.xlu1 %v1064_v36 }
 0x2c9   : >> { %v3240_v39 = vmul.f32 0.5, %v928_v38  ;;  %v2640_v40 = vpop.f32.mrb[7].mxu0  ;;  %v1079_v41 = vsel %vm1048_vm3, %v3236_v33, -inf }
 0x2ca   : >> { %1080 = vmax.xlane.f32.xlu0 %v1079_v41  ;;  %v875_v42 = vpop.f32.mrb[16].mxu1 }
 0x2cb   : >> { %v3244_v45 = vmul.f32 0.5, %v875_v42  ;;  %v2633_v46 = vpop.f32.mrb[17].mxu1  ;;  %v1082_v47 = vsel %vm1048_vm3, %v3240_v39, -inf }
 0x2cc   : >> { %1083 = vmax.xlane.f32.xlu1 %v1082_v47  ;;  %v878_v48 = vpop.f32.mrb[18].mxu1 }
 0x2cd   : >> { %v3248_v49 = vmul.f32 0.5, %v878_v48  ;;  %v2634_v50 = vpop.f32.mrb[19].mxu1  ;;  %v1073_v51 = vsel %vm1048_vm3, %v3244_v45, -inf }
 0x2ce   : >> { %v1025_v52 = vpop.f32.mrb[8].mxu0  ;;  %1074 = vmax.xlane.f32.xlu0 %v1073_v51 }
 0x2cf   : >> { %v3252_v53 = vmul.f32 0.5, %v1025_v52  ;;  %v2651_v54 = vpop.f32.mrb[9].mxu0  ;;  %v1076_v55 = vsel %vm1048_vm3, %v3248_v49, -inf }
 0x2d0   : >> { %v1028_v56 = vpop.f32.mrb[10].mxu0  ;;  %1077 = vmax.xlane.f32.xlu1 %v1076_v55 }
 0x2d1   : >> { %v3256_v57 = vmul.f32 0.5, %v1028_v56  ;;  %v2652_v58 = vpop.f32.mrb[11].mxu0  ;;  %v1091_v59 = vsel %vm1048_vm3, %v3252_v53, -inf }
 0x2d2   : >> { %1092 = vmax.xlane.f32.xlu0 %v1091_v59  ;;  %v975_v60 = vpop.f32.mrb[20].mxu1 }
 0x2d3   : >> { %v3260_v61 = vmul.f32 0.5, %v975_v60  ;;  %v2645_v63 = vpop.f32.mrb[21].mxu1  ;;  %v1094_v3 = vsel %vm1048_vm3, %v3256_v57, -inf }
 0x2d4   : >> { %1095 = vmax.xlane.f32.xlu1 %v1094_v3  ;;  %v978_v5 = vpop.f32.mrb[22].mxu1 }
 0x2d5   : >> { %v3264_v6 = vmul.f32 0.5, %v978_v5  ;;  %v2646_v7 = vpop.f32.mrb[23].mxu1  ;;  %v1085_v8 = vsel %vm1048_vm3, %v3260_v61, -inf }
 0x2d6   : >> { %1086 = vmax.xlane.f32.xlu0 %v1085_v8 }
 0x2d7   : >> { %v1088_v10 = vsel %vm1048_vm3, %v3264_v6, -inf }
 0x2d8   : >> { %1089 = vmax.xlane.f32.xlu1 %v1088_v10 }
 0x2e1   : >> { %v1051_v14 = vpop.xlane.xlu1 %1050 }
 0x2e2   : >> { %v1097_v17 = vsub.f32 %v3206_v62, %v1051_v14 }
 0x2e3   : >> { %v1054_v13 = vpop.xlane.xlu0 %1053 }
 0x2e4   : >> { %v1098_v15 = vsub.f32 %v3208_v4, %v1054_v13  ;;  %v1113_v19 = vmul.f32 1.442695, %v1097_v17 }
 0x2e6   : >> { %v1115_v18 = vmul.f32 1.442695, %v1098_v15 }
 0x2e8   : >> { %2867 = vpow2.f32 %v1115_v18 }
 0x2e9   : >> { %1421 = vrot.lane.b32.xlu1 %v3140_v34, %s2985_s30  ;;  %2869 = vpow2.f32 %v1113_v19 }
 0x2ec   : >> { %1374 = vrot.lane.b32.xlu0 %v3135_v26, %s2985_s30 }
 0x2f0   : >> { %1468 = vrot.lane.b32.xlu0 %v3142_v37, %s2985_s30 }
 0x2f2   : >> { %v3280_v21 = vpop.eup %2867 }
 0x2f3   : >> { %v3282_v34 = vpop.eup %2869  ;;  %v1148_v26 = vsel %vm1048_vm3, %v3280_v21, 0.0 }
 0x2f4   : >> { %v1145_v37 = vsel %vm1048_vm3, %v3282_v34, 0.0 }
 0x30d   : >> { %1149 = vadd.xlane.f32.xlu1 %v1148_v26 }
 0x30f   : >> { %1146 = vadd.xlane.f32.xlu0 %v1145_v37 }
 0x34b   : >> { %v1057_v22 = vpop.xlane.xlu0 %1056 }
 0x34c   : >> { %v1099_v4 = vsub.f32 %v3214_v9, %v1057_v22 }
 0x34d   : >> { %v1060_v62 = vpop.xlane.xlu1 %1059 }
 0x34e   : >> { %v1117_v23 = vmul.f32 1.442695, %v1099_v4  ;;  %v1100_v25 = vsub.f32 %v3216_v12, %v1060_v62 }
 0x34f   : >> { %v1069_v27 = vpop.xlane.xlu0 %1068 }
 0x350   : >> { %2871 = vpow2.f32 %v1117_v23  ;;  %v1119_v28 = vmul.f32 1.442695, %v1100_v25  ;;  %v1103_v30 = vsub.f32 %v3220_v16, %v1069_v27 }
 0x351   : >> { %v1072_v31 = vpop.xlane.xlu1 %1071 }
 0x352   : >> { %2873 = vpow2.f32 %v1119_v28  ;;  %v1125_v32 = vmul.f32 1.442695, %v1103_v30  ;;  %v1104_v35 = vsub.f32 %v3224_v20, %v1072_v31 }
 0x353   : >> { %v1063_v36 = vpop.xlane.xlu0 %1062 }
 0x354   : >> { %2875 = vpow2.f32 %v1125_v32  ;;  %v1127_v38 = vmul.f32 1.442695, %v1104_v35  ;;  %v1101_v40 = vsub.f32 %v3228_v24, %v1063_v36 }
 0x355   : >> { %v1066_v9 = vpop.xlane.xlu1 %1065 }
 0x356   : >> { %2877 = vpow2.f32 %v1127_v38  ;;  %v1121_v41 = vmul.f32 1.442695, %v1101_v40  ;;  %v1102_v12 = vsub.f32 %v3232_v29, %v1066_v9 }
 0x357   : >> { %v1081_v42 = vpop.xlane.xlu0 %1080 }
 0x358   : >> { %2879 = vpow2.f32 %v1121_v41  ;;  %v1123_v46 = vmul.f32 1.442695, %v1102_v12  ;;  %v1107_v16 = vsub.f32 %v3236_v33, %v1081_v42 }
 0x359   : >> { %v1084_v47 = vpop.xlane.xlu1 %1083 }
 0x35a   : >> { %v3295_v48 = vpop.eup %2871  ;;  %2881 = vpow2.f32 %v1123_v46  ;;  %v1133_v20 = vmul.f32 1.442695, %v1107_v16  ;;  %v1108_v50 = vsub.f32 %v3240_v39, %v1084_v47 }
 0x35b   : >> { %v1075_v51 = vpop.xlane.xlu0 %1074  ;;  %v1151_v24 = vsel %vm1048_vm3, %v3295_v48, 0.0 }
 0x35c   : >> { %v3300_v52 = vpop.eup %2873  ;;  %2883 = vpow2.f32 %v1133_v20  ;;  %v1135_v29 = vmul.f32 1.442695, %v1108_v50  ;;  %v1105_v54 = vsub.f32 %v3244_v45, %v1075_v51  ;;  %1152 = vadd.xlane.f32.xlu0 %v1151_v24 }
 0x35d   : >> { %v1078_v55 = vpop.xlane.xlu1 %1077  ;;  %v1154_v33 = vsel %vm1048_vm3, %v3300_v52, 0.0 }
 0x35e   : >> { %v3305_v56 = vpop.eup %2875  ;;  %2885 = vpow2.f32 %v1135_v29  ;;  %v1129_v58 = vmul.f32 1.442695, %v1105_v54  ;;  %v1106_v39 = vsub.f32 %v3248_v49, %v1078_v55  ;;  %1155 = vadd.xlane.f32.xlu1 %v1154_v33 }
 0x35f   : >> { %v1093_v59 = vpop.xlane.xlu0 %1092  ;;  %v1163_v60 = vsel %vm1048_vm3, %v3305_v56, 0.0 }
 0x360   : >> { %v3310_v63 = vpop.eup %2877  ;;  %2887 = vpow2.f32 %v1129_v58  ;;  %v1131_v45 = vmul.f32 1.442695, %v1106_v39  ;;  %v1111_v3 = vsub.f32 %v3252_v53, %v1093_v59  ;;  %1164 = vadd.xlane.f32.xlu0 %v1163_v60 }
 0x361   : >> { %v1096_v5 = vpop.xlane.xlu1 %1095  ;;  %v1166_v7 = vsel %vm1048_vm3, %v3310_v63, 0.0 }
 0x362   : >> { %v3315_v8 = vpop.eup %2879  ;;  %2889 = vpow2.f32 %v1131_v45  ;;  %v1141_v49 = vmul.f32 1.442695, %v1111_v3  ;;  %v1112_v10 = vsub.f32 %v3256_v57, %v1096_v5  ;;  %1167 = vadd.xlane.f32.xlu1 %v1166_v7 }
 0x363   : >> { %v1087_v13 = vpop.xlane.xlu0 %1086  ;;  %v1157_v14 = vsel %vm1048_vm3, %v3315_v8, 0.0 }
 0x364   : >> { %v3320_v15 = vpop.eup %2881  ;;  %2891 = vpow2.f32 %v1141_v49  ;;  %v1143_v53 = vmul.f32 1.442695, %v1112_v10  ;;  %v1109_v17 = vsub.f32 %v3260_v61, %v1087_v13  ;;  %1158 = vadd.xlane.f32.xlu0 %v1157_v14 }
 0x365   : >> { %v1090_v18 = vpop.xlane.xlu1 %1089  ;;  %v1160_v19 = vsel %vm1048_vm3, %v3320_v15, 0.0 }
 0x366   : >> { %v3325_v26 = vpop.eup %2883  ;;  %2893 = vpow2.f32 %v1143_v53  ;;  %v1137_v57 = vmul.f32 1.442695, %v1109_v17  ;;  %v1110_v37 = vsub.f32 %v3264_v6, %v1090_v18  ;;  %1161 = vadd.xlane.f32.xlu1 %v1160_v19 }
 0x367   : >> { %v1175_v22 = vsel %vm1048_vm3, %v3325_v26, 0.0  ;;  %v1375_v9 = vpop.permute.xlu0 %1374 }
 0x368   : >> { %v3330_v4 = vpop.eup %2885  ;;  %2895 = vpow2.f32 %v1137_v57  ;;  %v1139_v62 = vmul.f32 1.442695, %v1110_v37  ;;  %1176 = vadd.xlane.f32.xlu0 %v1175_v22 }
 0x369   : >> { %v1178_v61 = vsel %vm1048_vm3, %v3330_v4, 0.0  ;;  %v3362_v41 = vpop.permute.xlu1 %1421 }
 0x36a   : >> { %v3334_v23 = vpop.eup %2887  ;;  %2897 = vpow2.f32 %v1139_v62  ;;  %1179 = vadd.xlane.f32.xlu1 %v1178_v61 }
 0x36b   : >> { %v1169_v25 = vsel %vm1048_vm3, %v3334_v23, 0.0  ;;  %v3364_v12 = vpop.permute.xlu0 %1468 }
 0x36c   : >> { %v3338_v6 = vpop.eup %2889  ;;  %1170 = vadd.xlane.f32.xlu0 %v1169_v25 }
 0x36d   : >> { %v1172_v27 = vsel %vm1048_vm3, %v3338_v6, 0.0 }
 0x36e   : >> { %v3342_v28 = vpop.eup %2891  ;;  %1173 = vadd.xlane.f32.xlu1 %v1172_v27 }
 0x36f   : >> { %v1187_v30 = vsel %vm1048_vm3, %v3342_v28, 0.0 }
 0x370   : >> { %v3346_v31 = vpop.eup %2893  ;;  %1188 = vadd.xlane.f32.xlu0 %v1187_v30 }
 0x371   : >> { %v1190_v32 = vsel %vm1048_vm3, %v3346_v31, 0.0 }
 0x372   : >> { %v3350_v35 = vpop.eup %2895  ;;  %1191 = vadd.xlane.f32.xlu1 %v1190_v32 }
 0x373   : >> { %v1181_v36 = vsel %vm1048_vm3, %v3350_v35, 0.0 }
 0x374   : >> { %v3354_v38 = vpop.eup %2897  ;;  %1182 = vadd.xlane.f32.xlu0 %v1181_v36 }
 0x375   : >> { %v1184_v40 = vsel %vm1048_vm3, %v3354_v38, 0.0 }
 0x376   : >> { %1185 = vadd.xlane.f32.xlu1 %v1184_v40  ;;  %v1620_v40 = vld [vmem:[%s3401_s19] sm:$0x3] }
 0x387   : >> { %1515 = vrot.lane.b32.xlu1 %v3149_v43, %s2985_s30 }
 0x38a   : >> { %1562 = vrot.lane.b32.xlu0 %v3151_v44, %s2985_s30 }
 0x39a   : >> { %v1150_v42 = vpop.xlane.xlu1 %1149 }
 0x39b   : >> { %2899 = vrcp.f32 %v1150_v42 }
 0x39c   : >> { %v1147_v46 = vpop.xlane.xlu0 %1146 }
 0x39d   : >> { %2901 = vrcp.f32 %v1147_v46  ;;  %v1633_v46 = vsel %vm1631_vm4, %v1620_v40, 0 }
 0x3a5   : >> { %v2900_v16 = vpop.eup %2899 }
 0x3a6   : >> { %v1210_v20 = vmul.f32 %v2900_v16, %v3280_v21  ;;  %v1622_v16 = vld [vmem:[%s3401_s19 + $0x4] sm:$0x3] }
 0x3a7   : >> { %v2902_v47 = vpop.eup %2901 }
 0x3a8   : >> { %v1209_v50 = vmul.f32 %v2902_v47, %v3282_v34 }
 0x3aa   : >> { %v1225_v51 = vpack.c.bf16 %v1210_v20, %v1209_v50 }
 0x3ac   : >> { %2656 = vmatmul.mubr.msk.bf16.vlgmr.msra.gmra.mrb[24].mxu1 %vm1048_vm3, %v1225_v51 }
 0x3ad   : >> { %2666 = vmatpush3.bf16.msra.mxu1 %v3276_v11  ;;  %2667 = vmatprep.mubr.msk.bf16.mxu1 %vm2976_vm0, %v2975_v2 }
 0x3ae   : >> { %2677 = vmatprep.subr.bf16.mxu1 %v2975_v2 }
 0x3e9   : >> { %v1153_v43 = vpop.xlane.xlu0 %1152 }
 0x3ea   : >> { %2903 = vrcp.f32 %v1153_v43  ;;  %v1727_v43 = vsel %vm1631_vm4, %v1622_v16, 0 }
 0x3eb   : >> { %v1156_v44 = vpop.xlane.xlu1 %1155 }
 0x3ec   : >> { %2905 = vrcp.f32 %v1156_v44 }
 0x3ed   : >> { %v1165_v24 = vpop.xlane.xlu0 %1164 }
 0x3ef   : >> { %v1168_v29 = vpop.xlane.xlu1 %1167 }
 0x3f0   : >> { %2907 = vrcp.f32 %v1168_v29 }
 0x3f1   : >> { %2909 = vrcp.f32 %v1165_v24  ;;  %v1159_v21 = vpop.xlane.xlu0 %1158  ;;  %v1623_v24 = vld [vmem:[%s3401_s19 + $0x6] sm:$0x3] }
 0x3f2   : >> { %2911 = vrcp.f32 %v1159_v21 }
 0x3f3   : >> { %v1162_v34 = vpop.xlane.xlu1 %1161 }
 0x3f4   : >> { %v2904_v54 = vpop.eup %2903  ;;  %2913 = vrcp.f32 %v1162_v34 }
 0x3f5   : >> { %v1177_v55 = vpop.xlane.xlu0 %1176  ;;  %v1211_v33 = vmul.f32 %v2904_v54, %v3295_v48 }
 0x3f6   : >> { %v2906_v11 = vpop.eup %2905 }
 0x3f7   : >> { %v1212_v58 = vmul.f32 %v2906_v11, %v3300_v52  ;;  %v1180_v39 = vpop.xlane.xlu1 %1179 }
 0x3f8   : >> { %2915 = vrcp.f32 %v1180_v39  ;;  %v1625_v39 = vld [vmem:[%s3401_s19 + $0xa] sm:$0x3] }
 0x3f9   : >> { %2917 = vrcp.f32 %v1177_v55  ;;  %v1171_v59 = vpop.xlane.xlu0 %1170  ;;  %v1226_v60 = vpack.c.bf16 %v1212_v58, %v1211_v33  ;;  %v1774_v55 = vsel %vm1631_vm4, %v1623_v24, 0  ;;  %v1624_v58 = vld [vmem:[%s3401_s19 + $0x8] sm:$0x3] }
 0x3fa   : >> { %v2908_v45 = vpop.eup %2907  ;;  %2919 = vrcp.f32 %v1171_v59 }
 0x3fb   : >> { %v2910_v3 = vpop.eup %2909  ;;  %2662 = vmatmul.mubr.msk.bf16.vlgmr.msra.gmra.mrb[12].mxu0 %vm1048_vm3, %v1226_v60  ;;  %v1174_v5 = vpop.xlane.xlu1 %1173  ;;  %v1216_v48 = vmul.f32 %v2908_v45, %v3310_v63 }
 0x3fc   : >> { %v2912_v7 = vpop.eup %2911  ;;  %2672 = vmatpush3.bf16.msra.mxu0 %v1375_v9  ;;  %2921 = vrcp.f32 %v1174_v5  ;;  %2673 = vmatprep.mubr.msk.bf16.mxu0 %vm2976_vm0, %v2975_v2  ;;  %v1215_v10 = vmul.f32 %v2910_v3, %v3305_v56 }
 0x3fd   : >> { %v1189_v52 = vpop.xlane.xlu0 %1188  ;;  %2683 = vmatprep.subr.bf16.mxu0 %v2975_v2  ;;  %v1213_v13 = vmul.f32 %v2912_v7, %v3315_v8 }
 0x3fe   : >> { %v2914_v49 = vpop.eup %2913  ;;  %v1228_v19 = vpack.c.bf16 %v1216_v48, %v1215_v10  ;;  %v1868_v10 = vsel %vm1631_vm4, %v1625_v39, 0 }
 0x3ff   : >> { %v1214_v14 = vmul.f32 %v2914_v49, %v3320_v15  ;;  %v1192_v53 = vpop.xlane.xlu1 %1191  ;;  %v1821_v49 = vsel %vm1631_vm4, %v1624_v58, 0 }
 0x400   : >> { %2923 = vrcp.f32 %v1192_v53  ;;  %v1626_v53 = vld [vmem:[%s3401_s19 + $0xc] sm:$0x3] }
 0x401   : >> { %2925 = vrcp.f32 %v1189_v52  ;;  %v1183_v17 = vpop.xlane.xlu0 %1182  ;;  %v1227_v18 = vpack.c.bf16 %v1214_v14, %v1213_v13 }
 0x402   : >> { %v2916_v57 = vpop.eup %2915  ;;  %2927 = vrcp.f32 %v1183_v17  ;;  %v1627_v17 = vld [vmem:[%s3401_s19 + $0xe] sm:$0x3] }
 0x403   : >> { %v2918_v37 = vpop.eup %2917  ;;  %2668 = vmatmul.mubr.msk.bf16.vlgmr.msra.gmra.mrb[28].mxu1 %vm1048_vm3, %v1227_v18  ;;  %2674 = vmatmul.mubr.msk.bf16.vlgmr.msra.gmra.mrb[16].mxu0 %vm1048_vm3, %v1228_v19  ;;  %v1186_v63 = vpop.xlane.xlu1 %1185  ;;  %v1220_v56 = vmul.f32 %v2916_v57, %v3330_v4 }
 0x404   : >> { %v2920_v22 = vpop.eup %2919  ;;  %2678 = vmatpush3.bf16.msra.mxu1 %v3362_v41  ;;  %2684 = vmatpush3.bf16.msra.mxu0 %v3364_v12  ;;  %2929 = vrcp.f32 %v1186_v63  ;;  %v1219_v15 = vmul.f32 %v2918_v37, %v3325_v26 }
 0x405   : >> { %2679 = vmatprep.mubr.msk.bf16.mxu1 %vm2976_vm0, %v2975_v2  ;;  %2685 = vmatprep.mubr.msk.bf16.mxu0 %vm2976_vm0, %v2975_v2  ;;  %v1217_v62 = vmul.f32 %v2920_v22, %v3334_v23  ;;  %v1563_v32 = vpop.permute.xlu0 %1562 }
 0x406   : >> { %v2922_v8 = vpop.eup %2921  ;;  %2689 = vmatprep.subr.bf16.mxu1 %v2975_v2  ;;  %2695 = vmatprep.subr.bf16.mxu0 %v2975_v2  ;;  %v1230_v27 = vpack.c.bf16 %v1220_v56, %v1219_v15  ;;  %v1915_v15 = vsel %vm1631_vm4, %v1626_v53, 0 }
 0x407   : >> { %v1218_v61 = vmul.f32 %v2922_v8, %v3338_v6  ;;  %v1516_v36 = vpop.permute.xlu1 %1515 }
 0x409   : >> { %v1229_v25 = vpack.c.bf16 %v1218_v61, %v1217_v62  ;;  %v1962_v62 = vsel %vm1631_vm4, %v1627_v17, 0 }
 0x40a   : >> { %v2924_v4 = vpop.eup %2923 }
 0x40b   : >> { %v2926_v30 = vpop.eup %2925  ;;  %2680 = vmatmul.mubr.msk.bf16.vlgmr.msra.gmra.mrb[32].mxu1 %vm1048_vm3, %v1229_v25  ;;  %2686 = vmatmul.mubr.msk.bf16.vlgmr.msra.gmra.mrb[20].mxu0 %vm1048_vm3, %v1230_v27  ;;  %v1224_v23 = vmul.f32 %v2924_v4, %v3346_v31 }
 0x40c   : >> { %v2928_v26 = vpop.eup %2927  ;;  %2690 = vmatpush3.bf16.msra.mxu1 %v1516_v36  ;;  %2696 = vmatpush3.bf16.msra.mxu0 %v1563_v32  ;;  %v1223_v9 = vmul.f32 %v2926_v30, %v3342_v28  ;;  %v1621_v28 = vld [vmem:[%s3401_s19 + $0x2] sm:$0x3] }
 0x40d   : >> { %2691 = vmatprep.mubr.msk.bf16.mxu1 %vm2976_vm0, %v2975_v2  ;;  %2697 = vmatprep.mubr.msk.bf16.mxu0 %vm2976_vm0, %v2975_v2  ;;  %v1221_v41 = vmul.f32 %v2928_v26, %v3350_v35  ;;  %v1680_v35 = vsel %vm1631_vm4, %v1621_v28, 0 }
 0x40e   : >> { %v2930_v6 = vpop.eup %2929  ;;  %2701 = vmatprep.subr.bf16.mxu1 %v2975_v2  ;;  %2707 = vmatprep.subr.bf16.mxu0 %v2975_v2  ;;  %v1232_v42 = vpack.c.bf16 %v1224_v23, %v1223_v9 }
 0x40f   : >> { %v1222_v31 = vmul.f32 %v2930_v6, %v3354_v38 }
 0x411   : >> { %v1231_v12 = vpack.c.bf16 %v1222_v31, %v1221_v41 }
 0x413   : >> { %2692 = vmatmul.mubr.msk.bf16.vlgmr.msra.gmra.mrb[36].mxu1 %vm1048_vm3, %v1231_v12  ;;  %2698 = vmatmul.mubr.msk.bf16.vlgmr.msra.gmra.mrb[24].mxu0 %vm1048_vm3, %v1232_v42 }
 0x414   : >> { %2702 = vmatpush3.bf16.msra.mxu1 %v1633_v46  ;;  %2703 = vmatprep.mubr.msk.bf16.mxu1 %vm2976_vm0, %v2975_v2 }
 0x415   : >> { %2709 = vmatprep.mubr.msk.bf16.mxu0 %vm2976_vm0, %v2975_v2  ;;  %2713 = vmatprep.subr.bf16.mxu1 %v2975_v2 }
 0x416   : >> { %2708 = vmatpush3.bf16.msra.mxu0 %v1680_v35 }
 0x417   : >> { %2719 = vmatprep.subr.bf16.mxu0 %v2975_v2 }
 0x47f   : >> { %v1273_v38 = vpop.f32.mrb[24].mxu1 }
 0x480   : >> { %v2657_v47 = vpop.f32.mrb[25].mxu1 }
 0x481   : >> { %v1276_v20 = vpop.f32.mrb[26].mxu1 }
 0x482   : >> { %v1609_v50 = vpack.c.bf16 %v1276_v20, %v1273_v38  ;;  %v2658_v51 = vpop.f32.mrb[27].mxu1 }
 0x484   : >> { %2704 = vmatmul.mubr.msk.bf16.vlgmr.msra.gmra.mrb[40].mxu1 %vm634_vm2, %v1609_v50 }
 0x485   : >> { %2714 = vmatpush3.bf16.msra.mxu1 %v1727_v43  ;;  %2715 = vmatprep.mubr.msk.bf16.mxu1 %vm2976_vm0, %v2975_v2 }
 0x486   : >> { %2725 = vmatprep.subr.bf16.mxu1 %v2975_v2 }
 0x4ce   : >> { %v1320_v44 = vpop.f32.mrb[12].mxu0 }
 0x4cf   : >> { %v2663_v29 = vpop.f32.mrb[13].mxu0 }
 0x4d0   : >> { %v1323_v21 = vpop.f32.mrb[14].mxu0 }
 0x4d1   : >> { %v1610_v34 = vpack.c.bf16 %v1323_v21, %v1320_v44  ;;  %v2664_v54 = vpop.f32.mrb[15].mxu0 }
 0x4d3   : >> { %2710 = vmatmul.mubr.msk.bf16.vlgmr.msra.gmra.mrb[28].mxu0 %vm634_vm2, %v1610_v34 }
 0x4d4   : >> { %2720 = vmatpush3.bf16.msra.mxu0 %v1774_v55  ;;  %2721 = vmatprep.mubr.msk.bf16.mxu0 %vm2976_vm0, %v2975_v2 }
 0x4d5   : >> { %2731 = vmatprep.subr.bf16.mxu0 %v2975_v2 }
 0x4d6   : >> { %v1367_v11 = vpop.f32.mrb[28].mxu1  ;;  %v1414_v33 = vpop.f32.mrb[16].mxu0 }
 0x4d7   : >> { %v2669_v59 = vpop.f32.mrb[29].mxu1  ;;  %v2675_v60 = vpop.f32.mrb[17].mxu0 }
 0x4d8   : >> { %v1370_v45 = vpop.f32.mrb[30].mxu1  ;;  %v1417_v3 = vpop.f32.mrb[18].mxu0 }
 0x4d9   : >> { %v1611_v5 = vpack.c.bf16 %v1370_v45, %v1367_v11  ;;  %v1612_v7 = vpack.c.bf16 %v1417_v3, %v1414_v33  ;;  %v2670_v48 = vpop.f32.mrb[31].mxu1  ;;  %v2676_v52 = vpop.f32.mrb[19].mxu0 }
 0x4db   : >> { %2716 = vmatmul.mubr.msk.bf16.vlgmr.msra.gmra.mrb[44].mxu1 %vm634_vm2, %v1611_v5  ;;  %2722 = vmatmul.mubr.msk.bf16.vlgmr.msra.gmra.mrb[32].mxu0 %vm634_vm2, %v1612_v7 }
 0x4dc   : >> { %2726 = vmatpush3.bf16.msra.mxu1 %v1821_v49  ;;  %2732 = vmatpush3.bf16.msra.mxu0 %v1868_v10 }
 0x4dd   : >> { %2727 = vmatprep.mubr.msk.bf16.mxu1 %vm2976_vm0, %v2975_v2  ;;  %2733 = vmatprep.mubr.msk.bf16.mxu0 %vm2976_vm0, %v2975_v2 }
 0x4de   : >> { %v1461_v13 = vpop.f32.mrb[32].mxu1  ;;  %v1508_v14 = vpop.f32.mrb[20].mxu0  ;;  %2737 = vmatprep.subr.bf16.mxu1 %v2975_v2  ;;  %2743 = vmatprep.subr.bf16.mxu0 %v2975_v2 }
 0x4df   : >> { %v2681_v18 = vpop.f32.mrb[33].mxu1  ;;  %v2687_v19 = vpop.f32.mrb[21].mxu0 }
 0x4e0   : >> { %v1464_v57 = vpop.f32.mrb[34].mxu1  ;;  %v1511_v37 = vpop.f32.mrb[22].mxu0 }
 0x4e1   : >> { %v1613_v63 = vpack.c.bf16 %v1464_v57, %v1461_v13  ;;  %v1614_v22 = vpack.c.bf16 %v1511_v37, %v1508_v14  ;;  %v2682_v56 = vpop.f32.mrb[35].mxu1  ;;  %v2688_v8 = vpop.f32.mrb[23].mxu0 }
 0x4e3   : >> { %2728 = vmatmul.mubr.msk.bf16.vlgmr.msra.gmra.mrb[48].mxu1 %vm634_vm2, %v1613_v63  ;;  %2734 = vmatmul.mubr.msk.bf16.vlgmr.msra.gmra.mrb[36].mxu0 %vm634_vm2, %v1614_v22 }
 0x4e4   : >> { %2738 = vmatpush3.bf16.msra.mxu1 %v1915_v15  ;;  %2744 = vmatpush3.bf16.msra.mxu0 %v1962_v62 }
 0x4e5   : >> { %2739 = vmatprep.mubr.msk.bf16.mxu1 %vm2976_vm0, %v2975_v2  ;;  %2745 = vmatprep.mubr.msk.bf16.mxu0 %vm2976_vm0, %v2975_v2 }
 0x4e6   : >> { %v1555_v61 = vpop.f32.mrb[36].mxu1  ;;  %v1602_v25 = vpop.f32.mrb[24].mxu0  ;;  %2749 = vmatprep.subr.bf16.mxu1 %v2975_v2  ;;  %2757 = vmatprep.subr.bf16.mxu0 %v2975_v2 }
 0x4e7   : >> { %v2693_v27 = vpop.f32.mrb[37].mxu1  ;;  %v2699_v4 = vpop.f32.mrb[25].mxu0 }
 0x4e8   : >> { %v1558_v30 = vpop.f32.mrb[38].mxu1  ;;  %v1605_v32 = vpop.f32.mrb[26].mxu0 }
 0x4e9   : >> { %v1615_v36 = vpack.c.bf16 %v1558_v30, %v1555_v61  ;;  %v1616_v26 = vpack.c.bf16 %v1605_v32, %v1602_v25  ;;  %v2694_v23 = vpop.f32.mrb[39].mxu1  ;;  %v2700_v6 = vpop.f32.mrb[27].mxu0  ;;  %v2503_v30 = vld [vmem:[%s2035_s22] ss:$0 sm:$0xff] }
 0x4eb   : >> { %2740 = vmatmul.mubr.msk.bf16.vlgmr.msra.gmra.mrb[52].mxu1 %vm634_vm2, %v1615_v36  ;;  %2746 = vmatmul.mubr.msk.bf16.vlgmr.msra.gmra.mrb[40].mxu0 %vm634_vm2, %v1616_v26 }
 0x4ec   : >> { %2753 = vmatprep.mubr.msk.bf16.mxu1 %vm2976_vm0, %v2975_v2  ;;  %2773 = vmatprep.mubr.msk.bf16.mxu0 %vm2976_vm0, %v2975_v2 }
 0x557   : >> { %v1669_v40 = vpop.f32.mrb[40].mxu1 }
 0x558   : >> { %v2705_v9 = vpop.f32.mrb[41].mxu1  ;;  %v2005_v42 = vsel %vm534_vm1, %v1669_v40, 0.0 }
 0x559   : >> { %v1672_v41 = vpop.f32.mrb[42].mxu1 }
 0x55a   : >> { %v2706_v31 = vpop.f32.mrb[43].mxu1  ;;  %v2020_v16 = vsel %vm534_vm1, %v1672_v41, 0.0 }
 0x5a6   : >> { %v1716_v12 = vpop.f32.mrb[28].mxu0 }
 0x5a7   : >> { %v2006_v46 = vsel %vm534_vm1, %v1716_v12, 0.0  ;;  %v2711_v28 = vpop.f32.mrb[29].mxu0 }
 0x5a8   : >> { %v2007_v35 = vadd.f32 %v2006_v46, %v2005_v42  ;;  %v1719_v38 = vpop.f32.mrb[30].mxu0 }
 0x5a9   : >> { %v2021_v47 = vsel %vm534_vm1, %v1719_v38, 0.0  ;;  %v2712_v20 = vpop.f32.mrb[31].mxu0 }
 0x5aa   : >> { %v2022_v50 = vadd.f32 %v2021_v47, %v2020_v16 }
 0x5ae   : >> { %v1763_v51 = vpop.f32.mrb[44].mxu1  ;;  %v1810_v43 = vpop.f32.mrb[32].mxu0 }
 0x5af   : >> { %v2008_v44 = vsel %vm534_vm1, %v1763_v51, 0.0  ;;  %v2717_v24 = vpop.f32.mrb[45].mxu1  ;;  %v2723_v29 = vpop.f32.mrb[33].mxu0  ;;  %v2010_v55 = vsel %vm534_vm1, %v1810_v43, 0.0 }
 0x5b0   : >> { %v2009_v21 = vadd.f32 %v2008_v44, %v2007_v35  ;;  %v1766_v34 = vpop.f32.mrb[46].mxu1  ;;  %v1813_v54 = vpop.f32.mrb[34].mxu0  ;;  %v2857_v44 = vld [vmem:[%s3115_s21] sm:$0xff]   ;;  %v2858_v24 = vld [vmem:[%s3115_s21 + $0x8] sm:$0xff]  }
 0x5b1   : >> { %v2023_v11 = vsel %vm534_vm1, %v1766_v34, 0.0  ;;  %v2718_v33 = vpop.f32.mrb[47].mxu1  ;;  %v2724_v58 = vpop.f32.mrb[35].mxu0  ;;  %v2025_v60 = vsel %vm534_vm1, %v1813_v54, 0.0  ;;  %2750 = vmatpush3.bf16.msra.mxu1 %v2857_v44  ;;  %v2859_v29 = vld [vmem:[%s3120_s24] sm:$0xff]   ;;  %v2861_v34 = vld [vmem:[%s3120_s24 + $0x10] sm:$0xff]  }
 0x5b2   : >> { %v2011_v39 = vadd.f32 %v2010_v55, %v2009_v21  ;;  %v2024_v59 = vadd.f32 %v2023_v11, %v2022_v50  ;;  %2751 = vmatprep.subr.bf16.mxu1 %v2975_v2  ;;  %2758 = vmatpush3.bf16.msra.mxu0 %v2859_v29  ;;  %v2860_v21 = vld [vmem:[%s3120_s24 + $0x8] sm:$0xff]   ;;  %v2862_v54 = vld [vmem:[%s3120_s24 + $0x18] sm:$0xff]   ;;  %v2863_v55 = vld [vmem:[%s3120_s24 + $0x20] sm:$0xff]  }
 0x5b3   : >> { %2759 = vmatprep.subr.bf16.mxu0 %v2975_v2  ;;  %v2864_v11 = vld [vmem:[%s3120_s24 + $0x28] sm:$0xff]  }
 0x5b4   : >> { %v2026_v45 = vadd.f32 %v2025_v60, %v2024_v59 }
 0x5b5   : >> { %2752 = vmatpush3.bf16.msra.mxu1 %v2858_v24 }
 0x5b6   : >> { %v1857_v3 = vpop.f32.mrb[48].mxu1  ;;  %v1904_v5 = vpop.f32.mrb[36].mxu0  ;;  %2760 = vmatpush3.bf16.msra.mxu0 %v2860_v21 }
 0x5b7   : >> { %v2012_v7 = vsel %vm534_vm1, %v1857_v3, 0.0  ;;  %v2729_v48 = vpop.f32.mrb[49].mxu1  ;;  %v2735_v52 = vpop.f32.mrb[37].mxu0  ;;  %v2014_v14 = vsel %vm534_vm1, %v1904_v5, 0.0  ;;  %2761 = vmatprep.subr.bf16.mxu0 %v2975_v2  ;;  %v2504_v5 = vld [vmem:[%s2047_s25] ss:$0 sm:$0xff]  ;;  %s2286_s25 = scalar_lea.vmem %s3577_s11, %s2973_s27 }
 0x5b8   : >> { %v2013_v49 = vadd.f32 %v2012_v7, %v2011_v39  ;;  %v1860_v10 = vpop.f32.mrb[50].mxu1  ;;  %v1907_v13 = vpop.f32.mrb[38].mxu0  ;;  %v2522_v24 = vld [vmem:[%s2286_s25] ss:$0 sm:$0xff] }
 0x5b9   : >> { %v2027_v53 = vsel %vm534_vm1, %v1860_v10, 0.0  ;;  %v2730_v17 = vpop.f32.mrb[51].mxu1  ;;  %v2736_v18 = vpop.f32.mrb[39].mxu0  ;;  %v2029_v37 = vsel %vm534_vm1, %v1907_v13, 0.0  ;;  %v2505_v10 = vld [vmem:[%s2049_s16] ss:$0 sm:$0xff]  ;;  %s2288_s16 = scalar_lea.vmem %s3578_s12, %s2973_s27 }
 0x5ba   : >> { %v2015_v19 = vadd.f32 %v2014_v14, %v2013_v49  ;;  %v2028_v57 = vadd.f32 %v2027_v53, %v2026_v45  ;;  %2762 = vmatpush3.bf16.msra.mxu0 %v2861_v34  ;;  %v2865_v18 = vld [vmem:[%s3120_s24 + $0x30] sm:$0xff]   ;;  %v2523_v34 = vld [vmem:[%s2288_s16] ss:$0 sm:$0xff] }
 0x5bb   : >> { %2763 = vmatprep.subr.bf16.mxu0 %v2975_v2 }
 0x5bc   : >> { %v2030_v63 = vadd.f32 %v2029_v37, %v2028_v57  ;;  %v2507_v57 = vld [vmem:[%s2101_s28] ss:$0 sm:$0xff] }
 0x5be   : >> { %v1951_v22 = vpop.f32.mrb[52].mxu1  ;;  %v1998_v56 = vpop.f32.mrb[40].mxu0  ;;  %2764 = vmatpush3.bf16.msra.mxu0 %v2862_v54 }
 0x5bf   : >> { %v2016_v8 = vsel %vm534_vm1, %v1951_v22, 0.0  ;;  %v2741_v15 = vpop.f32.mrb[53].mxu1  ;;  %v2747_v62 = vpop.f32.mrb[41].mxu0  ;;  %v2018_v4 = vsel %vm534_vm1, %v1998_v56, 0.0  ;;  %2765 = vmatprep.subr.bf16.mxu0 %v2975_v2 }
 0x5c0   : >> { %v2017_v61 = vadd.f32 %v2016_v8, %v2015_v19  ;;  %v1954_v25 = vpop.f32.mrb[54].mxu1  ;;  %v2001_v27 = vpop.f32.mrb[42].mxu0  ;;  %v2866_v19 = vld [vmem:[%s3120_s24 + $0x38] sm:$0xff]   ;;  %s2187_s24 = scalar_lea.vmem %s3576_s10, %s2973_s27  ;;  %s503_s27 = sadd.s32 1, %s2973_s27  }
 0x5c1   : >> { %v2031_v32 = vsel %vm534_vm1, %v1954_v25, 0.0  ;;  %v2742_v36 = vpop.f32.mrb[55].mxu1  ;;  %v2748_v26 = vpop.f32.mrb[43].mxu0  ;;  %v2033_v40 = vsel %vm534_vm1, %v2001_v27, 0.0  ;;  %p500_p4 = scmp.ge.s32.totalorder %s503_s27, 4  }
 0x5c2   : >> { %v2019_v23 = vadd.f32 %v2018_v4, %v2017_v61  ;;  %v2032_v6 = vadd.f32 %v2031_v32, %v2030_v63  ;;  %2766 = vmatpush3.bf16.msra.mxu0 %v2863_v55 }
 0x5c3   : >> { %2767 = vmatprep.subr.bf16.mxu0 %v2975_v2 }
 0x5c4   : >> { %v2043_v9 = vadd.f32 %v2503_v30, %v2019_v23  ;;  %v2034_v41 = vadd.f32 %v2033_v40, %v2032_v6 }
 0x5c6   : >> { %v2044_v31 = vadd.f32 %v2503_v30, %v2034_v41  ;;  %v2045_v12 = vadd.f32 %v2969_v0, %v2043_v9  ;;  %2768 = vmatpush3.bf16.msra.mxu0 %v2864_v11 }
 0x5c7   : >> { %2769 = vmatprep.subr.bf16.mxu0 %v2975_v2 }
 0x5c8   : >> { %v2051_v42 = vsel %vm534_vm1, %v2045_v12, 0.0  ;;  %v2046_v46 = vadd.f32 %v2965_v1, %v2044_v31 }
 0x5c9   : >> { %2052 = vadd.xlane.f32.xlu1 %v2051_v42 }
 0x5ca   : >> { %v2054_v28 = vsel %vm534_vm1, %v2046_v46, 0.0  ;;  %2770 = vmatpush3.bf16.msra.mxu0 %v2865_v18 }
 0x5cb   : >> { %2055 = vadd.xlane.f32.xlu0 %v2054_v28  ;;  %2771 = vmatprep.subr.bf16.mxu0 %v2975_v2  ;;  %v2513_v2 = vld [vmem:[%s2187_s24] ss:$0 sm:$0xff] }
 0x5ce   : >> { %2772 = vmatpush3.bf16.msra.mxu0 %v2866_v19 }
 0x656   : >> { %v2053_v35 = vpop.xlane.xlu1 %2052 }
 0x657   : >> { %v2058_v38 = vmul.f32 0.03125, %v2053_v35 }
 0x658   : >> { %v2056_v16 = vpop.xlane.xlu0 %2055 }
 0x659   : >> { %v2060_v47 = vsub.f32 %v2045_v12, %v2058_v38  ;;  %v2059_v20 = vmul.f32 0.03125, %v2056_v16 }
 0x65b   : >> { %v2061_v50 = vsub.f32 %v2046_v46, %v2059_v20  ;;  %v2062_v51 = vmul.f32 %v2060_v47, %v2060_v47 }
 0x65d   : >> { %v2064_v0 = vsel %vm534_vm1, %v2062_v51, 0.0  ;;  %v2063_v43 = vmul.f32 %v2061_v50, %v2061_v50 }
 0x65e   : >> { %2065 = vadd.xlane.f32.xlu0 %v2064_v0 }
 0x65f   : >> { %v2067_v1 = vsel %vm534_vm1, %v2063_v43, 0.0 }
 0x660   : >> { %2068 = vadd.xlane.f32.xlu1 %v2067_v1 }
 0x6eb   : >> { %v2066_v33 = vpop.xlane.xlu0 %2065 }
 0x6ec   : >> { %v2070_v58 = vmul.f32 0.03125, %v2066_v33 }
 0x6ed   : >> { %v2069_v39 = vpop.xlane.xlu1 %2068 }
 0x6ee   : >> { %v2072_v59 = vadd.f32 1e-05, %v2070_v58  ;;  %v2071_v60 = vmul.f32 0.03125, %v2069_v39 }
 0x6f0   : >> { %2931 = vrsqrt.f32 %v2072_v59  ;;  %v2073_v45 = vadd.f32 1e-05, %v2071_v60 }
 0x6f2   : >> { %2933 = vrsqrt.f32 %v2073_v45 }
 0x6fa   : >> { %v2932_v3 = vpop.eup %2931 }
 0x6fb   : >> { %v2076_v7 = vmul.f32 %v2932_v3, %v2060_v47 }
 0x6fc   : >> { %v2934_v48 = vpop.eup %2933 }
 0x6fd   : >> { %v2084_v52 = vmul.f32 %v2504_v5, %v2076_v7  ;;  %v2077_v49 = vmul.f32 %v2934_v48, %v2061_v50 }
 0x6ff   : >> { %v2085_v13 = vmul.f32 %v2504_v5, %v2077_v49  ;;  %v2092_v14 = vadd.f32 %v2505_v10, %v2084_v52 }
 0x701   : >> { %v2093_v53 = vadd.f32 %v2505_v10, %v2085_v13 }
 0x703   : >> { %v2094_v17 = vpack.c.bf16 %v2093_v53, %v2092_v14 }
 0x705   : >> { %2754 = vmatmul.mubr.msk.bf16.vlgmr.msra.gmra.mrb[56].mxu1 %vm534_vm1, %v2094_v17 }
 0x7d8   : >> { %v2158_v37 = vpop.f32.mrb[56].mxu1 }
 0x7d9   : >> { %v2159_v63 = vadd.f32 %v2507_v57, %v2158_v37  ;;  %v2755_v22 = vpop.f32.mrb[57].mxu1 }
 0x7da   : >> { %v2161_v56 = vpop.f32.mrb[58].mxu1 }
 0x7db   : >> { %v2162_v8 = vadd.f32 %v2507_v57, %v2161_v56  ;;  %v2756_v15 = vpop.f32.mrb[59].mxu1  ;;  %v2165_v62 = vmax.f32 %v2159_v63, 0.0  ;;  %v2524_v63 = vld [vmem:[%s3579_s13] ss:$0 sm:$0xff] (%p500_p4) }
 0x7dc   : > { %v2525_v56 = vld [vmem:[%s3580_s14] ss:$0 sm:$0xff] (%p500_p4) }
 0x7dd   : >> { %v2166_v61 = vmax.f32 %v2162_v8, 0.0 }
 0x7df   : >> { %v2167_v25 = vpack.c.bf16 %v2166_v61, %v2165_v62 }
 0x7e1   : >> { %2774 = vmatmul.mubr.bf16.vlgmr.msra.gmra.mrb[44].mxu0 %v2167_v25 }
 0x8b4   : >> { %v2277_v27 = vpop.f32.mrb[44].mxu0 }
 0x8b5   : >> { %v2278_v4 = vadd.f32 %v2513_v2, %v2277_v27  ;;  %v2775_v30 = vpop.f32.mrb[45].mxu0 }
 0x8b6   : >> { %v2280_v32 = vpop.f32.mrb[46].mxu0 }
 0x8b7   : >> { %v2281_v36 = vadd.f32 %v2513_v2, %v2280_v32  ;;  %v2776_v26 = vpop.f32.mrb[47].mxu0  ;;  %v2284_v23 = vadd.f32 %v2278_v4, %v2092_v14 }
 0x8b9   : >> { %v2290_v6 = vsel %vm534_vm1, %v2284_v23, 0.0  ;;  %v2285_v40 = vadd.f32 %v2281_v36, %v2093_v53 }
 0x8ba   : >> { %2291 = vadd.xlane.f32.xlu0 %v2290_v6 }
 0x8bb   : >> { %v2293_v9 = vsel %vm534_vm1, %v2285_v40, 0.0 }
 0x8bc   : >> { %2294 = vadd.xlane.f32.xlu1 %v2293_v9 }
 0x947   : >> { %v2292_v41 = vpop.xlane.xlu0 %2291 }
 0x948   : >> { %v2296_v31 = vmul.f32 0.03125, %v2292_v41 }
 0x949   : >> { %v2295_v12 = vpop.xlane.xlu1 %2294 }
 0x94a   : >> { %v2298_v42 = vsub.f32 %v2284_v23, %v2296_v31  ;;  %v2297_v46 = vmul.f32 0.03125, %v2295_v12 }
 0x94c   : >> { %v2299_v28 = vsub.f32 %v2285_v40, %v2297_v46  ;;  %v2300_v35 = vmul.f32 %v2298_v42, %v2298_v42 }
 0x94e   : >> { %v2302_v38 = vsel %vm534_vm1, %v2300_v35, 0.0  ;;  %v2301_v16 = vmul.f32 %v2299_v28, %v2299_v28 }
 0x94f   : >> { %2303 = vadd.xlane.f32.xlu0 %v2302_v38 }
 0x950   : >> { %v2305_v47 = vsel %vm534_vm1, %v2301_v16, 0.0 }
 0x951   : >> { %2306 = vadd.xlane.f32.xlu1 %v2305_v47 }
 0x9dc   : >> { %v2304_v20 = vpop.xlane.xlu0 %2303 }
 0x9dd   : >> { %v2308_v50 = vmul.f32 0.03125, %v2304_v20 }
 0x9de   : >> { %v2307_v51 = vpop.xlane.xlu1 %2306 }
 0x9df   : >> { %v2310_v0 = vadd.f32 1e-05, %v2308_v50  ;;  %v2309_v43 = vmul.f32 0.03125, %v2307_v51 }
 0x9e1   : >> { %2935 = vrsqrt.f32 %v2310_v0  ;;  %v2311_v1 = vadd.f32 1e-05, %v2309_v43 }
 0x9e3   : >> { %2937 = vrsqrt.f32 %v2311_v1 }
 0x9eb   : >> { %v2936_v44 = vpop.eup %2935 }
 0x9ec   : >> { %v2314_v29 = vmul.f32 %v2936_v44, %v2298_v42 }
 0x9ed   : >> { %v2938_v21 = vpop.eup %2937 }
 0x9ee   : >> { %v2322_v54 = vmul.f32 %v2522_v24, %v2314_v29  ;;  %v2315_v55 = vmul.f32 %v2938_v21, %v2299_v28  ;;  %502 = sbr.rel (!%p500_p4) target bundleno = 17 (0x11), region = 129 }
 0x9f0   : >> { %v2330_v11 = vadd.f32 %v2523_v34, %v2322_v54   ;;  %v2323_v33 = vmul.f32 %v2522_v24, %v2315_v55 }
 0x9f2   : >> { %v2331_v58 = vadd.f32 %v2523_v34, %v2323_v33   ;;  %v3583_v0 = vmov %v2330_v11  ;;  %v2335_v39 = vsel (%p500_p4), %vm534_vm1, %v2330_v11, 0.0 }
 0x9f3   : > { %2336 = vadd.xlane.f32.xlu0 (%p500_p4), %v2335_v39 }
 0x9f4   : >> { %v3582_v1 = vmov %v2331_v58  ;;  %v2338_v59 = vsel (%p500_p4), %vm534_vm1, %v2331_v58, 0.0 }
 0x9f7   : > { %2339 = vadd.xlane.f32.xlu0 %v2338_v59 }
 0xa80   : > { %v2337_v60 = vpop.xlane.xlu0 %2336 }
 0xa81   : > { %v2342_v45 = vmul.f32 0.03125, %v2337_v60 }
 0xa83   : > { %v2344_v3 = vsub.f32 %v2330_v11, %v2342_v45 }
 0xa84   : > { %v2340_v5 = vpop.xlane.xlu0 %2339 }
 0xa85   : > { %v2343_v7 = vmul.f32 0.03125, %v2340_v5  ;;  %v2346_v48 = vmul.f32 %v2344_v3, %v2344_v3 }
 0xa87   : > { %v2345_v52 = vsub.f32 %v2331_v58, %v2343_v7  ;;  %v2348_v49 = vsel %vm534_vm1, %v2346_v48, 0.0 }
 0xa88   : > { %2349 = vadd.xlane.f32.xlu1 %v2348_v49 }
 0xa89   : > { %v2347_v10 = vmul.f32 %v2345_v52, %v2345_v52 }
 0xa8b   : > { %v2351_v13 = vsel %vm534_vm1, %v2347_v10, 0.0 }
 0xa8c   : > { %2352 = vadd.xlane.f32.xlu1 %v2351_v13 }
 0xb15   : > { %v2350_v14 = vpop.xlane.xlu1 %2349 }
 0xb16   : > { %v2354_v53 = vmul.f32 0.03125, %v2350_v14 }
 0xb18   : > { %v2356_v17 = vadd.f32 1e-05, %v2354_v53 }
 0xb19   : > { %v2353_v18 = vpop.xlane.xlu1 %2352 }
 0xb1a   : > { %2939 = vrsqrt.f32 %v2356_v17  ;;  %v2355_v19 = vmul.f32 0.03125, %v2353_v18 }
 0xb1c   : > { %v2357_v57 = vadd.f32 1e-05, %v2355_v19 }
 0xb1e   : > { %2941 = vrsqrt.f32 %v2357_v57 }
 0xb24   : > { %v2940_v37 = vpop.eup %2939 }
 0xb25   : > { %v2360_v22 = vmul.f32 %v2940_v37, %v2344_v3 }
 0xb27   : > { %v2368_v8 = vmul.f32 %v2524_v63, %v2360_v22 }
 0xb28   : > { %v2942_v15 = vpop.eup %2941 }
 0xb29   : > { %v2376_v62 = vadd.f32 %v2525_v56, %v2368_v8  ;;  %v2361_v61 = vmul.f32 %v2942_v15, %v2345_v52 }
 0xb2b   : > { %2378 = vst.msk [vmem:[%s3080_s26] sm:$0xff] %vm534_vm1, %v2376_v62  ;;  %v2369_v25 = vmul.f32 %v2524_v63, %v2361_v61 }
 0xb2d   : > { %v2377_v2 = vadd.f32 %v2525_v56, %v2369_v25 }
 0xb2f   : > { %2379 = vst.msk [vmem:[%s3080_s26 + $0x8] sm:$0xff] %vm534_vm1, %v2377_v2 }
 0xb30 PF: > { %s25_s18 = sadd.s32 1, %s2961_s18  }
 0xb31   : > { %p22_p5 = scmp.ge.s32.totalorder %s25_s18, 4  }
 0xb33   :  { %24 = sbr.rel (!%p22_p5) target bundleno = 1 (0x1), region = 140 }

// kernel: bidaf_transformer_forward.11
= control target key start
LH: loop header
LB: loop body
LE: loop exit
PB: predicated region body
PF: predicated region fallthrough
CT: control target
= control target key end

     0   :  { %12 = vsyncpa [#allocation3], 0  ;;  %s788_s24 = smov 0   ;;  %s850_s0 = inlined_call_operand.vmem [shape: f32[2], index: 0, kind: input, shape index: {}]   ;;  %s851_s1 = inlined_call_operand.vmem [shape: f32[2,2,16], index: 1, kind: input, shape index: {}]   ;;  %s852_s2 = inlined_call_operand.vmem [shape: f32[2,16,32], index: 2, kind: input, shape index: {}]   ;;  %s853_s3 = inlined_call_operand.vmem [shape: f32[2,16,32], index: 3, kind: input, shape index: {}]   ;;  %s854_s4 = inlined_call_operand.vmem [shape: f32[2,1,16], index: 4, kind: input, shape index: {}]   ;;  %s855_s5 = inlined_call_operand.vmem [shape: f32[1,32], index: 5, kind: input, shape index: {}]   ;;  %s856_s6 = inlined_call_operand.vmem [shape: f32[1,32], index: 6, kind: input, shape index: {}]   ;;  %s857_s7 = inlined_call_operand.vmem [shape: f32[2,2,16], index: 7, kind: output, shape index: {}]  }
   0x1 LB: > { %s638_s25 = sadd.s32 4294967295, %s742_s24   ;;  %p640_p0 = scmp.ge.s32.totalorder %s742_s24, 1  ;;  %s742_s24 = sphi %s788_s24, %s18_s24  }
   0x2   : > { %p216_p1 = scmp.lt.s32.totalorder %s742_s24, 3  ;;  %s229_s28 = sshll.u32 %s850_s0, 4  ;;  %s230_s28 = int_to_ptr.vmem [resolvable:$true] %s229_s28 }
   0x3   : > { %p699_p3 = scmp.eq.s32.totalorder %s638_s25, 0  ;;  %s717_s30 = scalar_lea.vmem %s230_s28, 16 }
   0x4   : > { %p799_p2 = pnand %p640_p0, %p216_p1  ;;  %p718_p6 = scmp.ne.s32.totalorder %s230_s28, %s717_s30 }
   0x5   : > { %p725_p10 = scmp.lt.s32.totalorder %s230_s28, %s230_s28  ;;  %p726_p11 = scmp.lt.s32.totalorder %s717_s30, %s717_s30 }
   0x6   : > { %p695_p4 = pneg %p799_p2 }
   0x7   : > { %p727_p12 = por %p726_p11, %p725_p10 }
   0x8   : > { %p696_p5 = pnand %p699_p3, %p695_p4 }
   0xa   : > { %p719_p7 = pneg %p696_p5 }
   0xc   : > { %p720_p8 = pnand %p719_p7, %p718_p6 }
   0xe   : > { %p721_p9 = pneg %p720_p8 }
  0x10   : > { %p728_p13 = pnand %p727_p12, %p721_p9 }
  0x12   : > { %731 = shalt.err (!%p728_p13)
}
  0x13   : > { %s744_s8 = smov [#allocation2]   ;;  %277 = sbr.rel (%p799_p2) target bundleno = 582 (0x246), region = 48 }
  0x14   : > { %698 = dma.vmem_to_smem (!%p696_p5), %s230_s28, 16, %s744_s8, [#allocation3]  }
  0x1a   : > { %737 = dma.done.wait (%p699_p3), [#allocation3], 16  }
  0x1b   : > { %739 = vsyncadd (%p699_p3), [#allocation3], 4294967280 }
  0x1c   : > { %283 = sfence }
  0x1d   : > { %p321_p0 = scmp.lt.s32.totalorder %s638_s25, 1  ;;  %v745_v0 = vmov 0.0|0.0   ;;  %vm351_vm0 = vcmask 261120   ;;  %vm746_vm1 = vmmov 0   ;;  %v747_v1 = vmov 0.0   ;;  %s654_s20 = sld [smem:[#allocation2 + $0x1]] }
  0x1e   : > { %687 = vmatprep.subr.bf16.mxu1 %v745_v0  ;;  %683 = vmatprep.subr.bf16.mxu0 %v745_v0  ;;  %vm685_vm2 = vmpackc.low %vm351_vm0, %vm351_vm0  ;;  %v431_v8 = vld [vmem:[%s856_s6] sm:$0x1]  ;;  %s349_s21 = sld [smem:[#allocation2]]  ;;  %vm516_vm3 = vcmask 1040384   ;;  %vm526_vm4 = vcmask 123904  }
  0x1f   : > { %s860_s25 = smov (!%p321_p0, %s638_s25), 1  ;;  %680 = vmatprep.mubr.msk.f32.mxu1 %vm746_vm1, %v747_v1  ;;  %673 = vmatprep.mubr.msk.f32.mxu0 %vm746_vm1, %v747_v1  ;;  %v348_v9 = vld [vmem:[%s855_s5] sm:$0x1] }
  0x20   : > { %s661_s9 = sshll.u32 %s860_s25, 4  ;;  %s645_s22 = sshll.u32 %s860_s25, 1 }
  0x21   : > { %s334_s12 = scalar_lea.vmem %s853_s3, %s661_s9  ;;  %s329_s15 = scalar_lea.vmem %s852_s2, %s661_s9 }
  0x22   : > { %v345_v2 = vld [vmem:[%s334_s12] sm:$0xff]  ;;  %v346_v3 = vld [vmem:[%s334_s12 + $0x8] sm:$0xff]  ;;  %s324_s27 = scalar_lea.vmem %s851_s1, %s645_s22  ;;  %s337_s30 = scalar_lea.vmem %s854_s4, %s860_s25 }
  0x23   : > { %v343_v4 = vld [vmem:[%s329_s15] sm:$0xff]  ;;  %v688_v5 = vpack.c.bf16 %v346_v3, %v345_v2  ;;  %v344_v6 = vld [vmem:[%s329_s15 + $0x8] sm:$0xff]  ;;  %v433_v10 = vstv %s654_s20  ;;  %s341_s10 = scalar_lea.vmem %s857_s7, %s645_s22 }
  0x24   : > { %v684_v7 = vpack.c.bf16 %v344_v6, %v343_v4  ;;  %v350_v11 = vstv %s349_s21  ;;  %v342_v19 = vld [vmem:[%s324_s27] sm:$0x3] }
  0x25   : > { %690 = vmatpush3.bf16.xpose.msk.msra.mxu1 %vm685_vm2, %v688_v5  ;;  %v658_v20 = vld [vmem:[%s337_s30] ss:$0 sm:$0xff] }
  0x26   : > { %686 = vmatpush3.bf16.xpose.msk.msra.mxu0 %vm685_vm2, %v684_v7 }
  0x2c   : > { %681 = vmatmul.mubr.msk.f32.vlgmr.msra.gmra.mrb[0].mxu1 %vm351_vm0, %v431_v8 }
  0x2d   : > { %674 = vmatmul.mubr.msk.f32.vlgmr.msra.gmra.mrb[0].mxu0 %vm351_vm0, %v348_v9 }
  0xff   : > { %v509_v12 = vpop.f32.mrb[0].mxu1 }
 0x100   : > { %v510_v13 = vadd.f32 %v509_v12, %v433_v10  ;;  %v427_v14 = vpop.f32.mrb[0].mxu0  ;;  %v682_v15 = vpop.f32.mrb[1].mxu1 }
 0x101   : > { %v428_v16 = vadd.f32 %v427_v14, %v350_v11  ;;  %v675_v17 = vpop.f32.mrb[1].mxu0 }
 0x102   : > { %v514_v18 = vrot.slane %v510_v13, 7 }
 0x104   : > { %v517_v21 = vsel %vm516_vm3, %v428_v16, %v514_v18 }
 0x105   : > { %v518_v22 = vadd.f32 %v517_v21, %v342_v19 }
 0x107   : > { %v525_v23 = vadd.f32 %v658_v20, %v518_v22 }
 0x109   : > { %v527_v24 = vsel %vm526_vm4, %v525_v23, -inf }
 0x10a   : > { %528 = vmax.xlane.f32.xlu0 %v527_v24 }
 0x197   : > { %v529_v25 = vpop.xlane.xlu0 %528 }
 0x198   : > { %v530_v26 = vsub.f32 %v525_v23, %v529_v25 }
 0x19a   : > { %v531_v27 = vmul.f32 1.442695, %v530_v26 }
 0x19c   : > { %713 = vpow2.f32 %v531_v27 }
 0x1a6   : > { %v714_v28 = vpop.eup %713 }
 0x1a7   : > { %v533_v29 = vsel %vm526_vm4, %v714_v28, 0.0 }
 0x1a8   : > { %534 = vadd.xlane.f32.xlu0 %v533_v29 }
 0x235   : > { %v535_v30 = vpop.xlane.xlu0 %534 }
 0x236   : > { %715 = vlog2.f32 %v535_v30 }
 0x240   : > { %v716_v31 = vpop.eup %715 }
 0x241   : > { %v537_v32 = vmul.f32 0.6931472, %v716_v31 }
 0x243   : > { %v538_v33 = vsub.f32 %v530_v26, %v537_v32 }
 0x245   : > { %539 = vst.msk [vmem:[%s341_s10] sm:$0x3] %vm526_vm4, %v538_v33 }
 0x246 PF: > { %s18_s24 = sadd.s32 1, %s742_s24  }
 0x247   : > { %p15_p1 = scmp.ge.s32.totalorder %s18_s24, 4  }
 0x249   :  { %17 = sbr.rel (!%p15_p1) target bundleno = 1 (0x1), region = 92 }
 0x250   :  { %559 = vsyncpa [#allocation3], 1 }
 0x251   :  { %561 = vsyncpa [#allocation3 + $0x1], 1 }

// kernel: bidaf_transformer_forward.10
= control target key start
LH: loop header
LB: loop body
LE: loop exit
PB: predicated region body
PF: predicated region fallthrough
CT: control target
= control target key end

     0   :  { %s3066_s18 = smov 0   ;;  %s3566_s0 = inlined_call_operand.vmem [shape: f32[2,16,32], index: 0, kind: input, shape index: {}]   ;;  %s3567_s1 = inlined_call_operand.vmem [shape: bf16[3,32,96], index: 1, kind: input, shape index: {}]   ;;  %s3568_s2 = inlined_call_operand.vmem [shape: f32[3,1,96], index: 2, kind: input, shape index: {}]   ;;  %s3569_s3 = inlined_call_operand.vmem [shape: bf16[3,8,4,32], index: 3, kind: input, shape index: {}]   ;;  %s3570_s4 = inlined_call_operand.vmem [shape: f32[3,1,32], index: 4, kind: input, shape index: {}]   ;;  %s3571_s5 = inlined_call_operand.vmem [shape: f32[3,1,32], index: 5, kind: input, shape index: {}]   ;;  %s3572_s6 = inlined_call_operand.vmem [shape: f32[3,1,32], index: 6, kind: input, shape index: {}]   ;;  %s3573_s7 = inlined_call_operand.vmem [shape: bf16[3,32,128], index: 7, kind: input, shape index: {}]   ;;  %s3574_s8 = inlined_call_operand.vmem [shape: f32[3,1,128], index: 8, kind: input, shape index: {}]   ;;  %s3575_s9 = inlined_call_operand.vmem [shape: bf16[3,128,32], index: 9, kind: input, shape index: {}]   ;;  %s3576_s10 = inlined_call_operand.vmem [shape: f32[3,1,32], index: 10, kind: input, shape index: {}]   ;;  %s3577_s11 = inlined_call_operand.vmem [shape: f32[3,1,32], index: 11, kind: input, shape index: {}]   ;;  %s3578_s12 = inlined_call_operand.vmem [shape: f32[3,1,32], index: 12, kind: input, shape index: {}]   ;;  %s3579_s13 = inlined_call_operand.vmem [shape: f32[1,1,32], index: 13, kind: input, shape index: {}]   ;;  %s3580_s14 = inlined_call_operand.vmem [shape: f32[1,1,32], index: 14, kind: input, shape index: {}]   ;;  %s3581_s15 = inlined_call_operand.vmem [shape: f32[2,16,32], index: 15, kind: output, shape index: {}]  }
   0x1 LB: > { %s2462_s19 = sadd.s32 4294967295, %s2961_s18   ;;  %p2466_p0 = scmp.ge.s32.totalorder %s2961_s18, 1  ;;  %s2961_s18 = sphi %s3066_s18, %s25_s18  }
   0x2   : > { %p437_p1 = scmp.lt.s32.totalorder %s2961_s18, 3 }
   0x4   : > { %p438_p2 = pnand %p2466_p0, %p437_p1 }
   0x5   : > { %p485_p3 = scmp.lt.s32.totalorder (!%p438_p2), %s2462_s19, 1  ;;  %s3086_s27 = smov (!%p438_p2), 0  }
   0x6   : > { %441 = sbr.rel (%p438_p2) target bundleno = 2864 (0xb30), region = 80 }
   0xd   : > { %s3585_s19 = smov (!%p485_p3, %s2462_s19), 1 }
   0xe   : > { %s2528_s20 = sshll.u32 %s3585_s19, 4 }
   0xf   : > { %s489_s23 = scalar_lea.vmem %s3566_s0, %s2528_s20  ;;  %s3080_s26 = scalar_lea.vmem %s3581_s15, %s2528_s20 }
  0x10   : > { %v496_v0 = vld [vmem:[%s489_s23] sm:$0xff]   ;;  %v497_v1 = vld [vmem:[%s489_s23 + $0x8] sm:$0xff]  }
  0x11 LB: >> { %v2975_v2 = vmov 0.0   ;;  %vm2976_vm0 = vmmov 0   ;;  %s3101_s28 = sshll.u32 %s2973_s27, 4  ;;  %s2533_s17 = sshll.u32 %s2973_s27, 6  ;;  %vm534_vm1 = vcmask 261120   ;;  %v506_v5 = vpack.c.bf16 %v2965_v1, %v2969_v0  ;;  %s2973_s27 = sphi %s3086_s27, %s503_s27   ;;  %v2969_v0 = vphi %v496_v0, %v3583_v0   ;;  %v2965_v1 = vphi %v497_v1, %v3582_v1  }
  0x12   : >> { %2597 = vmatprep.subr.bf16.mxu1 %v2975_v2  ;;  %2601 = vmatprep.mubr.msk.bf16.mxu1 %vm2976_vm0, %v2975_v2  ;;  %s509_s16 = scalar_lea.vmem %s3567_s1, %s3101_s28  ;;  %s3115_s21 = scalar_lea.vmem %s3573_s7, %s3101_s28  ;;  %vm634_vm2 = vcmask 31744   ;;  %vm1048_vm3 = vcmask 130048   ;;  %vm1631_vm4 = vcmask 1041408  }
  0x13   : >> { %2623 = vmatprep.subr.bf16.mxu0 %v2975_v2  ;;  %2625 = vmatprep.mubr.msk.bf16.mxu0 %vm2976_vm0, %v2975_v2  ;;  %v2855_v3 = vld [vmem:[%s509_s16] sm:$0xff]   ;;  %s3120_s24 = scalar_lea.vmem %s3575_s9, %s2533_s17  ;;  %v2856_v4 = vld [vmem:[%s509_s16 + $0x8] sm:$0xff]   ;;  %s514_s30 = scalar_lea.vmem %s3568_s2, %s2973_s27 }
  0x14   : >> { %2598 = vmatpush3.bf16.msra.mxu1 %v2855_v3  ;;  %v2473_v6 = vld [vmem:[%s514_s30] ss:$0 sm:$0xff]  ;;  %s2977_s16 = smov 116   ;;  %s2978_s17 = smov 124  }
  0x15   : >> { %2599 = vmatprep.subr.bf16.mxu1 %v2975_v2  ;;  %s2979_s19 = smov 112   ;;  %s2980_s20 = smov 120  }
  0x16   : >> { %s2981_s22 = smov 104   ;;  %s2982_s23 = smov 108  }
  0x17   : >> { %s2983_s25 = smov 100   ;;  %s2984_s29 = smov 96  }
  0x18   : >> { %2600 = vmatpush3.bf16.msra.mxu1 %v2856_v4  ;;  %s2985_s30 = smov 64  }
  0x19   : >> { %2605 = vmatprep.subr.bf16.mxu1 %v2975_v2 }
  0x1b   : >> { %2602 = vmatmul.mubr.msk.bf16.vlgmr.msra.gmra.mrb[0].mxu1 %vm534_vm1, %v506_v5 }
  0x1c   : >> { %2607 = vmatprep.mubr.msk.bf16.mxu1 %vm2976_vm0, %v2975_v2 }
  0xee   : >> { %v572_v7 = vpop.f32.mrb[0].mxu1 }
  0xef   : >> { %v2603_v8 = vpop.f32.mrb[1].mxu1  ;;  %v573_v10 = vadd.f32 %v2473_v6, %v572_v7 }
  0xf0   : >> { %v575_v9 = vpop.f32.mrb[2].mxu1 }
  0xf1   : >> { %v576_v11 = vadd.f32 %v2473_v6, %v575_v9  ;;  %v2604_v12 = vpop.f32.mrb[3].mxu1 }
  0xf3   : >> { %v2830_v13 = vpack.i.bf16 %v576_v11, %v573_v10  ;;  %v623_v14 = vpack.c.bf16 %v576_v11, %v573_v10 }
  0xf5   : >> { %2831 = vrot.lane.b32.xlu1 %v2830_v13, %s2977_s16  ;;  %2821 = vrot.lane.b32.xlu0 %v2830_v13, %s2978_s17  ;;  %s2049_s16 = scalar_lea.vmem %s3572_s6, %s2973_s27 }
  0xf9   : >> { %2836 = vrot.lane.b32.xlu1 %v2830_v13, %s2979_s19  ;;  %2826 = vrot.lane.b32.xlu0 %v2830_v13, %s2980_s20  ;;  %s3401_s19 = scalar_lea.vmem %s3569_s3, %s3101_s28  ;;  %s2101_s28 = scalar_lea.vmem %s3574_s8, %s2973_s27 }
  0xfd   : >> { %2846 = vrot.lane.b32.xlu1 %v2830_v13, %s2981_s22  ;;  %2841 = vrot.lane.b32.xlu0 %v2830_v13, %s2982_s23  ;;  %s2035_s22 = scalar_lea.vmem %s3570_s4, %s2973_s27 }
 0x101   : >> { %2851 = vrot.lane.b32.xlu0 %v2830_v13, %s2983_s25  ;;  %632 = vrot.lane.b32.xlu1 %v623_v14, %s2984_s29  ;;  %s2047_s25 = scalar_lea.vmem %s3571_s5, %s2973_s27 }
 0x167   : >> { %v2832_v15 = vpop.permute.xlu1 %2831  ;;  %v2822_v16 = vpop.permute.xlu0 %2821 }
 0x168   : >> { %v2824_v17 = vunpack.i.h.bf16 %v2822_v16  ;;  %v2823_v18 = vunpack.i.l.bf16 %v2822_v16  ;;  %v2834_v19 = vunpack.i.h.bf16 %v2832_v15  ;;  %v2833_v20 = vunpack.i.l.bf16 %v2832_v15 }
 0x16a   : >> { %v624_v21 = vpack.c.bf16 %v2824_v17, %v2823_v18  ;;  %v3135_v26 = vpack.c.bf16 %v2834_v19, %v2833_v20 }
 0x16b   : >> { %v2837_v22 = vpop.permute.xlu1 %2836  ;;  %v2827_v23 = vpop.permute.xlu0 %2826 }
 0x16c   : >> { %v2829_v24 = vunpack.i.h.bf16 %v2827_v23  ;;  %v2828_v25 = vunpack.i.l.bf16 %v2827_v23  ;;  %683 = vrot.lane.b32.xlu0 %v624_v21, %s2984_s29  ;;  %v2839_v27 = vunpack.i.h.bf16 %v2837_v22  ;;  %v2838_v28 = vunpack.i.l.bf16 %v2837_v22 }
 0x16e   : >> { %v625_v29 = vpack.c.bf16 %v2829_v24, %v2828_v25  ;;  %v3140_v34 = vpack.c.bf16 %v2839_v27, %v2838_v28 }
 0x16f   : >> { %v2847_v30 = vpop.permute.xlu1 %2846  ;;  %v2842_v31 = vpop.permute.xlu0 %2841 }
 0x170   : >> { %v2844_v32 = vunpack.i.h.bf16 %v2842_v31  ;;  %v2843_v33 = vunpack.i.l.bf16 %v2842_v31  ;;  %783 = vrot.lane.b32.xlu0 %v3135_v26, %s2984_s29  ;;  %733 = vrot.lane.b32.xlu1 %v625_v29, %s2984_s29  ;;  %v2849_v35 = vunpack.i.h.bf16 %v2847_v30  ;;  %v2848_v36 = vunpack.i.l.bf16 %v2847_v30 }
 0x172   : >> { %v3142_v37 = vpack.c.bf16 %v2844_v32, %v2843_v33  ;;  %v3149_v43 = vpack.c.bf16 %v2849_v35, %v2848_v36 }
 0x173   : >> { %v2852_v38 = vpop.permute.xlu0 %2851  ;;  %v633_v39 = vpop.permute.xlu1 %632 }
 0x174   : >> { %v2854_v40 = vunpack.i.h.bf16 %v2852_v38  ;;  %v2853_v41 = vunpack.i.l.bf16 %v2852_v38  ;;  %v639_v42 = vsel %vm634_vm2, %v633_v39, 0  ;;  %883 = vrot.lane.b32.xlu0 %v3142_v37, %s2984_s29  ;;  %833 = vrot.lane.b32.xlu1 %v3140_v34, %s2984_s29 }
 0x175   : >> { %2606 = vmatpush3.bf16.xpose.msra.mxu1 %v639_v42 }
 0x176   : >> { %v3151_v44 = vpack.c.bf16 %v2854_v40, %v2853_v41  ;;  %2611 = vmatprep.subr.bf16.mxu1 %v2975_v2 }
 0x178   : >> { %983 = vrot.lane.b32.xlu0 %v3151_v44, %s2984_s29  ;;  %933 = vrot.lane.b32.xlu1 %v3149_v43, %s2984_s29 }
 0x17c   : >> { %1233 = vrot.lane.b32.xlu0 %v623_v14, %s2985_s30  ;;  %1280 = vrot.lane.b32.xlu1 %v624_v21, %s2985_s30 }
 0x17d   : >> { %2608 = vmatmul.mubr.msk.bf16.vlgmr.msra.gmra.mrb[4].mxu1 %vm634_vm2, %v623_v14 }
 0x17e   : >> { %2613 = vmatprep.mubr.msk.bf16.mxu1 %vm2976_vm0, %v2975_v2 }
 0x180   : >> { %1327 = vrot.lane.b32.xlu1 %v625_v29, %s2985_s30 }
 0x1de   : >> { %v684_v45 = vpop.permute.xlu0 %683 }
 0x1df   : >> { %v689_v46 = vsel %vm634_vm2, %v684_v45, 0 }
 0x1e0   : >> { %2612 = vmatpush3.bf16.xpose.msra.mxu1 %v689_v46 }
 0x1e1   : >> { %2617 = vmatprep.subr.bf16.mxu1 %v2975_v2 }
 0x1e2   : >> { %v784_v47 = vpop.permute.xlu0 %783  ;;  %v734_v49 = vpop.permute.xlu1 %733 }
 0x1e3   : >> { %v789_v48 = vsel %vm634_vm2, %v784_v47, 0  ;;  %v739_v50 = vsel %vm634_vm2, %v734_v49, 0 }
 0x1e4   : >> { %2624 = vmatpush3.bf16.xpose.msra.mxu0 %v789_v48 }
 0x1e5   : >> { %2635 = vmatprep.subr.bf16.mxu0 %v2975_v2 }
 0x1e6   : >> { %v884_v51 = vpop.permute.xlu0 %883  ;;  %v834_v53 = vpop.permute.xlu1 %833 }
 0x1e7   : >> { %2614 = vmatmul.mubr.msk.bf16.vlgmr.msra.gmra.mrb[8].mxu1 %vm634_vm2, %v624_v21  ;;  %v889_v52 = vsel %vm634_vm2, %v884_v51, 0  ;;  %v839_v54 = vsel %vm634_vm2, %v834_v53, 0 }
 0x1e8   : >> { %2618 = vmatpush3.bf16.xpose.msra.mxu1 %v739_v50  ;;  %2619 = vmatprep.mubr.msk.bf16.mxu1 %vm2976_vm0, %v2975_v2 }
 0x1e9   : >> { %2629 = vmatprep.subr.bf16.mxu1 %v2975_v2 }
 0x1ea   : >> { %v984_v55 = vpop.permute.xlu0 %983  ;;  %v934_v57 = vpop.permute.xlu1 %933 }
 0x1eb   : >> { %2626 = vmatmul.mubr.msk.bf16.vlgmr.msra.gmra.mrb[0].mxu0 %vm634_vm2, %v3135_v26  ;;  %v989_v56 = vsel %vm634_vm2, %v984_v55, 0  ;;  %v939_v58 = vsel %vm634_vm2, %v934_v57, 0 }
 0x1ec   : >> { %2636 = vmatpush3.bf16.xpose.msra.mxu0 %v889_v52  ;;  %2637 = vmatprep.mubr.msk.bf16.mxu0 %vm2976_vm0, %v2975_v2 }
 0x1ed   : >> { %2647 = vmatprep.subr.bf16.mxu0 %v2975_v2 }
 0x1ee   : >> { %v1281_v59 = vpop.permute.xlu1 %1280  ;;  %v1234_v60 = vpop.permute.xlu0 %1233 }
 0x1ef   : >> { %2620 = vmatmul.mubr.msk.bf16.vlgmr.msra.gmra.mrb[12].mxu1 %vm634_vm2, %v625_v29 }
 0x1f0   : >> { %2630 = vmatpush3.bf16.xpose.msra.mxu1 %v839_v54  ;;  %2631 = vmatprep.mubr.msk.bf16.mxu1 %vm2976_vm0, %v2975_v2 }
 0x1f1   : >> { %2641 = vmatprep.subr.bf16.mxu1 %v2975_v2 }
 0x1f3   : >> { %2638 = vmatmul.mubr.msk.bf16.vlgmr.msra.gmra.mrb[4].mxu0 %vm634_vm2, %v3142_v37 }
 0x1f4   : >> { %2648 = vmatpush3.bf16.xpose.msra.mxu0 %v989_v56  ;;  %2649 = vmatprep.mubr.msk.bf16.mxu0 %vm2976_vm0, %v2975_v2 }
 0x1f5   : >> { %2659 = vmatprep.subr.bf16.mxu0 %v2975_v2 }
 0x1f7   : >> { %2632 = vmatmul.mubr.msk.bf16.vlgmr.msra.gmra.mrb[16].mxu1 %vm634_vm2, %v3140_v34 }
 0x1f8   : >> { %2642 = vmatpush3.bf16.xpose.msra.mxu1 %v939_v58  ;;  %2643 = vmatprep.mubr.msk.bf16.mxu1 %vm2976_vm0, %v2975_v2 }
 0x1f9   : >> { %2653 = vmatprep.subr.bf16.mxu1 %v2975_v2 }
 0x1fb   : >> { %2650 = vmatmul.mubr.msk.bf16.vlgmr.msra.gmra.mrb[8].mxu0 %vm634_vm2, %v3151_v44 }
 0x1fc   : >> { %2660 = vmatpush3.bf16.msra.mxu0 %v1281_v59  ;;  %2661 = vmatprep.mubr.msk.bf16.mxu0 %vm2976_vm0, %v2975_v2 }
 0x1fd   : >> { %2671 = vmatprep.subr.bf16.mxu0 %v2975_v2 }
 0x1ff   : >> { %2644 = vmatmul.mubr.msk.bf16.vlgmr.msra.gmra.mrb[20].mxu1 %vm634_vm2, %v3149_v43 }
 0x200   : >> { %2654 = vmatpush3.bf16.msra.mxu1 %v1234_v60  ;;  %2655 = vmatprep.mubr.msk.bf16.mxu1 %vm2976_vm0, %v2975_v2 }
 0x201   : >> { %2665 = vmatprep.subr.bf16.mxu1 %v2975_v2 }
 0x250   : >> { %v675_v61 = vpop.f32.mrb[4].mxu1 }
 0x251   : >> { %v3206_v62 = vmul.f32 0.5, %v675_v61  ;;  %v2609_v63 = vpop.f32.mrb[5].mxu1 }
 0x252   : >> { %v678_v3 = vpop.f32.mrb[6].mxu1 }
 0x253   : >> { %v3208_v4 = vmul.f32 0.5, %v678_v3  ;;  %v2610_v5 = vpop.f32.mrb[7].mxu1  ;;  %v1049_v6 = vsel %vm1048_vm3, %v3206_v62, -inf }
 0x254   : >> { %1050 = vmax.xlane.f32.xlu1 %v1049_v6 }
 0x255   : >> { %v1052_v7 = vsel %vm1048_vm3, %v3208_v4, -inf }
 0x256   : >> { %1053 = vmax.xlane.f32.xlu0 %v1052_v7 }
 0x2ba   : >> { %v725_v8 = vpop.f32.mrb[8].mxu1 }
 0x2bb   : >> { %v3214_v9 = vmul.f32 0.5, %v725_v8  ;;  %v2615_v10 = vpop.f32.mrb[9].mxu1 }
 0x2bc   : >> { %v728_v11 = vpop.f32.mrb[10].mxu1 }
 0x2bd   : >> { %v3216_v12 = vmul.f32 0.5, %v728_v11  ;;  %v2616_v13 = vpop.f32.mrb[11].mxu1  ;;  %v1055_v14 = vsel %vm1048_vm3, %v3214_v9, -inf  ;;  %v3276_v11 = vpop.permute.xlu1 %1327 }
 0x2be   : >> { %v825_v15 = vpop.f32.mrb[0].mxu0  ;;  %1056 = vmax.xlane.f32.xlu0 %v1055_v14 }
 0x2bf   : >> { %v3220_v16 = vmul.f32 0.5, %v825_v15  ;;  %v2627_v17 = vpop.f32.mrb[1].mxu0  ;;  %v1058_v18 = vsel %vm1048_vm3, %v3216_v12, -inf }
 0x2c0   : >> { %v828_v19 = vpop.f32.mrb[2].mxu0  ;;  %1059 = vmax.xlane.f32.xlu1 %v1058_v18 }
 0x2c1   : >> { %v3224_v20 = vmul.f32 0.5, %v828_v19  ;;  %v2628_v21 = vpop.f32.mrb[3].mxu0  ;;  %v1067_v22 = vsel %vm1048_vm3, %v3220_v16, -inf }
 0x2c2   : >> { %1068 = vmax.xlane.f32.xlu0 %v1067_v22  ;;  %v775_v23 = vpop.f32.mrb[12].mxu1 }
 0x2c3   : >> { %v3228_v24 = vmul.f32 0.5, %v775_v23  ;;  %v2621_v25 = vpop.f32.mrb[13].mxu1  ;;  %v1070_v27 = vsel %vm1048_vm3, %v3224_v20, -inf }
 0x2c4   : >> { %1071 = vmax.xlane.f32.xlu1 %v1070_v27  ;;  %v778_v28 = vpop.f32.mrb[14].mxu1 }
 0x2c5   : >> { %v3232_v29 = vmul.f32 0.5, %v778_v28  ;;  %v2622_v30 = vpop.f32.mrb[15].mxu1  ;;  %v1061_v31 = vsel %vm1048_vm3, %v3228_v24, -inf }
 0x2c6   : >> { %v925_v32 = vpop.f32.mrb[4].mxu0  ;;  %1062 = vmax.xlane.f32.xlu0 %v1061_v31 }
 0x2c7   : >> { %v3236_v33 = vmul.f32 0.5, %v925_v32  ;;  %v2639_v35 = vpop.f32.mrb[5].mxu0  ;;  %v1064_v36 = vsel %vm1048_vm3, %v3232_v29, -inf }
 0x2c8   : >> { %v928_v38 = vpop.f32.mrb[6].mxu0  ;;  %1065 = vmax.xlane.f32.xlu1 %v1064_v36 }
 0x2c9   : >> { %v3240_v39 = vmul.f32 0.5, %v928_v38  ;;  %v2640_v40 = vpop.f32.mrb[7].mxu0  ;;  %v1079_v41 = vsel %vm1048_vm3, %v3236_v33, -inf }
 0x2ca   : >> { %1080 = vmax.xlane.f32.xlu0 %v1079_v41  ;;  %v875_v42 = vpop.f32.mrb[16].mxu1 }
 0x2cb   : >> { %v3244_v45 = vmul.f32 0.5, %v875_v42  ;;  %v2633_v46 = vpop.f32.mrb[17].mxu1  ;;  %v1082_v47 = vsel %vm1048_vm3, %v3240_v39, -inf }
 0x2cc   : >> { %1083 = vmax.xlane.f32.xlu1 %v1082_v47  ;;  %v878_v48 = vpop.f32.mrb[18].mxu1 }
 0x2cd   : >> { %v3248_v49 = vmul.f32 0.5, %v878_v48  ;;  %v2634_v50 = vpop.f32.mrb[19].mxu1  ;;  %v1073_v51 = vsel %vm1048_vm3, %v3244_v45, -inf }
 0x2ce   : >> { %v1025_v52 = vpop.f32.mrb[8].mxu0  ;;  %1074 = vmax.xlane.f32.xlu0 %v1073_v51 }
 0x2cf   : >> { %v3252_v53 = vmul.f32 0.5, %v1025_v52  ;;  %v2651_v54 = vpop.f32.mrb[9].mxu0  ;;  %v1076_v55 = vsel %vm1048_vm3, %v3248_v49, -inf }
 0x2d0   : >> { %v1028_v56 = vpop.f32.mrb[10].mxu0  ;;  %1077 = vmax.xlane.f32.xlu1 %v1076_v55 }
 0x2d1   : >> { %v3256_v57 = vmul.f32 0.5, %v1028_v56  ;;  %v2652_v58 = vpop.f32.mrb[11].mxu0  ;;  %v1091_v59 = vsel %vm1048_vm3, %v3252_v53, -inf }
 0x2d2   : >> { %1092 = vmax.xlane.f32.xlu0 %v1091_v59  ;;  %v975_v60 = vpop.f32.mrb[20].mxu1 }
 0x2d3   : >> { %v3260_v61 = vmul.f32 0.5, %v975_v60  ;;  %v2645_v63 = vpop.f32.mrb[21].mxu1  ;;  %v1094_v3 = vsel %vm1048_vm3, %v3256_v57, -inf }
 0x2d4   : >> { %1095 = vmax.xlane.f32.xlu1 %v1094_v3  ;;  %v978_v5 = vpop.f32.mrb[22].mxu1 }
 0x2d5   : >> { %v3264_v6 = vmul.f32 0.5, %v978_v5  ;;  %v2646_v7 = vpop.f32.mrb[23].mxu1  ;;  %v1085_v8 = vsel %vm1048_vm3, %v3260_v61, -inf }
 0x2d6   : >> { %1086 = vmax.xlane.f32.xlu0 %v1085_v8 }
 0x2d7   : >> { %v1088_v10 = vsel %vm1048_vm3, %v3264_v6, -inf }
 0x2d8   : >> { %1089 = vmax.xlane.f32.xlu1 %v1088_v10 }
 0x2e1   : >> { %v1051_v14 = vpop.xlane.xlu1 %1050 }
 0x2e2   : >> { %v1097_v17 = vsub.f32 %v3206_v62, %v1051_v14 }
 0x2e3   : >> { %v1054_v13 = vpop.xlane.xlu0 %1053 }
 0x2e4   : >> { %v1098_v15 = vsub.f32 %v3208_v4, %v1054_v13  ;;  %v1113_v19 = vmul.f32 1.442695, %v1097_v17 }
 0x2e6   : >> { %v1115_v18 = vmul.f32 1.442695, %v1098_v15 }
 0x2e8   : >> { %2867 = vpow2.f32 %v1115_v18 }
 0x2e9   : >> { %1421 = vrot.lane.b32.xlu1 %v3140_v34, %s2985_s30  ;;  %2869 = vpow2.f32 %v1113_v19 }
 0x2ec   : >> { %1374 = vrot.lane.b32.xlu0 %v3135_v26, %s2985_s30 }
 0x2f0   : >> { %1468 = vrot.lane.b32.xlu0 %v3142_v37, %s2985_s30 }
 0x2f2   : >> { %v3280_v21 = vpop.eup %2867 }
 0x2f3   : >> { %v3282_v34 = vpop.eup %2869  ;;  %v1148_v26 = vsel %vm1048_vm3, %v3280_v21, 0.0 }
 0x2f4   : >> { %v1145_v37 = vsel %vm1048_vm3, %v3282_v34, 0.0 }
 0x30d   : >> { %1149 = vadd.xlane.f32.xlu1 %v1148_v26 }
 0x30f   : >> { %1146 = vadd.xlane.f32.xlu0 %v1145_v37 }
 0x34b   : >> { %v1057_v22 = vpop.xlane.xlu0 %1056 }
 0x34c   : >> { %v1099_v4 = vsub.f32 %v3214_v9, %v1057_v22 }
 0x34d   : >> { %v1060_v62 = vpop.xlane.xlu1 %1059 }
 0x34e   : >> { %v1117_v23 = vmul.f32 1.442695, %v1099_v4  ;;  %v1100_v25 = vsub.f32 %v3216_v12, %v1060_v62 }
 0x34f   : >> { %v1069_v27 = vpop.xlane.xlu0 %1068 }
 0x350   : >> { %2871 = vpow2.f32 %v1117_v23  ;;  %v1119_v28 = vmul.f32 1.442695, %v1100_v25  ;;  %v1103_v30 = vsub.f32 %v3220_v16, %v1069_v27 }
 0x351   : >> { %v1072_v31 = vpop.xlane.xlu1 %1071 }
 0x352   : >> { %2873 = vpow2.f32 %v1119_v28  ;;  %v1125_v32 = vmul.f32 1.442695, %v1103_v30  ;;  %v1104_v35 = vsub.f32 %v3224_v20, %v1072_v31 }
 0x353   : >> { %v1063_v36 = vpop.xlane.xlu0 %1062 }
 0x354   : >> { %2875 = vpow2.f32 %v1125_v32  ;;  %v1127_v38 = vmul.f32 1.442695, %v1104_v35  ;;  %v1101_v40 = vsub.f32 %v3228_v24, %v1063_v36 }
 0x355   : >> { %v1066_v9 = vpop.xlane.xlu1 %1065 }
 0x356   : >> { %2877 = vpow2.f32 %v1127_v38  ;;  %v1121_v41 = vmul.f32 1.442695, %v1101_v40  ;;  %v1102_v12 = vsub.f32 %v3232_v29, %v1066_v9 }
 0x357   : >> { %v1081_v42 = vpop.xlane.xlu0 %1080 }
 0x358   : >> { %2879 = vpow2.f32 %v1121_v41  ;;  %v1123_v46 = vmul.f32 1.442695, %v1102_v12  ;;  %v1107_v16 = vsub.f32 %v3236_v33, %v1081_v42 }
 0x359   : >> { %v1084_v47 = vpop.xlane.xlu1 %1083 }
 0x35a   : >> { %v3295_v48 = vpop.eup %2871  ;;  %2881 = vpow2.f32 %v1123_v46  ;;  %v1133_v20 = vmul.f32 1.442695, %v1107_v16  ;;  %v1108_v50 = vsub.f32 %v3240_v39, %v1084_v47 }
 0x35b   : >> { %v1075_v51 = vpop.xlane.xlu0 %1074  ;;  %v1151_v24 = vsel %vm1048_vm3, %v3295_v48, 0.0 }
 0x35c   : >> { %v3300_v52 = vpop.eup %2873  ;;  %2883 = vpow2.f32 %v1133_v20  ;;  %v1135_v29 = vmul.f32 1.442695, %v1108_v50  ;;  %v1105_v54 = vsub.f32 %v3244_v45, %v1075_v51  ;;  %1152 = vadd.xlane.f32.xlu0 %v1151_v24 }
 0x35d   : >> { %v1078_v55 = vpop.xlane.xlu1 %1077  ;;  %v1154_v33 = vsel %vm1048_vm3, %v3300_v52, 0.0 }
 0x35e   : >> { %v3305_v56 = vpop.eup %2875  ;;  %2885 = vpow2.f32 %v1135_v29  ;;  %v1129_v58 = vmul.f32 1.442695, %v1105_v54  ;;  %v1106_v39 = vsub.f32 %v3248_v49, %v1078_v55  ;;  %1155 = vadd.xlane.f32.xlu1 %v1154_v33 }
 0x35f   : >> { %v1093_v59 = vpop.xlane.xlu0 %1092  ;;  %v1163_v60 = vsel %vm1048_vm3, %v3305_v56, 0.0 }
 0x360   : >> { %v3310_v63 = vpop.eup %2877  ;;  %2887 = vpow2.f32 %v1129_v58  ;;  %v1131_v45 = vmul.f32 1.442695, %v1106_v39  ;;  %v1111_v3 = vsub.f32 %v3252_v53, %v1093_v59  ;;  %1164 = vadd.xlane.f32.xlu0 %v1163_v60 }
 0x361   : >> { %v1096_v5 = vpop.xlane.xlu1 %1095  ;;  %v1166_v7 = vsel %vm1048_vm3, %v3310_v63, 0.0 }
 0x362   : >> { %v3315_v8 = vpop.eup %2879  ;;  %2889 = vpow2.f32 %v1131_v45  ;;  %v1141_v49 = vmul.f32 1.442695, %v1111_v3  ;;  %v1112_v10 = vsub.f32 %v3256_v57, %v1096_v5  ;;  %1167 = vadd.xlane.f32.xlu1 %v1166_v7 }
 0x363   : >> { %v1087_v13 = vpop.xlane.xlu0 %1086  ;;  %v1157_v14 = vsel %vm1048_vm3, %v3315_v8, 0.0 }
 0x364   : >> { %v3320_v15 = vpop.eup %2881  ;;  %2891 = vpow2.f32 %v1141_v49  ;;  %v1143_v53 = vmul.f32 1.442695, %v1112_v10  ;;  %v1109_v17 = vsub.f32 %v3260_v61, %v1087_v13  ;;  %1158 = vadd.xlane.f32.xlu0 %v1157_v14 }
 0x365   : >> { %v1090_v18 = vpop.xlane.xlu1 %1089  ;;  %v1160_v19 = vsel %vm1048_vm3, %v3320_v15, 0.0 }
 0x366   : >> { %v3325_v26 = vpop.eup %2883  ;;  %2893 = vpow2.f32 %v1143_v53  ;;  %v1137_v57 = vmul.f32 1.442695, %v1109_v17  ;;  %v1110_v37 = vsub.f32 %v3264_v6, %v1090_v18  ;;  %1161 = vadd.xlane.f32.xlu1 %v1160_v19 }
 0x367   : >> { %v1175_v22 = vsel %vm1048_vm3, %v3325_v26, 0.0  ;;  %v1375_v9 = vpop.permute.xlu0 %1374 }
 0x368   : >> { %v3330_v4 = vpop.eup %2885  ;;  %2895 = vpow2.f32 %v1137_v57  ;;  %v1139_v62 = vmul.f32 1.442695, %v1110_v37  ;;  %1176 = vadd.xlane.f32.xlu0 %v1175_v22 }
 0x369   : >> { %v1178_v61 = vsel %vm1048_vm3, %v3330_v4, 0.0  ;;  %v3362_v41 = vpop.permute.xlu1 %1421 }
 0x36a   : >> { %v3334_v23 = vpop.eup %2887  ;;  %2897 = vpow2.f32 %v1139_v62  ;;  %1179 = vadd.xlane.f32.xlu1 %v1178_v61 }
 0x36b   : >> { %v1169_v25 = vsel %vm1048_vm3, %v3334_v23, 0.0  ;;  %v3364_v12 = vpop.permute.xlu0 %1468 }
 0x36c   : >> { %v3338_v6 = vpop.eup %2889  ;;  %1170 = vadd.xlane.f32.xlu0 %v1169_v25 }
 0x36d   : >> { %v1172_v27 = vsel %vm1048_vm3, %v3338_v6, 0.0 }
 0x36e   : >> { %v3342_v28 = vpop.eup %2891  ;;  %1173 = vadd.xlane.f32.xlu1 %v1172_v27 }
 0x36f   : >> { %v1187_v30 = vsel %vm1048_vm3, %v3342_v28, 0.0 }
 0x370   : >> { %v3346_v31 = vpop.eup %2893  ;;  %1188 = vadd.xlane.f32.xlu0 %v1187_v30 }
 0x371   : >> { %v1190_v32 = vsel %vm1048_vm3, %v3346_v31, 0.0 }
 0x372   : >> { %v3350_v35 = vpop.eup %2895  ;;  %1191 = vadd.xlane.f32.xlu1 %v1190_v32 }
 0x373   : >> { %v1181_v36 = vsel %vm1048_vm3, %v3350_v35, 0.0 }
 0x374   : >> { %v3354_v38 = vpop.eup %2897  ;;  %1182 = vadd.xlane.f32.xlu0 %v1181_v36 }
 0x375   : >> { %v1184_v40 = vsel %vm1048_vm3, %v3354_v38, 0.0 }
 0x376   : >> { %1185 = vadd.xlane.f32.xlu1 %v1184_v40  ;;  %v1620_v40 = vld [vmem:[%s3401_s19] sm:$0x3] }
 0x387   : >> { %1515 = vrot.lane.b32.xlu1 %v3149_v43, %s2985_s30 }
 0x38a   : >> { %1562 = vrot.lane.b32.xlu0 %v3151_v44, %s2985_s30 }
 0x39a   : >> { %v1150_v42 = vpop.xlane.xlu1 %1149 }
 0x39b   : >> { %2899 = vrcp.f32 %v1150_v42 }
 0x39c   : >> { %v1147_v46 = vpop.xlane.xlu0 %1146 }
 0x39d   : >> { %2901 = vrcp.f32 %v1147_v46  ;;  %v1633_v46 = vsel %vm1631_vm4, %v1620_v40, 0 }
 0x3a5   : >> { %v2900_v16 = vpop.eup %2899 }
 0x3a6   : >> { %v1210_v20 = vmul.f32 %v2900_v16, %v3280_v21  ;;  %v1622_v16 = vld [vmem:[%s3401_s19 + $0x4] sm:$0x3] }
 0x3a7   : >> { %v2902_v47 = vpop.eup %2901 }
 0x3a8   : >> { %v1209_v50 = vmul.f32 %v2902_v47, %v3282_v34 }
 0x3aa   : >> { %v1225_v51 = vpack.c.bf16 %v1210_v20, %v1209_v50 }
 0x3ac   : >> { %2656 = vmatmul.mubr.msk.bf16.vlgmr.msra.gmra.mrb[24].mxu1 %vm1048_vm3, %v1225_v51 }
 0x3ad   : >> { %2666 = vmatpush3.bf16.msra.mxu1 %v3276_v11  ;;  %2667 = vmatprep.mubr.msk.bf16.mxu1 %vm2976_vm0, %v2975_v2 }
 0x3ae   : >> { %2677 = vmatprep.subr.bf16.mxu1 %v2975_v2 }
 0x3e9   : >> { %v1153_v43 = vpop.xlane.xlu0 %1152 }
 0x3ea   : >> { %2903 = vrcp.f32 %v1153_v43  ;;  %v1727_v43 = vsel %vm1631_vm4, %v1622_v16, 0 }
 0x3eb   : >> { %v1156_v44 = vpop.xlane.xlu1 %1155 }
 0x3ec   : >> { %2905 = vrcp.f32 %v1156_v44 }
 0x3ed   : >> { %v1165_v24 = vpop.xlane.xlu0 %1164 }
 0x3ef   : >> { %v1168_v29 = vpop.xlane.xlu1 %1167 }
 0x3f0   : >> { %2907 = vrcp.f32 %v1168_v29 }
 0x3f1   : >> { %2909 = vrcp.f32 %v1165_v24  ;;  %v1159_v21 = vpop.xlane.xlu0 %1158  ;;  %v1623_v24 = vld [vmem:[%s3401_s19 + $0x6] sm:$0x3] }
 0x3f2   : >> { %2911 = vrcp.f32 %v1159_v21 }
 0x3f3   : >> { %v1162_v34 = vpop.xlane.xlu1 %1161 }
 0x3f4   : >> { %v2904_v54 = vpop.eup %2903  ;;  %2913 = vrcp.f32 %v1162_v34 }
 0x3f5   : >> { %v1177_v55 = vpop.xlane.xlu0 %1176  ;;  %v1211_v33 = vmul.f32 %v2904_v54, %v3295_v48 }
 0x3f6   : >> { %v2906_v11 = vpop.eup %2905 }
 0x3f7   : >> { %v1212_v58 = vmul.f32 %v2906_v11, %v3300_v52  ;;  %v1180_v39 = vpop.xlane.xlu1 %1179 }
 0x3f8   : >> { %2915 = vrcp.f32 %v1180_v39  ;;  %v1625_v39 = vld [vmem:[%s3401_s19 + $0xa] sm:$0x3] }
 0x3f9   : >> { %2917 = vrcp.f32 %v1177_v55  ;;  %v1171_v59 = vpop.xlane.xlu0 %1170  ;;  %v1226_v60 = vpack.c.bf16 %v1212_v58, %v1211_v33  ;;  %v1774_v55 = vsel %vm1631_vm4, %v1623_v24, 0  ;;  %v1624_v58 = vld [vmem:[%s3401_s19 + $0x8] sm:$0x3] }
 0x3fa   : >> { %v2908_v45 = vpop.eup %2907  ;;  %2919 = vrcp.f32 %v1171_v59 }
 0x3fb   : >> { %v2910_v3 = vpop.eup %2909  ;;  %2662 = vmatmul.mubr.msk.bf16.vlgmr.msra.gmra.mrb[12].mxu0 %vm1048_vm3, %v1226_v60  ;;  %v1174_v5 = vpop.xlane.xlu1 %1173  ;;  %v1216_v48 = vmul.f32 %v2908_v45, %v3310_v63 }
 0x3fc   : >> { %v2912_v7 = vpop.eup %2911  ;;  %2672 = vmatpush3.bf16.msra.mxu0 %v1375_v9  ;;  %2921 = vrcp.f32 %v1174_v5  ;;  %2673 = vmatprep.mubr.msk.bf16.mxu0 %vm2976_vm0, %v2975_v2  ;;  %v1215_v10 = vmul.f32 %v2910_v3, %v3305_v56 }
 0x3fd   : >> { %v1189_v52 = vpop.xlane.xlu0 %1188  ;;  %2683 = vmatprep.subr.bf16.mxu0 %v2975_v2  ;;  %v1213_v13 = vmul.f32 %v2912_v7, %v3315_v8 }
 0x3fe   : >> { %v2914_v49 = vpop.eup %2913  ;;  %v1228_v19 = vpack.c.bf16 %v1216_v48, %v1215_v10  ;;  %v1868_v10 = vsel %vm1631_vm4, %v1625_v39, 0 }
 0x3ff   : >> { %v1214_v14 = vmul.f32 %v2914_v49, %v3320_v15  ;;  %v1192_v53 = vpop.xlane.xlu1 %1191  ;;  %v1821_v49 = vsel %vm1631_vm4, %v1624_v58, 0 }
 0x400   : >> { %2923 = vrcp.f32 %v1192_v53  ;;  %v1626_v53 = vld [vmem:[%s3401_s19 + $0xc] sm:$0x3] }
 0x401   : >> { %2925 = vrcp.f32 %v1189_v52  ;;  %v1183_v17 = vpop.xlane.xlu0 %1182  ;;  %v1227_v18 = vpack.c.bf16 %v1214_v14, %v1213_v13 }
 0x402   : >> { %v2916_v57 = vpop.eup %2915  ;;  %2927 = vrcp.f32 %v1183_v17  ;;  %v1627_v17 = vld [vmem:[%s3401_s19 + $0xe] sm:$0x3] }
 0x403   : >> { %v2918_v37 = vpop.eup %2917  ;;  %2668 = vmatmul.mubr.msk.bf16.vlgmr.msra.gmra.mrb[28].mxu1 %vm1048_vm3, %v1227_v18  ;;  %2674 = vmatmul.mubr.msk.bf16.vlgmr.msra.gmra.mrb[16].mxu0 %vm1048_vm3, %v1228_v19  ;;  %v1186_v63 = vpop.xlane.xlu1 %1185  ;;  %v1220_v56 = vmul.f32 %v2916_v57, %v3330_v4 }
 0x404   : >> { %v2920_v22 = vpop.eup %2919  ;;  %2678 = vmatpush3.bf16.msra.mxu1 %v3362_v41  ;;  %2684 = vmatpush3.bf16.msra.mxu0 %v3364_v12  ;;  %2929 = vrcp.f32 %v1186_v63  ;;  %v1219_v15 = vmul.f32 %v2918_v37, %v3325_v26 }
 0x405   : >> { %2679 = vmatprep.mubr.msk.bf16.mxu1 %vm2976_vm0, %v2975_v2  ;;  %2685 = vmatprep.mubr.msk.bf16.mxu0 %vm2976_vm0, %v2975_v2  ;;  %v1217_v62 = vmul.f32 %v2920_v22, %v3334_v23  ;;  %v1563_v32 = vpop.permute.xlu0 %1562 }
 0x406   : >> { %v2922_v8 = vpop.eup %2921  ;;  %2689 = vmatprep.subr.bf16.mxu1 %v2975_v2  ;;  %2695 = vmatprep.subr.bf16.mxu0 %v2975_v2  ;;  %v1230_v27 = vpack.c.bf16 %v1220_v56, %v1219_v15  ;;  %v1915_v15 = vsel %vm1631_vm4, %v1626_v53, 0 }
 0x407   : >> { %v1218_v61 = vmul.f32 %v2922_v8, %v3338_v6  ;;  %v1516_v36 = vpop.permute.xlu1 %1515 }
 0x409   : >> { %v1229_v25 = vpack.c.bf16 %v1218_v61, %v1217_v62  ;;  %v1962_v62 = vsel %vm1631_vm4, %v1627_v17, 0 }
 0x40a   : >> { %v2924_v4 = vpop.eup %2923 }
 0x40b   : >> { %v2926_v30 = vpop.eup %2925  ;;  %2680 = vmatmul.mubr.msk.bf16.vlgmr.msra.gmra.mrb[32].mxu1 %vm1048_vm3, %v1229_v25  ;;  %2686 = vmatmul.mubr.msk.bf16.vlgmr.msra.gmra.mrb[20].mxu0 %vm1048_vm3, %v1230_v27  ;;  %v1224_v23 = vmul.f32 %v2924_v4, %v3346_v31 }
 0x40c   : >> { %v2928_v26 = vpop.eup %2927  ;;  %2690 = vmatpush3.bf16.msra.mxu1 %v1516_v36  ;;  %2696 = vmatpush3.bf16.msra.mxu0 %v1563_v32  ;;  %v1223_v9 = vmul.f32 %v2926_v30, %v3342_v28  ;;  %v1621_v28 = vld [vmem:[%s3401_s19 + $0x2] sm:$0x3] }
 0x40d   : >> { %2691 = vmatprep.mubr.msk.bf16.mxu1 %vm2976_vm0, %v2975_v2  ;;  %2697 = vmatprep.mubr.msk.bf16.mxu0 %vm2976_vm0, %v2975_v2  ;;  %v1221_v41 = vmul.f32 %v2928_v26, %v3350_v35  ;;  %v1680_v35 = vsel %vm1631_vm4, %v1621_v28, 0 }
 0x40e   : >> { %v2930_v6 = vpop.eup %2929  ;;  %2701 = vmatprep.subr.bf16.mxu1 %v2975_v2  ;;  %2707 = vmatprep.subr.bf16.mxu0 %v2975_v2  ;;  %v1232_v42 = vpack.c.bf16 %v1224_v23, %v1223_v9 }
 0x40f   : >> { %v1222_v31 = vmul.f32 %v2930_v6, %v3354_v38 }
 0x411   : >> { %v1231_v12 = vpack.c.bf16 %v1222_v31, %v1221_v41 }
 0x413   : >> { %2692 = vmatmul.mubr.msk.bf16.vlgmr.msra.gmra.mrb[36].mxu1 %vm1048_vm3, %v1231_v12  ;;  %2698 = vmatmul.mubr.msk.bf16.vlgmr.msra.gmra.mrb[24].mxu0 %vm1048_vm3, %v1232_v42 }
 0x414   : >> { %2702 = vmatpush3.bf16.msra.mxu1 %v1633_v46  ;;  %2703 = vmatprep.mubr.msk.bf16.mxu1 %vm2976_vm0, %v2975_v2 }
 0x415   : >> { %2709 = vmatprep.mubr.msk.bf16.mxu0 %vm2976_vm0, %v2975_v2  ;;  %2713 = vmatprep.subr.bf16.mxu1 %v2975_v2 }
 0x416   : >> { %2708 = vmatpush3.bf16.msra.mxu0 %v1680_v35 }
 0x417   : >> { %2719 = vmatprep.subr.bf16.mxu0 %v2975_v2 }
 0x47f   : >> { %v1273_v38 = vpop.f32.mrb[24].mxu1 }
 0x480   : >> { %v2657_v47 = vpop.f32.mrb[25].mxu1 }
 0x481   : >> { %v1276_v20 = vpop.f32.mrb[26].mxu1 }
 0x482   : >> { %v1609_v50 = vpack.c.bf16 %v1276_v20, %v1273_v38  ;;  %v2658_v51 = vpop.f32.mrb[27].mxu1 }
 0x484   : >> { %2704 = vmatmul.mubr.msk.bf16.vlgmr.msra.gmra.mrb[40].mxu1 %vm634_vm2, %v1609_v50 }
 0x485   : >> { %2714 = vmatpush3.bf16.msra.mxu1 %v1727_v43  ;;  %2715 = vmatprep.mubr.msk.bf16.mxu1 %vm2976_vm0, %v2975_v2 }
 0x486   : >> { %2725 = vmatprep.subr.bf16.mxu1 %v2975_v2 }
 0x4ce   : >> { %v1320_v44 = vpop.f32.mrb[12].mxu0 }
 0x4cf   : >> { %v2663_v29 = vpop.f32.mrb[13].mxu0 }
 0x4d0   : >> { %v1323_v21 = vpop.f32.mrb[14].mxu0 }
 0x4d1   : >> { %v1610_v34 = vpack.c.bf16 %v1323_v21, %v1320_v44  ;;  %v2664_v54 = vpop.f32.mrb[15].mxu0 }
 0x4d3   : >> { %2710 = vmatmul.mubr.msk.bf16.vlgmr.msra.gmra.mrb[28].mxu0 %vm634_vm2, %v1610_v34 }
 0x4d4   : >> { %2720 = vmatpush3.bf16.msra.mxu0 %v1774_v55  ;;  %2721 = vmatprep.mubr.msk.bf16.mxu0 %vm2976_vm0, %v2975_v2 }
 0x4d5   : >> { %2731 = vmatprep.subr.bf16.mxu0 %v2975_v2 }
 0x4d6   : >> { %v1367_v11 = vpop.f32.mrb[28].mxu1  ;;  %v1414_v33 = vpop.f32.mrb[16].mxu0 }
 0x4d7   : >> { %v2669_v59 = vpop.f32.mrb[29].mxu1  ;;  %v2675_v60 = vpop.f32.mrb[17].mxu0 }
 0x4d8   : >> { %v1370_v45 = vpop.f32.mrb[30].mxu1  ;;  %v1417_v3 = vpop.f32.mrb[18].mxu0 }
 0x4d9   : >> { %v1611_v5 = vpack.c.bf16 %v1370_v45, %v1367_v11  ;;  %v1612_v7 = vpack.c.bf16 %v1417_v3, %v1414_v33  ;;  %v2670_v48 = vpop.f32.mrb[31].mxu1  ;;  %v2676_v52 = vpop.f32.mrb[19].mxu0 }
 0x4db   : >> { %2716 = vmatmul.mubr.msk.bf16.vlgmr.msra.gmra.mrb[44].mxu1 %vm634_vm2, %v1611_v5  ;;  %2722 = vmatmul.mubr.msk.bf16.vlgmr.msra.gmra.mrb[32].mxu0 %vm634_vm2, %v1612_v7 }
 0x4dc   : >> { %2726 = vmatpush3.bf16.msra.mxu1 %v1821_v49  ;;  %2732 = vmatpush3.bf16.msra.mxu0 %v1868_v10 }
 0x4dd   : >> { %2727 = vmatprep.mubr.msk.bf16.mxu1 %vm2976_vm0, %v2975_v2  ;;  %2733 = vmatprep.mubr.msk.bf16.mxu0 %vm2976_vm0, %v2975_v2 }
 0x4de   : >> { %v1461_v13 = vpop.f32.mrb[32].mxu1  ;;  %v1508_v14 = vpop.f32.mrb[20].mxu0  ;;  %2737 = vmatprep.subr.bf16.mxu1 %v2975_v2  ;;  %2743 = vmatprep.subr.bf16.mxu0 %v2975_v2 }
 0x4df   : >> { %v2681_v18 = vpop.f32.mrb[33].mxu1  ;;  %v2687_v19 = vpop.f32.mrb[21].mxu0 }
 0x4e0   : >> { %v1464_v57 = vpop.f32.mrb[34].mxu1  ;;  %v1511_v37 = vpop.f32.mrb[22].mxu0 }
 0x4e1   : >> { %v1613_v63 = vpack.c.bf16 %v1464_v57, %v1461_v13  ;;  %v1614_v22 = vpack.c.bf16 %v1511_v37, %v1508_v14  ;;  %v2682_v56 = vpop.f32.mrb[35].mxu1  ;;  %v2688_v8 = vpop.f32.mrb[23].mxu0 }
 0x4e3   : >> { %2728 = vmatmul.mubr.msk.bf16.vlgmr.msra.gmra.mrb[48].mxu1 %vm634_vm2, %v1613_v63  ;;  %2734 = vmatmul.mubr.msk.bf16.vlgmr.msra.gmra.mrb[36].mxu0 %vm634_vm2, %v1614_v22 }
 0x4e4   : >> { %2738 = vmatpush3.bf16.msra.mxu1 %v1915_v15  ;;  %2744 = vmatpush3.bf16.msra.mxu0 %v1962_v62 }
 0x4e5   : >> { %2739 = vmatprep.mubr.msk.bf16.mxu1 %vm2976_vm0, %v2975_v2  ;;  %2745 = vmatprep.mubr.msk.bf16.mxu0 %vm2976_vm0, %v2975_v2 }
 0x4e6   : >> { %v1555_v61 = vpop.f32.mrb[36].mxu1  ;;  %v1602_v25 = vpop.f32.mrb[24].mxu0  ;;  %2749 = vmatprep.subr.bf16.mxu1 %v2975_v2  ;;  %2757 = vmatprep.subr.bf16.mxu0 %v2975_v2 }
 0x4e7   : >> { %v2693_v27 = vpop.f32.mrb[37].mxu1  ;;  %v2699_v4 = vpop.f32.mrb[25].mxu0 }
 0x4e8   : >> { %v1558_v30 = vpop.f32.mrb[38].mxu1  ;;  %v1605_v32 = vpop.f32.mrb[26].mxu0 }
 0x4e9   : >> { %v1615_v36 = vpack.c.bf16 %v1558_v30, %v1555_v61  ;;  %v1616_v26 = vpack.c.bf16 %v1605_v32, %v1602_v25  ;;  %v2694_v23 = vpop.f32.mrb[39].mxu1  ;;  %v2700_v6 = vpop.f32.mrb[27].mxu0  ;;  %v2503_v30 = vld [vmem:[%s2035_s22] ss:$0 sm:$0xff] }
 0x4eb   : >> { %2740 = vmatmul.mubr.msk.bf16.vlgmr.msra.gmra.mrb[52].mxu1 %vm634_vm2, %v1615_v36  ;;  %2746 = vmatmul.mubr.msk.bf16.vlgmr.msra.gmra.mrb[40].mxu0 %vm634_vm2, %v1616_v26 }
 0x4ec   : >> { %2753 = vmatprep.mubr.msk.bf16.mxu1 %vm2976_vm0, %v2975_v2  ;;  %2773 = vmatprep.mubr.msk.bf16.mxu0 %vm2976_vm0, %v2975_v2 }
 0x557   : >> { %v1669_v40 = vpop.f32.mrb[40].mxu1 }
 0x558   : >> { %v2705_v9 = vpop.f32.mrb[41].mxu1  ;;  %v2005_v42 = vsel %vm534_vm1, %v1669_v40, 0.0 }
 0x559   : >> { %v1672_v41 = vpop.f32.mrb[42].mxu1 }
 0x55a   : >> { %v2706_v31 = vpop.f32.mrb[43].mxu1  ;;  %v2020_v16 = vsel %vm534_vm1, %v1672_v41, 0.0 }
 0x5a6   : >> { %v1716_v12 = vpop.f32.mrb[28].mxu0 }
 0x5a7   : >> { %v2006_v46 = vsel %vm534_vm1, %v1716_v12, 0.0  ;;  %v2711_v28 = vpop.f32.mrb[29].mxu0 }
 0x5a8   : >> { %v2007_v35 = vadd.f32 %v2006_v46, %v2005_v42  ;;  %v1719_v38 = vpop.f32.mrb[30].mxu0 }
 0x5a9   : >> { %v2021_v47 = vsel %vm534_vm1, %v1719_v38, 0.0  ;;  %v2712_v20 = vpop.f32.mrb[31].mxu0 }
 0x5aa   : >> { %v2022_v50 = vadd.f32 %v2021_v47, %v2020_v16 }
 0x5ae   : >> { %v1763_v51 = vpop.f32.mrb[44].mxu1  ;;  %v1810_v43 = vpop.f32.mrb[32].mxu0 }
 0x5af   : >> { %v2008_v44 = vsel %vm534_vm1, %v1763_v51, 0.0  ;;  %v2717_v24 = vpop.f32.mrb[45].mxu1  ;;  %v2723_v29 = vpop.f32.mrb[33].mxu0  ;;  %v2010_v55 = vsel %vm534_vm1, %v1810_v43, 0.0 }
 0x5b0   : >> { %v2009_v21 = vadd.f32 %v2008_v44, %v2007_v35  ;;  %v1766_v34 = vpop.f32.mrb[46].mxu1  ;;  %v1813_v54 = vpop.f32.mrb[34].mxu0  ;;  %v2857_v44 = vld [vmem:[%s3115_s21] sm:$0xff]   ;;  %v2858_v24 = vld [vmem:[%s3115_s21 + $0x8] sm:$0xff]  }
 0x5b1   : >> { %v2023_v11 = vsel %vm534_vm1, %v1766_v34, 0.0  ;;  %v2718_v33 = vpop.f32.mrb[47].mxu1  ;;  %v2724_v58 = vpop.f32.mrb[35].mxu0  ;;  %v2025_v60 = vsel %vm534_vm1, %v1813_v54, 0.0  ;;  %2750 = vmatpush3.bf16.msra.mxu1 %v2857_v44  ;;  %v2859_v29 = vld [vmem:[%s3120_s24] sm:$0xff]   ;;  %v2861_v34 = vld [vmem:[%s3120_s24 + $0x10] sm:$0xff]  }
 0x5b2   : >> { %v2011_v39 = vadd.f32 %v2010_v55, %v2009_v21  ;;  %v2024_v59 = vadd.f32 %v2023_v11, %v2022_v50  ;;  %2751 = vmatprep.subr.bf16.mxu1 %v2975_v2  ;;  %2758 = vmatpush3.bf16.msra.mxu0 %v2859_v29  ;;  %v2860_v21 = vld [vmem:[%s3120_s24 + $0x8] sm:$0xff]   ;;  %v2862_v54 = vld [vmem:[%s3120_s24 + $0x18] sm:$0xff]   ;;  %v2863_v55 = vld [vmem:[%s3120_s24 + $0x20] sm:$0xff]  }
 0x5b3   : >> { %2759 = vmatprep.subr.bf16.mxu0 %v2975_v2  ;;  %v2864_v11 = vld [vmem:[%s3120_s24 + $0x28] sm:$0xff]  }
 0x5b4   : >> { %v2026_v45 = vadd.f32 %v2025_v60, %v2024_v59 }
 0x5b5   : >> { %2752 = vmatpush3.bf16.msra.mxu1 %v2858_v24 }
 0x5b6   : >> { %v1857_v3 = vpop.f32.mrb[48].mxu1  ;;  %v1904_v5 = vpop.f32.mrb[36].mxu0  ;;  %2760 = vmatpush3.bf16.msra.mxu0 %v2860_v21 }
 0x5b7   : >> { %v2012_v7 = vsel %vm534_vm1, %v1857_v3, 0.0  ;;  %v2729_v48 = vpop.f32.mrb[49].mxu1  ;;  %v2735_v52 = vpop.f32.mrb[37].mxu0  ;;  %v2014_v14 = vsel %vm534_vm1, %v1904_v5, 0.0  ;;  %2761 = vmatprep.subr.bf16.mxu0 %v2975_v2  ;;  %v2504_v5 = vld [vmem:[%s2047_s25] ss:$0 sm:$0xff]  ;;  %s2286_s25 = scalar_lea.vmem %s3577_s11, %s2973_s27 }
 0x5b8   : >> { %v2013_v49 = vadd.f32 %v2012_v7, %v2011_v39  ;;  %v1860_v10 = vpop.f32.mrb[50].mxu1  ;;  %v1907_v13 = vpop.f32.mrb[38].mxu0  ;;  %v2522_v24 = vld [vmem:[%s2286_s25] ss:$0 sm:$0xff] }
 0x5b9   : >> { %v2027_v53 = vsel %vm534_vm1, %v1860_v10, 0.0  ;;  %v2730_v17 = vpop.f32.mrb[51].mxu1  ;;  %v2736_v18 = vpop.f32.mrb[39].mxu0  ;;  %v2029_v37 = vsel %vm534_vm1, %v1907_v13, 0.0  ;;  %v2505_v10 = vld [vmem:[%s2049_s16] ss:$0 sm:$0xff]  ;;  %s2288_s16 = scalar_lea.vmem %s3578_s12, %s2973_s27 }
 0x5ba   : >> { %v2015_v19 = vadd.f32 %v2014_v14, %v2013_v49  ;;  %v2028_v57 = vadd.f32 %v2027_v53, %v2026_v45  ;;  %2762 = vmatpush3.bf16.msra.mxu0 %v2861_v34  ;;  %v2865_v18 = vld [vmem:[%s3120_s24 + $0x30] sm:$0xff]   ;;  %v2523_v34 = vld [vmem:[%s2288_s16] ss:$0 sm:$0xff] }
 0x5bb   : >> { %2763 = vmatprep.subr.bf16.mxu0 %v2975_v2 }
 0x5bc   : >> { %v2030_v63 = vadd.f32 %v2029_v37, %v2028_v57  ;;  %v2507_v57 = vld [vmem:[%s2101_s28] ss:$0 sm:$0xff] }
 0x5be   : >> { %v1951_v22 = vpop.f32.mrb[52].mxu1  ;;  %v1998_v56 = vpop.f32.mrb[40].mxu0  ;;  %2764 = vmatpush3.bf16.msra.mxu0 %v2862_v54 }
 0x5bf   : >> { %v2016_v8 = vsel %vm534_vm1, %v1951_v22, 0.0  ;;  %v2741_v15 = vpop.f32.mrb[53].mxu1  ;;  %v2747_v62 = vpop.f32.mrb[41].mxu0  ;;  %v2018_v4 = vsel %vm534_vm1, %v1998_v56, 0.0  ;;  %2765 = vmatprep.subr.bf16.mxu0 %v2975_v2 }
 0x5c0   : >> { %v2017_v61 = vadd.f32 %v2016_v8, %v2015_v19  ;;  %v1954_v25 = vpop.f32.mrb[54].mxu1  ;;  %v2001_v27 = vpop.f32.mrb[42].mxu0  ;;  %v2866_v19 = vld [vmem:[%s3120_s24 + $0x38] sm:$0xff]   ;;  %s2187_s24 = scalar_lea.vmem %s3576_s10, %s2973_s27  ;;  %s503_s27 = sadd.s32 1, %s2973_s27  }
 0x5c1   : >> { %v2031_v32 = vsel %vm534_vm1, %v1954_v25, 0.0  ;;  %v2742_v36 = vpop.f32.mrb[55].mxu1  ;;  %v2748_v26 = vpop.f32.mrb[43].mxu0  ;;  %v2033_v40 = vsel %vm534_vm1, %v2001_v27, 0.0  ;;  %p500_p4 = scmp.ge.s32.totalorder %s503_s27, 3  }
 0x5c2   : >> { %v2019_v23 = vadd.f32 %v2018_v4, %v2017_v61  ;;  %v2032_v6 = vadd.f32 %v2031_v32, %v2030_v63  ;;  %2766 = vmatpush3.bf16.msra.mxu0 %v2863_v55 }
 0x5c3   : >> { %2767 = vmatprep.subr.bf16.mxu0 %v2975_v2 }
 0x5c4   : >> { %v2043_v9 = vadd.f32 %v2503_v30, %v2019_v23  ;;  %v2034_v41 = vadd.f32 %v2033_v40, %v2032_v6 }
 0x5c6   : >> { %v2044_v31 = vadd.f32 %v2503_v30, %v2034_v41  ;;  %v2045_v12 = vadd.f32 %v2969_v0, %v2043_v9  ;;  %2768 = vmatpush3.bf16.msra.mxu0 %v2864_v11 }
 0x5c7   : >> { %2769 = vmatprep.subr.bf16.mxu0 %v2975_v2 }
 0x5c8   : >> { %v2051_v42 = vsel %vm534_vm1, %v2045_v12, 0.0  ;;  %v2046_v46 = vadd.f32 %v2965_v1, %v2044_v31 }
 0x5c9   : >> { %2052 = vadd.xlane.f32.xlu1 %v2051_v42 }
 0x5ca   : >> { %v2054_v28 = vsel %vm534_vm1, %v2046_v46, 0.0  ;;  %2770 = vmatpush3.bf16.msra.mxu0 %v2865_v18 }
 0x5cb   : >> { %2055 = vadd.xlane.f32.xlu0 %v2054_v28  ;;  %2771 = vmatprep.subr.bf16.mxu0 %v2975_v2  ;;  %v2513_v2 = vld [vmem:[%s2187_s24] ss:$0 sm:$0xff] }
 0x5ce   : >> { %2772 = vmatpush3.bf16.msra.mxu0 %v2866_v19 }
 0x656   : >> { %v2053_v35 = vpop.xlane.xlu1 %2052 }
 0x657   : >> { %v2058_v38 = vmul.f32 0.03125, %v2053_v35 }
 0x658   : >> { %v2056_v16 = vpop.xlane.xlu0 %2055 }
 0x659   : >> { %v2060_v47 = vsub.f32 %v2045_v12, %v2058_v38  ;;  %v2059_v20 = vmul.f32 0.03125, %v2056_v16 }
 0x65b   : >> { %v2061_v50 = vsub.f32 %v2046_v46, %v2059_v20  ;;  %v2062_v51 = vmul.f32 %v2060_v47, %v2060_v47 }
 0x65d   : >> { %v2064_v0 = vsel %vm534_vm1, %v2062_v51, 0.0  ;;  %v2063_v43 = vmul.f32 %v2061_v50, %v2061_v50 }
 0x65e   : >> { %2065 = vadd.xlane.f32.xlu0 %v2064_v0 }
 0x65f   : >> { %v2067_v1 = vsel %vm534_vm1, %v2063_v43, 0.0 }
 0x660   : >> { %2068 = vadd.xlane.f32.xlu1 %v2067_v1 }
 0x6eb   : >> { %v2066_v33 = vpop.xlane.xlu0 %2065 }
 0x6ec   : >> { %v2070_v58 = vmul.f32 0.03125, %v2066_v33 }
 0x6ed   : >> { %v2069_v39 = vpop.xlane.xlu1 %2068 }
 0x6ee   : >> { %v2072_v59 = vadd.f32 1e-05, %v2070_v58  ;;  %v2071_v60 = vmul.f32 0.03125, %v2069_v39 }
 0x6f0   : >> { %2931 = vrsqrt.f32 %v2072_v59  ;;  %v2073_v45 = vadd.f32 1e-05, %v2071_v60 }
 0x6f2   : >> { %2933 = vrsqrt.f32 %v2073_v45 }
 0x6fa   : >> { %v2932_v3 = vpop.eup %2931 }
 0x6fb   : >> { %v2076_v7 = vmul.f32 %v2932_v3, %v2060_v47 }
 0x6fc   : >> { %v2934_v48 = vpop.eup %2933 }
 0x6fd   : >> { %v2084_v52 = vmul.f32 %v2504_v5, %v2076_v7  ;;  %v2077_v49 = vmul.f32 %v2934_v48, %v2061_v50 }
 0x6ff   : >> { %v2085_v13 = vmul.f32 %v2504_v5, %v2077_v49  ;;  %v2092_v14 = vadd.f32 %v2505_v10, %v2084_v52 }
 0x701   : >> { %v2093_v53 = vadd.f32 %v2505_v10, %v2085_v13 }
 0x703   : >> { %v2094_v17 = vpack.c.bf16 %v2093_v53, %v2092_v14 }
 0x705   : >> { %2754 = vmatmul.mubr.msk.bf16.vlgmr.msra.gmra.mrb[56].mxu1 %vm534_vm1, %v2094_v17 }
 0x7d8   : >> { %v2158_v37 = vpop.f32.mrb[56].mxu1 }
 0x7d9   : >> { %v2159_v63 = vadd.f32 %v2507_v57, %v2158_v37  ;;  %v2755_v22 = vpop.f32.mrb[57].mxu1 }
 0x7da   : >> { %v2161_v56 = vpop.f32.mrb[58].mxu1 }
 0x7db   : >> { %v2162_v8 = vadd.f32 %v2507_v57, %v2161_v56  ;;  %v2756_v15 = vpop.f32.mrb[59].mxu1  ;;  %v2165_v62 = vmax.f32 %v2159_v63, 0.0  ;;  %v2524_v63 = vld [vmem:[%s3579_s13] ss:$0 sm:$0xff] (%p500_p4) }
 0x7dc   : > { %v2525_v56 = vld [vmem:[%s3580_s14] ss:$0 sm:$0xff] (%p500_p4) }
 0x7dd   : >> { %v2166_v61 = vmax.f32 %v2162_v8, 0.0 }
 0x7df   : >> { %v2167_v25 = vpack.c.bf16 %v2166_v61, %v2165_v62 }
 0x7e1   : >> { %2774 = vmatmul.mubr.bf16.vlgmr.msra.gmra.mrb[44].mxu0 %v2167_v25 }
 0x8b4   : >> { %v2277_v27 = vpop.f32.mrb[44].mxu0 }
 0x8b5   : >> { %v2278_v4 = vadd.f32 %v2513_v2, %v2277_v27  ;;  %v2775_v30 = vpop.f32.mrb[45].mxu0 }
 0x8b6   : >> { %v2280_v32 = vpop.f32.mrb[46].mxu0 }
 0x8b7   : >> { %v2281_v36 = vadd.f32 %v2513_v2, %v2280_v32  ;;  %v2776_v26 = vpop.f32.mrb[47].mxu0  ;;  %v2284_v23 = vadd.f32 %v2278_v4, %v2092_v14 }
 0x8b9   : >> { %v2290_v6 = vsel %vm534_vm1, %v2284_v23, 0.0  ;;  %v2285_v40 = vadd.f32 %v2281_v36, %v2093_v53 }
 0x8ba   : >> { %2291 = vadd.xlane.f32.xlu0 %v2290_v6 }
 0x8bb   : >> { %v2293_v9 = vsel %vm534_vm1, %v2285_v40, 0.0 }
 0x8bc   : >> { %2294 = vadd.xlane.f32.xlu1 %v2293_v9 }
 0x947   : >> { %v2292_v41 = vpop.xlane.xlu0 %2291 }
 0x948   : >> { %v2296_v31 = vmul.f32 0.03125, %v2292_v41 }
 0x949   : >> { %v2295_v12 = vpop.xlane.xlu1 %2294 }
 0x94a   : >> { %v2298_v42 = vsub.f32 %v2284_v23, %v2296_v31  ;;  %v2297_v46 = vmul.f32 0.03125, %v2295_v12 }
 0x94c   : >> { %v2299_v28 = vsub.f32 %v2285_v40, %v2297_v46  ;;  %v2300_v35 = vmul.f32 %v2298_v42, %v2298_v42 }
 0x94e   : >> { %v2302_v38 = vsel %vm534_vm1, %v2300_v35, 0.0  ;;  %v2301_v16 = vmul.f32 %v2299_v28, %v2299_v28 }
 0x94f   : >> { %2303 = vadd.xlane.f32.xlu0 %v2302_v38 }
 0x950   : >> { %v2305_v47 = vsel %vm534_vm1, %v2301_v16, 0.0 }
 0x951   : >> { %2306 = vadd.xlane.f32.xlu1 %v2305_v47 }
 0x9dc   : >> { %v2304_v20 = vpop.xlane.xlu0 %2303 }
 0x9dd   : >> { %v2308_v50 = vmul.f32 0.03125, %v2304_v20 }
 0x9de   : >> { %v2307_v51 = vpop.xlane.xlu1 %2306 }
 0x9df   : >> { %v2310_v0 = vadd.f32 1e-05, %v2308_v50  ;;  %v2309_v43 = vmul.f32 0.03125, %v2307_v51 }
 0x9e1   : >> { %2935 = vrsqrt.f32 %v2310_v0  ;;  %v2311_v1 = vadd.f32 1e-05, %v2309_v43 }
 0x9e3   : >> { %2937 = vrsqrt.f32 %v2311_v1 }
 0x9eb   : >> { %v2936_v44 = vpop.eup %2935 }
 0x9ec   : >> { %v2314_v29 = vmul.f32 %v2936_v44, %v2298_v42 }
 0x9ed   : >> { %v2938_v21 = vpop.eup %2937 }
 0x9ee   : >> { %v2322_v54 = vmul.f32 %v2522_v24, %v2314_v29  ;;  %v2315_v55 = vmul.f32 %v2938_v21, %v2299_v28  ;;  %502 = sbr.rel (!%p500_p4) target bundleno = 17 (0x11), region = 129 }
 0x9f0   : >> { %v2330_v11 = vadd.f32 %v2523_v34, %v2322_v54   ;;  %v2323_v33 = vmul.f32 %v2522_v24, %v2315_v55 }
 0x9f2   : >> { %v2331_v58 = vadd.f32 %v2523_v34, %v2323_v33   ;;  %v3583_v0 = vmov %v2330_v11  ;;  %v2335_v39 = vsel (%p500_p4), %vm534_vm1, %v2330_v11, 0.0 }
 0x9f3   : > { %2336 = vadd.xlane.f32.xlu0 (%p500_p4), %v2335_v39 }
 0x9f4   : >> { %v3582_v1 = vmov %v2331_v58  ;;  %v2338_v59 = vsel (%p500_p4), %vm534_vm1, %v2331_v58, 0.0 }
 0x9f7   : > { %2339 = vadd.xlane.f32.xlu0 %v2338_v59 }
 0xa80   : > { %v2337_v60 = vpop.xlane.xlu0 %2336 }
 0xa81   : > { %v2342_v45 = vmul.f32 0.03125, %v2337_v60 }
 0xa83   : > { %v2344_v3 = vsub.f32 %v2330_v11, %v2342_v45 }
 0xa84   : > { %v2340_v5 = vpop.xlane.xlu0 %2339 }
 0xa85   : > { %v2343_v7 = vmul.f32 0.03125, %v2340_v5  ;;  %v2346_v48 = vmul.f32 %v2344_v3, %v2344_v3 }
 0xa87   : > { %v2345_v52 = vsub.f32 %v2331_v58, %v2343_v7  ;;  %v2348_v49 = vsel %vm534_vm1, %v2346_v48, 0.0 }
 0xa88   : > { %2349 = vadd.xlane.f32.xlu1 %v2348_v49 }
 0xa89   : > { %v2347_v10 = vmul.f32 %v2345_v52, %v2345_v52 }
 0xa8b   : > { %v2351_v13 = vsel %vm534_vm1, %v2347_v10, 0.0 }
 0xa8c   : > { %2352 = vadd.xlane.f32.xlu1 %v2351_v13 }
 0xb15   : > { %v2350_v14 = vpop.xlane.xlu1 %2349 }
 0xb16   : > { %v2354_v53 = vmul.f32 0.03125, %v2350_v14 }
 0xb18   : > { %v2356_v17 = vadd.f32 1e-05, %v2354_v53 }
 0xb19   : > { %v2353_v18 = vpop.xlane.xlu1 %2352 }
 0xb1a   : > { %2939 = vrsqrt.f32 %v2356_v17  ;;  %v2355_v19 = vmul.f32 0.03125, %v2353_v18 }
 0xb1c   : > { %v2357_v57 = vadd.f32 1e-05, %v2355_v19 }
 0xb1e   : > { %2941 = vrsqrt.f32 %v2357_v57 }
 0xb24   : > { %v2940_v37 = vpop.eup %2939 }
 0xb25   : > { %v2360_v22 = vmul.f32 %v2940_v37, %v2344_v3 }
 0xb27   : > { %v2368_v8 = vmul.f32 %v2524_v63, %v2360_v22 }
 0xb28   : > { %v2942_v15 = vpop.eup %2941 }
 0xb29   : > { %v2376_v62 = vadd.f32 %v2525_v56, %v2368_v8  ;;  %v2361_v61 = vmul.f32 %v2942_v15, %v2345_v52 }
 0xb2b   : > { %2378 = vst.msk [vmem:[%s3080_s26] sm:$0xff] %vm534_vm1, %v2376_v62  ;;  %v2369_v25 = vmul.f32 %v2524_v63, %v2361_v61 }
 0xb2d   : > { %v2377_v2 = vadd.f32 %v2525_v56, %v2369_v25 }
 0xb2f   : > { %2379 = vst.msk [vmem:[%s3080_s26 + $0x8] sm:$0xff] %vm534_vm1, %v2377_v2 }
 0xb30 PF: > { %s25_s18 = sadd.s32 1, %s2961_s18  }
 0xb31   : > { %p22_p5 = scmp.ge.s32.totalorder %s25_s18, 4  }
 0xb33   :  { %24 = sbr.rel (!%p22_p5) target bundleno = 1 (0x1), region = 140 }

</bundles_post_ra>
